<compile_context>
chip_gen: v7x
topology: tpu7x:2x2x1
jax: 0.10.0
libtpu: 0.0.40
codegen_flags: <defaults>
</compile_context>

<pallas_src>
import functools
import math

import jax
import jax.numpy as jnp
from jax.experimental import pallas as pl
from jax.experimental.pallas import tpu as pltpu


def _round_up(x, m):
    return (x + m - 1) // m * m


_VMEM_LIMIT = 32 * 1024 * 1024          # safe on v5e/v6e (128 MiB) and v7x (64 MiB)
_BBOX_XFORM_CLIP = math.log(1000.0 / 16.0)


# ----------------------------------------------------------------------------
# Pallas kernel 1: fused matmul + bias (+ optional ReLU).
#   Fast path (n_k == 1): weights fully VMEM-resident, no scratch, no zeroing.
#   Fallback  (n_k >  1): K-tiled accumulation into f32 VMEM scratch (P3).
# ----------------------------------------------------------------------------
def _mm_bias_kernel(a_ref, w_ref, b_ref, o_ref, *, relu):
    out = jnp.dot(a_ref[...], w_ref[...],
                  preferred_element_type=jnp.float32) + b_ref[...]
    if relu:
        out = jnp.maximum(out, 0.0)
    o_ref[...] = out.astype(o_ref.dtype)


def _mm_bias_ktiled_kernel(a_ref, w_ref, b_ref, o_ref, acc_ref, *, relu, n_k):
    k = pl.program_id(1)

    @pl.when(k == 0)
    def _():
        acc_ref[...] = jnp.zeros_like(acc_ref)

    acc_ref[...] += jnp.dot(a_ref[...], w_ref[...],
                            preferred_element_type=jnp.float32)

    @pl.when(k == n_k - 1)
    def _():
        out = acc_ref[...] + b_ref[...]
        if relu:
            out = jnp.maximum(out, 0.0)
        o_ref[...] = out.astype(o_ref.dtype)


def make_linear_params(w, b, weight_resident_bytes=8 * 1024 * 1024):
    """Pad weights/bias to lane-aligned bf16/f32 shapes ONCE (hoisted)."""
    K, N = w.shape
    Kp = _round_up(K, 128)
    Np = _round_up(N, 128)
    w_p = jnp.zeros((Kp, Np), jnp.bfloat16).at[:K, :N].set(
        w.astype(jnp.bfloat16))
    b_p = jnp.zeros((1, Np), jnp.float32).at[0, :N].set(b.astype(jnp.float32))
    # Collapse to a single K step whenever the whole bf16 weight fits the VMEM
    # budget: at these layer sizes per-grid-step overhead dominates MXU time,
    # and a constant weight block index also means no repeated weight DMA.
    if Kp * Np * 2 <= weight_resident_bytes:
        tk = Kp
    else:
        tk = max(t for t in (512, 384, 256, 128) if Kp % t == 0)
    return dict(w=w_p, b=b_p, K=K, N=N, Kp=Kp, Np=Np, tk=tk)


def _choose_tm(M, tm_max=256):
    # Largest multiple of 16 (bf16 sublane pack) <= tm_max that divides M:
    # avoids a padded copy of A and keeps Mp//tm > 1 on the big layers so the
    # parallel M axis can feed v7x's two TensorCores.
    best = None
    t = 16
    lim = min(M, tm_max)
    while t <= lim:
        if M % t == 0:
            best = t
        t += 16
    if best is not None:
        return best
    return min(_round_up(M, 16), tm_max)     # fallback: triggers M padding


def pallas_linear(a, p, relu=False, out_dtype=jnp.float32, tm_max=256):
    M, Ka = a.shape
    K, Kp, Np, N, tk = p['K'], p['Kp'], p['Np'], p['N'], p['tk']
    assert Ka in (K, Kp)
    a = a.astype(jnp.bfloat16)
    if Ka != Kp:                       # callers normally hand in Kp-padded A
        a = jnp.pad(a, ((0, 0), (0, Kp - Ka)))
    tm = _choose_tm(M, tm_max)
    Mp = _round_up(M, tm)
    if Mp != M:                        # fallback only; avoided by _choose_tm
        a = jnp.pad(a, ((0, Mp - M), (0, 0)))
    n_k = Kp // tk
    if n_k == 1:
        out = pl.pallas_call(
            functools.partial(_mm_bias_kernel, relu=relu),
            out_shape=jax.ShapeDtypeStruct((Mp, Np), out_dtype),
            grid=(Mp // tm,),
            in_specs=[
                pl.BlockSpec((tm, Kp), lambda i: (i, 0)),
                pl.BlockSpec((Kp, Np), lambda i: (0, 0)),
                pl.BlockSpec((1, Np), lambda i: (0, 0)),
            ],
            out_specs=pl.BlockSpec((tm, Np), lambda i: (i, 0)),
            compiler_params=pltpu.CompilerParams(
                dimension_semantics=("parallel",),
                vmem_limit_bytes=_VMEM_LIMIT),
        )(a, p['w'], p['b'])
    else:
        out = pl.pallas_call(
            functools.partial(_mm_bias_ktiled_kernel, relu=relu, n_k=n_k),
            out_shape=jax.ShapeDtypeStruct((Mp, Np), out_dtype),
            grid=(Mp // tm, n_k),
            in_specs=[
                pl.BlockSpec((tm, tk), lambda i, k: (i, k)),
                pl.BlockSpec((tk, Np), lambda i, k: (k, 0)),
                pl.BlockSpec((1, Np), lambda i, k: (0, 0)),
            ],
            out_specs=pl.BlockSpec((tm, Np), lambda i, k: (i, 0)),
            scratch_shapes=[pltpu.VMEM((tm, Np), jnp.float32)],
            compiler_params=pltpu.CompilerParams(
                dimension_semantics=("parallel", "arbitrary"),
                vmem_limit_bytes=_VMEM_LIMIT),
        )(a, p['w'], p['b'])
    if (Mp, Np) != (M, N):
        out = out[:M, :N]
    return out


# ----------------------------------------------------------------------------
# Pallas kernel 2: fused RPN block (per image):
#   3x3 conv (as matmul on the pre-im2col'd block, ReLU) -> fused loc/score
#   head -> anchor decode + clip + pair-softmax fg prob (sigmoid(fg - bg)).
#   The loc/score head weights are stored component-major in lane groups of
#   width `a_group`, so the decode de-interleaves with contiguous lane slices
#   and the result is written with one lane-dense full-block store.
# ----------------------------------------------------------------------------
def _rpn_fused_kernel(col_ref, w1_ref, b1_ref, w2_ref, b2_ref, anc_ref,
                      rpn_ref, dec_ref, *, a_group, img_w, img_h):
    h = jnp.dot(col_ref[...], w1_ref[...],
                preferred_element_type=jnp.float32) + b1_ref[...]
    h = jnp.maximum(h, 0.0)                               # stays in VMEM
    out = jnp.dot(h.astype(jnp.bfloat16), w2_ref[...],
                  preferred_element_type=jnp.float32) + b2_ref[...]
    rpn_ref[...] = out

    g = a_group
    a = anc_ref[...]
    ax1, ay1 = a[:, 0 * g:1 * g], a[:, 1 * g:2 * g]
    ax2, ay2 = a[:, 2 * g:3 * g], a[:, 3 * g:4 * g]
    dx, dy = out[:, 0 * g:1 * g], out[:, 1 * g:2 * g]
    dw = jnp.minimum(out[:, 2 * g:3 * g], _BBOX_XFORM_CLIP)
    dh = jnp.minimum(out[:, 3 * g:4 * g], _BBOX_XFORM_CLIP)
    bg, fg = out[:, 4 * g:5 * g], out[:, 5 * g:6 * g]
    aw = ax2 - ax1
    ah = ay2 - ay1
    cx = ax1 + 0.5 * aw
    cy = ay1 + 0.5 * ah
    ncx = dx * aw + cx
    ncy = dy * ah + cy
    nw = jnp.exp(dw) * aw
    nh = jnp.exp(dh) * ah
    x1 = jnp.clip(ncx - 0.5 * nw, 0.0, img_w)
    y1 = jnp.clip(ncy - 0.5 * nh, 0.0, img_h)
    x2 = jnp.clip(ncx + 0.5 * nw, 0.0, img_w)
    y2 = jnp.clip(ncy + 0.5 * nh, 0.0, img_h)
    fgp = 1.0 / (1.0 + jnp.exp(bg - fg))                  # sigmoid(fg - bg)
    pad = jnp.zeros((x1.shape[0], dec_ref.shape[-1] - 5 * g), jnp.float32)
    dec_ref[...] = jnp.concatenate([x1, y1, x2, y2, fgp, pad], axis=-1)


# ----------------------------------------------------------------------------
# Pallas kernel 3: fused RoI head (per group of n_roi RoIs):
#   classifier FC + ReLU -> f32 spatial mean -> fused cls_loc/score FC,
#   all without intermediate HBM round-trips or an explicit f32 upcast copy.
# ----------------------------------------------------------------------------
def _head_fused_kernel(x_ref, w1_ref, b1_ref, w2_ref, b2_ref, o_ref, *, n_roi):
    feats = []
    for r in range(n_roi):                                # static unroll
        xr = x_ref[r]                                     # (S, C) bf16
        hr = jnp.dot(xr, w1_ref[...], preferred_element_type=jnp.float32)
        hr = jnp.maximum(hr + b1_ref[...], 0.0)
        feats.append(jnp.mean(hr, axis=0, keepdims=True))  # (1, HID) f32
    m = jnp.concatenate(feats, axis=0)                    # (n_roi, HID)
    out = jnp.dot(m.astype(jnp.bfloat16), w2_ref[...],
                  preferred_element_type=jnp.float32) + b2_ref[...]
    o_ref[...] = out


# ----------------------------------------------------------------------------
# JAX glue: im2col (emits lane-padded K directly), anchors, RoI pooling.
# ----------------------------------------------------------------------------
def im2col(x, ksize=3, stride=1, pad=1, lane=128):
    # x: [N, H, W, C] -> ([N*Ho*Wo, Kp], (N, Ho, Wo)) with Kp = round_up(9C,128)
    # padded inside the concatenate: no separate zero+scatter copy of A.
    # TODO(synk): a 9-tap shifted-accumulate Pallas conv would avoid the 9x
    # activation expansion through HBM (matters at v5e bandwidth / production
    # channel counts; negligible at these mini shapes).
    N, H, W, C = x.shape
    Ho = (H + 2 * pad - ksize) // stride + 1
    Wo = (W + 2 * pad - ksize) // stride + 1
    xp = jnp.pad(x, ((0, 0), (pad, pad), (pad, pad), (0, 0)))
    cols = []
    for i in range(ksize):
        for j in range(ksize):
            cols.append(xp[:, i:i + stride * Ho:stride,
                           j:j + stride * Wo:stride, :])
    K = ksize * ksize * C
    Kp = _round_up(K, lane)
    if Kp != K:
        cols.append(jnp.zeros((N, Ho, Wo, Kp - K), x.dtype))
    col = jnp.concatenate(cols, axis=-1)
    return col.reshape(N * Ho * Wo, Kp), (N, Ho, Wo)


def generate_anchor_base(base_size, ratios, scales):
    rows = []
    for r in ratios:
        for s in scales:
            h = base_size * s * math.sqrt(r)
            w = base_size * s * math.sqrt(1.0 / r)
            rows.append([-w / 2.0, -h / 2.0, w / 2.0, h / 2.0])  # x1,y1,x2,y2
    return jnp.array(rows, dtype=jnp.float32)


def enumerate_shifted_anchors(anchor_base, feat_stride, h, w):
    shift_x = jnp.arange(0, w * feat_stride, feat_stride, dtype=jnp.float32)
    shift_y = jnp.arange(0, h * feat_stride, feat_stride, dtype=jnp.float32)
    sx, sy = jnp.meshgrid(shift_x, shift_y)
    shift = jnp.stack([sx.ravel(), sy.ravel(), sx.ravel(), sy.ravel()], axis=1)
    anchors = shift[:, None, :] + anchor_base[None, :, :]
    return anchors.reshape(-1, 4)


def roi_pool_nearest(feat, rois_fm, roi_indices, out_size):
    # feat [N, Hf, Wf, C], rois_fm [R,4] (x1,y1,x2,y2 in feature coords)
    # TODO(synk): exact torchvision RoIPool variable-window max is
    # data-dependent; nearest-bin-center sampling used instead (JAX gather,
    # fine at R=16; a P2 scalar-prefetch Pallas gather only pays off at larger R).
    _, Hf, Wf, _ = feat.shape
    x1, y1, x2, y2 = rois_fm[:, 0], rois_fm[:, 1], rois_fm[:, 2], rois_fm[:, 3]
    bins = (jnp.arange(out_size, dtype=jnp.float32) + 0.5) / out_size
    xs = x1[:, None] + bins[None, :] * (x2 - x1)[:, None]
    ys = y1[:, None] + bins[None, :] * (y2 - y1)[:, None]
    xi = jnp.clip(jnp.floor(xs).astype(jnp.int32), 0, Wf - 1)
    yi = jnp.clip(jnp.floor(ys).astype(jnp.int32), 0, Hf - 1)
    return feat[roi_indices[:, None, None], yi[:, :, None], xi[:, None, :], :]


# ----------------------------------------------------------------------------
# Mini FasterRCNN
# ----------------------------------------------------------------------------
class MiniFasterRCNN:
    FEAT_CH = 128      # stand-in for 1024 (resnet50) backbone channels
    RPN_MID = 128      # stand-in for 512 RPN mid channels
    HEAD_HID = 256     # stand-in for 2048 resnet classifier features
    ROI_SIZE = 14
    N_POST_NMS = 8     # proposals kept per image
    HEAD_GROUP = 8     # RoIs processed per grid step in the fused head kernel

    def __init__(self, key, num_classes=3, feat_stride=16,
                 anchor_scales=(2, 4, 8), ratios=(0.5, 1.0, 2.0)):
        self.num_classes = num_classes
        self.n_class = num_classes + 1
        self.feat_stride = feat_stride
        self.anchor_base = generate_anchor_base(16, ratios, anchor_scales)
        self.n_anchor = self.anchor_base.shape[0]
        A = self.n_anchor
        self.a_group = max(8, _round_up(A, 8))   # lane group per component
        Ag = self.a_group

        def init(k, shape, std=0.05):
            return std * jax.random.normal(k, shape, jnp.float32)

        ks = jax.random.split(key, 16)
        # extractor: 4 conv layers, 3x3, stride 2 each  (feat_stride = 16)
        chans = [3, 16, 32, 64, self.FEAT_CH]
        self.extractor_p = []
        for li in range(4):
            self.extractor_p.append(make_linear_params(
                init(ks[li], (9 * chans[li], chans[li + 1])),
                jnp.zeros((chans[li + 1],), jnp.float32)))
        # RPN 3x3 conv
        self.rpn_conv_p = make_linear_params(
            init(ks[4], (9 * self.FEAT_CH, self.RPN_MID)),
            jnp.zeros((self.RPN_MID,), jnp.float32))
        # RPN loc + score head, fused and stored COMPONENT-MAJOR:
        # lanes [dx|dy|dw|dh|bg|fg] x a_group so the decode kernel can slice
        # contiguous lane groups (also keeps one wider MXU output on v6e/v7x).
        head_w = init(ks[5], (self.RPN_MID, 6, A))
        head_w = jnp.pad(head_w, ((0, 0), (0, 0), (0, Ag - A)))
        self.rpn_head_p = make_linear_params(
            head_w.reshape(self.RPN_MID, 6 * Ag),
            jnp.zeros((6 * Ag,), jnp.float32))
        assert self.rpn_conv_p['Np'] == self.rpn_head_p['Kp']
        # RoI head ("classifier" stand-in + fused cls_loc/score FC)
        self.head_cls_p = make_linear_params(
            init(ks[7], (self.FEAT_CH, self.HEAD_HID)),
            jnp.zeros((self.HEAD_HID,), jnp.float32))
        cls_loc_w = init(ks[8], (self.HEAD_HID, self.n_class * 4))
        score_w = init(ks[9], (self.HEAD_HID, self.n_class))
        self.roi_head_p = make_linear_params(
            jnp.concatenate([cls_loc_w, score_w], axis=1),
            jnp.zeros((self.n_class * 5,), jnp.float32))
        assert self.head_cls_p['Np'] == self.roi_head_p['Kp']

    # -- conv helper: im2col + Pallas matmul ----------------------------------
    def _conv3x3(self, x, p, stride, relu=True, out_dtype=jnp.bfloat16):
        col, (n, ho, wo) = im2col(x, ksize=3, stride=stride, pad=1)
        out = pallas_linear(col, p, relu=relu, out_dtype=out_dtype)
        return out.reshape(n, ho, wo, -1)

    # -- extractor -------------------------------------------------------------
    def extractor(self, x_nchw):
        x = jnp.transpose(x_nchw, (0, 2, 3, 1)).astype(jnp.bfloat16)  # NHWC bf16
        for p in self.extractor_p:
            x = self._conv3x3(x, p, stride=2, relu=True)
        return x  # [N, H/16, W/16, FEAT_CH] bf16

    # -- region proposal network -----------------------------------------------
    def rpn(self, feat, img_size, scale=1.0):
        del scale  # TODO(synk): min-size filtering + NMS skipped; top-k fg used.
        n, hf, wf, c = feat.shape
        A, Ag = self.n_anchor, self.a_group
        img_h, img_w = img_size
        rows = hf * wf
        K = rows * A
        np_out = self.rpn_head_p['Np']

        col, _ = im2col(feat, ksize=3, stride=1, pad=1)   # (n*rows, 9c) aligned

        anchor = enumerate_shifted_anchors(self.anchor_base, self.feat_stride,
                                           hf, wf)        # (K, 4)
        anc = jnp.transpose(anchor.reshape(rows, A, 4), (0, 2, 1))  # (rows,4,A)
        anc = jnp.pad(anc, ((0, 0), (0, 0), (0, Ag - A))).reshape(rows, 4 * Ag)
        anc = jnp.pad(anc, ((0, 0), (0, np_out - 4 * Ag)))          # (rows, Np)

        if rows % 8 == 0:
            grid_n, blk_rows, anc_in = n, rows, anc
            row_map = lambda b: (b, 0)
        else:  # fallback: one full block (full-dim blocks bypass (8,128) rule)
            grid_n, blk_rows, anc_in = 1, n * rows, jnp.tile(anc, (n, 1))
            row_map = lambda b: (0, 0)

        p1, p2 = self.rpn_conv_p, self.rpn_head_p
        kp1 = col.shape[1]
        rpn_out, dec = pl.pallas_call(
            functools.partial(_rpn_fused_kernel, a_group=Ag,
                              img_w=float(img_w), img_h=float(img_h)),
            out_shape=(jax.ShapeDtypeStruct((n * rows, np_out), jnp.float32),
                       jax.ShapeDtypeStruct((n * rows, np_out), jnp.float32)),
            grid=(grid_n,),
            in_specs=[
                pl.BlockSpec((blk_rows, kp1), row_map),
                pl.BlockSpec((p1['Kp'], p1['Np']), lambda b: (0, 0)),
                pl.BlockSpec((1, p1['Np']), lambda b: (0, 0)),
                pl.BlockSpec((p2['Kp'], p2['Np']), lambda b: (0, 0)),
                pl.BlockSpec((1, p2['Np']), lambda b: (0, 0)),
                pl.BlockSpec((blk_rows, np_out), lambda b: (0, 0)),
            ],
            out_specs=(pl.BlockSpec((blk_rows, np_out), row_map),
                       pl.BlockSpec((blk_rows, np_out), row_map)),
            compiler_params=pltpu.CompilerParams(
                dimension_semantics=("parallel",),
                vmem_limit_bytes=_VMEM_LIMIT),
        )(col, p1['w'], p1['b'], p2['w'], p2['b'], anc_in)

        # de-group the component-major lanes back to [n, K, {4,2}] (tiny).
        def _degroup(block, ncomp):
            t = block.reshape(n, rows, ncomp, Ag)[..., :A]
            return jnp.transpose(t, (0, 1, 3, 2)).reshape(n, K, ncomp)

        rpn_locs = _degroup(rpn_out[:, :4 * Ag], 4)
        rpn_scores = _degroup(rpn_out[:, 4 * Ag:6 * Ag], 2)
        boxes = _degroup(dec[:, :4 * Ag], 4)
        fg_scores = dec[:, 4 * Ag:4 * Ag + A].reshape(n, K)

        # TODO(synk): NMS has no clean Pallas equivalent (data-dependent
        # sequential suppression); proposals are selected by top-k fg score.
        _, top = jax.vmap(
            lambda s: jax.lax.top_k(s, self.N_POST_NMS))(fg_scores)   # [n, P]
        rois = jnp.take_along_axis(boxes, top[:, :, None], axis=1).reshape(-1, 4)
        roi_indices = jnp.repeat(jnp.arange(n, dtype=jnp.int32),
                                 self.N_POST_NMS)
        return rpn_locs, rpn_scores, rois, roi_indices, anchor

    # -- RoI head ---------------------------------------------------------------
    def head(self, feat, rois, roi_indices, img_size):
        n, hf, wf, c = feat.shape
        img_h, img_w = img_size
        scale_vec = jnp.array([wf / img_w, hf / img_h, wf / img_w, hf / img_h],
                              jnp.float32)
        rois_fm = rois * scale_vec[None, :]
        pooled = roi_pool_nearest(feat, rois_fm, roi_indices, self.ROI_SIZE)
        R = pooled.shape[0]
        S = self.ROI_SIZE * self.ROI_SIZE
        G = self.HEAD_GROUP
        Rp = _round_up(R, G)
        x = pooled.reshape(R, S, c).astype(jnp.bfloat16)
        if Rp != R:
            x = jnp.pad(x, ((0, Rp - R), (0, 0), (0, 0)))
        p1, p2 = self.head_cls_p, self.roi_head_p
        out = pl.pallas_call(
            functools.partial(_head_fused_kernel, n_roi=G),
            out_shape=jax.ShapeDtypeStruct((Rp, p2['Np']), jnp.float32),
            grid=(Rp // G,),
            in_specs=[
                pl.BlockSpec((G, S, c), lambda i: (i, 0, 0)),
                pl.BlockSpec((p1['Kp'], p1['Np']), lambda i: (0, 0)),
                pl.BlockSpec((1, p1['Np']), lambda i: (0, 0)),
                pl.BlockSpec((p2['Kp'], p2['Np']), lambda i: (0, 0)),
                pl.BlockSpec((1, p2['Np']), lambda i: (0, 0)),
            ],
            out_specs=pl.BlockSpec((G, p2['Np']), lambda i: (i, 0)),
            compiler_params=pltpu.CompilerParams(
                dimension_semantics=("parallel",),
                vmem_limit_bytes=_VMEM_LIMIT),
        )(x, p1['w'], p1['b'], p2['w'], p2['b'])
        out = out[:R]
        roi_cls_locs = out[:, :self.n_class * 4]
        roi_scores = out[:, self.n_class * 4:self.n_class * 5]
        roi_cls_locs = roi_cls_locs.reshape(n, -1, self.n_class * 4)
        roi_scores = roi_scores.reshape(n, -1, self.n_class)
        return roi_cls_locs, roi_scores

    # -- forward dispatch (mirrors the PyTorch module) ---------------------------
    def forward(self, x, scale=1.0, mode='forward'):
        if mode == 'forward':
            img_size = x.shape[2:]
            base_feature = self.extractor(x)
            _, _, rois, roi_indices, _ = self.rpn(base_feature, img_size, scale)
            roi_cls_locs, roi_scores = self.head(base_feature, rois,
                                                 roi_indices, img_size)
            return roi_cls_locs, roi_scores, rois, roi_indices
        elif mode == 'extractor':
            return self.extractor(x)
        elif mode == 'rpn':
            base_feature, img_size = x
            return self.rpn(base_feature, img_size, scale)
        elif mode == 'head':
            base_feature, rois, roi_indices, img_size = x
            return self.head(base_feature, rois, roi_indices, img_size)


if __name__ == "__main__":
    key = jax.random.PRNGKey(0)
    model = MiniFasterRCNN(key, num_classes=3)
    x = jax.random.normal(jax.random.fold_in(key, 999), (2, 3, 64, 64),
                          jnp.float32)  # NCHW, feat_stride 16 -> 4x4 feature
    fwd = jax.jit(lambda inp: model.forward(inp))
    roi_cls_locs, roi_scores, rois, roi_indices = fwd(x)
    jax.block_until_ready((roi_cls_locs, roi_scores, rois, roi_indices))
    assert roi_cls_locs.shape == (2, 8, 16)
    assert roi_scores.shape == (2, 8, 4)
    assert rois.shape == (16, 4)
    assert roi_indices.shape == (16,)
    print("KERNEL_OK")
</pallas_src>

<mosaic_0001>
module attributes {stable_mosaic.version = 11 : i64} {
  func.func @_mm_bias_kernel(%arg0: i32, %arg1: memref<256x128xbf16, #tpu.memory_space<vmem>>, %arg2: memref<128x128xbf16, #tpu.memory_space<vmem>>, %arg3: memref<1x128xf32, #tpu.memory_space<vmem>>, %arg4: memref<256x128xbf16, #tpu.memory_space<vmem>>) attributes {dimension_semantics = [#tpu.dimension_semantics<parallel>], iteration_bounds = array<i64: 8>, scalar_prefetch = 0 : i64, scratch_operands = 0 : i64, tpu.core_type = #tpu.core_type<tc>, window_params = [{transform_indices = @transform_0, window_bounds = array<i64: 256, 128>}, {pipeline_mode = #tpu.pipeline_mode<synchronous>, transform_indices = @transform_1, window_bounds = array<i64: 128, 128>}, {pipeline_mode = #tpu.pipeline_mode<synchronous>, transform_indices = @transform_2, window_bounds = array<i64: 1, 128>}, {transform_indices = @transform_3, window_bounds = array<i64: 256, 128>}]} {
    %c0 = arith.constant 0 : index
    %c0_0 = arith.constant 0 : index
    %0 = vector.load %arg1[%c0, %c0_0] : memref<256x128xbf16, #tpu.memory_space<vmem>>, vector<256x128xbf16>
    %c0_1 = arith.constant 0 : index
    %c0_2 = arith.constant 0 : index
    %1 = vector.load %arg2[%c0_1, %c0_2] : memref<128x128xbf16, #tpu.memory_space<vmem>>, vector<128x128xbf16>
    %cst = arith.constant dense<0.000000e+00> : vector<256x128xf32>
    %2 = tpu.matmul %0, %1, %cst {dimension_numbers = #tpu.dot_dimension_numbers<[1], [0], [0], [1], [0, 0, 1, 1], [], []>} : vector<256x128xbf16>, vector<128x128xbf16>, vector<256x128xf32> -> vector<256x128xf32>
    %c0_3 = arith.constant 0 : index
    %c0_4 = arith.constant 0 : index
    %3 = vector.load %arg3[%c0_3, %c0_4] : memref<1x128xf32, #tpu.memory_space<vmem>>, vector<1x128xf32>
    %4 = vector.broadcast %3 : vector<1x128xf32> to vector<256x128xf32>
    %5 = arith.addf %2, %4 : vector<256x128xf32>
    %cst_5 = arith.constant 0.000000e+00 : f32
    %6 = vector.broadcast %cst_5 : f32 to vector<256x128xf32>
    %7 = arith.maximumf %5, %6 : vector<256x128xf32>
    %8 = arith.truncf %7 : vector<256x128xf32> to vector<256x128xbf16>
    %c0_6 = arith.constant 0 : index
    %c0_7 = arith.constant 0 : index
    %9 = vector.load %arg4[%c0_6, %c0_7] : memref<256x128xbf16, #tpu.memory_space<vmem>>, vector<256x128xbf16>
    tpu.vector_store %arg4[%c0_6, %c0_7], %8 {strides = array<i32>} : memref<256x128xbf16, #tpu.memory_space<vmem>>, vector<256x128xbf16>,
    return
  }
  func.func @transform_0(%arg0: i32) -> (i32, i32) {
    %c0_i32 = arith.constant 0 : i32
    %c0_i32_0 = arith.constant 0 : i32
    return %arg0, %c0_i32 : i32, i32
  }
  func.func @transform_1(%arg0: i32) -> (i32, i32) {
    %c0_i32 = arith.constant 0 : i32
    %c0_i32_0 = arith.constant 0 : i32
    %c0_i32_1 = arith.constant 0 : i32
    return %c0_i32, %c0_i32_0 : i32, i32
  }
  func.func @transform_2(%arg0: i32) -> (i32, i32) {
    %c0_i32 = arith.constant 0 : i32
    %c0_i32_0 = arith.constant 0 : i32
    %c0_i32_1 = arith.constant 0 : i32
    return %c0_i32, %c0_i32_0 : i32, i32
  }
  func.func @transform_3(%arg0: i32) -> (i32, i32) {
    %c0_i32 = arith.constant 0 : i32
    %c0_i32_0 = arith.constant 0 : i32
    return %arg0, %c0_i32 : i32, i32
  }
}

module attributes {stable_mosaic.version = 11 : i64} {
  func.func @_mm_bias_kernel(%arg0: i32, %arg1: memref<256x256xbf16, #tpu.memory_space<vmem>>, %arg2: memref<256x128xbf16, #tpu.memory_space<vmem>>, %arg3: memref<1x128xf32, #tpu.memory_space<vmem>>, %arg4: memref<256x128xbf16, #tpu.memory_space<vmem>>) attributes {dimension_semantics = [#tpu.dimension_semantics<parallel>], iteration_bounds = array<i64: 2>, scalar_prefetch = 0 : i64, scratch_operands = 0 : i64, tpu.core_type = #tpu.core_type<tc>, window_params = [{transform_indices = @transform_0, window_bounds = array<i64: 256, 256>}, {pipeline_mode = #tpu.pipeline_mode<synchronous>, transform_indices = @transform_1, window_bounds = array<i64: 256, 128>}, {pipeline_mode = #tpu.pipeline_mode<synchronous>, transform_indices = @transform_2, window_bounds = array<i64: 1, 128>}, {transform_indices = @transform_3, window_bounds = array<i64: 256, 128>}]} {
    %c0 = arith.constant 0 : index
    %c0_0 = arith.constant 0 : index
    %0 = vector.load %arg1[%c0, %c0_0] : memref<256x256xbf16, #tpu.memory_space<vmem>>, vector<256x256xbf16>
    %c0_1 = arith.constant 0 : index
    %c0_2 = arith.constant 0 : index
    %1 = vector.load %arg2[%c0_1, %c0_2] : memref<256x128xbf16, #tpu.memory_space<vmem>>, vector<256x128xbf16>
    %cst = arith.constant dense<0.000000e+00> : vector<256x128xf32>
    %2 = tpu.matmul %0, %1, %cst {dimension_numbers = #tpu.dot_dimension_numbers<[1], [0], [0], [1], [0, 0, 1, 1], [], []>} : vector<256x256xbf16>, vector<256x128xbf16>, vector<256x128xf32> -> vector<256x128xf32>
    %c0_3 = arith.constant 0 : index
    %c0_4 = arith.constant 0 : index
    %3 = vector.load %arg3[%c0_3, %c0_4] : memref<1x128xf32, #tpu.memory_space<vmem>>, vector<1x128xf32>
    %4 = vector.broadcast %3 : vector<1x128xf32> to vector<256x128xf32>
    %5 = arith.addf %2, %4 : vector<256x128xf32>
    %cst_5 = arith.constant 0.000000e+00 : f32
    %6 = vector.broadcast %cst_5 : f32 to vector<256x128xf32>
    %7 = arith.maximumf %5, %6 : vector<256x128xf32>
    %8 = arith.truncf %7 : vector<256x128xf32> to vector<256x128xbf16>
    %c0_6 = arith.constant 0 : index
    %c0_7 = arith.constant 0 : index
    %9 = vector.load %arg4[%c0_6, %c0_7] : memref<256x128xbf16, #tpu.memory_space<vmem>>, vector<256x128xbf16>
    tpu.vector_store %arg4[%c0_6, %c0_7], %8 {strides = array<i32>} : memref<256x128xbf16, #tpu.memory_space<vmem>>, vector<256x128xbf16>,
    return
  }
  func.func @transform_0(%arg0: i32) -> (i32, i32) {
    %c0_i32 = arith.constant 0 : i32
    %c0_i32_0 = arith.constant 0 : i32
    return %arg0, %c0_i32 : i32, i32
  }
  func.func @transform_1(%arg0: i32) -> (i32, i32) {
    %c0_i32 = arith.constant 0 : i32
    %c0_i32_0 = arith.constant 0 : i32
    %c0_i32_1 = arith.constant 0 : i32
    return %c0_i32, %c0_i32_0 : i32, i32
  }
  func.func @transform_2(%arg0: i32) -> (i32, i32) {
    %c0_i32 = arith.constant 0 : i32
    %c0_i32_0 = arith.constant 0 : i32
    %c0_i32_1 = arith.constant 0 : i32
    return %c0_i32, %c0_i32_0 : i32, i32
  }
  func.func @transform_3(%arg0: i32) -> (i32, i32) {
    %c0_i32 = arith.constant 0 : i32
    %c0_i32_0 = arith.constant 0 : i32
    return %arg0, %c0_i32 : i32, i32
  }
}

module attributes {stable_mosaic.version = 11 : i64} {
  func.func @_mm_bias_kernel(%arg0: i32, %arg1: memref<128x384xbf16, #tpu.memory_space<vmem>>, %arg2: memref<384x128xbf16, #tpu.memory_space<vmem>>, %arg3: memref<1x128xf32, #tpu.memory_space<vmem>>, %arg4: memref<128x128xbf16, #tpu.memory_space<vmem>>) attributes {dimension_semantics = [#tpu.dimension_semantics<parallel>], iteration_bounds = array<i64: 1>, scalar_prefetch = 0 : i64, scratch_operands = 0 : i64, tpu.core_type = #tpu.core_type<tc>, window_params = [{transform_indices = @transform_0, window_bounds = array<i64: 128, 384>}, {pipeline_mode = #tpu.pipeline_mode<synchronous>, transform_indices = @transform_1, window_bounds = array<i64: 384, 128>}, {pipeline_mode = #tpu.pipeline_mode<synchronous>, transform_indices = @transform_2, window_bounds = array<i64: 1, 128>}, {transform_indices = @transform_3, window_bounds = array<i64: 128, 128>}]} {
    %c0 = arith.constant 0 : index
    %c0_0 = arith.constant 0 : index
    %0 = vector.load %arg1[%c0, %c0_0] : memref<128x384xbf16, #tpu.memory_space<vmem>>, vector<128x384xbf16>
    %c0_1 = arith.constant 0 : index
    %c0_2 = arith.constant 0 : index
    %1 = vector.load %arg2[%c0_1, %c0_2] : memref<384x128xbf16, #tpu.memory_space<vmem>>, vector<384x128xbf16>
    %cst = arith.constant dense<0.000000e+00> : vector<128x128xf32>
    %2 = tpu.matmul %0, %1, %cst {dimension_numbers = #tpu.dot_dimension_numbers<[1], [0], [0], [1], [0, 0, 1, 1], [], []>} : vector<128x384xbf16>, vector<384x128xbf16>, vector<128x128xf32> -> vector<128x128xf32>
    %c0_3 = arith.constant 0 : index
    %c0_4 = arith.constant 0 : index
    %3 = vector.load %arg3[%c0_3, %c0_4] : memref<1x128xf32, #tpu.memory_space<vmem>>, vector<1x128xf32>
    %4 = vector.broadcast %3 : vector<1x128xf32> to vector<128x128xf32>
    %5 = arith.addf %2, %4 : vector<128x128xf32>
    %cst_5 = arith.constant 0.000000e+00 : f32
    %6 = vector.broadcast %cst_5 : f32 to vector<128x128xf32>
    %7 = arith.maximumf %5, %6 : vector<128x128xf32>
    %8 = arith.truncf %7 : vector<128x128xf32> to vector<128x128xbf16>
    %c0_6 = arith.constant 0 : index
    %c0_7 = arith.constant 0 : index
    %9 = vector.load %arg4[%c0_6, %c0_7] : memref<128x128xbf16, #tpu.memory_space<vmem>>, vector<128x128xbf16>
    tpu.vector_store %arg4[%c0_6, %c0_7], %8 {strides = array<i32>} : memref<128x128xbf16, #tpu.memory_space<vmem>>, vector<128x128xbf16>,
    return
  }
  func.func @transform_0(%arg0: i32) -> (i32, i32) {
    %c0_i32 = arith.constant 0 : i32
    %c0_i32_0 = arith.constant 0 : i32
    return %arg0, %c0_i32 : i32, i32
  }
  func.func @transform_1(%arg0: i32) -> (i32, i32) {
    %c0_i32 = arith.constant 0 : i32
    %c0_i32_0 = arith.constant 0 : i32
    %c0_i32_1 = arith.constant 0 : i32
    return %c0_i32, %c0_i32_0 : i32, i32
  }
  func.func @transform_2(%arg0: i32) -> (i32, i32) {
    %c0_i32 = arith.constant 0 : i32
    %c0_i32_0 = arith.constant 0 : i32
    %c0_i32_1 = arith.constant 0 : i32
    return %c0_i32, %c0_i32_0 : i32, i32
  }
  func.func @transform_3(%arg0: i32) -> (i32, i32) {
    %c0_i32 = arith.constant 0 : i32
    %c0_i32_0 = arith.constant 0 : i32
    return %arg0, %c0_i32 : i32, i32
  }
}

module attributes {stable_mosaic.version = 11 : i64} {
  func.func @_mm_bias_kernel(%arg0: i32, %arg1: memref<32x640xbf16, #tpu.memory_space<vmem>>, %arg2: memref<640x128xbf16, #tpu.memory_space<vmem>>, %arg3: memref<1x128xf32, #tpu.memory_space<vmem>>, %arg4: memref<32x128xbf16, #tpu.memory_space<vmem>>) attributes {dimension_semantics = [#tpu.dimension_semantics<parallel>], iteration_bounds = array<i64: 1>, scalar_prefetch = 0 : i64, scratch_operands = 0 : i64, tpu.core_type = #tpu.core_type<tc>, window_params = [{transform_indices = @transform_0, window_bounds = array<i64: 32, 640>}, {pipeline_mode = #tpu.pipeline_mode<synchronous>, transform_indices = @transform_1, window_bounds = array<i64: 640, 128>}, {pipeline_mode = #tpu.pipeline_mode<synchronous>, transform_indices = @transform_2, window_bounds = array<i64: 1, 128>}, {transform_indices = @transform_3, window_bounds = array<i64: 32, 128>}]} {
    %c0 = arith.constant 0 : index
    %c0_0 = arith.constant 0 : index
    %0 = vector.load %arg1[%c0, %c0_0] : memref<32x640xbf16, #tpu.memory_space<vmem>>, vector<32x640xbf16>
    %c0_1 = arith.constant 0 : index
    %c0_2 = arith.constant 0 : index
    %1 = vector.load %arg2[%c0_1, %c0_2] : memref<640x128xbf16, #tpu.memory_space<vmem>>, vector<640x128xbf16>
    %cst = arith.constant dense<0.000000e+00> : vector<32x128xf32>
    %2 = tpu.matmul %0, %1, %cst {dimension_numbers = #tpu.dot_dimension_numbers<[1], [0], [0], [1], [0, 0, 1, 1], [], []>} : vector<32x640xbf16>, vector<640x128xbf16>, vector<32x128xf32> -> vector<32x128xf32>
    %c0_3 = arith.constant 0 : index
    %c0_4 = arith.constant 0 : index
    %3 = vector.load %arg3[%c0_3, %c0_4] : memref<1x128xf32, #tpu.memory_space<vmem>>, vector<1x128xf32>
    %4 = vector.broadcast %3 : vector<1x128xf32> to vector<32x128xf32>
    %5 = arith.addf %2, %4 : vector<32x128xf32>
    %cst_5 = arith.constant 0.000000e+00 : f32
    %6 = vector.broadcast %cst_5 : f32 to vector<32x128xf32>
    %7 = arith.maximumf %5, %6 : vector<32x128xf32>
    %8 = arith.truncf %7 : vector<32x128xf32> to vector<32x128xbf16>
    %c0_6 = arith.constant 0 : index
    %c0_7 = arith.constant 0 : index
    %9 = vector.load %arg4[%c0_6, %c0_7] : memref<32x128xbf16, #tpu.memory_space<vmem>>, vector<32x128xbf16>
    tpu.vector_store %arg4[%c0_6, %c0_7], %8 {strides = array<i32>} : memref<32x128xbf16, #tpu.memory_space<vmem>>, vector<32x128xbf16>,
    return
  }
  func.func @transform_0(%arg0: i32) -> (i32, i32) {
    %c0_i32 = arith.constant 0 : i32
    %c0_i32_0 = arith.constant 0 : i32
    return %arg0, %c0_i32 : i32, i32
  }
  func.func @transform_1(%arg0: i32) -> (i32, i32) {
    %c0_i32 = arith.constant 0 : i32
    %c0_i32_0 = arith.constant 0 : i32
    %c0_i32_1 = arith.constant 0 : i32
    return %c0_i32, %c0_i32_0 : i32, i32
  }
  func.func @transform_2(%arg0: i32) -> (i32, i32) {
    %c0_i32 = arith.constant 0 : i32
    %c0_i32_0 = arith.constant 0 : i32
    %c0_i32_1 = arith.constant 0 : i32
    return %c0_i32, %c0_i32_0 : i32, i32
  }
  func.func @transform_3(%arg0: i32) -> (i32, i32) {
    %c0_i32 = arith.constant 0 : i32
    %c0_i32_0 = arith.constant 0 : i32
    return %arg0, %c0_i32 : i32, i32
  }
}

module attributes {stable_mosaic.version = 11 : i64} {
  func.func @_rpn_fused_kernel(%arg0: i32, %arg1: memref<16x1152xbf16, #tpu.memory_space<vmem>>, %arg2: memref<1152x128xbf16, #tpu.memory_space<vmem>>, %arg3: memref<1x128xf32, #tpu.memory_space<vmem>>, %arg4: memref<128x128xbf16, #tpu.memory_space<vmem>>, %arg5: memref<1x128xf32, #tpu.memory_space<vmem>>, %arg6: memref<16x128xf32, #tpu.memory_space<vmem>>, %arg7: memref<16x128xf32, #tpu.memory_space<vmem>>, %arg8: memref<16x128xf32, #tpu.memory_space<vmem>>) attributes {dimension_semantics = [#tpu.dimension_semantics<parallel>], iteration_bounds = array<i64: 2>, scalar_prefetch = 0 : i64, scratch_operands = 0 : i64, tpu.core_type = #tpu.core_type<tc>, window_params = [{transform_indices = @transform_0, window_bounds = array<i64: 16, 1152>}, {pipeline_mode = #tpu.pipeline_mode<synchronous>, transform_indices = @transform_1, window_bounds = array<i64: 1152, 128>}, {pipeline_mode = #tpu.pipeline_mode<synchronous>, transform_indices = @transform_2, window_bounds = array<i64: 1, 128>}, {pipeline_mode = #tpu.pipeline_mode<synchronous>, transform_indices = @transform_3, window_bounds = array<i64: 128, 128>}, {pipeline_mode = #tpu.pipeline_mode<synchronous>, transform_indices = @transform_4, window_bounds = array<i64: 1, 128>}, {pipeline_mode = #tpu.pipeline_mode<synchronous>, transform_indices = @transform_5, window_bounds = array<i64: 16, 128>}, {transform_indices = @transform_6, window_bounds = array<i64: 16, 128>}, {transform_indices = @transform_7, window_bounds = array<i64: 16, 128>}]} {
    %c0 = arith.constant 0 : index
    %c0_0 = arith.constant 0 : index
    %0 = vector.load %arg1[%c0, %c0_0] : memref<16x1152xbf16, #tpu.memory_space<vmem>>, vector<16x1152xbf16>
    %c0_1 = arith.constant 0 : index
    %c0_2 = arith.constant 0 : index
    %1 = vector.load %arg2[%c0_1, %c0_2] : memref<1152x128xbf16, #tpu.memory_space<vmem>>, vector<1152x128xbf16>
    %cst = arith.constant dense<0.000000e+00> : vector<16x128xf32>
    %2 = tpu.matmul %0, %1, %cst {dimension_numbers = #tpu.dot_dimension_numbers<[1], [0], [0], [1], [0, 0, 1, 1], [], []>} : vector<16x1152xbf16>, vector<1152x128xbf16>, vector<16x128xf32> -> vector<16x128xf32>
    %c0_3 = arith.constant 0 : index
    %c0_4 = arith.constant 0 : index
    %3 = vector.load %arg3[%c0_3, %c0_4] : memref<1x128xf32, #tpu.memory_space<vmem>>, vector<1x128xf32>
    %4 = vector.broadcast %3 : vector<1x128xf32> to vector<16x128xf32>
    %5 = arith.addf %2, %4 : vector<16x128xf32>
    %cst_5 = arith.constant 0.000000e+00 : f32
    %6 = vector.broadcast %cst_5 : f32 to vector<16x128xf32>
    %7 = arith.maximumf %5, %6 : vector<16x128xf32>
    %8 = arith.truncf %7 : vector<16x128xf32> to vector<16x128xbf16>
    %c0_6 = arith.constant 0 : index
    %c0_7 = arith.constant 0 : index
    %9 = vector.load %arg4[%c0_6, %c0_7] : memref<128x128xbf16, #tpu.memory_space<vmem>>, vector<128x128xbf16>
    %cst_8 = arith.constant dense<0.000000e+00> : vector<16x128xf32>
    %10 = tpu.matmul %8, %9, %cst_8 {dimension_numbers = #tpu.dot_dimension_numbers<[1], [0], [0], [1], [0, 0, 1, 1], [], []>} : vector<16x128xbf16>, vector<128x128xbf16>, vector<16x128xf32> -> vector<16x128xf32>
    %c0_9 = arith.constant 0 : index
    %c0_10 = arith.constant 0 : index
    %11 = vector.load %arg5[%c0_9, %c0_10] : memref<1x128xf32, #tpu.memory_space<vmem>>, vector<1x128xf32>
    %12 = vector.broadcast %11 : vector<1x128xf32> to vector<16x128xf32>
    %13 = arith.addf %10, %12 : vector<16x128xf32>
    %c0_11 = arith.constant 0 : index
    %c0_12 = arith.constant 0 : index
    %14 = vector.load %arg7[%c0_11, %c0_12] : memref<16x128xf32, #tpu.memory_space<vmem>>, vector<16x128xf32>
    tpu.vector_store %arg7[%c0_11, %c0_12], %13 {strides = array<i32>} : memref<16x128xf32, #tpu.memory_space<vmem>>, vector<16x128xf32>,
    %c0_13 = arith.constant 0 : index
    %c0_14 = arith.constant 0 : index
    %15 = vector.load %arg6[%c0_13, %c0_14] : memref<16x128xf32, #tpu.memory_space<vmem>>, vector<16x128xf32>
    %16 = vector.extract_strided_slice %15 {offsets = [0, 0], sizes = [16, 16], strides = [1, 1]} : vector<16x128xf32> to vector<16x16xf32>
    %17 = vector.extract_strided_slice %15 {offsets = [0, 16], sizes = [16, 16], strides = [1, 1]} : vector<16x128xf32> to vector<16x16xf32>
    %18 = vector.extract_strided_slice %15 {offsets = [0, 32], sizes = [16, 16], strides = [1, 1]} : vector<16x128xf32> to vector<16x16xf32>
    %19 = vector.extract_strided_slice %15 {offsets = [0, 48], sizes = [16, 16], strides = [1, 1]} : vector<16x128xf32> to vector<16x16xf32>
    %20 = vector.extract_strided_slice %13 {offsets = [0, 0], sizes = [16, 16], strides = [1, 1]} : vector<16x128xf32> to vector<16x16xf32>
    %21 = vector.extract_strided_slice %13 {offsets = [0, 16], sizes = [16, 16], strides = [1, 1]} : vector<16x128xf32> to vector<16x16xf32>
    %22 = vector.extract_strided_slice %13 {offsets = [0, 32], sizes = [16, 16], strides = [1, 1]} : vector<16x128xf32> to vector<16x16xf32>
    %cst_15 = arith.constant 4.13516665 : f32
    %23 = vector.broadcast %cst_15 : f32 to vector<16x16xf32>
    %24 = arith.minimumf %22, %23 : vector<16x16xf32>
    %25 = vector.extract_strided_slice %13 {offsets = [0, 48], sizes = [16, 16], strides = [1, 1]} : vector<16x128xf32> to vector<16x16xf32>
    %cst_16 = arith.constant 4.13516665 : f32
    %26 = vector.broadcast %cst_16 : f32 to vector<16x16xf32>
    %27 = arith.minimumf %25, %26 : vector<16x16xf32>
    %28 = vector.extract_strided_slice %13 {offsets = [0, 64], sizes = [16, 16], strides = [1, 1]} : vector<16x128xf32> to vector<16x16xf32>
    %29 = vector.extract_strided_slice %13 {offsets = [0, 80], sizes = [16, 16], strides = [1, 1]} : vector<16x128xf32> to vector<16x16xf32>
    %30 = arith.subf %18, %16 : vector<16x16xf32>
    %31 = arith.subf %19, %17 : vector<16x16xf32>
    %cst_17 = arith.constant 5.000000e-01 : f32
    %32 = vector.broadcast %cst_17 : f32 to vector<16x16xf32>
    %33 = arith.mulf %32, %30 : vector<16x16xf32>
    %34 = arith.addf %16, %33 : vector<16x16xf32>
    %cst_18 = arith.constant 5.000000e-01 : f32
    %35 = vector.broadcast %cst_18 : f32 to vector<16x16xf32>
    %36 = arith.mulf %35, %31 : vector<16x16xf32>
    %37 = arith.addf %17, %36 : vector<16x16xf32>
    %38 = arith.mulf %20, %30 : vector<16x16xf32>
    %39 = arith.addf %38, %34 : vector<16x16xf32>
    %40 = arith.mulf %21, %31 : vector<16x16xf32>
    %41 = arith.addf %40, %37 : vector<16x16xf32>
    %42 = math.exp %24 : vector<16x16xf32>
    %43 = arith.mulf %42, %30 : vector<16x16xf32>
    %44 = math.exp %27 : vector<16x16xf32>
    %45 = arith.mulf %44, %31 : vector<16x16xf32>
    %cst_19 = arith.constant 5.000000e-01 : f32
    %46 = vector.broadcast %cst_19 : f32 to vector<16x16xf32>
    %47 = arith.mulf %46, %43 : vector<16x16xf32>
    %48 = arith.subf %39, %47 : vector<16x16xf32>
    %cst_20 = arith.constant 0.000000e+00 : f32
    %cst_21 = arith.constant 6.400000e+01 : f32
    %49 = vector.broadcast %cst_20 : f32 to vector<16x16xf32>
    %50 = arith.maximumf %49, %48 : vector<16x16xf32>
    %51 = vector.broadcast %cst_21 : f32 to vector<16x16xf32>
    %52 = arith.minimumf %51, %50 : vector<16x16xf32>
    %cst_22 = arith.constant 5.000000e-01 : f32
    %53 = vector.broadcast %cst_22 : f32 to vector<16x16xf32>
    %54 = arith.mulf %53, %45 : vector<16x16xf32>
    %55 = arith.subf %41, %54 : vector<16x16xf32>
    %cst_23 = arith.constant 0.000000e+00 : f32
    %cst_24 = arith.constant 6.400000e+01 : f32
    %56 = vector.broadcast %cst_23 : f32 to vector<16x16xf32>
    %57 = arith.maximumf %56, %55 : vector<16x16xf32>
    %58 = vector.broadcast %cst_24 : f32 to vector<16x16xf32>
    %59 = arith.minimumf %58, %57 : vector<16x16xf32>
    %cst_25 = arith.constant 5.000000e-01 : f32
    %60 = vector.broadcast %cst_25 : f32 to vector<16x16xf32>
    %61 = arith.mulf %60, %43 : vector<16x16xf32>
    %62 = arith.addf %39, %61 : vector<16x16xf32>
    %cst_26 = arith.constant 0.000000e+00 : f32
    %cst_27 = arith.constant 6.400000e+01 : f32
    %63 = vector.broadcast %cst_26 : f32 to vector<16x16xf32>
    %64 = arith.maximumf %63, %62 : vector<16x16xf32>
    %65 = vector.broadcast %cst_27 : f32 to vector<16x16xf32>
    %66 = arith.minimumf %65, %64 : vector<16x16xf32>
    %cst_28 = arith.constant 5.000000e-01 : f32
    %67 = vector.broadcast %cst_28 : f32 to vector<16x16xf32>
    %68 = arith.mulf %67, %45 : vector<16x16xf32>
    %69 = arith.addf %41, %68 : vector<16x16xf32>
    %cst_29 = arith.constant 0.000000e+00 : f32
    %cst_30 = arith.constant 6.400000e+01 : f32
    %70 = vector.broadcast %cst_29 : f32 to vector<16x16xf32>
    %71 = arith.maximumf %70, %69 : vector<16x16xf32>
    %72 = vector.broadcast %cst_30 : f32 to vector<16x16xf32>
    %73 = arith.minimumf %72, %71 : vector<16x16xf32>
    %74 = arith.subf %28, %29 : vector<16x16xf32>
    %75 = math.exp %74 : vector<16x16xf32>
    %cst_31 = arith.constant 1.000000e+00 : f32
    %76 = vector.broadcast %cst_31 : f32 to vector<16x16xf32>
    %77 = arith.addf %76, %75 : vector<16x16xf32>
    %cst_32 = arith.constant 1.000000e+00 : f32
    %78 = vector.broadcast %cst_32 : f32 to vector<16x16xf32>
    %79 = arith.divf %78, %77 : vector<16x16xf32>
    %cst_33 = arith.constant 0.000000e+00 : f32
    %80 = vector.broadcast %cst_33 : f32 to vector<16x48xf32>
    %81 = tpu.concatenate %52, %59, %66, %73, %79, %80 in 1 : vector<16x16xf32>, vector<16x16xf32>, vector<16x16xf32>, vector<16x16xf32>, vector<16x16xf32>, vector<16x48xf32> -> vector<16x128xf32>
    %c0_34 = arith.constant 0 : index
    %c0_35 = arith.constant 0 : index
    %82 = vector.load %arg8[%c0_34, %c0_35] : memref<16x128xf32, #tpu.memory_space<vmem>>, vector<16x128xf32>
    tpu.vector_store %arg8[%c0_34, %c0_35], %81 {strides = array<i32>} : memref<16x128xf32, #tpu.memory_space<vmem>>, vector<16x128xf32>,
    return
  }
  func.func @transform_0(%arg0: i32) -> (i32, i32) {
    %c0_i32 = arith.constant 0 : i32
    %c0_i32_0 = arith.constant 0 : i32
    return %arg0, %c0_i32 : i32, i32
  }
  func.func @transform_1(%arg0: i32) -> (i32, i32) {
    %c0_i32 = arith.constant 0 : i32
    %c0_i32_0 = arith.constant 0 : i32
    %c0_i32_1 = arith.constant 0 : i32
    return %c0_i32, %c0_i32_0 : i32, i32
  }
  func.func @transform_2(%arg0: i32) -> (i32, i32) {
    %c0_i32 = arith.constant 0 : i32
    %c0_i32_0 = arith.constant 0 : i32
    %c0_i32_1 = arith.constant 0 : i32
    return %c0_i32, %c0_i32_0 : i32, i32
  }
  func.func @transform_3(%arg0: i32) -> (i32, i32) {
    %c0_i32 = arith.constant 0 : i32
    %c0_i32_0 = arith.constant 0 : i32
    %c0_i32_1 = arith.constant 0 : i32
    return %c0_i32, %c0_i32_0 : i32, i32
  }
  func.func @transform_4(%arg0: i32) -> (i32, i32) {
    %c0_i32 = arith.constant 0 : i32
    %c0_i32_0 = arith.constant 0 : i32
    %c0_i32_1 = arith.constant 0 : i32
    return %c0_i32, %c0_i32_0 : i32, i32
  }
  func.func @transform_5(%arg0: i32) -> (i32, i32) {
    %c0_i32 = arith.constant 0 : i32
    %c0_i32_0 = arith.constant 0 : i32
    %c0_i32_1 = arith.constant 0 : i32
    return %c0_i32, %c0_i32_0 : i32, i32
  }
  func.func @transform_6(%arg0: i32) -> (i32, i32) {
    %c0_i32 = arith.constant 0 : i32
    %c0_i32_0 = arith.constant 0 : i32
    return %arg0, %c0_i32 : i32, i32
  }
  func.func @transform_7(%arg0: i32) -> (i32, i32) {
    %c0_i32 = arith.constant 0 : i32
    %c0_i32_0 = arith.constant 0 : i32
    return %arg0, %c0_i32 : i32, i32
  }
}

module attributes {stable_mosaic.version = 11 : i64} {
  func.func @_head_fused_kernel(%arg0: i32, %arg1: memref<8x196x128xbf16, #tpu.memory_space<vmem>>, %arg2: memref<128x256xbf16, #tpu.memory_space<vmem>>, %arg3: memref<1x256xf32, #tpu.memory_space<vmem>>, %arg4: memref<256x128xbf16, #tpu.memory_space<vmem>>, %arg5: memref<1x128xf32, #tpu.memory_space<vmem>>, %arg6: memref<8x128xf32, #tpu.memory_space<vmem>>) attributes {dimension_semantics = [#tpu.dimension_semantics<parallel>], iteration_bounds = array<i64: 2>, scalar_prefetch = 0 : i64, scratch_operands = 0 : i64, tpu.core_type = #tpu.core_type<tc>, window_params = [{transform_indices = @transform_0, window_bounds = array<i64: 8, 196, 128>}, {pipeline_mode = #tpu.pipeline_mode<synchronous>, transform_indices = @transform_1, window_bounds = array<i64: 128, 256>}, {pipeline_mode = #tpu.pipeline_mode<synchronous>, transform_indices = @transform_2, window_bounds = array<i64: 1, 256>}, {pipeline_mode = #tpu.pipeline_mode<synchronous>, transform_indices = @transform_3, window_bounds = array<i64: 256, 128>}, {pipeline_mode = #tpu.pipeline_mode<synchronous>, transform_indices = @transform_4, window_bounds = array<i64: 1, 128>}, {transform_indices = @transform_5, window_bounds = array<i64: 8, 128>}]} {
    %c0 = arith.constant 0 : index
    %c0_0 = arith.constant 0 : index
    %c0_1 = arith.constant 0 : index
    %0 = vector.load %arg1[%c0, %c0_0, %c0_1] : memref<8x196x128xbf16, #tpu.memory_space<vmem>>, vector<1x196x128xbf16>
    %1 = vector.shape_cast %0 : vector<1x196x128xbf16> to vector<196x128xbf16>
    %c0_2 = arith.constant 0 : index
    %c0_3 = arith.constant 0 : index
    %2 = vector.load %arg2[%c0_2, %c0_3] : memref<128x256xbf16, #tpu.memory_space<vmem>>, vector<128x256xbf16>
    %cst = arith.constant dense<0.000000e+00> : vector<196x256xf32>
    %3 = tpu.matmul %1, %2, %cst {dimension_numbers = #tpu.dot_dimension_numbers<[1], [0], [0], [1], [0, 0, 1, 1], [], []>} : vector<196x128xbf16>, vector<128x256xbf16>, vector<196x256xf32> -> vector<196x256xf32>
    %c0_4 = arith.constant 0 : index
    %c0_5 = arith.constant 0 : index
    %4 = vector.load %arg3[%c0_4, %c0_5] : memref<1x256xf32, #tpu.memory_space<vmem>>, vector<1x256xf32>
    %5 = vector.broadcast %4 : vector<1x256xf32> to vector<196x256xf32>
    %6 = arith.addf %3, %5 : vector<196x256xf32>
    %cst_6 = arith.constant 0.000000e+00 : f32
    %7 = vector.broadcast %cst_6 : f32 to vector<196x256xf32>
    %8 = arith.maximumf %6, %7 : vector<196x256xf32>
    %cst_7 = arith.constant dense<0.000000e+00> : vector<256xf32>
    %9 = vector.multi_reduction <add>, %8, %cst_7 [0] : vector<196x256xf32> to vector<256xf32>
    %10 = vector.shape_cast %9 : vector<256xf32> to vector<1x256xf32>
    %cst_8 = arith.constant 1.960000e+02 : f32
    %11 = vector.broadcast %cst_8 : f32 to vector<1x256xf32>
    %12 = arith.divf %10, %11 : vector<1x256xf32>
    %c1 = arith.constant 1 : index
    %c0_9 = arith.constant 0 : index
    %c0_10 = arith.constant 0 : index
    %13 = vector.load %arg1[%c1, %c0_9, %c0_10] : memref<8x196x128xbf16, #tpu.memory_space<vmem>>, vector<1x196x128xbf16>
    %14 = vector.shape_cast %13 : vector<1x196x128xbf16> to vector<196x128xbf16>
    %c0_11 = arith.constant 0 : index
    %c0_12 = arith.constant 0 : index
    %15 = vector.load %arg2[%c0_11, %c0_12] : memref<128x256xbf16, #tpu.memory_space<vmem>>, vector<128x256xbf16>
    %cst_13 = arith.constant dense<0.000000e+00> : vector<196x256xf32>
    %16 = tpu.matmul %14, %15, %cst_13 {dimension_numbers = #tpu.dot_dimension_numbers<[1], [0], [0], [1], [0, 0, 1, 1], [], []>} : vector<196x128xbf16>, vector<128x256xbf16>, vector<196x256xf32> -> vector<196x256xf32>
    %c0_14 = arith.constant 0 : index
    %c0_15 = arith.constant 0 : index
    %17 = vector.load %arg3[%c0_14, %c0_15] : memref<1x256xf32, #tpu.memory_space<vmem>>, vector<1x256xf32>
    %18 = vector.broadcast %17 : vector<1x256xf32> to vector<196x256xf32>
    %19 = arith.addf %16, %18 : vector<196x256xf32>
    %cst_16 = arith.constant 0.000000e+00 : f32
    %20 = vector.broadcast %cst_16 : f32 to vector<196x256xf32>
    %21 = arith.maximumf %19, %20 : vector<196x256xf32>
    %cst_17 = arith.constant dense<0.000000e+00> : vector<256xf32>
    %22 = vector.multi_reduction <add>, %21, %cst_17 [0] : vector<196x256xf32> to vector<256xf32>
    %23 = vector.shape_cast %22 : vector<256xf32> to vector<1x256xf32>
    %cst_18 = arith.constant 1.960000e+02 : f32
    %24 = vector.broadcast %cst_18 : f32 to vector<1x256xf32>
    %25 = arith.divf %23, %24 : vector<1x256xf32>
    %c2 = arith.constant 2 : index
    %c0_19 = arith.constant 0 : index
    %c0_20 = arith.constant 0 : index
    %26 = vector.load %arg1[%c2, %c0_19, %c0_20] : memref<8x196x128xbf16, #tpu.memory_space<vmem>>, vector<1x196x128xbf16>
    %27 = vector.shape_cast %26 : vector<1x196x128xbf16> to vector<196x128xbf16>
    %c0_21 = arith.constant 0 : index
    %c0_22 = arith.constant 0 : index
    %28 = vector.load %arg2[%c0_21, %c0_22] : memref<128x256xbf16, #tpu.memory_space<vmem>>, vector<128x256xbf16>
    %cst_23 = arith.constant dense<0.000000e+00> : vector<196x256xf32>
    %29 = tpu.matmul %27, %28, %cst_23 {dimension_numbers = #tpu.dot_dimension_numbers<[1], [0], [0], [1], [0, 0, 1, 1], [], []>} : vector<196x128xbf16>, vector<128x256xbf16>, vector<196x256xf32> -> vector<196x256xf32>
    %c0_24 = arith.constant 0 : index
    %c0_25 = arith.constant 0 : index
    %30 = vector.load %arg3[%c0_24, %c0_25] : memref<1x256xf32, #tpu.memory_space<vmem>>, vector<1x256xf32>
    %31 = vector.broadcast %30 : vector<1x256xf32> to vector<196x256xf32>
    %32 = arith.addf %29, %31 : vector<196x256xf32>
    %cst_26 = arith.constant 0.000000e+00 : f32
    %33 = vector.broadcast %cst_26 : f32 to vector<196x256xf32>
    %34 = arith.maximumf %32, %33 : vector<196x256xf32>
    %cst_27 = arith.constant dense<0.000000e+00> : vector<256xf32>
    %35 = vector.multi_reduction <add>, %34, %cst_27 [0] : vector<196x256xf32> to vector<256xf32>
    %36 = vector.shape_cast %35 : vector<256xf32> to vector<1x256xf32>
    %cst_28 = arith.constant 1.960000e+02 : f32
    %37 = vector.broadcast %cst_28 : f32 to vector<1x256xf32>
    %38 = arith.divf %36, %37 : vector<1x256xf32>
    %c3 = arith.constant 3 : index
    %c0_29 = arith.constant 0 : index
    %c0_30 = arith.constant 0 : index
    %39 = vector.load %arg1[%c3, %c0_29, %c0_30] : memref<8x196x128xbf16, #tpu.memory_space<vmem>>, vector<1x196x128xbf16>
    %40 = vector.shape_cast %39 : vector<1x196x128xbf16> to vector<196x128xbf16>
    %c0_31 = arith.constant 0 : index
    %c0_32 = arith.constant 0 : index
    %41 = vector.load %arg2[%c0_31, %c0_32] : memref<128x256xbf16, #tpu.memory_space<vmem>>, vector<128x256xbf16>
    %cst_33 = arith.constant dense<0.000000e+00> : vector<196x256xf32>
    %42 = tpu.matmul %40, %41, %cst_33 {dimension_numbers = #tpu.dot_dimension_numbers<[1], [0], [0], [1], [0, 0, 1, 1], [], []>} : vector<196x128xbf16>, vector<128x256xbf16>, vector<196x256xf32> -> vector<196x256xf32>
    %c0_34 = arith.constant 0 : index
    %c0_35 = arith.constant 0 : index
    %43 = vector.load %arg3[%c0_34, %c0_35] : memref<1x256xf32, #tpu.memory_space<vmem>>, vector<1x256xf32>
    %44 = vector.broadcast %43 : vector<1x256xf32> to vector<196x256xf32>
    %45 = arith.addf %42, %44 : vector<196x256xf32>
    %cst_36 = arith.constant 0.000000e+00 : f32
    %46 = vector.broadcast %cst_36 : f32 to vector<196x256xf32>
    %47 = arith.maximumf %45, %46 : vector<196x256xf32>
    %cst_37 = arith.constant dense<0.000000e+00> : vector<256xf32>
    %48 = vector.multi_reduction <add>, %47, %cst_37 [0] : vector<196x256xf32> to vector<256xf32>
    %49 = vector.shape_cast %48 : vector<256xf32> to vector<1x256xf32>
    %cst_38 = arith.constant 1.960000e+02 : f32
    %50 = vector.broadcast %cst_38 : f32 to vector<1x256xf32>
    %51 = arith.divf %49, %50 : vector<1x256xf32>
    %c4 = arith.constant 4 : index
    %c0_39 = arith.constant 0 : index
    %c0_40 = arith.constant 0 : index
    %52 = vector.load %arg1[%c4, %c0_39, %c0_40] : memref<8x196x128xbf16, #tpu.memory_space<vmem>>, vector<1x196x128xbf16>
    %53 = vector.shape_cast %52 : vector<1x196x128xbf16> to vector<196x128xbf16>
    %c0_41 = arith.constant 0 : index
    %c0_42 = arith.constant 0 : index
    %54 = vector.load %arg2[%c0_41, %c0_42] : memref<128x256xbf16, #tpu.memory_space<vmem>>, vector<128x256xbf16>
    %cst_43 = arith.constant dense<0.000000e+00> : vector<196x256xf32>
    %55 = tpu.matmul %53, %54, %cst_43 {dimension_numbers = #tpu.dot_dimension_numbers<[1], [0], [0], [1], [0, 0, 1, 1], [], []>} : vector<196x128xbf16>, vector<128x256xbf16>, vector<196x256xf32> -> vector<196x256xf32>
    %c0_44 = arith.constant 0 : index
    %c0_45 = arith.constant 0 : index
    %56 = vector.load %arg3[%c0_44, %c0_45] : memref<1x256xf32, #tpu.memory_space<vmem>>, vector<1x256xf32>
    %57 = vector.broadcast %56 : vector<1x256xf32> to vector<196x256xf32>
    %58 = arith.addf %55, %57 : vector<196x256xf32>
    %cst_46 = arith.constant 0.000000e+00 : f32
    %59 = vector.broadcast %cst_46 : f32 to vector<196x256xf32>
    %60 = arith.maximumf %58, %59 : vector<196x256xf32>
    %cst_47 = arith.constant dense<0.000000e+00> : vector<256xf32>
    %61 = vector.multi_reduction <add>, %60, %cst_47 [0] : vector<196x256xf32> to vector<256xf32>
    %62 = vector.shape_cast %61 : vector<256xf32> to vector<1x256xf32>
    %cst_48 = arith.constant 1.960000e+02 : f32
    %63 = vector.broadcast %cst_48 : f32 to vector<1x256xf32>
    %64 = arith.divf %62, %63 : vector<1x256xf32>
    %c5 = arith.constant 5 : index
    %c0_49 = arith.constant 0 : index
    %c0_50 = arith.constant 0 : index
    %65 = vector.load %arg1[%c5, %c0_49, %c0_50] : memref<8x196x128xbf16, #tpu.memory_space<vmem>>, vector<1x196x128xbf16>
    %66 = vector.shape_cast %65 : vector<1x196x128xbf16> to vector<196x128xbf16>
    %c0_51 = arith.constant 0 : index
    %c0_52 = arith.constant 0 : index
    %67 = vector.load %arg2[%c0_51, %c0_52] : memref<128x256xbf16, #tpu.memory_space<vmem>>, vector<128x256xbf16>
    %cst_53 = arith.constant dense<0.000000e+00> : vector<196x256xf32>
    %68 = tpu.matmul %66, %67, %cst_53 {dimension_numbers = #tpu.dot_dimension_numbers<[1], [0], [0], [1], [0, 0, 1, 1], [], []>} : vector<196x128xbf16>, vector<128x256xbf16>, vector<196x256xf32> -> vector<196x256xf32>
    %c0_54 = arith.constant 0 : index
    %c0_55 = arith.constant 0 : index
    %69 = vector.load %arg3[%c0_54, %c0_55] : memref<1x256xf32, #tpu.memory_space<vmem>>, vector<1x256xf32>
    %70 = vector.broadcast %69 : vector<1x256xf32> to vector<196x256xf32>
    %71 = arith.addf %68, %70 : vector<196x256xf32>
    %cst_56 = arith.constant 0.000000e+00 : f32
    %72 = vector.broadcast %cst_56 : f32 to vector<196x256xf32>
    %73 = arith.maximumf %71, %72 : vector<196x256xf32>
    %cst_57 = arith.constant dense<0.000000e+00> : vector<256xf32>
    %74 = vector.multi_reduction <add>, %73, %cst_57 [0] : vector<196x256xf32> to vector<256xf32>
    %75 = vector.shape_cast %74 : vector<256xf32> to vector<1x256xf32>
    %cst_58 = arith.constant 1.960000e+02 : f32
    %76 = vector.broadcast %cst_58 : f32 to vector<1x256xf32>
    %77 = arith.divf %75, %76 : vector<1x256xf32>
    %c6 = arith.constant 6 : index
    %c0_59 = arith.constant 0 : index
    %c0_60 = arith.constant 0 : index
    %78 = vector.load %arg1[%c6, %c0_59, %c0_60] : memref<8x196x128xbf16, #tpu.memory_space<vmem>>, vector<1x196x128xbf16>
    %79 = vector.shape_cast %78 : vector<1x196x128xbf16> to vector<196x128xbf16>
    %c0_61 = arith.constant 0 : index
    %c0_62 = arith.constant 0 : index
    %80 = vector.load %arg2[%c0_61, %c0_62] : memref<128x256xbf16, #tpu.memory_space<vmem>>, vector<128x256xbf16>
    %cst_63 = arith.constant dense<0.000000e+00> : vector<196x256xf32>
    %81 = tpu.matmul %79, %80, %cst_63 {dimension_numbers = #tpu.dot_dimension_numbers<[1], [0], [0], [1], [0, 0, 1, 1], [], []>} : vector<196x128xbf16>, vector<128x256xbf16>, vector<196x256xf32> -> vector<196x256xf32>
    %c0_64 = arith.constant 0 : index
    %c0_65 = arith.constant 0 : index
    %82 = vector.load %arg3[%c0_64, %c0_65] : memref<1x256xf32, #tpu.memory_space<vmem>>, vector<1x256xf32>
    %83 = vector.broadcast %82 : vector<1x256xf32> to vector<196x256xf32>
    %84 = arith.addf %81, %83 : vector<196x256xf32>
    %cst_66 = arith.constant 0.000000e+00 : f32
    %85 = vector.broadcast %cst_66 : f32 to vector<196x256xf32>
    %86 = arith.maximumf %84, %85 : vector<196x256xf32>
    %cst_67 = arith.constant dense<0.000000e+00> : vector<256xf32>
    %87 = vector.multi_reduction <add>, %86, %cst_67 [0] : vector<196x256xf32> to vector<256xf32>
    %88 = vector.shape_cast %87 : vector<256xf32> to vector<1x256xf32>
    %cst_68 = arith.constant 1.960000e+02 : f32
    %89 = vector.broadcast %cst_68 : f32 to vector<1x256xf32>
    %90 = arith.divf %88, %89 : vector<1x256xf32>
    %c7 = arith.constant 7 : index
    %c0_69 = arith.constant 0 : index
    %c0_70 = arith.constant 0 : index
    %91 = vector.load %arg1[%c7, %c0_69, %c0_70] : memref<8x196x128xbf16, #tpu.memory_space<vmem>>, vector<1x196x128xbf16>
    %92 = vector.shape_cast %91 : vector<1x196x128xbf16> to vector<196x128xbf16>
    %c0_71 = arith.constant 0 : index
    %c0_72 = arith.constant 0 : index
    %93 = vector.load %arg2[%c0_71, %c0_72] : memref<128x256xbf16, #tpu.memory_space<vmem>>, vector<128x256xbf16>
    %cst_73 = arith.constant dense<0.000000e+00> : vector<196x256xf32>
    %94 = tpu.matmul %92, %93, %cst_73 {dimension_numbers = #tpu.dot_dimension_numbers<[1], [0], [0], [1], [0, 0, 1, 1], [], []>} : vector<196x128xbf16>, vector<128x256xbf16>, vector<196x256xf32> -> vector<196x256xf32>
    %c0_74 = arith.constant 0 : index
    %c0_75 = arith.constant 0 : index
    %95 = vector.load %arg3[%c0_74, %c0_75] : memref<1x256xf32, #tpu.memory_space<vmem>>, vector<1x256xf32>
    %96 = vector.broadcast %95 : vector<1x256xf32> to vector<196x256xf32>
    %97 = arith.addf %94, %96 : vector<196x256xf32>
    %cst_76 = arith.constant 0.000000e+00 : f32
    %98 = vector.broadcast %cst_76 : f32 to vector<196x256xf32>
    %99 = arith.maximumf %97, %98 : vector<196x256xf32>
    %cst_77 = arith.constant dense<0.000000e+00> : vector<256xf32>
    %100 = vector.multi_reduction <add>, %99, %cst_77 [0] : vector<196x256xf32> to vector<256xf32>
    %101 = vector.shape_cast %100 : vector<256xf32> to vector<1x256xf32>
    %cst_78 = arith.constant 1.960000e+02 : f32
    %102 = vector.broadcast %cst_78 : f32 to vector<1x256xf32>
    %103 = arith.divf %101, %102 : vector<1x256xf32>
    %104 = tpu.concatenate %12, %25, %38, %51, %64, %77, %90, %103 in 0 : vector<1x256xf32>, vector<1x256xf32>, vector<1x256xf32>, vector<1x256xf32>, vector<1x256xf32>, vector<1x256xf32>, vector<1x256xf32>, vector<1x256xf32> -> vector<8x256xf32>
    %105 = arith.truncf %104 : vector<8x256xf32> to vector<8x256xbf16>
    %c0_79 = arith.constant 0 : index
    %c0_80 = arith.constant 0 : index
    %106 = vector.load %arg4[%c0_79, %c0_80] : memref<256x128xbf16, #tpu.memory_space<vmem>>, vector<256x128xbf16>
    %cst_81 = arith.constant dense<0.000000e+00> : vector<8x128xf32>
    %107 = tpu.matmul %105, %106, %cst_81 {dimension_numbers = #tpu.dot_dimension_numbers<[1], [0], [0], [1], [0, 0, 1, 1], [], []>} : vector<8x256xbf16>, vector<256x128xbf16>, vector<8x128xf32> -> vector<8x128xf32>
    %c0_82 = arith.constant 0 : index
    %c0_83 = arith.constant 0 : index
    %108 = vector.load %arg5[%c0_82, %c0_83] : memref<1x128xf32, #tpu.memory_space<vmem>>, vector<1x128xf32>
    %109 = vector.broadcast %108 : vector<1x128xf32> to vector<8x128xf32>
    %110 = arith.addf %107, %109 : vector<8x128xf32>
    %c0_84 = arith.constant 0 : index
    %c0_85 = arith.constant 0 : index
    %111 = vector.load %arg6[%c0_84, %c0_85] : memref<8x128xf32, #tpu.memory_space<vmem>>, vector<8x128xf32>
    tpu.vector_store %arg6[%c0_84, %c0_85], %110 {strides = array<i32>} : memref<8x128xf32, #tpu.memory_space<vmem>>, vector<8x128xf32>,
    return
  }
  func.func @transform_0(%arg0: i32) -> (i32, i32, i32) {
    %c0_i32 = arith.constant 0 : i32
    %c0_i32_0 = arith.constant 0 : i32
    %c0_i32_1 = arith.constant 0 : i32
    return %arg0, %c0_i32, %c0_i32_0 : i32, i32, i32
  }
  func.func @transform_1(%arg0: i32) -> (i32, i32) {
    %c0_i32 = arith.constant 0 : i32
    %c0_i32_0 = arith.constant 0 : i32
    %c0_i32_1 = arith.constant 0 : i32
    return %c0_i32, %c0_i32_0 : i32, i32
  }
  func.func @transform_2(%arg0: i32) -> (i32, i32) {
    %c0_i32 = arith.constant 0 : i32
    %c0_i32_0 = arith.constant 0 : i32
    %c0_i32_1 = arith.constant 0 : i32
    return %c0_i32, %c0_i32_0 : i32, i32
  }
  func.func @transform_3(%arg0: i32) -> (i32, i32) {
    %c0_i32 = arith.constant 0 : i32
    %c0_i32_0 = arith.constant 0 : i32
    %c0_i32_1 = arith.constant 0 : i32
    return %c0_i32, %c0_i32_0 : i32, i32
  }
  func.func @transform_4(%arg0: i32) -> (i32, i32) {
    %c0_i32 = arith.constant 0 : i32
    %c0_i32_0 = arith.constant 0 : i32
    %c0_i32_1 = arith.constant 0 : i32
    return %c0_i32, %c0_i32_0 : i32, i32
  }
  func.func @transform_5(%arg0: i32) -> (i32, i32) {
    %c0_i32 = arith.constant 0 : i32
    %c0_i32_0 = arith.constant 0 : i32
    return %arg0, %c0_i32 : i32, i32
  }
}

</mosaic_0001>

<bundles_post_ra>
// kernel: _lambda_.6
= control target key start
LH: loop header
LB: loop body
LE: loop exit
PB: predicated region body
PF: predicated region fallthrough
CT: control target
= control target key end

     0   :  { %s1126_s12 = smov 0   ;;  %s1247_s0 = inlined_call_operand.vmem [shape: bf16[2048,128], index: 0, kind: input, shape index: {}]   ;;  %s1248_s1 = inlined_call_operand.vmem [shape: bf16[128,128], index: 1, kind: input, shape index: {}]   ;;  %s1249_s2 = inlined_call_operand.vmem [shape: f32[1,128], index: 2, kind: input, shape index: {}]   ;;  %s1250_s3 = inlined_call_operand.vmem [shape: bf16[2048,128], index: 3, kind: output, shape index: {}]  }
   0x1 LB: > { %s783_s13 = sadd.s32 4294967295, %s1104_s12   ;;  %p787_p0 = scmp.ge.s32.totalorder %s1104_s12, 1  ;;  %s1104_s12 = sphi %s1126_s12, %s13_s12  }
   0x2   : > { %p138_p1 = scmp.lt.s32.totalorder %s1104_s12, 9 }
   0x4   : > { %p139_p2 = pnand %p787_p0, %p138_p1 }
   0x5   : > { %v1074_v0 = vld [vmem:[%s1248_s1] sm:$0xff] (!%p139_p2)   ;;  %s788_s16 = sshll.u32 (!%p139_p2), %s783_s13, 5  ;;  %v1075_v1 = vld [vmem:[%s1248_s1 + $0x8] sm:$0xff] (!%p139_p2)   ;;  %v1076_v2 = vld [vmem:[%s1248_s1 + $0x10] sm:$0xff] (!%p139_p2)  }
   0x6   : > { %142 = sbr.rel (%p139_p2) target bundleno = 284 (0x11c), region = 32  ;;  %p163_p3 = scmp.lt.s32.totalorder (!%p139_p2), %s788_s16, 255  ;;  %1002 = vmatprep.subr.bf16.mxu0 (!%p139_p2), %v1074_v0  ;;  %1050 = vmatprep.subr.bf16.mxu1 (!%p139_p2), %v1074_v0  ;;  %v1077_v3 = vld [vmem:[%s1248_s1 + $0x18] sm:$0xff] (!%p139_p2)   ;;  %v1078_v6 = vld [vmem:[%s1248_s1 + $0x20] sm:$0xff] (!%p139_p2)   ;;  %v1079_v7 = vld [vmem:[%s1248_s1 + $0x28] sm:$0xff] (!%p139_p2)  }
   0x7   : > { %1003 = vmatpush3.bf16.msra.mxu0 (!%p139_p2), %v1074_v0  ;;  %1058 = vmatpush3.bf16.msra.mxu1 (!%p139_p2), %v1074_v0  ;;  %v1080_v8 = vld [vmem:[%s1248_s1 + $0x30] sm:$0xff] (!%p139_p2)   ;;  %v1081_v9 = vld [vmem:[%s1248_s1 + $0x38] sm:$0xff] (!%p139_p2)   ;;  %v1187_v24 = vld [vmem:[%s1249_s2] ss:$0 sm:$0xff] (!%p139_p2) }
   0x8   : > { %1004 = vmatprep.subr.bf16.mxu0 (!%p139_p2), %v1075_v1  ;;  %1051 = vmatprep.subr.bf16.mxu1 (!%p139_p2), %v1075_v1 }
   0xb   : > { %1005 = vmatpush3.bf16.msra.mxu0 (!%p139_p2), %v1075_v1  ;;  %1059 = vmatpush3.bf16.msra.mxu1 (!%p139_p2), %v1075_v1 }
   0xc   : > { %1006 = vmatprep.subr.bf16.mxu0 (!%p139_p2), %v1076_v2  ;;  %1052 = vmatprep.subr.bf16.mxu1 (!%p139_p2), %v1076_v2 }
   0xd   : > { %s1252_s16 = smov (!%p163_p3, %s788_s16), 255 }
   0xe   : > { %s789_s21 = sshll.u32 %s1252_s16, 2 }
   0xf   : > { %s1151_s24 = scalar_lea.vmem %s1247_s0, %s789_s21  ;;  %1007 = vmatpush3.bf16.msra.mxu0 %v1076_v2  ;;  %1060 = vmatpush3.bf16.msra.mxu1 %v1076_v2  ;;  %s1202_s13 = scalar_lea.vmem %s1250_s3, %s789_s21 }
  0x10   : > { %v1082_v4 = vld [vmem:[%s1151_s24] sm:$0xff]   ;;  %1008 = vmatprep.subr.bf16.mxu0 %v1077_v3  ;;  %1053 = vmatprep.subr.bf16.mxu1 %v1077_v3  ;;  %v1084_v10 = vld [vmem:[%s1151_s24 + $0x8] sm:$0xff]   ;;  %v1086_v12 = vld [vmem:[%s1151_s24 + $0x10] sm:$0xff]  }
  0x11   : > { %v1083_v5 = vld [vmem:[%s1151_s24 + $0x40] sm:$0xff]   ;;  %1018 = vmatprep.mubr.bf16.mxu0 %v1082_v4  ;;  %v1085_v11 = vld [vmem:[%s1151_s24 + $0x48] sm:$0xff]   ;;  %v1087_v13 = vld [vmem:[%s1151_s24 + $0x50] sm:$0xff]  }
  0x12   : > { %1034 = vmatprep.mubr.bf16.mxu1 %v1083_v5  ;;  %v1088_v14 = vld [vmem:[%s1151_s24 + $0x18] sm:$0xff]   ;;  %v1090_v16 = vld [vmem:[%s1151_s24 + $0x20] sm:$0xff]   ;;  %v1092_v18 = vld [vmem:[%s1151_s24 + $0x28] sm:$0xff]  }
  0x13   : > { %1009 = vmatpush3.bf16.msra.mxu0 %v1077_v3  ;;  %1061 = vmatpush3.bf16.msra.mxu1 %v1077_v3  ;;  %v1089_v15 = vld [vmem:[%s1151_s24 + $0x58] sm:$0xff]   ;;  %v1091_v17 = vld [vmem:[%s1151_s24 + $0x60] sm:$0xff]   ;;  %v1093_v19 = vld [vmem:[%s1151_s24 + $0x68] sm:$0xff]  }
  0x14   : > { %1010 = vmatprep.subr.bf16.mxu0 %v1078_v6  ;;  %1054 = vmatprep.subr.bf16.mxu1 %v1078_v6  ;;  %v1094_v20 = vld [vmem:[%s1151_s24 + $0x30] sm:$0xff]   ;;  %v1096_v22 = vld [vmem:[%s1151_s24 + $0x38] sm:$0xff]  }
  0x15   : > { %v1095_v21 = vld [vmem:[%s1151_s24 + $0x70] sm:$0xff]   ;;  %v1097_v23 = vld [vmem:[%s1151_s24 + $0x78] sm:$0xff]  }
  0x17   : > { %1011 = vmatpush3.bf16.msra.mxu0 %v1078_v6  ;;  %1062 = vmatpush3.bf16.msra.mxu1 %v1078_v6 }
  0x18   : > { %1012 = vmatprep.subr.bf16.mxu0 %v1079_v7  ;;  %1055 = vmatprep.subr.bf16.mxu1 %v1079_v7 }
  0x1b   : > { %1013 = vmatpush3.bf16.msra.mxu0 %v1079_v7  ;;  %1063 = vmatpush3.bf16.msra.mxu1 %v1079_v7 }
  0x1c   : > { %1014 = vmatprep.subr.bf16.mxu0 %v1080_v8  ;;  %1056 = vmatprep.subr.bf16.mxu1 %v1080_v8 }
  0x1f   : > { %1015 = vmatpush3.bf16.msra.mxu0 %v1080_v8  ;;  %1064 = vmatpush3.bf16.msra.mxu1 %v1080_v8 }
  0x20   : > { %1016 = vmatprep.subr.bf16.mxu0 %v1081_v9  ;;  %1057 = vmatprep.subr.bf16.mxu1 %v1081_v9 }
  0x23   : > { %1017 = vmatpush3.bf16.msra.mxu0 %v1081_v9  ;;  %1065 = vmatpush3.bf16.msra.mxu1 %v1081_v9 }
  0x26   : > { %1019 = vmatmul.mubr.bf16.vlgmr.msra.gmra.mrb[0].mxu0 %v1084_v10  ;;  %1035 = vmatmul.mubr.bf16.vlgmr.msra.gmra.mrb[0].mxu1 %v1085_v11 }
  0x27   : > { %1022 = vmatprep.mubr.bf16.mxu0 %v1086_v12  ;;  %1038 = vmatprep.mubr.bf16.mxu1 %v1087_v13 }
  0x2e   : > { %1023 = vmatmul.mubr.bf16.gmra.mrb[4].mxu0 %v1088_v14  ;;  %1039 = vmatmul.mubr.bf16.gmra.mrb[4].mxu1 %v1089_v15 }
  0x2f   : > { %1026 = vmatprep.mubr.bf16.mxu0 %v1090_v16  ;;  %1042 = vmatprep.mubr.bf16.mxu1 %v1091_v17 }
  0x36   : > { %1027 = vmatmul.mubr.bf16.gmra.mrb[8].mxu0 %v1092_v18  ;;  %1043 = vmatmul.mubr.bf16.gmra.mrb[8].mxu1 %v1093_v19 }
  0x37   : > { %1030 = vmatprep.mubr.bf16.mxu0 %v1094_v20  ;;  %1046 = vmatprep.mubr.bf16.mxu1 %v1095_v21 }
  0x3e   : > { %1031 = vmatmul.mubr.bf16.gmra.mrb[12].mxu0 %v1096_v22  ;;  %1047 = vmatmul.mubr.bf16.gmra.mrb[12].mxu1 %v1097_v23 }
  0xf9   : > { %v1020_v25 = vpop.f32.mrb[0].mxu0  ;;  %v1036_v26 = vpop.f32.mrb[0].mxu1 }
  0xfa   : > { %v417_v27 = vadd.f32 %v1020_v25, %v1187_v24  ;;  %v481_v28 = vadd.f32 %v1036_v26, %v1187_v24  ;;  %v408_v29 = vpop.f32.mrb[1].mxu0  ;;  %v472_v30 = vpop.f32.mrb[1].mxu1 }
  0xfb   : > { %v409_v31 = vadd.f32 %v1187_v24, %v408_v29  ;;  %v473_v32 = vadd.f32 %v1187_v24, %v472_v30  ;;  %v1021_v33 = vpop.f32.mrb[2].mxu0  ;;  %v1037_v34 = vpop.f32.mrb[2].mxu1 }
  0xfc   : > { %v420_v35 = vadd.f32 %v1021_v33, %v1187_v24  ;;  %v484_v36 = vadd.f32 %v1037_v34, %v1187_v24  ;;  %v411_v37 = vpop.f32.mrb[3].mxu0  ;;  %v475_v38 = vpop.f32.mrb[3].mxu1  ;;  %v537_v41 = vmax.f32 %v417_v27, 0.0  ;;  %v553_v42 = vmax.f32 %v481_v28, 0.0 }
  0xfd   : > { %v412_v39 = vadd.f32 %v1187_v24, %v411_v37  ;;  %v476_v40 = vadd.f32 %v1187_v24, %v475_v38  ;;  %v535_v45 = vmax.f32 %v409_v31, 0.0  ;;  %v551_v46 = vmax.f32 %v473_v32, 0.0 }
  0xfe   : > { %v538_v43 = vmax.f32 %v420_v35, 0.0  ;;  %v554_v44 = vmax.f32 %v484_v36, 0.0 }
  0xff   : > { %v536_v47 = vmax.f32 %v412_v39, 0.0  ;;  %v552_v48 = vmax.f32 %v476_v40, 0.0 }
 0x100   : > { %v891_v49 = vpack.c.bf16 %v538_v43, %v537_v41  ;;  %v931_v50 = vpack.c.bf16 %v554_v44, %v553_v42 }
 0x101   : > { %v886_v51 = vpack.c.bf16 %v536_v47, %v535_v45  ;;  %v926_v52 = vpack.c.bf16 %v552_v48, %v551_v46  ;;  %v1024_v53 = vpop.f32.mrb[4].mxu0  ;;  %v1040_v54 = vpop.f32.mrb[4].mxu1 }
 0x102   : > { %963 = vst [vmem:[%s1202_s13 + $0x8] sm:$0xff] %v891_v49   ;;  %971 = vst [vmem:[%s1202_s13 + $0x48] sm:$0xff] %v931_v50   ;;  %v433_v55 = vadd.f32 %v1024_v53, %v1187_v24  ;;  %v497_v56 = vadd.f32 %v1040_v54, %v1187_v24  ;;  %v424_v57 = vpop.f32.mrb[5].mxu0  ;;  %v488_v58 = vpop.f32.mrb[5].mxu1 }
 0x103   : > { %887 = vst [vmem:[%s1202_s13] sm:$0xff] %v886_v51   ;;  %970 = vst [vmem:[%s1202_s13 + $0x40] sm:$0xff] %v926_v52   ;;  %v425_v59 = vadd.f32 %v1187_v24, %v424_v57  ;;  %v489_v60 = vadd.f32 %v1187_v24, %v488_v58  ;;  %v1025_v61 = vpop.f32.mrb[6].mxu0  ;;  %v1041_v62 = vpop.f32.mrb[6].mxu1 }
 0x104   : > { %v436_v63 = vadd.f32 %v1025_v61, %v1187_v24  ;;  %v500_v0 = vadd.f32 %v1041_v62, %v1187_v24  ;;  %v427_v1 = vpop.f32.mrb[7].mxu0  ;;  %v491_v2 = vpop.f32.mrb[7].mxu1  ;;  %v541_v5 = vmax.f32 %v433_v55, 0.0  ;;  %v557_v6 = vmax.f32 %v497_v56, 0.0 }
 0x105   : > { %v428_v3 = vadd.f32 %v1187_v24, %v427_v1  ;;  %v492_v4 = vadd.f32 %v1187_v24, %v491_v2  ;;  %v539_v9 = vmax.f32 %v425_v59, 0.0  ;;  %v555_v10 = vmax.f32 %v489_v60, 0.0 }
 0x106   : > { %v542_v7 = vmax.f32 %v436_v63, 0.0  ;;  %v558_v8 = vmax.f32 %v500_v0, 0.0 }
 0x107   : > { %v540_v11 = vmax.f32 %v428_v3, 0.0  ;;  %v556_v12 = vmax.f32 %v492_v4, 0.0 }
 0x108   : > { %v901_v13 = vpack.c.bf16 %v542_v7, %v541_v5  ;;  %v941_v14 = vpack.c.bf16 %v558_v8, %v557_v6 }
 0x109   : > { %v896_v15 = vpack.c.bf16 %v540_v11, %v539_v9  ;;  %v936_v16 = vpack.c.bf16 %v556_v12, %v555_v10  ;;  %v1028_v17 = vpop.f32.mrb[8].mxu0  ;;  %v1044_v18 = vpop.f32.mrb[8].mxu1 }
 0x10a   : > { %965 = vst [vmem:[%s1202_s13 + $0x18] sm:$0xff] %v901_v13   ;;  %973 = vst [vmem:[%s1202_s13 + $0x58] sm:$0xff] %v941_v14   ;;  %v449_v19 = vadd.f32 %v1028_v17, %v1187_v24  ;;  %v513_v20 = vadd.f32 %v1044_v18, %v1187_v24  ;;  %v440_v21 = vpop.f32.mrb[9].mxu0  ;;  %v504_v22 = vpop.f32.mrb[9].mxu1 }
 0x10b   : > { %964 = vst [vmem:[%s1202_s13 + $0x10] sm:$0xff] %v896_v15   ;;  %972 = vst [vmem:[%s1202_s13 + $0x50] sm:$0xff] %v936_v16   ;;  %v441_v23 = vadd.f32 %v1187_v24, %v440_v21  ;;  %v505_v25 = vadd.f32 %v1187_v24, %v504_v22  ;;  %v1029_v26 = vpop.f32.mrb[10].mxu0  ;;  %v1045_v27 = vpop.f32.mrb[10].mxu1 }
 0x10c   : > { %v452_v28 = vadd.f32 %v1029_v26, %v1187_v24  ;;  %v516_v29 = vadd.f32 %v1045_v27, %v1187_v24  ;;  %v443_v30 = vpop.f32.mrb[11].mxu0  ;;  %v507_v31 = vpop.f32.mrb[11].mxu1  ;;  %v545_v34 = vmax.f32 %v449_v19, 0.0  ;;  %v561_v35 = vmax.f32 %v513_v20, 0.0 }
 0x10d   : > { %v444_v32 = vadd.f32 %v1187_v24, %v443_v30  ;;  %v508_v33 = vadd.f32 %v1187_v24, %v507_v31  ;;  %v543_v38 = vmax.f32 %v441_v23, 0.0  ;;  %v559_v39 = vmax.f32 %v505_v25, 0.0 }
 0x10e   : > { %v546_v36 = vmax.f32 %v452_v28, 0.0  ;;  %v562_v37 = vmax.f32 %v516_v29, 0.0 }
 0x10f   : > { %v544_v40 = vmax.f32 %v444_v32, 0.0  ;;  %v560_v41 = vmax.f32 %v508_v33, 0.0 }
 0x110   : > { %v911_v42 = vpack.c.bf16 %v546_v36, %v545_v34  ;;  %v951_v43 = vpack.c.bf16 %v562_v37, %v561_v35 }
 0x111   : > { %v906_v44 = vpack.c.bf16 %v544_v40, %v543_v38  ;;  %v946_v45 = vpack.c.bf16 %v560_v41, %v559_v39  ;;  %v1032_v46 = vpop.f32.mrb[12].mxu0  ;;  %v1048_v47 = vpop.f32.mrb[12].mxu1 }
 0x112   : > { %967 = vst [vmem:[%s1202_s13 + $0x28] sm:$0xff] %v911_v42   ;;  %975 = vst [vmem:[%s1202_s13 + $0x68] sm:$0xff] %v951_v43   ;;  %v465_v48 = vadd.f32 %v1032_v46, %v1187_v24  ;;  %v529_v49 = vadd.f32 %v1048_v47, %v1187_v24  ;;  %v456_v50 = vpop.f32.mrb[13].mxu0  ;;  %v520_v51 = vpop.f32.mrb[13].mxu1 }
 0x113   : > { %966 = vst [vmem:[%s1202_s13 + $0x20] sm:$0xff] %v906_v44   ;;  %974 = vst [vmem:[%s1202_s13 + $0x60] sm:$0xff] %v946_v45   ;;  %v457_v52 = vadd.f32 %v1187_v24, %v456_v50  ;;  %v521_v53 = vadd.f32 %v1187_v24, %v520_v51  ;;  %v1033_v54 = vpop.f32.mrb[14].mxu0  ;;  %v1049_v55 = vpop.f32.mrb[14].mxu1 }
 0x114   : > { %v468_v56 = vadd.f32 %v1033_v54, %v1187_v24  ;;  %v532_v57 = vadd.f32 %v1049_v55, %v1187_v24  ;;  %v459_v58 = vpop.f32.mrb[15].mxu0  ;;  %v523_v59 = vpop.f32.mrb[15].mxu1  ;;  %v549_v62 = vmax.f32 %v465_v48, 0.0  ;;  %v565_v63 = vmax.f32 %v529_v49, 0.0 }
 0x115   : > { %v460_v60 = vadd.f32 %v1187_v24, %v459_v58  ;;  %v524_v61 = vadd.f32 %v1187_v24, %v523_v59  ;;  %v547_v2 = vmax.f32 %v457_v52, 0.0  ;;  %v563_v3 = vmax.f32 %v521_v53, 0.0 }
 0x116   : > { %v550_v0 = vmax.f32 %v468_v56, 0.0  ;;  %v566_v1 = vmax.f32 %v532_v57, 0.0 }
 0x117   : > { %v548_v4 = vmax.f32 %v460_v60, 0.0  ;;  %v564_v5 = vmax.f32 %v524_v61, 0.0 }
 0x118   : > { %v921_v6 = vpack.c.bf16 %v550_v0, %v549_v62  ;;  %v961_v7 = vpack.c.bf16 %v566_v1, %v565_v63 }
 0x119   : > { %v916_v8 = vpack.c.bf16 %v548_v4, %v547_v2  ;;  %v956_v9 = vpack.c.bf16 %v564_v5, %v563_v3 }
 0x11a   : > { %969 = vst [vmem:[%s1202_s13 + $0x38] sm:$0xff] %v921_v6   ;;  %977 = vst [vmem:[%s1202_s13 + $0x78] sm:$0xff] %v961_v7  }
 0x11b   : > { %968 = vst [vmem:[%s1202_s13 + $0x30] sm:$0xff] %v916_v8   ;;  %976 = vst [vmem:[%s1202_s13 + $0x70] sm:$0xff] %v956_v9  }
 0x11c PF: > { %s13_s12 = sadd.s32 1, %s1104_s12  }
 0x11d   : > { %p10_p4 = scmp.ge.s32.totalorder %s13_s12, 10  }
 0x11f   :  { %12 = sbr.rel (!%p10_p4) target bundleno = 1 (0x1), region = 62 }

// kernel: _lambda_.7
= control target key start
LH: loop header
LB: loop body
LE: loop exit
PB: predicated region body
PF: predicated region fallthrough
CT: control target
= control target key end

     0   :  { %s1363_s12 = smov 0   ;;  %s1521_s0 = inlined_call_operand.vmem [shape: bf16[512,256], index: 0, kind: input, shape index: {}]   ;;  %s1522_s1 = inlined_call_operand.vmem [shape: bf16[256,128], index: 1, kind: input, shape index: {}]   ;;  %s1523_s2 = inlined_call_operand.vmem [shape: f32[1,128], index: 2, kind: input, shape index: {}]   ;;  %s1524_s3 = inlined_call_operand.vmem [shape: bf16[512,128], index: 3, kind: output, shape index: {}]  }
   0x1 LB: > { %s914_s13 = sadd.s32 4294967295, %s1341_s12   ;;  %p918_p0 = scmp.ge.s32.totalorder %s1341_s12, 1  ;;  %s1341_s12 = sphi %s1363_s12, %s13_s12  }
   0x2   : > { %p139_p1 = scmp.lt.s32.totalorder %s1341_s12, 3 }
   0x4   : > { %p140_p2 = pnand %p918_p0, %p139_p1 }
   0x5   : > { %v1271_v0 = vld [vmem:[%s1522_s1 + $0x40] sm:$0xff] (!%p140_p2)   ;;  %s919_s16 = sshll.u32 (!%p140_p2), %s914_s13, 5  ;;  %v1273_v2 = vld [vmem:[%s1522_s1 + $0x48] sm:$0xff] (!%p140_p2)   ;;  %v1275_v4 = vld [vmem:[%s1522_s1 + $0x50] sm:$0xff] (!%p140_p2)  }
   0x6   : > { %143 = sbr.rel (%p140_p2) target bundleno = 319 (0x13f), region = 32  ;;  %v1272_v1 = vld [vmem:[%s1522_s1] sm:$0xff] (!%p140_p2)   ;;  %1135 = vmatprep.subr.bf16.mxu0 (!%p140_p2), %v1271_v0  ;;  %1247 = vmatprep.subr.bf16.mxu1 (!%p140_p2), %v1271_v0  ;;  %v1274_v3 = vld [vmem:[%s1522_s1 + $0x8] sm:$0xff] (!%p140_p2)   ;;  %p165_p3 = scmp.lt.s32.totalorder (!%p140_p2), %s919_s16, 63  ;;  %v1276_v5 = vld [vmem:[%s1522_s1 + $0x10] sm:$0xff] (!%p140_p2)  }
   0x7   : > { %1136 = vmatpush3.bf16.msra.mxu0 (!%p140_p2), %v1272_v1  ;;  %1255 = vmatpush3.bf16.msra.mxu1 (!%p140_p2), %v1272_v1  ;;  %v1277_v6 = vld [vmem:[%s1522_s1 + $0x58] sm:$0xff] (!%p140_p2)   ;;  %v1279_v8 = vld [vmem:[%s1522_s1 + $0x60] sm:$0xff] (!%p140_p2)   ;;  %v1281_v10 = vld [vmem:[%s1522_s1 + $0x68] sm:$0xff] (!%p140_p2)  }
   0x8   : > { %1137 = vmatprep.subr.bf16.mxu0 (!%p140_p2), %v1273_v2  ;;  %1248 = vmatprep.subr.bf16.mxu1 (!%p140_p2), %v1273_v2  ;;  %v1278_v7 = vld [vmem:[%s1522_s1 + $0x18] sm:$0xff] (!%p140_p2)   ;;  %v1280_v9 = vld [vmem:[%s1522_s1 + $0x20] sm:$0xff] (!%p140_p2)   ;;  %v1282_v13 = vld [vmem:[%s1522_s1 + $0x28] sm:$0xff] (!%p140_p2)  }
   0x9   : > { %v1283_v14 = vld [vmem:[%s1522_s1 + $0x70] sm:$0xff] (!%p140_p2)   ;;  %v1285_v16 = vld [vmem:[%s1522_s1 + $0x78] sm:$0xff] (!%p140_p2)   ;;  %v1462_v50 = vld [vmem:[%s1523_s2] ss:$0 sm:$0xff] (!%p140_p2) }
   0xa   : > { %v1284_v15 = vld [vmem:[%s1522_s1 + $0x30] sm:$0xff] (!%p140_p2)   ;;  %v1286_v17 = vld [vmem:[%s1522_s1 + $0x38] sm:$0xff] (!%p140_p2)  }
   0xb   : > { %1138 = vmatpush3.bf16.msra.mxu0 (!%p140_p2), %v1274_v3  ;;  %1256 = vmatpush3.bf16.msra.mxu1 (!%p140_p2), %v1274_v3 }
   0xc   : > { %1139 = vmatprep.subr.bf16.mxu0 (!%p140_p2), %v1275_v4  ;;  %1249 = vmatprep.subr.bf16.mxu1 (!%p140_p2), %v1275_v4 }
   0xd   : > { %s1526_s16 = smov (!%p165_p3, %s919_s16), 63 }
   0xe   : > { %s1007_s4 = sshll.u32 %s1526_s16, 3  ;;  %s923_s28 = sshll.u32 %s1526_s16, 2 }
   0xf   : > { %1140 = vmatpush3.bf16.msra.mxu0 %v1276_v5  ;;  %1257 = vmatpush3.bf16.msra.mxu1 %v1276_v5  ;;  %s1404_s9 = scalar_lea.vmem %s1521_s0, %s1007_s4  ;;  %s1472_s4 = scalar_lea.vmem %s1524_s3, %s923_s28 }
  0x10   : > { %1141 = vmatprep.subr.bf16.mxu0 %v1277_v6  ;;  %1250 = vmatprep.subr.bf16.mxu1 %v1277_v6  ;;  %v1289_v11 = vld [vmem:[%s1404_s9 + $0x4] ss:$8 sps:$4 sm:$0xff]   ;;  %v1287_v18 = vld [vmem:[%s1404_s9] ss:$8 sps:$4 sm:$0xff]   ;;  %v1293_v20 = vld [vmem:[%s1404_s9 + $0x14] ss:$8 sps:$4 sm:$0xff]  }
  0x11   : > { %v1292_v12 = vld [vmem:[%s1404_s9 + $0x84] ss:$8 sps:$4 sm:$0xff]   ;;  %537 = vmatprep.mubr.bf16.mxu0 %v1289_v11  ;;  %v1290_v19 = vld [vmem:[%s1404_s9 + $0x80] ss:$8 sps:$4 sm:$0xff]   ;;  %v1295_v21 = vld [vmem:[%s1404_s9 + $0x94] ss:$8 sps:$4 sm:$0xff]  }
  0x12   : > { %601 = vmatprep.mubr.bf16.mxu1 %v1292_v12  ;;  %v1297_v22 = vld [vmem:[%s1404_s9 + $0x10] ss:$8 sps:$4 sm:$0xff]   ;;  %v1299_v24 = vld [vmem:[%s1404_s9 + $0x24] ss:$8 sps:$4 sm:$0xff]   ;;  %v1303_v26 = vld [vmem:[%s1404_s9 + $0x20] ss:$8 sps:$4 sm:$0xff]  }
  0x13   : > { %1142 = vmatpush3.bf16.msra.mxu0 %v1278_v7  ;;  %1258 = vmatpush3.bf16.msra.mxu1 %v1278_v7  ;;  %v1298_v23 = vld [vmem:[%s1404_s9 + $0x90] ss:$8 sps:$4 sm:$0xff]   ;;  %v1301_v25 = vld [vmem:[%s1404_s9 + $0xa4] ss:$8 sps:$4 sm:$0xff]   ;;  %v1304_v27 = vld [vmem:[%s1404_s9 + $0xa0] ss:$8 sps:$4 sm:$0xff]  }
  0x14   : > { %1143 = vmatprep.subr.bf16.mxu0 %v1279_v8  ;;  %1251 = vmatprep.subr.bf16.mxu1 %v1279_v8  ;;  %v1305_v28 = vld [vmem:[%s1404_s9 + $0x34] ss:$8 sps:$4 sm:$0xff]   ;;  %v1309_v30 = vld [vmem:[%s1404_s9 + $0x30] ss:$8 sps:$4 sm:$0xff]   ;;  %v1311_v32 = vld [vmem:[%s1404_s9 + $0x44] ss:$8 sps:$4 sm:$0xff]  }
  0x15   : > { %v1307_v29 = vld [vmem:[%s1404_s9 + $0xb4] ss:$8 sps:$4 sm:$0xff]   ;;  %v1310_v31 = vld [vmem:[%s1404_s9 + $0xb0] ss:$8 sps:$4 sm:$0xff]   ;;  %v1313_v33 = vld [vmem:[%s1404_s9 + $0xc4] ss:$8 sps:$4 sm:$0xff]  }
  0x16   : > { %v1315_v34 = vld [vmem:[%s1404_s9 + $0x40] ss:$8 sps:$4 sm:$0xff]   ;;  %v1317_v36 = vld [vmem:[%s1404_s9 + $0x54] ss:$8 sps:$4 sm:$0xff]   ;;  %v1321_v38 = vld [vmem:[%s1404_s9 + $0x50] ss:$8 sps:$4 sm:$0xff]  }
  0x17   : > { %1144 = vmatpush3.bf16.msra.mxu0 %v1280_v9  ;;  %1259 = vmatpush3.bf16.msra.mxu1 %v1280_v9  ;;  %v1316_v35 = vld [vmem:[%s1404_s9 + $0xc0] ss:$8 sps:$4 sm:$0xff]   ;;  %v1319_v37 = vld [vmem:[%s1404_s9 + $0xd4] ss:$8 sps:$4 sm:$0xff]   ;;  %v1322_v39 = vld [vmem:[%s1404_s9 + $0xd0] ss:$8 sps:$4 sm:$0xff]  }
  0x18   : > { %1145 = vmatprep.subr.bf16.mxu0 %v1281_v10  ;;  %1252 = vmatprep.subr.bf16.mxu1 %v1281_v10  ;;  %v1323_v40 = vld [vmem:[%s1404_s9 + $0x64] ss:$8 sps:$4 sm:$0xff]   ;;  %v1327_v42 = vld [vmem:[%s1404_s9 + $0x60] ss:$8 sps:$4 sm:$0xff]   ;;  %v1329_v44 = vld [vmem:[%s1404_s9 + $0x74] ss:$8 sps:$4 sm:$0xff]  }
  0x19   : > { %v1325_v41 = vld [vmem:[%s1404_s9 + $0xe4] ss:$8 sps:$4 sm:$0xff]   ;;  %v1328_v43 = vld [vmem:[%s1404_s9 + $0xe0] ss:$8 sps:$4 sm:$0xff]   ;;  %v1331_v45 = vld [vmem:[%s1404_s9 + $0xf4] ss:$8 sps:$4 sm:$0xff]  }
  0x1a   : > { %v1333_v46 = vld [vmem:[%s1404_s9 + $0x70] ss:$8 sps:$4 sm:$0xff]  }
  0x1b   : > { %1146 = vmatpush3.bf16.msra.mxu0 %v1282_v13  ;;  %1260 = vmatpush3.bf16.msra.mxu1 %v1282_v13  ;;  %v1334_v47 = vld [vmem:[%s1404_s9 + $0xf0] ss:$8 sps:$4 sm:$0xff]  }
  0x1c   : > { %1147 = vmatprep.subr.bf16.mxu0 %v1283_v14  ;;  %1253 = vmatprep.subr.bf16.mxu1 %v1283_v14 }
  0x1f   : > { %1148 = vmatpush3.bf16.msra.mxu0 %v1284_v15  ;;  %1261 = vmatpush3.bf16.msra.mxu1 %v1284_v15 }
  0x20   : > { %1149 = vmatprep.subr.bf16.mxu0 %v1285_v16  ;;  %1254 = vmatprep.subr.bf16.mxu1 %v1285_v16 }
  0x23   : > { %1150 = vmatpush3.bf16.msra.mxu0 %v1286_v17  ;;  %1262 = vmatpush3.bf16.msra.mxu1 %v1286_v17 }
  0x26   : > { %538 = vmatmul.mubr.bf16.vlgmr.msra.gmra.mrb[0].mxu0 %v1287_v18  ;;  %602 = vmatmul.mubr.bf16.vlgmr.msra.gmra.mrb[0].mxu1 %v1290_v19 }
  0x27   : > { %545 = vmatprep.mubr.bf16.mxu0 %v1293_v20  ;;  %609 = vmatprep.mubr.bf16.mxu1 %v1295_v21 }
  0x2e   : > { %546 = vmatmul.mubr.bf16.gmra.mrb[4].mxu0 %v1297_v22  ;;  %610 = vmatmul.mubr.bf16.gmra.mrb[4].mxu1 %v1298_v23 }
  0x2f   : > { %553 = vmatprep.mubr.bf16.mxu0 %v1299_v24  ;;  %617 = vmatprep.mubr.bf16.mxu1 %v1301_v25 }
  0x36   : > { %554 = vmatmul.mubr.bf16.gmra.mrb[8].mxu0 %v1303_v26  ;;  %618 = vmatmul.mubr.bf16.gmra.mrb[8].mxu1 %v1304_v27 }
  0x37   : > { %561 = vmatprep.mubr.bf16.mxu0 %v1305_v28  ;;  %625 = vmatprep.mubr.bf16.mxu1 %v1307_v29 }
  0x3e   : > { %562 = vmatmul.mubr.bf16.gmra.mrb[12].mxu0 %v1309_v30  ;;  %626 = vmatmul.mubr.bf16.gmra.mrb[12].mxu1 %v1310_v31 }
  0x3f   : > { %569 = vmatprep.mubr.bf16.mxu0 %v1311_v32  ;;  %633 = vmatprep.mubr.bf16.mxu1 %v1313_v33 }
  0x46   : > { %570 = vmatmul.mubr.bf16.gmra.mrb[16].mxu0 %v1315_v34  ;;  %634 = vmatmul.mubr.bf16.gmra.mrb[16].mxu1 %v1316_v35 }
  0x47   : > { %577 = vmatprep.mubr.bf16.mxu0 %v1317_v36  ;;  %641 = vmatprep.mubr.bf16.mxu1 %v1319_v37 }
  0x4e   : > { %578 = vmatmul.mubr.bf16.gmra.mrb[20].mxu0 %v1321_v38  ;;  %642 = vmatmul.mubr.bf16.gmra.mrb[20].mxu1 %v1322_v39 }
  0x4f   : > { %585 = vmatprep.mubr.bf16.mxu0 %v1323_v40  ;;  %649 = vmatprep.mubr.bf16.mxu1 %v1325_v41 }
  0x56   : > { %586 = vmatmul.mubr.bf16.gmra.mrb[24].mxu0 %v1327_v42  ;;  %650 = vmatmul.mubr.bf16.gmra.mrb[24].mxu1 %v1328_v43 }
  0x57   : > { %593 = vmatprep.mubr.bf16.mxu0 %v1329_v44  ;;  %657 = vmatprep.mubr.bf16.mxu1 %v1331_v45 }
  0x5e   : > { %594 = vmatmul.mubr.bf16.gmra.mrb[28].mxu0 %v1333_v46  ;;  %658 = vmatmul.mubr.bf16.gmra.mrb[28].mxu1 %v1334_v47 }
  0xf9   : > { %v1151_v48 = vpop.f32.mrb[0].mxu0  ;;  %v1199_v49 = vpop.f32.mrb[0].mxu1 }
  0xfa   : > { %v1152_v51 = vpop.f32.mrb[1].mxu0  ;;  %v1200_v52 = vpop.f32.mrb[1].mxu1 }
  0xfb   : > { %v1153_v53 = vadd.f32 %v1152_v51, %v1151_v48  ;;  %v1201_v54 = vadd.f32 %v1200_v52, %v1199_v49  ;;  %v1154_v55 = vpop.f32.mrb[2].mxu0  ;;  %v1202_v56 = vpop.f32.mrb[2].mxu1 }
  0xfc   : > { %v1155_v57 = vpop.f32.mrb[3].mxu0  ;;  %v1203_v58 = vpop.f32.mrb[3].mxu1 }
  0xfd   : > { %v540_v59 = vadd.f32 %v1153_v53, %v1462_v50  ;;  %v604_v60 = vadd.f32 %v1201_v54, %v1462_v50  ;;  %v1156_v61 = vadd.f32 %v1155_v57, %v1154_v55  ;;  %v1204_v62 = vadd.f32 %v1203_v58, %v1202_v56 }
  0xff   : > { %v543_v63 = vadd.f32 %v1156_v61, %v1462_v50  ;;  %v607_v0 = vadd.f32 %v1204_v62, %v1462_v50  ;;  %v666_v1 = vmax.f32 %v540_v59, 0.0  ;;  %v682_v2 = vmax.f32 %v604_v60, 0.0 }
 0x101   : > { %v667_v3 = vmax.f32 %v543_v63, 0.0  ;;  %v683_v4 = vmax.f32 %v607_v0, 0.0  ;;  %v1157_v5 = vpop.f32.mrb[4].mxu0  ;;  %v1205_v6 = vpop.f32.mrb[4].mxu1 }
 0x102   : > { %v1158_v7 = vpop.f32.mrb[5].mxu0  ;;  %v1206_v8 = vpop.f32.mrb[5].mxu1 }
 0x103   : > { %v1043_v9 = vpack.c.bf16 %v667_v3, %v666_v1  ;;  %v1083_v10 = vpack.c.bf16 %v683_v4, %v682_v2  ;;  %v1159_v11 = vadd.f32 %v1158_v7, %v1157_v5  ;;  %v1207_v12 = vadd.f32 %v1206_v8, %v1205_v6  ;;  %v1160_v13 = vpop.f32.mrb[6].mxu0  ;;  %v1208_v14 = vpop.f32.mrb[6].mxu1 }
 0x104   : > { %v1161_v15 = vpop.f32.mrb[7].mxu0  ;;  %v1209_v16 = vpop.f32.mrb[7].mxu1 }
 0x105   : > { %1044 = vst [vmem:[%s1472_s4] sm:$0xff] %v1043_v9   ;;  %1127 = vst [vmem:[%s1472_s4 + $0x40] sm:$0xff] %v1083_v10   ;;  %v548_v17 = vadd.f32 %v1159_v11, %v1462_v50  ;;  %v612_v18 = vadd.f32 %v1207_v12, %v1462_v50  ;;  %v1162_v19 = vadd.f32 %v1161_v15, %v1160_v13 }
 0x106   : > { %v1210_v20 = vadd.f32 %v1209_v16, %v1208_v14 }
 0x107   : > { %v551_v21 = vadd.f32 %v1162_v19, %v1462_v50  ;;  %v668_v23 = vmax.f32 %v548_v17, 0.0  ;;  %v684_v24 = vmax.f32 %v612_v18, 0.0 }
 0x108   : > { %v615_v22 = vadd.f32 %v1210_v20, %v1462_v50 }
 0x109   : > { %v669_v25 = vmax.f32 %v551_v21, 0.0  ;;  %v1163_v27 = vpop.f32.mrb[8].mxu0  ;;  %v1211_v28 = vpop.f32.mrb[8].mxu1 }
 0x10a   : > { %v685_v26 = vmax.f32 %v615_v22, 0.0  ;;  %v1164_v29 = vpop.f32.mrb[9].mxu0  ;;  %v1212_v30 = vpop.f32.mrb[9].mxu1 }
 0x10b   : > { %v1048_v31 = vpack.c.bf16 %v669_v25, %v668_v23  ;;  %v1165_v33 = vadd.f32 %v1164_v29, %v1163_v27  ;;  %v1213_v34 = vadd.f32 %v1212_v30, %v1211_v28  ;;  %v1166_v35 = vpop.f32.mrb[10].mxu0  ;;  %v1214_v36 = vpop.f32.mrb[10].mxu1 }
 0x10c   : > { %v1088_v32 = vpack.c.bf16 %v685_v26, %v684_v24  ;;  %v1167_v37 = vpop.f32.mrb[11].mxu0  ;;  %v1215_v38 = vpop.f32.mrb[11].mxu1 }
 0x10d   : > { %1120 = vst [vmem:[%s1472_s4 + $0x8] sm:$0xff] %v1048_v31   ;;  %v556_v39 = vadd.f32 %v1165_v33, %v1462_v50  ;;  %v620_v40 = vadd.f32 %v1213_v34, %v1462_v50  ;;  %v1168_v41 = vadd.f32 %v1167_v37, %v1166_v35  ;;  %v1216_v42 = vadd.f32 %v1215_v38, %v1214_v36 }
 0x10e   : > { %1128 = vst [vmem:[%s1472_s4 + $0x48] sm:$0xff] %v1088_v32  }
 0x10f   : > { %v559_v43 = vadd.f32 %v1168_v41, %v1462_v50  ;;  %v623_v44 = vadd.f32 %v1216_v42, %v1462_v50  ;;  %v670_v45 = vmax.f32 %v556_v39, 0.0  ;;  %v686_v46 = vmax.f32 %v620_v40, 0.0 }
 0x111   : > { %v671_v47 = vmax.f32 %v559_v43, 0.0  ;;  %v687_v48 = vmax.f32 %v623_v44, 0.0  ;;  %v1169_v49 = vpop.f32.mrb[12].mxu0  ;;  %v1217_v51 = vpop.f32.mrb[12].mxu1 }
 0x112   : > { %v1170_v52 = vpop.f32.mrb[13].mxu0  ;;  %v1218_v53 = vpop.f32.mrb[13].mxu1 }
 0x113   : > { %v1053_v54 = vpack.c.bf16 %v671_v47, %v670_v45  ;;  %v1093_v55 = vpack.c.bf16 %v687_v48, %v686_v46  ;;  %v1171_v56 = vadd.f32 %v1170_v52, %v1169_v49  ;;  %v1219_v57 = vadd.f32 %v1218_v53, %v1217_v51  ;;  %v1172_v58 = vpop.f32.mrb[14].mxu0  ;;  %v1220_v59 = vpop.f32.mrb[14].mxu1 }
 0x114   : > { %v1173_v60 = vpop.f32.mrb[15].mxu0  ;;  %v1221_v61 = vpop.f32.mrb[15].mxu1 }
 0x115   : > { %1121 = vst [vmem:[%s1472_s4 + $0x10] sm:$0xff] %v1053_v54   ;;  %1129 = vst [vmem:[%s1472_s4 + $0x50] sm:$0xff] %v1093_v55   ;;  %v564_v62 = vadd.f32 %v1171_v56, %v1462_v50  ;;  %v628_v63 = vadd.f32 %v1219_v57, %v1462_v50  ;;  %v1174_v0 = vadd.f32 %v1173_v60, %v1172_v58 }
 0x116   : > { %v1222_v1 = vadd.f32 %v1221_v61, %v1220_v59 }
 0x117   : > { %v567_v2 = vadd.f32 %v1174_v0, %v1462_v50  ;;  %v672_v4 = vmax.f32 %v564_v62, 0.0  ;;  %v688_v5 = vmax.f32 %v628_v63, 0.0 }
 0x118   : > { %v631_v3 = vadd.f32 %v1222_v1, %v1462_v50 }
 0x119   : > { %v673_v6 = vmax.f32 %v567_v2, 0.0  ;;  %v1175_v8 = vpop.f32.mrb[16].mxu0  ;;  %v1223_v9 = vpop.f32.mrb[16].mxu1 }
 0x11a   : > { %v689_v7 = vmax.f32 %v631_v3, 0.0  ;;  %v1176_v10 = vpop.f32.mrb[17].mxu0  ;;  %v1224_v11 = vpop.f32.mrb[17].mxu1 }
 0x11b   : > { %v1058_v12 = vpack.c.bf16 %v673_v6, %v672_v4  ;;  %v1177_v14 = vadd.f32 %v1176_v10, %v1175_v8  ;;  %v1225_v15 = vadd.f32 %v1224_v11, %v1223_v9  ;;  %v1178_v16 = vpop.f32.mrb[18].mxu0  ;;  %v1226_v17 = vpop.f32.mrb[18].mxu1 }
 0x11c   : > { %v1098_v13 = vpack.c.bf16 %v689_v7, %v688_v5  ;;  %v1179_v18 = vpop.f32.mrb[19].mxu0  ;;  %v1227_v19 = vpop.f32.mrb[19].mxu1 }
 0x11d   : > { %1122 = vst [vmem:[%s1472_s4 + $0x18] sm:$0xff] %v1058_v12   ;;  %v572_v20 = vadd.f32 %v1177_v14, %v1462_v50  ;;  %v636_v21 = vadd.f32 %v1225_v15, %v1462_v50  ;;  %v1180_v22 = vadd.f32 %v1179_v18, %v1178_v16  ;;  %v1228_v23 = vadd.f32 %v1227_v19, %v1226_v17 }
 0x11e   : > { %1130 = vst [vmem:[%s1472_s4 + $0x58] sm:$0xff] %v1098_v13  }
 0x11f   : > { %v575_v24 = vadd.f32 %v1180_v22, %v1462_v50  ;;  %v639_v25 = vadd.f32 %v1228_v23, %v1462_v50  ;;  %v674_v26 = vmax.f32 %v572_v20, 0.0  ;;  %v690_v27 = vmax.f32 %v636_v21, 0.0 }
 0x121   : > { %v675_v28 = vmax.f32 %v575_v24, 0.0  ;;  %v691_v29 = vmax.f32 %v639_v25, 0.0  ;;  %v1181_v30 = vpop.f32.mrb[20].mxu0  ;;  %v1229_v31 = vpop.f32.mrb[20].mxu1 }
 0x122   : > { %v1182_v32 = vpop.f32.mrb[21].mxu0  ;;  %v1230_v33 = vpop.f32.mrb[21].mxu1 }
 0x123   : > { %v1063_v34 = vpack.c.bf16 %v675_v28, %v674_v26  ;;  %v1103_v35 = vpack.c.bf16 %v691_v29, %v690_v27  ;;  %v1183_v36 = vadd.f32 %v1182_v32, %v1181_v30  ;;  %v1231_v37 = vadd.f32 %v1230_v33, %v1229_v31  ;;  %v1184_v38 = vpop.f32.mrb[22].mxu0  ;;  %v1232_v39 = vpop.f32.mrb[22].mxu1 }
 0x124   : > { %v1185_v40 = vpop.f32.mrb[23].mxu0  ;;  %v1233_v41 = vpop.f32.mrb[23].mxu1 }
 0x125   : > { %1123 = vst [vmem:[%s1472_s4 + $0x20] sm:$0xff] %v1063_v34   ;;  %1131 = vst [vmem:[%s1472_s4 + $0x60] sm:$0xff] %v1103_v35   ;;  %v580_v42 = vadd.f32 %v1183_v36, %v1462_v50  ;;  %v644_v43 = vadd.f32 %v1231_v37, %v1462_v50  ;;  %v1186_v44 = vadd.f32 %v1185_v40, %v1184_v38 }
 0x126   : > { %v1234_v45 = vadd.f32 %v1233_v41, %v1232_v39 }
 0x127   : > { %v583_v46 = vadd.f32 %v1186_v44, %v1462_v50  ;;  %v676_v48 = vmax.f32 %v580_v42, 0.0  ;;  %v692_v49 = vmax.f32 %v644_v43, 0.0 }
 0x128   : > { %v647_v47 = vadd.f32 %v1234_v45, %v1462_v50 }
 0x129   : > { %v677_v51 = vmax.f32 %v583_v46, 0.0  ;;  %v1187_v53 = vpop.f32.mrb[24].mxu0  ;;  %v1235_v54 = vpop.f32.mrb[24].mxu1 }
 0x12a   : > { %v693_v52 = vmax.f32 %v647_v47, 0.0  ;;  %v1188_v55 = vpop.f32.mrb[25].mxu0  ;;  %v1236_v56 = vpop.f32.mrb[25].mxu1 }
 0x12b   : > { %v1068_v57 = vpack.c.bf16 %v677_v51, %v676_v48  ;;  %v1189_v59 = vadd.f32 %v1188_v55, %v1187_v53  ;;  %v1237_v60 = vadd.f32 %v1236_v56, %v1235_v54  ;;  %v1190_v61 = vpop.f32.mrb[26].mxu0  ;;  %v1238_v62 = vpop.f32.mrb[26].mxu1 }
 0x12c   : > { %v1108_v58 = vpack.c.bf16 %v693_v52, %v692_v49  ;;  %v1191_v63 = vpop.f32.mrb[27].mxu0  ;;  %v1239_v0 = vpop.f32.mrb[27].mxu1 }
 0x12d   : > { %1124 = vst [vmem:[%s1472_s4 + $0x28] sm:$0xff] %v1068_v57   ;;  %v588_v1 = vadd.f32 %v1189_v59, %v1462_v50  ;;  %v652_v2 = vadd.f32 %v1237_v60, %v1462_v50  ;;  %v1192_v3 = vadd.f32 %v1191_v63, %v1190_v61  ;;  %v1240_v4 = vadd.f32 %v1239_v0, %v1238_v62 }
 0x12e   : > { %1132 = vst [vmem:[%s1472_s4 + $0x68] sm:$0xff] %v1108_v58  }
 0x12f   : > { %v591_v5 = vadd.f32 %v1192_v3, %v1462_v50  ;;  %v655_v6 = vadd.f32 %v1240_v4, %v1462_v50  ;;  %v678_v7 = vmax.f32 %v588_v1, 0.0  ;;  %v694_v8 = vmax.f32 %v652_v2, 0.0 }
 0x131   : > { %v679_v9 = vmax.f32 %v591_v5, 0.0  ;;  %v695_v10 = vmax.f32 %v655_v6, 0.0  ;;  %v1193_v11 = vpop.f32.mrb[28].mxu0  ;;  %v1241_v12 = vpop.f32.mrb[28].mxu1 }
 0x132   : > { %v1194_v13 = vpop.f32.mrb[29].mxu0  ;;  %v1242_v14 = vpop.f32.mrb[29].mxu1 }
 0x133   : > { %v1073_v15 = vpack.c.bf16 %v679_v9, %v678_v7  ;;  %v1113_v16 = vpack.c.bf16 %v695_v10, %v694_v8  ;;  %v1195_v17 = vadd.f32 %v1194_v13, %v1193_v11  ;;  %v1243_v18 = vadd.f32 %v1242_v14, %v1241_v12  ;;  %v1196_v19 = vpop.f32.mrb[30].mxu0  ;;  %v1244_v20 = vpop.f32.mrb[30].mxu1 }
 0x134   : > { %v1197_v21 = vpop.f32.mrb[31].mxu0  ;;  %v1245_v22 = vpop.f32.mrb[31].mxu1 }
 0x135   : > { %1125 = vst [vmem:[%s1472_s4 + $0x30] sm:$0xff] %v1073_v15   ;;  %1133 = vst [vmem:[%s1472_s4 + $0x70] sm:$0xff] %v1113_v16   ;;  %v596_v23 = vadd.f32 %v1195_v17, %v1462_v50  ;;  %v660_v24 = vadd.f32 %v1243_v18, %v1462_v50  ;;  %v1198_v25 = vadd.f32 %v1197_v21, %v1196_v19 }
 0x136   : > { %v1246_v26 = vadd.f32 %v1245_v22, %v1244_v20 }
 0x137   : > { %v599_v27 = vadd.f32 %v1198_v25, %v1462_v50  ;;  %v680_v29 = vmax.f32 %v596_v23, 0.0  ;;  %v696_v30 = vmax.f32 %v660_v24, 0.0 }
 0x138   : > { %v663_v28 = vadd.f32 %v1246_v26, %v1462_v50 }
 0x139   : > { %v681_v31 = vmax.f32 %v599_v27, 0.0 }
 0x13a   : > { %v697_v32 = vmax.f32 %v663_v28, 0.0 }
 0x13b   : > { %v1078_v33 = vpack.c.bf16 %v681_v31, %v680_v29 }
 0x13c   : > { %v1118_v34 = vpack.c.bf16 %v697_v32, %v696_v30 }
 0x13d   : > { %1126 = vst [vmem:[%s1472_s4 + $0x38] sm:$0xff] %v1078_v33  }
 0x13e   : > { %1134 = vst [vmem:[%s1472_s4 + $0x78] sm:$0xff] %v1118_v34  }
 0x13f PF: > { %s13_s12 = sadd.s32 1, %s1341_s12  }
 0x140   : > { %p10_p4 = scmp.ge.s32.totalorder %s13_s12, 4  }
 0x142   :  { %12 = sbr.rel (!%p10_p4) target bundleno = 1 (0x1), region = 62 }

// kernel: _lambda_.8
= control target key start
LH: loop header
LB: loop body
LE: loop exit
PB: predicated region body
PF: predicated region fallthrough
CT: control target
= control target key end

     0   :  { %s1176_s1 = inlined_call_operand.vmem [shape: bf16[384,128], index: 1, kind: input, shape index: {}]   ;;  %s1177_s0 = inlined_call_operand.vmem [shape: bf16[128,384], index: 0, kind: input, shape index: {}]   ;;  %s1178_s2 = inlined_call_operand.vmem [shape: f32[1,128], index: 2, kind: input, shape index: {}]   ;;  %s1179_s3 = inlined_call_operand.vmem [shape: bf16[128,128], index: 3, kind: output, shape index: {}]  }
   0x1   :  { %v908_v0 = vld [vmem:[%s1176_s1 + $0x40] sm:$0xff]   ;;  %v910_v2 = vld [vmem:[%s1176_s1 + $0x48] sm:$0xff]   ;;  %v913_v5 = vld [vmem:[%s1176_s1 + $0x50] sm:$0xff]  }
   0x2   :  { %v909_v1 = vld [vmem:[%s1176_s1] sm:$0xff]   ;;  %796 = vmatprep.subr.bf16.mxu0 %v908_v0  ;;  %v912_v4 = vld [vmem:[%s1176_s1 + $0x8] sm:$0xff]   ;;  %v915_v7 = vld [vmem:[%s1176_s1 + $0x10] sm:$0xff]  }
   0x3   :  { %797 = vmatpush3.bf16.msra.mxu0 %v909_v1  ;;  %v911_v3 = vld [vmem:[%s1176_s1 + $0x80] sm:$0xff]   ;;  %v914_v6 = vld [vmem:[%s1176_s1 + $0x88] sm:$0xff]   ;;  %v916_v8 = vld [vmem:[%s1176_s1 + $0x58] sm:$0xff]  }
   0x4   :  { %798 = vmatprep.subr.bf16.mxu0 %v910_v2  ;;  %876 = vmatprep.subr.bf16.mxu1 %v911_v3  ;;  %v917_v9 = vld [vmem:[%s1176_s1 + $0x90] sm:$0xff]   ;;  %v918_v10 = vld [vmem:[%s1176_s1 + $0x18] sm:$0xff]   ;;  %v919_v11 = vld [vmem:[%s1176_s1 + $0x60] sm:$0xff]  }
   0x5   :  { %877 = vmatpush3.bf16.msra.mxu1 %v911_v3  ;;  %v920_v12 = vld [vmem:[%s1176_s1 + $0x98] sm:$0xff]   ;;  %v921_v13 = vld [vmem:[%s1176_s1 + $0x20] sm:$0xff]   ;;  %v922_v15 = vld [vmem:[%s1176_s1 + $0x68] sm:$0xff]  }
   0x6   :  { %878 = vmatprep.subr.bf16.mxu1 %v914_v6  ;;  %v923_v14 = vld [vmem:[%s1176_s1 + $0xa0] sm:$0xff]   ;;  %v924_v16 = vld [vmem:[%s1176_s1 + $0x28] sm:$0xff]   ;;  %v925_v18 = vld [vmem:[%s1176_s1 + $0x70] sm:$0xff]  }
   0x7   :  { %799 = vmatpush3.bf16.msra.mxu0 %v912_v4  ;;  %v926_v17 = vld [vmem:[%s1176_s1 + $0xa8] sm:$0xff]   ;;  %v927_v19 = vld [vmem:[%s1176_s1 + $0x30] sm:$0xff]   ;;  %v928_v20 = vld [vmem:[%s1176_s1 + $0x78] sm:$0xff]  }
   0x8   :  { %800 = vmatprep.subr.bf16.mxu0 %v913_v5  ;;  %v929_v21 = vld [vmem:[%s1176_s1 + $0xb0] sm:$0xff]   ;;  %v930_v23 = vld [vmem:[%s1176_s1 + $0x38] sm:$0xff]   ;;  %v931_v26 = vld [vmem:[%s1177_s0] ss:$12 sps:$4 sm:$0xff]  }
   0x9   :  { %879 = vmatpush3.bf16.msra.mxu1 %v914_v6  ;;  %v933_v22 = vld [vmem:[%s1177_s0 + $0x4] ss:$12 sps:$4 sm:$0xff]   ;;  %v935_v24 = vld [vmem:[%s1177_s0 + $0x8] ss:$12 sps:$4 sm:$0xff]   ;;  %v934_v25 = vld [vmem:[%s1176_s1 + $0xb8] sm:$0xff]  }
   0xa   :  { %880 = vmatprep.subr.bf16.mxu1 %v917_v9  ;;  %406 = vmatprep.mubr.bf16.mxu0 %v933_v22  ;;  %v937_v27 = vld [vmem:[%s1177_s0 + $0x1c] ss:$12 sps:$4 sm:$0xff]   ;;  %v936_v28 = vld [vmem:[%s1177_s0 + $0x20] ss:$12 sps:$4 sm:$0xff]   ;;  %v943_v29 = vld [vmem:[%s1177_s0 + $0x38] ss:$12 sps:$4 sm:$0xff]  }
   0xb   :  { %801 = vmatpush3.bf16.msra.mxu0 %v915_v7  ;;  %892 = vmatprep.mubr.bf16.mxu1 %v935_v24  ;;  %v939_v30 = vld [vmem:[%s1177_s0 + $0x18] ss:$12 sps:$4 sm:$0xff]   ;;  %v940_v31 = vld [vmem:[%s1177_s0 + $0x34] ss:$12 sps:$4 sm:$0xff]   ;;  %v944_v32 = vld [vmem:[%s1177_s0 + $0x50] ss:$12 sps:$4 sm:$0xff]  }
   0xc   :  { %802 = vmatprep.subr.bf16.mxu0 %v916_v8  ;;  %v951_v33 = vld [vmem:[%s1177_s0 + $0x68] ss:$12 sps:$4 sm:$0xff]   ;;  %v942_v34 = vld [vmem:[%s1177_s0 + $0x30] ss:$12 sps:$4 sm:$0xff]   ;;  %v945_v35 = vld [vmem:[%s1177_s0 + $0x4c] ss:$12 sps:$4 sm:$0xff]  }
   0xd   :  { %881 = vmatpush3.bf16.msra.mxu1 %v917_v9  ;;  %v952_v36 = vld [vmem:[%s1177_s0 + $0x80] ss:$12 sps:$4 sm:$0xff]   ;;  %v959_v37 = vld [vmem:[%s1177_s0 + $0x98] ss:$12 sps:$4 sm:$0xff]   ;;  %v947_v38 = vld [vmem:[%s1177_s0 + $0x48] ss:$12 sps:$4 sm:$0xff]  }
   0xe   :  { %882 = vmatprep.subr.bf16.mxu1 %v920_v12  ;;  %v948_v39 = vld [vmem:[%s1177_s0 + $0x64] ss:$12 sps:$4 sm:$0xff]   ;;  %v950_v41 = vld [vmem:[%s1177_s0 + $0x60] ss:$12 sps:$4 sm:$0xff]   ;;  %v953_v42 = vld [vmem:[%s1177_s0 + $0x7c] ss:$12 sps:$4 sm:$0xff]  }
   0xf   :  { %803 = vmatpush3.bf16.msra.mxu0 %v918_v10  ;;  %v960_v40 = vld [vmem:[%s1177_s0 + $0xb0] ss:$12 sps:$4 sm:$0xff]   ;;  %v955_v43 = vld [vmem:[%s1177_s0 + $0x78] ss:$12 sps:$4 sm:$0xff]   ;;  %v956_v44 = vld [vmem:[%s1177_s0 + $0x94] ss:$12 sps:$4 sm:$0xff]  }
  0x10   :  { %804 = vmatprep.subr.bf16.mxu0 %v919_v11  ;;  %v958_v45 = vld [vmem:[%s1177_s0 + $0x90] ss:$12 sps:$4 sm:$0xff]   ;;  %v961_v46 = vld [vmem:[%s1177_s0 + $0xac] ss:$12 sps:$4 sm:$0xff]   ;;  %v963_v47 = vld [vmem:[%s1177_s0 + $0xa8] ss:$12 sps:$4 sm:$0xff]  }
  0x11   :  { %883 = vmatpush3.bf16.msra.mxu1 %v920_v12  ;;  %v1131_v50 = vld [vmem:[%s1178_s2] ss:$0 sm:$0xff] }
  0x12   :  { %884 = vmatprep.subr.bf16.mxu1 %v923_v14 }
  0x13   :  { %805 = vmatpush3.bf16.msra.mxu0 %v921_v13 }
  0x14   :  { %806 = vmatprep.subr.bf16.mxu0 %v922_v15 }
  0x15   :  { %885 = vmatpush3.bf16.msra.mxu1 %v923_v14 }
  0x16   :  { %886 = vmatprep.subr.bf16.mxu1 %v926_v17 }
  0x17   :  { %807 = vmatpush3.bf16.msra.mxu0 %v924_v16 }
  0x18   :  { %808 = vmatprep.subr.bf16.mxu0 %v925_v18 }
  0x19   :  { %887 = vmatpush3.bf16.msra.mxu1 %v926_v17 }
  0x1a   :  { %888 = vmatprep.subr.bf16.mxu1 %v929_v21 }
  0x1b   :  { %809 = vmatpush3.bf16.msra.mxu0 %v927_v19 }
  0x1c   :  { %810 = vmatprep.subr.bf16.mxu0 %v928_v20 }
  0x1d   :  { %889 = vmatpush3.bf16.msra.mxu1 %v929_v21 }
  0x1e   :  { %890 = vmatprep.subr.bf16.mxu1 %v934_v25 }
  0x1f   :  { %811 = vmatpush3.bf16.msra.mxu0 %v930_v23 }
  0x21   :  { %891 = vmatpush3.bf16.msra.mxu1 %v934_v25 }
  0x22   :  { %407 = vmatmul.mubr.bf16.vlgmr.msra.gmra.mrb[0].mxu0 %v931_v26 }
  0x23   :  { %414 = vmatprep.mubr.bf16.mxu0 %v937_v27 }
  0x24   :  { %893 = vmatmul.mubr.bf16.vlgmr.msra.gmra.mrb[0].mxu1 %v936_v28 }
  0x25   :  { %896 = vmatprep.mubr.bf16.mxu1 %v943_v29 }
  0x2a   :  { %415 = vmatmul.mubr.bf16.gmra.mrb[4].mxu0 %v939_v30 }
  0x2b   :  { %422 = vmatprep.mubr.bf16.mxu0 %v940_v31 }
  0x2c   :  { %897 = vmatmul.mubr.bf16.gmra.mrb[4].mxu1 %v944_v32 }
  0x2d   :  { %900 = vmatprep.mubr.bf16.mxu1 %v951_v33 }
  0x32   :  { %423 = vmatmul.mubr.bf16.gmra.mrb[8].mxu0 %v942_v34 }
  0x33   :  { %430 = vmatprep.mubr.bf16.mxu0 %v945_v35 }
  0x34   :  { %901 = vmatmul.mubr.bf16.gmra.mrb[8].mxu1 %v952_v36 }
  0x35   :  { %904 = vmatprep.mubr.bf16.mxu1 %v959_v37 }
  0x3a   :  { %431 = vmatmul.mubr.bf16.gmra.mrb[12].mxu0 %v947_v38 }
  0x3b   :  { %438 = vmatprep.mubr.bf16.mxu0 %v948_v39 }
  0x3c   :  { %905 = vmatmul.mubr.bf16.gmra.mrb[12].mxu1 %v960_v40 }
  0x42   :  { %439 = vmatmul.mubr.bf16.gmra.mrb[16].mxu0 %v950_v41 }
  0x43   :  { %446 = vmatprep.mubr.bf16.mxu0 %v953_v42 }
  0x4a   :  { %447 = vmatmul.mubr.bf16.gmra.mrb[20].mxu0 %v955_v43 }
  0x4b   :  { %454 = vmatprep.mubr.bf16.mxu0 %v956_v44 }
  0x52   :  { %455 = vmatmul.mubr.bf16.gmra.mrb[24].mxu0 %v958_v45 }
  0x53   :  { %462 = vmatprep.mubr.bf16.mxu0 %v961_v46 }
  0x5a   :  { %463 = vmatmul.mubr.bf16.gmra.mrb[28].mxu0 %v963_v47 }
  0xf5   :  { %v812_v48 = vpop.f32.mrb[0].mxu0 }
  0xf6   :  { %v813_v49 = vpop.f32.mrb[1].mxu0 }
  0xf7   :  { %v814_v51 = vadd.f32 %v813_v49, %v812_v48  ;;  %v815_v52 = vpop.f32.mrb[2].mxu0  ;;  %v894_v54 = vpop.f32.mrb[0].mxu1 }
  0xf8   :  { %v816_v53 = vpop.f32.mrb[3].mxu0  ;;  %v505_v57 = vpop.f32.mrb[1].mxu1 }
  0xf9   :  { %v817_v55 = vadd.f32 %v816_v53, %v815_v52  ;;  %v409_v56 = vadd.f32 %v814_v51, %v1131_v50  ;;  %v895_v58 = vpop.f32.mrb[2].mxu1 }
  0xfa   :  { %v508_v61 = vpop.f32.mrb[3].mxu1 }
  0xfb   :  { %v506_v59 = vadd.f32 %v505_v57, %v409_v56  ;;  %v412_v60 = vadd.f32 %v817_v55, %v1131_v50 }
  0xfd   :  { %v509_v62 = vadd.f32 %v508_v61, %v412_v60  ;;  %v818_v63 = vpop.f32.mrb[4].mxu0  ;;  %v568_v1 = vmax.f32 %v506_v59, 0.0 }
  0xfe   :  { %v819_v0 = vpop.f32.mrb[5].mxu0 }
  0xff   :  { %v569_v2 = vmax.f32 %v509_v62, 0.0  ;;  %v820_v3 = vadd.f32 %v819_v0, %v818_v63  ;;  %v821_v4 = vpop.f32.mrb[6].mxu0  ;;  %v898_v6 = vpop.f32.mrb[4].mxu1 }
 0x100   :  { %v822_v5 = vpop.f32.mrb[7].mxu0  ;;  %v521_v10 = vpop.f32.mrb[5].mxu1 }
 0x101   :  { %v752_v7 = vpack.c.bf16 %v569_v2, %v568_v1  ;;  %v417_v8 = vadd.f32 %v820_v3, %v1131_v50  ;;  %v823_v9 = vadd.f32 %v822_v5, %v821_v4  ;;  %v899_v11 = vpop.f32.mrb[6].mxu1 }
 0x102   :  { %v524_v14 = vpop.f32.mrb[7].mxu1 }
 0x103   :  { %753 = vst [vmem:[%s1179_s3] sm:$0xff] %v752_v7   ;;  %v514_v12 = vadd.f32 %v894_v54, %v417_v8  ;;  %v420_v13 = vadd.f32 %v823_v9, %v1131_v50 }
 0x105   :  { %v517_v15 = vadd.f32 %v895_v58, %v420_v13  ;;  %v824_v16 = vpop.f32.mrb[8].mxu0  ;;  %v570_v18 = vmax.f32 %v514_v12, 0.0 }
 0x106   :  { %v825_v17 = vpop.f32.mrb[9].mxu0 }
 0x107   :  { %v571_v19 = vmax.f32 %v517_v15, 0.0  ;;  %v826_v20 = vadd.f32 %v825_v17, %v824_v16  ;;  %v827_v21 = vpop.f32.mrb[10].mxu0  ;;  %v902_v23 = vpop.f32.mrb[8].mxu1 }
 0x108   :  { %v828_v22 = vpop.f32.mrb[11].mxu0  ;;  %v537_v27 = vpop.f32.mrb[9].mxu1 }
 0x109   :  { %v757_v24 = vpack.c.bf16 %v571_v19, %v570_v18  ;;  %v829_v25 = vadd.f32 %v828_v22, %v827_v21  ;;  %v425_v26 = vadd.f32 %v826_v20, %v1131_v50  ;;  %v903_v28 = vpop.f32.mrb[10].mxu1 }
 0x10a   :  { %v540_v31 = vpop.f32.mrb[11].mxu1 }
 0x10b   :  { %789 = vst [vmem:[%s1179_s3 + $0x8] sm:$0xff] %v757_v24   ;;  %v522_v29 = vadd.f32 %v521_v10, %v425_v26  ;;  %v428_v30 = vadd.f32 %v829_v25, %v1131_v50 }
 0x10d   :  { %v525_v32 = vadd.f32 %v524_v14, %v428_v30  ;;  %v830_v33 = vpop.f32.mrb[12].mxu0  ;;  %v572_v35 = vmax.f32 %v522_v29, 0.0 }
 0x10e   :  { %v831_v34 = vpop.f32.mrb[13].mxu0 }
 0x10f   :  { %v573_v36 = vmax.f32 %v525_v32, 0.0  ;;  %v832_v37 = vadd.f32 %v831_v34, %v830_v33  ;;  %v833_v38 = vpop.f32.mrb[14].mxu0  ;;  %v1145_v40 = vpop.f32.mrb[12].mxu1 }
 0x110   :  { %v834_v39 = vpop.f32.mrb[15].mxu0  ;;  %v553_v44 = vpop.f32.mrb[13].mxu1 }
 0x111   :  { %v762_v41 = vpack.c.bf16 %v573_v36, %v572_v35  ;;  %v433_v42 = vadd.f32 %v832_v37, %v1131_v50  ;;  %v835_v43 = vadd.f32 %v834_v39, %v833_v38  ;;  %v907_v45 = vpop.f32.mrb[14].mxu1 }
 0x112   :  { %v556_v48 = vpop.f32.mrb[15].mxu1 }
 0x113   :  { %790 = vst [vmem:[%s1179_s3 + $0x10] sm:$0xff] %v762_v41   ;;  %v530_v46 = vadd.f32 %v898_v6, %v433_v42  ;;  %v436_v47 = vadd.f32 %v835_v43, %v1131_v50 }
 0x115   :  { %v533_v49 = vadd.f32 %v899_v11, %v436_v47  ;;  %v836_v51 = vpop.f32.mrb[16].mxu0  ;;  %v574_v53 = vmax.f32 %v530_v46, 0.0 }
 0x116   :  { %v837_v52 = vpop.f32.mrb[17].mxu0 }
 0x117   :  { %v575_v54 = vmax.f32 %v533_v49, 0.0  ;;  %v838_v55 = vadd.f32 %v837_v52, %v836_v51  ;;  %v839_v56 = vpop.f32.mrb[18].mxu0 }
 0x118   :  { %v840_v57 = vpop.f32.mrb[19].mxu0 }
 0x119   :  { %v767_v58 = vpack.c.bf16 %v575_v54, %v574_v53  ;;  %v841_v59 = vadd.f32 %v840_v57, %v839_v56  ;;  %v441_v60 = vadd.f32 %v838_v55, %v1131_v50 }
 0x11b   :  { %791 = vst [vmem:[%s1179_s3 + $0x18] sm:$0xff] %v767_v58   ;;  %v538_v61 = vadd.f32 %v537_v27, %v441_v60  ;;  %v444_v62 = vadd.f32 %v841_v59, %v1131_v50 }
 0x11d   :  { %v541_v63 = vadd.f32 %v540_v31, %v444_v62  ;;  %v842_v0 = vpop.f32.mrb[20].mxu0  ;;  %v576_v2 = vmax.f32 %v538_v61, 0.0 }
 0x11e   :  { %v843_v1 = vpop.f32.mrb[21].mxu0 }
 0x11f   :  { %v577_v3 = vmax.f32 %v541_v63, 0.0  ;;  %v844_v4 = vadd.f32 %v843_v1, %v842_v0  ;;  %v845_v5 = vpop.f32.mrb[22].mxu0 }
 0x120   :  { %v846_v6 = vpop.f32.mrb[23].mxu0 }
 0x121   :  { %v772_v7 = vpack.c.bf16 %v577_v3, %v576_v2  ;;  %v449_v8 = vadd.f32 %v844_v4, %v1131_v50  ;;  %v847_v9 = vadd.f32 %v846_v6, %v845_v5 }
 0x123   :  { %792 = vst [vmem:[%s1179_s3 + $0x20] sm:$0xff] %v772_v7   ;;  %v546_v10 = vadd.f32 %v902_v23, %v449_v8  ;;  %v452_v11 = vadd.f32 %v847_v9, %v1131_v50 }
 0x125   :  { %v549_v12 = vadd.f32 %v903_v28, %v452_v11  ;;  %v848_v13 = vpop.f32.mrb[24].mxu0  ;;  %v578_v15 = vmax.f32 %v546_v10, 0.0 }
 0x126   :  { %v849_v14 = vpop.f32.mrb[25].mxu0 }
 0x127   :  { %v579_v16 = vmax.f32 %v549_v12, 0.0  ;;  %v850_v17 = vadd.f32 %v849_v14, %v848_v13  ;;  %v851_v18 = vpop.f32.mrb[26].mxu0 }
 0x128   :  { %v852_v19 = vpop.f32.mrb[27].mxu0 }
 0x129   :  { %v777_v20 = vpack.c.bf16 %v579_v16, %v578_v15  ;;  %v853_v21 = vadd.f32 %v852_v19, %v851_v18  ;;  %v457_v22 = vadd.f32 %v850_v17, %v1131_v50 }
 0x12b   :  { %793 = vst [vmem:[%s1179_s3 + $0x28] sm:$0xff] %v777_v20   ;;  %v554_v24 = vadd.f32 %v553_v44, %v457_v22  ;;  %v460_v23 = vadd.f32 %v853_v21, %v1131_v50 }
 0x12d   :  { %v557_v25 = vadd.f32 %v556_v48, %v460_v23  ;;  %v854_v26 = vpop.f32.mrb[28].mxu0  ;;  %v580_v28 = vmax.f32 %v554_v24, 0.0 }
 0x12e   :  { %v855_v27 = vpop.f32.mrb[29].mxu0 }
 0x12f   :  { %v581_v29 = vmax.f32 %v557_v25, 0.0  ;;  %v856_v30 = vadd.f32 %v855_v27, %v854_v26  ;;  %v857_v31 = vpop.f32.mrb[30].mxu0 }
 0x130   :  { %v858_v32 = vpop.f32.mrb[31].mxu0 }
 0x131   :  { %v782_v33 = vpack.c.bf16 %v581_v29, %v580_v28  ;;  %v465_v34 = vadd.f32 %v856_v30, %v1131_v50  ;;  %v859_v35 = vadd.f32 %v858_v32, %v857_v31 }
 0x133   :  { %794 = vst [vmem:[%s1179_s3 + $0x30] sm:$0xff] %v782_v33   ;;  %v562_v36 = vadd.f32 %v1145_v40, %v465_v34  ;;  %v468_v37 = vadd.f32 %v859_v35, %v1131_v50 }
 0x135   :  { %v565_v38 = vadd.f32 %v907_v45, %v468_v37  ;;  %v582_v39 = vmax.f32 %v562_v36, 0.0 }
 0x137   :  { %v583_v41 = vmax.f32 %v565_v38, 0.0 }
 0x139   :  { %v787_v42 = vpack.c.bf16 %v583_v41, %v582_v39 }
 0x13b   :  { %795 = vst [vmem:[%s1179_s3 + $0x38] sm:$0xff] %v787_v42  }

// kernel: _lambda_.9
= control target key start
LH: loop header
LB: loop body
LE: loop exit
PB: predicated region body
PF: predicated region fallthrough
CT: control target
= control target key end

     0   :  { %s970_s1 = inlined_call_operand.vmem [shape: bf16[640,128], index: 1, kind: input, shape index: {}]   ;;  %s971_s0 = inlined_call_operand.vmem [shape: bf16[32,640], index: 0, kind: input, shape index: {}]   ;;  %s972_s2 = inlined_call_operand.vmem [shape: f32[1,128], index: 2, kind: input, shape index: {}]   ;;  %s973_s3 = inlined_call_operand.vmem [shape: bf16[32,128], index: 3, kind: output, shape index: {}]  }
   0x1   :  { %v737_v0 = vld [vmem:[%s970_s1 + $0x40] sm:$0xff]   ;;  %v741_v4 = vld [vmem:[%s970_s1 + $0x48] sm:$0xff]   ;;  %v745_v8 = vld [vmem:[%s970_s1 + $0x50] sm:$0xff]  }
   0x2   :  { %v738_v1 = vld [vmem:[%s970_s1] sm:$0xff]   ;;  %651 = vmatprep.subr.bf16.mxu0 %v737_v0  ;;  %v742_v5 = vld [vmem:[%s970_s1 + $0x8] sm:$0xff]   ;;  %v746_v9 = vld [vmem:[%s970_s1 + $0x10] sm:$0xff]  }
   0x3   :  { %v739_v2 = vld [vmem:[%s970_s1 + $0xc0] sm:$0xff]   ;;  %652 = vmatpush3.bf16.msra.mxu0 %v738_v1  ;;  %v743_v6 = vld [vmem:[%s970_s1 + $0xc8] sm:$0xff]   ;;  %v747_v10 = vld [vmem:[%s970_s1 + $0xd0] sm:$0xff]  }
   0x4   :  { %v740_v3 = vld [vmem:[%s970_s1 + $0x80] sm:$0xff]   ;;  %679 = vmatprep.subr.bf16.mxu1 %v739_v2  ;;  %653 = vmatprep.subr.bf16.mxu0 %v741_v4  ;;  %v744_v7 = vld [vmem:[%s970_s1 + $0x88] sm:$0xff]   ;;  %v748_v11 = vld [vmem:[%s970_s1 + $0x90] sm:$0xff]  }
   0x5   :  { %680 = vmatpush3.bf16.msra.mxu1 %v740_v3  ;;  %v749_v12 = vld [vmem:[%s970_s1 + $0x58] sm:$0xff]   ;;  %v753_v16 = vld [vmem:[%s970_s1 + $0x60] sm:$0xff]   ;;  %v757_v20 = vld [vmem:[%s970_s1 + $0x68] sm:$0xff]  }
   0x6   :  { %681 = vmatprep.subr.bf16.mxu1 %v743_v6  ;;  %v750_v13 = vld [vmem:[%s970_s1 + $0x18] sm:$0xff]   ;;  %v754_v17 = vld [vmem:[%s970_s1 + $0x20] sm:$0xff]   ;;  %v758_v21 = vld [vmem:[%s970_s1 + $0x28] sm:$0xff]  }
   0x7   :  { %654 = vmatpush3.bf16.msra.mxu0 %v742_v5  ;;  %v751_v14 = vld [vmem:[%s970_s1 + $0xd8] sm:$0xff]   ;;  %v755_v18 = vld [vmem:[%s970_s1 + $0xe0] sm:$0xff]   ;;  %v759_v22 = vld [vmem:[%s970_s1 + $0xe8] sm:$0xff]  }
   0x8   :  { %655 = vmatprep.subr.bf16.mxu0 %v745_v8  ;;  %v752_v15 = vld [vmem:[%s970_s1 + $0x98] sm:$0xff]   ;;  %v756_v19 = vld [vmem:[%s970_s1 + $0xa0] sm:$0xff]   ;;  %v760_v23 = vld [vmem:[%s970_s1 + $0xa8] sm:$0xff]  }
   0x9   :  { %682 = vmatpush3.bf16.msra.mxu1 %v744_v7  ;;  %v761_v24 = vld [vmem:[%s970_s1 + $0x70] sm:$0xff]   ;;  %v765_v28 = vld [vmem:[%s970_s1 + $0x78] sm:$0xff]   ;;  %v772_v34 = vld [vmem:[%s970_s1 + $0x100] sm:$0xff]  }
   0xa   :  { %683 = vmatprep.subr.bf16.mxu1 %v747_v10  ;;  %v762_v25 = vld [vmem:[%s970_s1 + $0x30] sm:$0xff]   ;;  %v766_v29 = vld [vmem:[%s970_s1 + $0x38] sm:$0xff]   ;;  %v775_v36 = vld [vmem:[%s971_s0 + $0xc] ss:$20 sps:$4 sm:$0xff]  }
   0xb   :  { %656 = vmatpush3.bf16.msra.mxu0 %v746_v9  ;;  %v763_v26 = vld [vmem:[%s970_s1 + $0xf0] sm:$0xff]   ;;  %v767_v30 = vld [vmem:[%s970_s1 + $0xf8] sm:$0xff]   ;;  %v776_v37 = vld [vmem:[%s970_s1 + $0x108] sm:$0xff]   ;;  %487 = vmatprep.mubr.bf16.mxu1 %v775_v36 }
   0xc   :  { %657 = vmatprep.subr.bf16.mxu0 %v749_v12  ;;  %v764_v27 = vld [vmem:[%s970_s1 + $0xb0] sm:$0xff]   ;;  %v770_v32 = vld [vmem:[%s971_s0 + $0x4] ss:$20 sps:$4 sm:$0xff]   ;;  %v773_v35 = vld [vmem:[%s971_s0 + $0x8] ss:$20 sps:$4 sm:$0xff]  }
   0xd   :  { %684 = vmatpush3.bf16.msra.mxu1 %v748_v11  ;;  %v768_v31 = vld [vmem:[%s971_s0] ss:$20 sps:$4 sm:$0xff]   ;;  %v771_v33 = vld [vmem:[%s970_s1 + $0xb8] sm:$0xff]   ;;  %438 = vmatprep.mubr.bf16.mxu0 %v770_v32  ;;  %v786_v43 = vld [vmem:[%s971_s0 + $0x30] ss:$20 sps:$4 sm:$0xff]  }
   0xe   :  { %685 = vmatprep.subr.bf16.mxu1 %v751_v14  ;;  %v777_v38 = vld [vmem:[%s970_s1 + $0x110] sm:$0xff]   ;;  %v780_v39 = vld [vmem:[%s971_s0 + $0x2c] ss:$20 sps:$4 sm:$0xff]   ;;  %v778_v40 = vld [vmem:[%s970_s1 + $0x118] sm:$0xff]  }
   0xf   :  { %658 = vmatpush3.bf16.msra.mxu0 %v750_v13  ;;  %v783_v41 = vld [vmem:[%s971_s0 + $0x28] ss:$20 sps:$4 sm:$0xff]   ;;  %v779_v44 = vld [vmem:[%s970_s1 + $0x120] sm:$0xff]   ;;  %v787_v47 = vld [vmem:[%s970_s1 + $0x130] sm:$0xff]  }
  0x10   :  { %659 = vmatprep.subr.bf16.mxu0 %v753_v16  ;;  %v784_v42 = vld [vmem:[%s971_s0 + $0x34] ss:$20 sps:$4 sm:$0xff]   ;;  %v789_v45 = vld [vmem:[%s971_s0 + $0x10] ss:$20 sps:$4 sm:$0xff]   ;;  %v788_v48 = vld [vmem:[%s970_s1 + $0x138] sm:$0xff]  }
  0x11   :  { %686 = vmatpush3.bf16.msra.mxu1 %v752_v15  ;;  %v782_v46 = vld [vmem:[%s970_s1 + $0x128] sm:$0xff]   ;;  %v581_v51 = vld [vmem:[%s972_s2] ss:$0 sm:$0xff] }
  0x12   :  { %687 = vmatprep.subr.bf16.mxu1 %v755_v18  ;;  %v790_v49 = vld [vmem:[%s971_s0 + $0x38] ss:$20 sps:$4 sm:$0xff]  }
  0x13   :  { %660 = vmatpush3.bf16.msra.mxu0 %v754_v17 }
  0x14   :  { %661 = vmatprep.subr.bf16.mxu0 %v757_v20 }
  0x15   :  { %688 = vmatpush3.bf16.msra.mxu1 %v756_v19 }
  0x16   :  { %689 = vmatprep.subr.bf16.mxu1 %v759_v22 }
  0x17   :  { %662 = vmatpush3.bf16.msra.mxu0 %v758_v21 }
  0x18   :  { %663 = vmatprep.subr.bf16.mxu0 %v761_v24 }
  0x19   :  { %690 = vmatpush3.bf16.msra.mxu1 %v760_v23 }
  0x1a   :  { %691 = vmatprep.subr.bf16.mxu1 %v763_v26 }
  0x1b   :  { %664 = vmatpush3.bf16.msra.mxu0 %v762_v25 }
  0x1c   :  { %665 = vmatprep.subr.bf16.mxu0 %v765_v28 }
  0x1d   :  { %692 = vmatpush3.bf16.msra.mxu1 %v764_v27 }
  0x1e   :  { %693 = vmatprep.subr.bf16.mxu1 %v767_v30 }
  0x1f   :  { %666 = vmatpush3.bf16.msra.mxu0 %v766_v29 }
  0x20   :  { %717 = vmatprep.subr.bf16.mxu0 %v772_v34 }
  0x21   :  { %694 = vmatpush3.bf16.msra.mxu1 %v771_v33 }
  0x22   :  { %439 = vmatmul.mubr.bf16.vlgmr.msra.gmra.mrb[0].mxu0 %v768_v31 }
  0x23   :  { %718 = vmatpush3.bf16.msra.mxu0 %v772_v34  ;;  %446 = vmatprep.mubr.bf16.mxu0 %v780_v39 }
  0x24   :  { %488 = vmatmul.mubr.bf16.vlgmr.msra.gmra.mrb[0].mxu1 %v773_v35  ;;  %719 = vmatprep.subr.bf16.mxu0 %v776_v37 }
  0x25   :  { %495 = vmatprep.mubr.bf16.mxu1 %v784_v42 }
  0x27   :  { %720 = vmatpush3.bf16.msra.mxu0 %v776_v37 }
  0x28   :  { %721 = vmatprep.subr.bf16.mxu0 %v777_v38 }
  0x2a   :  { %447 = vmatmul.mubr.bf16.gmra.mrb[4].mxu0 %v783_v41 }
  0x2b   :  { %722 = vmatpush3.bf16.msra.mxu0 %v777_v38  ;;  %733 = vmatprep.mubr.bf16.mxu0 %v789_v45 }
  0x2c   :  { %723 = vmatprep.subr.bf16.mxu0 %v778_v40  ;;  %496 = vmatmul.mubr.bf16.gmra.mrb[4].mxu1 %v786_v43 }
  0x2f   :  { %724 = vmatpush3.bf16.msra.mxu0 %v778_v40 }
  0x30   :  { %725 = vmatprep.subr.bf16.mxu0 %v779_v44 }
  0x33   :  { %726 = vmatpush3.bf16.msra.mxu0 %v779_v44 }
  0x34   :  { %727 = vmatprep.subr.bf16.mxu0 %v782_v46 }
  0x37   :  { %728 = vmatpush3.bf16.msra.mxu0 %v782_v46 }
  0x38   :  { %729 = vmatprep.subr.bf16.mxu0 %v787_v47 }
  0x3b   :  { %730 = vmatpush3.bf16.msra.mxu0 %v787_v47 }
  0x3c   :  { %731 = vmatprep.subr.bf16.mxu0 %v788_v48 }
  0x3f   :  { %732 = vmatpush3.bf16.msra.mxu0 %v788_v48 }
  0x42   :  { %734 = vmatmul.mubr.bf16.vlgmr.msra.gmra.mrb[8].mxu0 %v790_v49 }
  0xf5   :  { %v667_v50 = vpop.f32.mrb[0].mxu0 }
  0xf6   :  { %v668_v52 = vpop.f32.mrb[1].mxu0 }
  0xf7   :  { %v669_v53 = vadd.f32 %v668_v52, %v667_v50  ;;  %v670_v54 = vpop.f32.mrb[2].mxu0  ;;  %v695_v55 = vpop.f32.mrb[0].mxu1 }
  0xf8   :  { %v671_v56 = vpop.f32.mrb[3].mxu0  ;;  %v696_v59 = vpop.f32.mrb[1].mxu1 }
  0xf9   :  { %v441_v57 = vadd.f32 %v669_v53, %v581_v51  ;;  %v672_v58 = vadd.f32 %v671_v56, %v670_v54  ;;  %v697_v60 = vadd.f32 %v696_v59, %v695_v55  ;;  %v698_v61 = vpop.f32.mrb[2].mxu1 }
  0xfa   :  { %v699_v63 = vpop.f32.mrb[3].mxu1 }
  0xfb   :  { %v444_v62 = vadd.f32 %v672_v58, %v581_v51  ;;  %v700_v0 = vadd.f32 %v699_v63, %v698_v61  ;;  %v490_v1 = vadd.f32 %v697_v60, %v441_v57 }
  0xfd   :  { %v673_v2 = vpop.f32.mrb[4].mxu0  ;;  %v493_v4 = vadd.f32 %v700_v0, %v444_v62 }
  0xfe   :  { %v674_v3 = vpop.f32.mrb[5].mxu0 }
  0xff   :  { %v675_v5 = vadd.f32 %v674_v3, %v673_v2  ;;  %v676_v6 = vpop.f32.mrb[6].mxu0  ;;  %v701_v7 = vpop.f32.mrb[4].mxu1 }
 0x100   :  { %v677_v8 = vpop.f32.mrb[7].mxu0  ;;  %v702_v11 = vpop.f32.mrb[5].mxu1 }
 0x101   :  { %v449_v9 = vadd.f32 %v675_v5, %v581_v51  ;;  %v678_v10 = vadd.f32 %v677_v8, %v676_v6  ;;  %v703_v12 = vadd.f32 %v702_v11, %v701_v7  ;;  %v704_v13 = vpop.f32.mrb[6].mxu1 }
 0x102   :  { %v705_v15 = vpop.f32.mrb[7].mxu1 }
 0x103   :  { %v452_v14 = vadd.f32 %v678_v10, %v581_v51  ;;  %v706_v16 = vadd.f32 %v705_v15, %v704_v13  ;;  %v498_v17 = vadd.f32 %v703_v12, %v449_v9 }
 0x105   :  { %v501_v18 = vadd.f32 %v706_v16, %v452_v14 }
 0x115   :  { %v735_v19 = vpop.f32.mrb[8].mxu0 }
 0x116   :  { %v547_v20 = vadd.f32 %v735_v19, %v498_v17  ;;  %v538_v21 = vpop.f32.mrb[9].mxu0 }
 0x117   :  { %v539_v22 = vadd.f32 %v538_v21, %v490_v1  ;;  %v736_v23 = vpop.f32.mrb[10].mxu0 }
 0x118   :  { %v550_v24 = vadd.f32 %v736_v23, %v501_v18  ;;  %v541_v25 = vpop.f32.mrb[11].mxu0  ;;  %v555_v27 = vmax.f32 %v547_v20, 0.0 }
 0x119   :  { %v542_v26 = vadd.f32 %v541_v25, %v493_v4  ;;  %v553_v29 = vmax.f32 %v539_v22, 0.0 }
 0x11a   :  { %v556_v28 = vmax.f32 %v550_v24, 0.0 }
 0x11b   :  { %v554_v30 = vmax.f32 %v542_v26, 0.0 }
 0x11c   :  { %v648_v31 = vpack.c.bf16 %v556_v28, %v555_v27 }
 0x11d   :  { %v643_v32 = vpack.c.bf16 %v554_v30, %v553_v29 }
 0x11e   :  { %650 = vst [vmem:[%s973_s3 + $0x8] sm:$0xff] %v648_v31  }
 0x11f   :  { %644 = vst [vmem:[%s973_s3] sm:$0xff] %v643_v32  }

// kernel: _lambda_.10
= control target key start
LH: loop header
LB: loop body
LE: loop exit
PB: predicated region body
PF: predicated region fallthrough
CT: control target
= control target key end

     0   :  { %13 = vsyncpa [#allocation3], 0  ;;  %s2408_s0 = inlined_call_operand.vmem [shape: bf16[32,1152], index: 0, kind: input, shape index: {}]   ;;  %s2409_s1 = inlined_call_operand.vmem [shape: bf16[1152,128], index: 1, kind: input, shape index: {}]   ;;  %s2410_s2 = inlined_call_operand.vmem [shape: f32[1,128], index: 2, kind: input, shape index: {}, may-alias: {2,4}]   ;;  %s2411_s3 = inlined_call_operand.vmem [shape: bf16[128,128], index: 3, kind: input, shape index: {}]   ;;  %s2412_s4 = inlined_call_operand.vmem [shape: f32[1,128], index: 4, kind: input, shape index: {}, may-alias: {2,4}]   ;;  %s2413_s5 = inlined_call_operand.vmem [shape: f32[16,128], index: 5, kind: input, shape index: {}]   ;;  %s2414_s6 = inlined_call_operand.hbm [shape: f32[32,128], index: 6, kind: output, shape index: {0}]   ;;  %s2415_s7 = inlined_call_operand.vmem [shape: f32[32,128], index: 7, kind: output, shape index: {1}]  }
   0x1   :  { %15 = vsyncpa [#allocation3 + $0x1], 0  ;;  %s1993_s24 = smov 0   ;;  %s1995_s25 = smov 0  }
   0x2   :  { %s1997_s26 = smov 0   ;;  %s1999_s27 = smov 0  }
   0x3 LB: > { %s2014_s28 = sadd.s32 4294967295, %s1943_s27   ;;  %s1477_s29 = sadd.s32 4294967294, %s1943_s27   ;;  %s1943_s27 = sphi %s1999_s27, %s2421_s27   ;;  %s1939_s26 = sphi %s1997_s26, %s2420_s26   ;;  %s1935_s25 = sphi %s1995_s25, %s2419_s25   ;;  %s1931_s24 = sphi %s1993_s24, %s2418_s24  }
   0x4   : > { %s2018_s30 = sadd.s32 1, %s1943_s27   ;;  %s159_s8 = sadd.s32 1, %s1939_s26 }
   0x5   : > { %s156_s9 = ssub.s32 %s1943_s27, %s2018_s30  ;;  %p169_p0 = scmp.ne.s32.totalorder %s1939_s26, %s1935_s25 }
   0x6   : > { %p157_p1 = scmp.eq.s32.totalorder %s156_s9, 0  ;;  %p170_p2 = scmp.eq.s32.totalorder %s2014_s28, 1 }
   0x7   : > { %p175_p3 = scmp.ne.s32.totalorder %s1935_s25, %s1931_s24  ;;  %p176_p4 = scmp.eq.s32.totalorder %s1477_s29, 1 }
   0x8   : > { %s2029_s10 = scalar_select %p157_p1, %s1939_s26, %s159_s8  }
   0x9   : > { %p2031_p5 = por %p170_p2, %p169_p0  ;;  %p2035_p6 = por %p176_p4, %p175_p3 }
   0xa   : > { %p1480_p7 = scmp.ge.s32.totalorder %s1943_s27, 1  ;;  %p245_p8 = scmp.lt.s32.totalorder %s1943_s27, 3 }
   0xc   : > { %p246_p9 = pnand %p1480_p7, %p245_p8 }
   0xd   : > { %v1776_v0 = vld [vmem:[%s2409_s1 + $0x40] sm:$0xff] (!%p246_p9)   ;;  %v1780_v4 = vld [vmem:[%s2409_s1 + $0x48] sm:$0xff] (!%p246_p9)   ;;  %v1784_v8 = vld [vmem:[%s2409_s1 + $0x50] sm:$0xff] (!%p246_p9)   ;;  %s1482_s13 = sshll.u32 (!%p246_p9), %s2014_s28, 1  ;;  %vm1946_vm0 = vmmov (!%p246_p9), 0   ;;  %s1947_s15 = smov (!%p246_p9), 32  }
   0xe   : > { %249 = sbr.rel (%p246_p9) target bundleno = 817 (0x331), region = 44  ;;  %v1777_v1 = vld [vmem:[%s2409_s1] sm:$0xff] (!%p246_p9)   ;;  %1583 = vmatprep.subr.bf16.mxu0 (!%p246_p9), %v1776_v0  ;;  %v1781_v5 = vld [vmem:[%s2409_s1 + $0x8] sm:$0xff] (!%p246_p9)   ;;  %v1785_v9 = vld [vmem:[%s2409_s1 + $0x10] sm:$0xff] (!%p246_p9)   ;;  %p284_p10 = scmp.lt.s32.totalorder (!%p246_p9), %s1482_s13, 3 }
   0xf   : > { %v1778_v2 = vld [vmem:[%s2409_s1 + $0xc0] sm:$0xff] (!%p246_p9)   ;;  %1584 = vmatpush3.bf16.msra.mxu0 (!%p246_p9), %v1777_v1  ;;  %v1782_v6 = vld [vmem:[%s2409_s1 + $0xc8] sm:$0xff] (!%p246_p9)   ;;  %v1786_v10 = vld [vmem:[%s2409_s1 + $0xd0] sm:$0xff] (!%p246_p9)   ;;  %s1948_s22 = smov (!%p246_p9), 96   ;;  %s273_s29 = sand.u32 (!%p246_p9), 1, %s1935_s25  }
  0x10   : > { %v1779_v3 = vld [vmem:[%s2409_s1 + $0x80] sm:$0xff] (!%p246_p9)   ;;  %1605 = vmatprep.subr.bf16.mxu1 (!%p246_p9), %v1778_v2  ;;  %1585 = vmatprep.subr.bf16.mxu0 (!%p246_p9), %v1780_v4  ;;  %v1783_v7 = vld [vmem:[%s2409_s1 + $0x88] sm:$0xff] (!%p246_p9)   ;;  %v1787_v11 = vld [vmem:[%s2409_s1 + $0x90] sm:$0xff] (!%p246_p9)   ;;  %s1481_s8 = sshll.u32 (!%p246_p9), %s273_s29, 4  ;;  %s1949_s16 = smov (!%p246_p9), 112  }
  0x11   : > { %1606 = vmatpush3.bf16.msra.mxu1 (!%p246_p9), %v1779_v3  ;;  %v1788_v12 = vld [vmem:[%s2409_s1 + $0x58] sm:$0xff] (!%p246_p9)   ;;  %v1792_v16 = vld [vmem:[%s2409_s1 + $0x60] sm:$0xff] (!%p246_p9)   ;;  %v1796_v20 = vld [vmem:[%s2409_s1 + $0x68] sm:$0xff] (!%p246_p9)   ;;  %s2333_s14 = scalar_lea.vmem (!%p246_p9), [#allocation2], %s1481_s8  ;;  %s1582_s17 = sshll.u32 (!%p246_p9), %s2014_s28, 8 }
  0x12   : > { %1607 = vmatprep.subr.bf16.mxu1 (!%p246_p9), %v1782_v6  ;;  %v1789_v13 = vld [vmem:[%s2409_s1 + $0x18] sm:$0xff] (!%p246_p9)   ;;  %v1793_v17 = vld [vmem:[%s2409_s1 + $0x20] sm:$0xff] (!%p246_p9)   ;;  %v1797_v21 = vld [vmem:[%s2409_s1 + $0x28] sm:$0xff] (!%p246_p9)   ;;  %v1945_v6 = vmov (!%p246_p9), 0.0   ;;  %s2353_s20 = scalar_lea.hbm (!%p246_p9), %s2414_s6, %s1582_s17  ;;  %s2359_s28 = scalar_lea.sflag (!%p246_p9), [#allocation3], %s273_s29 }
  0x13   : > { %1586 = vmatpush3.bf16.msra.mxu0 (!%p246_p9), %v1781_v5  ;;  %v1790_v14 = vld [vmem:[%s2409_s1 + $0xd8] sm:$0xff] (!%p246_p9)   ;;  %v1794_v18 = vld [vmem:[%s2409_s1 + $0xe0] sm:$0xff] (!%p246_p9)   ;;  %v1798_v22 = vld [vmem:[%s2409_s1 + $0xe8] sm:$0xff] (!%p246_p9)   ;;  %s1950_s8 = smov (!%p246_p9), [#allocation2]  }
  0x14   : > { %1587 = vmatprep.subr.bf16.mxu0 (!%p246_p9), %v1784_v8  ;;  %v1791_v15 = vld [vmem:[%s2409_s1 + $0x98] sm:$0xff] (!%p246_p9)   ;;  %v1795_v19 = vld [vmem:[%s2409_s1 + $0xa0] sm:$0xff] (!%p246_p9)   ;;  %v1799_v23 = vld [vmem:[%s2409_s1 + $0xa8] sm:$0xff] (!%p246_p9)   ;;  %s1885_s9 = sshll.u32 (!%p246_p9), %s1950_s8, 4  ;;  %s1886_s9 = int_to_ptr.vmem [resolvable:$false] %s1885_s9 }
  0x15   : > { %1608 = vmatpush3.bf16.msra.mxu1 %v1783_v7  ;;  %s2423_s13 = smov (!%p284_p10, %s1482_s13), 3  ;;  %v1800_v24 = vld [vmem:[%s2409_s1 + $0x70] sm:$0xff]   ;;  %v1804_v28 = vld [vmem:[%s2409_s1 + $0x78] sm:$0xff]   ;;  %v1811_v34 = vld [vmem:[%s2409_s1 + $0x140] sm:$0xff]  }
  0x16   : > { %1609 = vmatprep.subr.bf16.mxu1 %v1786_v10  ;;  %s1729_s23 = smul.u32 36, %s2423_s13  ;;  %v1801_v25 = vld [vmem:[%s2409_s1 + $0x30] sm:$0xff]   ;;  %v1805_v29 = vld [vmem:[%s2409_s1 + $0x38] sm:$0xff]   ;;  %v1815_v37 = vld [vmem:[%s2409_s1 + $0x100] sm:$0xff]  }
  0x17   : > { %1588 = vmatpush3.bf16.msra.mxu0 %v1785_v9  ;;  %v1802_v26 = vld [vmem:[%s2409_s1 + $0xf0] sm:$0xff]   ;;  %v1806_v30 = vld [vmem:[%s2409_s1 + $0xf8] sm:$0xff]   ;;  %v1816_v38 = vld [vmem:[%s2409_s1 + $0x1c0] sm:$0xff]  }
  0x18   : > { %1589 = vmatprep.subr.bf16.mxu0 %v1788_v12  ;;  %v1803_v27 = vld [vmem:[%s2409_s1 + $0xb0] sm:$0xff]   ;;  %s2135_s21 = scalar_lea.vmem %s2408_s0, %s1729_s23  ;;  %v1810_v33 = vld [vmem:[%s2409_s1 + $0xb8] sm:$0xff]   ;;  %v1817_v39 = vld [vmem:[%s2409_s1 + $0x180] sm:$0xff]   ;;  %s1887_s23 = scalar_lea.vmem %s1886_s9, 512 }
  0x19   : > { %1610 = vmatpush3.bf16.msra.mxu1 %v1787_v11  ;;  %v1807_v31 = vld [vmem:[%s2135_s21] ss:$36 sps:$4 sm:$0xff]   ;;  %v1812_v35 = vld [vmem:[%s2135_s21 + $0x8] ss:$36 sps:$4 sm:$0xff]   ;;  %v1822_v44 = vld [vmem:[%s2409_s1 + $0x150] sm:$0xff]  }
  0x1a   : > { %1611 = vmatprep.subr.bf16.mxu1 %v1790_v14  ;;  %v1809_v32 = vld [vmem:[%s2135_s21 + $0x4] ss:$36 sps:$4 sm:$0xff]   ;;  %v1814_v36 = vld [vmem:[%s2135_s21 + $0xc] ss:$36 sps:$4 sm:$0xff]   ;;  %v1826_v48 = vld [vmem:[%s2409_s1 + $0x158] sm:$0xff]  }
  0x1b   : > { %1590 = vmatpush3.bf16.msra.mxu0 %v1789_v13  ;;  %969 = vmatprep.mubr.bf16.mxu0 %v1809_v32  ;;  %v1818_v40 = vld [vmem:[%s2409_s1 + $0x148] sm:$0xff]   ;;  %v1823_v45 = vld [vmem:[%s2409_s1 + $0x110] sm:$0xff]   ;;  %v1827_v49 = vld [vmem:[%s2409_s1 + $0x118] sm:$0xff]  }
  0x1c   : > { %1591 = vmatprep.subr.bf16.mxu0 %v1792_v16  ;;  %1010 = vmatprep.mubr.bf16.mxu1 %v1814_v36  ;;  %v1819_v41 = vld [vmem:[%s2409_s1 + $0x108] sm:$0xff]   ;;  %v1824_v46 = vld [vmem:[%s2409_s1 + $0x1d0] sm:$0xff]   ;;  %v1828_v50 = vld [vmem:[%s2409_s1 + $0x1d8] sm:$0xff]  }
  0x1d   : > { %1612 = vmatpush3.bf16.msra.mxu1 %v1791_v15  ;;  %v1820_v42 = vld [vmem:[%s2409_s1 + $0x1c8] sm:$0xff]   ;;  %v1825_v47 = vld [vmem:[%s2409_s1 + $0x190] sm:$0xff]   ;;  %v1829_v51 = vld [vmem:[%s2409_s1 + $0x198] sm:$0xff]  }
  0x1e   : > { %1613 = vmatprep.subr.bf16.mxu1 %v1794_v18  ;;  %v1821_v43 = vld [vmem:[%s2409_s1 + $0x188] sm:$0xff]   ;;  %v1830_v52 = vld [vmem:[%s2409_s1 + $0x160] sm:$0xff]   ;;  %v1838_v60 = vld [vmem:[%s2409_s1 + $0x170] sm:$0xff]  }
  0x1f   : > { %1592 = vmatpush3.bf16.msra.mxu0 %v1793_v17  ;;  %v1831_v53 = vld [vmem:[%s2409_s1 + $0x120] sm:$0xff]   ;;  %v1834_v56 = vld [vmem:[%s2409_s1 + $0x168] sm:$0xff]   ;;  %v1839_v61 = vld [vmem:[%s2409_s1 + $0x130] sm:$0xff]  }
  0x20   : > { %1593 = vmatprep.subr.bf16.mxu0 %v1796_v20  ;;  %v1832_v54 = vld [vmem:[%s2409_s1 + $0x1e0] sm:$0xff]   ;;  %v1835_v57 = vld [vmem:[%s2409_s1 + $0x128] sm:$0xff]   ;;  %v1840_v62 = vld [vmem:[%s2409_s1 + $0x1f0] sm:$0xff]  }
  0x21   : > { %1614 = vmatpush3.bf16.msra.mxu1 %v1795_v19  ;;  %v1833_v55 = vld [vmem:[%s2409_s1 + $0x1a0] sm:$0xff]   ;;  %v1836_v58 = vld [vmem:[%s2409_s1 + $0x1e8] sm:$0xff]   ;;  %v1841_v63 = vld [vmem:[%s2409_s1 + $0x1b0] sm:$0xff]  }
  0x22   : > { %1615 = vmatprep.subr.bf16.mxu1 %v1798_v22  ;;  %v1837_v59 = vld [vmem:[%s2409_s1 + $0x1a8] sm:$0xff]   ;;  %v1842_v0 = vld [vmem:[%s2409_s1 + $0x178] sm:$0xff]   ;;  %v1845_v3 = vld [vmem:[%s2135_s21 + $0x10] ss:$36 sps:$4 sm:$0xff]  }
  0x23   : > { %1594 = vmatpush3.bf16.msra.mxu0 %v1797_v21  ;;  %v1843_v1 = vld [vmem:[%s2409_s1 + $0x138] sm:$0xff]   ;;  %v1852_v9 = vld [vmem:[%s2409_s1 + $0x200] sm:$0xff]   ;;  %v1853_v10 = vld [vmem:[%s2409_s1 + $0x208] sm:$0xff]  }
  0x24   : > { %1595 = vmatprep.subr.bf16.mxu0 %v1800_v24  ;;  %v1844_v2 = vld [vmem:[%s2409_s1 + $0x1f8] sm:$0xff]   ;;  %v1854_v11 = vld [vmem:[%s2409_s1 + $0x210] sm:$0xff]   ;;  %v1856_v13 = vld [vmem:[%s2409_s1 + $0x220] sm:$0xff]  }
  0x25   : > { %1616 = vmatpush3.bf16.msra.mxu1 %v1799_v23  ;;  %v1847_v4 = vld [vmem:[%s2135_s21 + $0x14] ss:$36 sps:$4 sm:$0xff]   ;;  %v1851_v8 = vld [vmem:[%s2135_s21 + $0x1c] ss:$36 sps:$4 sm:$0xff]   ;;  %v1857_v14 = vld [vmem:[%s2409_s1 + $0x228] sm:$0xff]  }
  0x26   : > { %1617 = vmatprep.subr.bf16.mxu1 %v1802_v26  ;;  %v1848_v5 = vld [vmem:[%s2409_s1 + $0x1b8] sm:$0xff]   ;;  %v1858_v15 = vld [vmem:[%s2409_s1 + $0x230] sm:$0xff]   ;;  %v1860_v17 = vld [vmem:[%s2135_s21 + $0x20] ss:$36 sps:$4 sm:$0xff]  }
  0x27   : > { %1596 = vmatpush3.bf16.msra.mxu0 %v1801_v25  ;;  %v1849_v7 = vld [vmem:[%s2135_s21 + $0x18] ss:$36 sps:$4 sm:$0xff]   ;;  %v1861_v18 = vld [vmem:[%s2411_s3] sm:$0xff]   ;;  %v1862_v20 = vld [vmem:[%s2411_s3 + $0x8] sm:$0xff]   ;;  %s1386_s21 = sshll.u32 %s2333_s14, 4  ;;  %s2355_s21 = int_to_ptr.vmem [resolvable:$true] %s1386_s21 }
  0x28   : > { %1597 = vmatprep.subr.bf16.mxu0 %v1804_v28  ;;  %v1855_v12 = vld [vmem:[%s2409_s1 + $0x218] sm:$0xff]   ;;  %v2281_v19 = vld [vmem:[%s2413_s5] sm:$0xff]  ;;  %v2291_v21 = vld [vmem:[%s2413_s5 + $0x8] sm:$0xff]  ;;  %p1888_p0 = scmp.lt.s32.totalorder %s2355_s21, %s1886_s9 }
  0x29   : > { %1618 = vmatpush3.bf16.msra.mxu1 %v1803_v27  ;;  %v1859_v16 = vld [vmem:[%s2409_s1 + $0x238] sm:$0xff]   ;;  %1265 = vrot.lane.b32.xlu0 %v2281_v19, %s1947_s15  ;;  %v1863_v22 = vld [vmem:[%s2411_s3 + $0x10] sm:$0xff]   ;;  %v1865_v24 = vld [vmem:[%s2411_s3 + $0x20] sm:$0xff]  }
  0x2a   : > { %1619 = vmatprep.subr.bf16.mxu1 %v1806_v30  ;;  %v1864_v23 = vld [vmem:[%s2411_s3 + $0x18] sm:$0xff]   ;;  %v1866_v25 = vld [vmem:[%s2411_s3 + $0x28] sm:$0xff]   ;;  %v1867_v26 = vld [vmem:[%s2411_s3 + $0x30] sm:$0xff]  }
  0x2b   : > { %1598 = vmatpush3.bf16.msra.mxu0 %v1805_v29  ;;  %v1868_v27 = vld [vmem:[%s2411_s3 + $0x38] sm:$0xff]   ;;  %v1486_v29 = vld [vmem:[%s2410_s2] ss:$0 sm:$0xff] }
  0x2c   : > { %1627 = vmatprep.subr.bf16.mxu0 %v1811_v34 }
  0x2d   : > { %1620 = vmatpush3.bf16.msra.mxu1 %v1810_v33  ;;  %1267 = vrot.lane.b32.xlu0 %v2291_v21, %s1947_s15 }
  0x2e   : > { %970 = vmatmul.mubr.bf16.vlgmr.msra.gmra.mrb[0].mxu0 %v1807_v31  ;;  %1649 = vmatprep.subr.bf16.mxu1 %v1816_v38 }
  0x2f   : > { %1628 = vmatpush3.bf16.msra.mxu0 %v1815_v37  ;;  %1051 = vmatprep.mubr.bf16.mxu0 %v1847_v4 }
  0x30   : > { %1011 = vmatmul.mubr.bf16.vlgmr.msra.gmra.mrb[0].mxu1 %v1812_v35  ;;  %1629 = vmatprep.subr.bf16.mxu0 %v1818_v40 }
  0x31   : > { %1650 = vmatpush3.bf16.msra.mxu1 %v1817_v39  ;;  %1092 = vmatprep.mubr.bf16.mxu1 %v1851_v8 }
  0x32   : > { %1651 = vmatprep.subr.bf16.mxu1 %v1820_v42 }
  0x33   : > { %1630 = vmatpush3.bf16.msra.mxu0 %v1819_v41 }
  0x34   : > { %1631 = vmatprep.subr.bf16.mxu0 %v1822_v44 }
  0x35   : > { %1652 = vmatpush3.bf16.msra.mxu1 %v1821_v43 }
  0x36   : > { %1653 = vmatprep.subr.bf16.mxu1 %v1824_v46 }
  0x37   : > { %1632 = vmatpush3.bf16.msra.mxu0 %v1823_v45 }
  0x38   : > { %1633 = vmatprep.subr.bf16.mxu0 %v1826_v48 }
  0x39   : > { %1654 = vmatpush3.bf16.msra.mxu1 %v1825_v47 }
  0x3a   : > { %1655 = vmatprep.subr.bf16.mxu1 %v1828_v50 }
  0x3b   : > { %1634 = vmatpush3.bf16.msra.mxu0 %v1827_v49 }
  0x3c   : > { %1635 = vmatprep.subr.bf16.mxu0 %v1830_v52 }
  0x3d   : > { %1656 = vmatpush3.bf16.msra.mxu1 %v1829_v51 }
  0x3e   : > { %1657 = vmatprep.subr.bf16.mxu1 %v1832_v54 }
  0x3f   : > { %1636 = vmatpush3.bf16.msra.mxu0 %v1831_v53 }
  0x40   : > { %1637 = vmatprep.subr.bf16.mxu0 %v1834_v56 }
  0x41   : > { %1658 = vmatpush3.bf16.msra.mxu1 %v1833_v55 }
  0x42   : > { %1659 = vmatprep.subr.bf16.mxu1 %v1836_v58 }
  0x43   : > { %1638 = vmatpush3.bf16.msra.mxu0 %v1835_v57 }
  0x44   : > { %1639 = vmatprep.subr.bf16.mxu0 %v1838_v60 }
  0x45   : > { %1660 = vmatpush3.bf16.msra.mxu1 %v1837_v59 }
  0x46   : > { %1661 = vmatprep.subr.bf16.mxu1 %v1840_v62 }
  0x47   : > { %1640 = vmatpush3.bf16.msra.mxu0 %v1839_v61 }
  0x48   : > { %1641 = vmatprep.subr.bf16.mxu0 %v1842_v0 }
  0x49   : > { %1662 = vmatpush3.bf16.msra.mxu1 %v1841_v63 }
  0x4a   : > { %1663 = vmatprep.subr.bf16.mxu1 %v1844_v2 }
  0x4b   : > { %1642 = vmatpush3.bf16.msra.mxu0 %v1843_v1 }
  0x4c   : > { %1689 = vmatprep.subr.bf16.mxu0 %v1945_v6 }
  0x4d   : > { %1664 = vmatpush3.bf16.msra.mxu1 %v1848_v5 }
  0x4e   : > { %1052 = vmatmul.mubr.bf16.vlgmr.msra.gmra.mrb[4].mxu0 %v1845_v3  ;;  %1709 = vmatprep.subr.bf16.mxu1 %v1945_v6 }
  0x4f   : > { %1705 = vmatprep.mubr.msk.bf16.mxu0 %vm1946_vm0, %v1945_v6  ;;  %1690 = vmatpush3.bf16.msra.mxu0 %v1852_v9 }
  0x50   : > { %1093 = vmatmul.mubr.bf16.vlgmr.msra.gmra.mrb[4].mxu1 %v1849_v7  ;;  %1691 = vmatprep.subr.bf16.mxu0 %v1945_v6 }
  0x51   : > { %1725 = vmatprep.mubr.msk.bf16.mxu1 %vm1946_vm0, %v1945_v6  ;;  %1710 = vmatpush3.bf16.msra.mxu1 %v1861_v18 }
  0x52   : > { %1711 = vmatprep.subr.bf16.mxu1 %v1945_v6 }
  0x53   : > { %1692 = vmatpush3.bf16.msra.mxu0 %v1853_v10 }
  0x54   : > { %1693 = vmatprep.subr.bf16.mxu0 %v1945_v6 }
  0x55   : > { %1712 = vmatpush3.bf16.msra.mxu1 %v1862_v20 }
  0x56   : > { %1713 = vmatprep.subr.bf16.mxu1 %v1945_v6 }
  0x57   : > { %1694 = vmatpush3.bf16.msra.mxu0 %v1854_v11 }
  0x58   : > { %1695 = vmatprep.subr.bf16.mxu0 %v1945_v6 }
  0x59   : > { %1714 = vmatpush3.bf16.msra.mxu1 %v1863_v22 }
  0x5a   : > { %1715 = vmatprep.subr.bf16.mxu1 %v1945_v6 }
  0x5b   : > { %1696 = vmatpush3.bf16.msra.mxu0 %v1855_v12  ;;  %v1568_v12 = vld [vmem:[%s2412_s4] ss:$0 sm:$0xff] }
  0x5c   : > { %1697 = vmatprep.subr.bf16.mxu0 %v1945_v6 }
  0x5d   : > { %1716 = vmatpush3.bf16.msra.mxu1 %v1864_v23 }
  0x5e   : > { %1717 = vmatprep.subr.bf16.mxu1 %v1945_v6 }
  0x5f   : > { %1698 = vmatpush3.bf16.msra.mxu0 %v1856_v13 }
  0x60   : > { %1699 = vmatprep.subr.bf16.mxu0 %v1945_v6 }
  0x61   : > { %1718 = vmatpush3.bf16.msra.mxu1 %v1865_v24 }
  0x62   : > { %1719 = vmatprep.subr.bf16.mxu1 %v1945_v6 }
  0x63   : > { %1700 = vmatpush3.bf16.msra.mxu0 %v1857_v14 }
  0x64   : > { %1701 = vmatprep.subr.bf16.mxu0 %v1945_v6 }
  0x65   : > { %1720 = vmatpush3.bf16.msra.mxu1 %v1866_v25 }
  0x66   : > { %1721 = vmatprep.subr.bf16.mxu1 %v1945_v6 }
  0x67   : > { %1702 = vmatpush3.bf16.msra.mxu0 %v1858_v15 }
  0x68   : > { %1703 = vmatprep.subr.bf16.mxu0 %v1945_v6 }
  0x69   : > { %1722 = vmatpush3.bf16.msra.mxu1 %v1867_v26 }
  0x6a   : > { %1723 = vmatprep.subr.bf16.mxu1 %v1945_v6 }
  0x6b   : > { %1704 = vmatpush3.bf16.msra.mxu0 %v1859_v16 }
  0x6d   : > { %1724 = vmatpush3.bf16.msra.mxu1 %v1868_v27 }
  0x6e   : > { %1706 = vmatmul.mubr.bf16.vlgmr.msra.gmra.mrb[8].mxu0 %v1860_v17 }
  0x9b   : > { %v1266_v45 = vpop.permute.xlu0 %1265 }
  0x9c   : > { %v1271_v46 = vsub.f32 %v2281_v19, %v1266_v45 }
  0x9e   : > { %1287 = vrot.lane.b32.xlu1 %v1271_v46, %s1948_s22  ;;  %v1273_v47 = vmul.f32 0.5, %v1271_v46 }
  0x9f   : > { %v1268_v48 = vpop.permute.xlu0 %1267 }
  0xa0   : > { %v1272_v49 = vsub.f32 %v2291_v21, %v1268_v48 }
  0xa2   : > { %1277 = vrot.lane.b32.xlu1 %v1273_v47, %s1948_s22  ;;  %v1274_v52 = vmul.f32 0.5, %v1272_v49 }
  0xa4   : > { %1279 = vrot.lane.b32.xlu0 %v1274_v52, %s1948_s22 }
  0xa6   : > { %1289 = vrot.lane.b32.xlu1 %v1272_v49, %s1948_s22 }
 0x101   : > { %v1599_v28 = vpop.f32.mrb[0].mxu0 }
 0x102   : > { %v1600_v30 = vpop.f32.mrb[1].mxu0 }
 0x103   : > { %v1601_v31 = vadd.f32 %v1600_v30, %v1599_v28  ;;  %v1602_v32 = vpop.f32.mrb[2].mxu0  ;;  %v1621_v33 = vpop.f32.mrb[0].mxu1 }
 0x104   : > { %v1603_v34 = vpop.f32.mrb[3].mxu0  ;;  %v1622_v37 = vpop.f32.mrb[1].mxu1 }
 0x105   : > { %v972_v35 = vadd.f32 %v1601_v31, %v1486_v29  ;;  %v1604_v36 = vadd.f32 %v1603_v34, %v1602_v32  ;;  %v1623_v38 = vadd.f32 %v1622_v37, %v1621_v33  ;;  %v1624_v39 = vpop.f32.mrb[2].mxu1 }
 0x106   : > { %v1625_v41 = vpop.f32.mrb[3].mxu1 }
 0x107   : > { %v975_v40 = vadd.f32 %v1604_v36, %v1486_v29  ;;  %v1013_v42 = vadd.f32 %v1623_v38, %v972_v35  ;;  %v1626_v43 = vadd.f32 %v1625_v41, %v1624_v39 }
 0x109   : > { %v1016_v44 = vadd.f32 %v1626_v43, %v975_v40 }
 0x110   : > { %v1288_v31 = vpop.permute.xlu1 %1287 }
 0x114   : > { %v1278_v32 = vpop.permute.xlu1 %1277 }
 0x115   : > { %v1283_v35 = vadd.f32 %v1278_v32, %v2281_v19 }
 0x116   : > { %v1280_v34 = vpop.permute.xlu0 %1279 }
 0x117   : > { %v1284_v38 = vadd.f32 %v1280_v34, %v2291_v21 }
 0x118   : > { %v1290_v33 = vpop.permute.xlu1 %1289 }
 0x121   : > { %v1643_v50 = vpop.f32.mrb[4].mxu0 }
 0x122   : > { %v1644_v51 = vpop.f32.mrb[5].mxu0 }
 0x123   : > { %v1645_v53 = vadd.f32 %v1644_v51, %v1643_v50  ;;  %v1646_v54 = vpop.f32.mrb[6].mxu0  ;;  %v1665_v55 = vpop.f32.mrb[4].mxu1 }
 0x124   : > { %v1647_v56 = vpop.f32.mrb[7].mxu0  ;;  %v1666_v59 = vpop.f32.mrb[5].mxu1 }
 0x125   : > { %v1054_v57 = vadd.f32 %v1645_v53, %v1013_v42  ;;  %v1648_v58 = vadd.f32 %v1647_v56, %v1646_v54  ;;  %v1667_v60 = vadd.f32 %v1666_v59, %v1665_v55  ;;  %v1668_v61 = vpop.f32.mrb[6].mxu1 }
 0x126   : > { %v1669_v63 = vpop.f32.mrb[7].mxu1 }
 0x127   : > { %v1057_v62 = vadd.f32 %v1648_v58, %v1016_v44  ;;  %v1670_v0 = vadd.f32 %v1669_v63, %v1668_v61  ;;  %v1095_v1 = vadd.f32 %v1667_v60, %v1054_v57 }
 0x129   : > { %v1098_v2 = vadd.f32 %v1670_v0, %v1057_v62 }
 0x141   : > { %v1135_v3 = vpop.f32.mrb[8].mxu0 }
 0x142   : > { %v1136_v4 = vadd.f32 %v1135_v3, %v1095_v1  ;;  %v1707_v5 = vpop.f32.mrb[9].mxu0 }
 0x143   : > { %v1138_v6 = vpop.f32.mrb[10].mxu0 }
 0x144   : > { %v1139_v7 = vadd.f32 %v1138_v6, %v1098_v2  ;;  %v1708_v8 = vpop.f32.mrb[11].mxu0  ;;  %v1142_v9 = vmax.f32 %v1136_v4, 0.0 }
 0x146   : > { %v1143_v10 = vmax.f32 %v1139_v7, 0.0 }
 0x148   : > { %v1144_v11 = vpack.c.bf16 %v1143_v10, %v1142_v9 }
 0x14a   : > { %1726 = vmatmul.mubr.bf16.vlgmr.msra.gmra.mrb[8].mxu1 %v1144_v11 }
 0x21d   : > { %v1250_v13 = vpop.f32.mrb[8].mxu1 }
 0x21e   : > { %v2328_v14 = vadd.f32 %v1568_v12, %v1250_v13  ;;  %v1727_v15 = vpop.f32.mrb[9].mxu1 }
 0x21f   : > { %v1253_v16 = vpop.f32.mrb[10].mxu1 }
 0x220   : > { %v1261_v17 = vmin.f32 %v2328_v14, 4.1351666  ;;  %v2331_v18 = vadd.f32 %v1568_v12, %v1253_v16  ;;  %v1728_v20 = vpop.f32.mrb[11].mxu1  ;;  %1257 = vst [vmem:[%s2333_s14] sm:$0xff] %v2328_v14  ;;  %v1293_v36 = vmul.f32 %v1288_v31, %v2328_v14 }
 0x222   : > { %v1297_v22 = vmul.f32 1.442695, %v1261_v17  ;;  %v1262_v23 = vmin.f32 %v2331_v18, 4.1351666  ;;  %1258 = vst [vmem:[%s2333_s14 + $0x8] sm:$0xff] %v2331_v18  ;;  %v1294_v37 = vmul.f32 %v1290_v33, %v2331_v18  ;;  %v1295_v39 = vadd.f32 %v1293_v36, %v1283_v35 }
 0x224   : > { %1869 = vpow2.f32 %v1297_v22  ;;  %v1299_v24 = vmul.f32 1.442695, %v1262_v23  ;;  %v1296_v41 = vadd.f32 %v1294_v37, %v1284_v38 }
 0x226   : > { %1871 = vpow2.f32 %v1299_v24 }
 0x22e   : > { %v1870_v25 = vpop.eup %1869 }
 0x22f   : > { %v1301_v26 = vmul.f32 %v1870_v25, %v1271_v46 }
 0x230   : > { %v1872_v27 = vpop.eup %1871 }
 0x231   : > { %v1303_v28 = vmul.f32 0.5, %v1301_v26  ;;  %v1302_v29 = vmul.f32 %v1872_v27, %v1272_v49 }
 0x233   : > { %1307 = vrot.lane.b32.xlu0 %v1303_v28, %s1948_s22  ;;  %v1304_v30 = vmul.f32 0.5, %v1302_v29 }
 0x235   : > { %1309 = vrot.lane.b32.xlu1 %v1304_v30, %s1948_s22  ;;  %s1881_s22 = scalar_lea.vmem %s2355_s21, 256 }
 0x236   : > { %p1882_p11 = scmp.ne.s32.totalorder %s2355_s21, %s1881_s22  ;;  %p1889_p1 = scmp.lt.s32.totalorder %s1887_s23, %s1881_s22 }
 0x237   : > { %1327 = vrot.lane.b32.xlu0 %v2328_v14, %s1949_s16 }
 0x238   : > { %p1883_p12 = pnand %p1882_p11, %p2031_p5  ;;  %p1890_p2 = por %p1889_p1, %p1888_p0 }
 0x239   : > { %1329 = vrot.lane.b32.xlu1 %v2331_v18, %s1949_s16 }
 0x23a   : > { %p1884_p13 = pneg %p1883_p12 }
 0x23c   : > { %p1891_p3 = pnand %p1890_p2, %p1884_p13 }
 0x2a5   : > { %v1308_v40 = vpop.permute.xlu0 %1307 }
 0x2a6   : > { %v1313_v42 = vsub.f32 %v1295_v39, %v1308_v40  ;;  %v1319_v19 = vadd.f32 %v1308_v40, %v1295_v39 }
 0x2a7   : > { %v1310_v43 = vpop.permute.xlu1 %1309 }
 0x2a8   : > { %v1321_v21 = vmax.f32 %v1319_v19, 0.0  ;;  %v1314_v44 = vsub.f32 %v1296_v41, %v1310_v43  ;;  %v1320_v45 = vadd.f32 %v1310_v43, %v1296_v41 }
 0x2a9   : > { %1894 = shalt.err (!%p1891_p3)
}
 0x2aa   : > { %s1895_s29 = scalar_lea.hbm %s2353_s20, 256  ;;  %s1899_s17 = scalar_lea.hbm %s2414_s6, 512 }
 0x2ab   : > { %p1896_p4 = scmp.ne.s32.totalorder %s2353_s20, %s1895_s29  ;;  %p1900_p9 = scmp.lt.u32.totalorder %s2353_s20, %s2414_s6 }
 0x2ac   : > { %p1901_p10 = scmp.lt.u32.totalorder %s1899_s17, %s1895_s29  ;;  %p1903_p12 = scmp.lt.u32.totalorder %s1895_s29, %s2353_s20 }
 0x2ad   : > { %p1897_p7 = pnand %p1896_p4, %p2031_p5 }
 0x2ae   : > { %p1902_p11 = por %p1901_p10, %p1900_p9 }
 0x2af   : > { %p1898_p8 = pneg %p1897_p7 }
 0x2b0   : > { %p1904_p13 = por %p1903_p12, %p1902_p11 }
 0x2b2   : > { %p1905_p0 = pnand %p1904_p13, %p1898_p8 }
 0x2b4   : > { %1908 = shalt.err (!%p1905_p0)
}
 0x2b5   : > { %s1951_s22 = smov 128   ;;  %s1952_s8 = smov 8   ;;  %v1323_v46 = vmin.f32 %v1321_v21, 64.0  ;;  %v1322_v47 = vmax.f32 %v1320_v45, 0.0  ;;  %v1328_v49 = vpop.permute.xlu0 %1327  ;;  %v1330_v50 = vpop.permute.xlu1 %1329  ;;  %v1315_v59 = vmax.f32 %v1313_v42, 0.0  ;;  %v1316_v60 = vmax.f32 %v1314_v44, 0.0 }
 0x2b6   : > { %1730 = dma.vmem_to_hbm [thread:$0]  (%p2031_p5), %s2355_s21, 256, %s2353_s20, %s2359_s28, %s1951_s22, %s1951_s22, %s1952_s8   ;;  %v1333_v51 = vsub.f32 %v2328_v14, %v1328_v49  ;;  %v1334_v52 = vsub.f32 %v2331_v18, %v1330_v50  ;;  %vm1353_vm1 = vcmask 261120   ;;  %vm1356_vm2 = vcmask 392192  }
 0x2b7   : > { %v1324_v48 = vmin.f32 %v1322_v47, 64.0  ;;  %1347 = vrot.lane.b32.xlu0 %v1323_v46, %s1947_s15  ;;  %v1317_v61 = vmin.f32 %v1315_v59, 64.0  ;;  %s1485_s11 = sshll.u32 %s2423_s13, 3  ;;  %vm1359_vm3 = vcmask 523264   ;;  %v1318_v63 = vmin.f32 %v1316_v60, 64.0 }
 0x2b8   : > { %v1335_v53 = vmul.f32 1.442695, %v1333_v51  ;;  %v1337_v54 = vmul.f32 1.442695, %v1334_v52  ;;  %vm1362_vm4 = vcmask 654336   ;;  %s295_s20 = scalar_lea.vmem %s2415_s7, %s1485_s11 }
 0x2b9   : > { %1349 = vrot.lane.b32.xlu1 %v1324_v48, %s1947_s15 }
 0x2ba   : > { %1873 = vpow2.f32 %v1335_v53 }
 0x2bb   : > { %1875 = vpow2.f32 %v1337_v54 }
 0x2c4   : > { %v1874_v55 = vpop.eup %1873 }
 0x2c5   : > { %v1876_v56 = vpop.eup %1875  ;;  %v1339_v57 = vadd.f32 1.0, %v1874_v55 }
 0x2c6   : > { %v1340_v58 = vadd.f32 1.0, %v1876_v56 }
 0x2c7   : > { %1877 = vrcp.f32 %v1339_v57 }
 0x2c8   : > { %1879 = vrcp.f32 %v1340_v58 }
 0x2d1   : > { %v1878_v1 = vpop.eup %1877 }
 0x2d2   : > { %v1880_v6 = vpop.eup %1879 }
 0x329   : > { %v1348_v62 = vpop.permute.xlu0 %1347 }
 0x32a   : > { %v1354_v0 = vsel %vm1353_vm1, %v1317_v61, %v1348_v62 }
 0x32b   : > { %v1357_v2 = vsel %vm1356_vm2, %v1354_v0, %v1348_v62  ;;  %v1350_v3 = vpop.permute.xlu1 %1349 }
 0x32c   : > { %v1360_v4 = vsel %vm1359_vm3, %v1357_v2, %v1878_v1  ;;  %v1355_v5 = vsel %vm1353_vm1, %v1318_v63, %v1350_v3 }
 0x32d   : > { %v1363_v7 = vsel %vm1362_vm4, %v1360_v4, 0.0  ;;  %v1358_v8 = vsel %vm1356_vm2, %v1355_v5, %v1350_v3 }
 0x32e   : > { %1365 = vst [vmem:[%s295_s20] sm:$0xff] %v1363_v7  ;;  %v1361_v9 = vsel %vm1359_vm3, %v1358_v8, %v1880_v6 }
 0x32f   : > { %v1364_v10 = vsel %vm1362_vm4, %v1361_v9, 0.0 }
 0x330   : > { %1366 = vst [vmem:[%s295_s20 + $0x8] sm:$0xff] %v1364_v10 }
 0x331 PF: > { %p1736_p5 = scmp.ge.s32.totalorder %s1943_s27, 2  ;;  %s1405_s13 = sand.u32 1, %s1931_s24  }
 0x332   : > { %s1406_s28 = scalar_lea.sflag [#allocation3], %s1405_s13 }
 0x333   : > { %p1733_p1 = pnand %p1736_p5, %p2035_p6 }
 0x335   : > { %1926 = dma.done.wait (!%p1733_p1), %s1406_s28, 256  }
 0x336   : > { %1928 = vsyncadd (!%p1733_p1), %s1406_s28, 4294967040  ;;  %p18_p2 = scmp.ge.s32.totalorder %s2018_s30, 4   ;;  %s2418_s24 = smov %s1935_s25 }
 0x337   : > { %s2419_s25 = smov %s1939_s26  ;;  %s2420_s26 = smov %s2029_s10 }
 0x338   : > { %s2421_s27 = smov %s2018_s30  ;;  %20 = sbr.rel (!%p18_p2) target bundleno = 3 (0x3), region = 91 }
 0x33f   :  { %1419 = vsyncpa [#allocation3], 1 }
 0x340   :  { %1421 = vsyncpa [#allocation3 + $0x1], 1 }

// kernel: _lambda_.11
= control target key start
LH: loop header
LB: loop body
LE: loop exit
PB: predicated region body
PF: predicated region fallthrough
CT: control target
= control target key end

     0   :  { %s4157_s18 = smov 0   ;;  %s5114_s0 = inlined_call_operand.vmem [shape: bf16[16,196,128], index: 0, kind: input, shape index: {}]   ;;  %s5115_s1 = inlined_call_operand.vmem [shape: bf16[128,256], index: 1, kind: input, shape index: {}]   ;;  %s5116_s2 = inlined_call_operand.vmem [shape: f32[1,256], index: 2, kind: input, shape index: {}]   ;;  %s5117_s3 = inlined_call_operand.vmem [shape: bf16[256,128], index: 3, kind: input, shape index: {}]   ;;  %s5118_s4 = inlined_call_operand.vmem [shape: f32[1,128], index: 4, kind: input, shape index: {}]   ;;  %s5119_s5 = inlined_call_operand.vmem [shape: f32[16,128], index: 5, kind: output, shape index: {}]  }
   0x1 LB: > { %s4163_s19 = sadd.s32 4294967295, %s4124_s18   ;;  %p3609_p0 = scmp.ge.s32.totalorder %s4124_s18, 1  ;;  %s4124_s18 = sphi %s4157_s18, %s15_s18  }
   0x2   : > { %p189_p1 = scmp.lt.s32.totalorder %s4124_s18, 3 }
   0x4   : > { %p190_p2 = pnand %p3609_p0, %p189_p1 }
   0x5   : > { %v4170_v0 = vld [vmem:[%s5115_s1 + $0x4] ss:$8 sps:$4 sm:$0xff] (!%p190_p2)   ;;  %s3610_s22 = sshll.u32 (!%p190_p2), %s4163_s19, 3  ;;  %v4176_v1 = vld [vmem:[%s5115_s1] ss:$8 sps:$4 sm:$0xff] (!%p190_p2)   ;;  %v4126_v2 = vmov (!%p190_p2), 0  }
   0x6   : > { %193 = sbr.rel (%p190_p2) target bundleno = 904 (0x388), region = 40  ;;  %470 = vmatprep.mubr.bf16.mxu0 (!%p190_p2), %v4126_v2  ;;  %849 = vmatprep.mubr.bf16.mxu1 (!%p190_p2), %v4126_v2  ;;  %p218_p3 = scmp.lt.s32.totalorder (!%p190_p2), %s3610_s22, 15  ;;  %v4185_v3 = vld [vmem:[%s5115_s1 + $0x14] ss:$8 sps:$4 sm:$0xff] (!%p190_p2)   ;;  %v4192_v4 = vld [vmem:[%s5115_s1 + $0x10] ss:$8 sps:$4 sm:$0xff] (!%p190_p2)  }
   0x7   : > { %438 = vmatprep.subr.bf16.mxu0 (!%p190_p2), %v4170_v0  ;;  %817 = vmatprep.subr.bf16.mxu1 (!%p190_p2), %v4170_v0  ;;  %v4199_v5 = vld [vmem:[%s5115_s1 + $0x24] ss:$8 sps:$4 sm:$0xff] (!%p190_p2)   ;;  %v4206_v6 = vld [vmem:[%s5115_s1 + $0x20] ss:$8 sps:$4 sm:$0xff] (!%p190_p2)   ;;  %v4213_v7 = vld [vmem:[%s5115_s1 + $0x34] ss:$8 sps:$4 sm:$0xff] (!%p190_p2)  }
   0x8   : > { %439 = vmatpush1.bf16.msra.mxu0 (!%p190_p2), %v4176_v1  ;;  %818 = vmatpush1.bf16.msra.mxu1 (!%p190_p2), %v4176_v1  ;;  %v4225_v8 = vld [vmem:[%s5115_s1 + $0x30] ss:$8 sps:$4 sm:$0xff] (!%p190_p2)   ;;  %v4232_v9 = vld [vmem:[%s5115_s1 + $0x44] ss:$8 sps:$4 sm:$0xff] (!%p190_p2)   ;;  %v4239_v10 = vld [vmem:[%s5115_s1 + $0x40] ss:$8 sps:$4 sm:$0xff] (!%p190_p2)  }
   0x9   : > { %440 = vmatprep.subr.bf16.mxu0 (!%p190_p2), %v4185_v3  ;;  %819 = vmatprep.subr.bf16.mxu1 (!%p190_p2), %v4185_v3  ;;  %v4246_v11 = vld [vmem:[%s5115_s1 + $0x54] ss:$8 sps:$4 sm:$0xff] (!%p190_p2)   ;;  %v4253_v12 = vld [vmem:[%s5115_s1 + $0x50] ss:$8 sps:$4 sm:$0xff] (!%p190_p2)   ;;  %v4260_v13 = vld [vmem:[%s5115_s1 + $0x64] ss:$8 sps:$4 sm:$0xff] (!%p190_p2)  }
   0xa   : > { %v4267_v14 = vld [vmem:[%s5115_s1 + $0x60] ss:$8 sps:$4 sm:$0xff] (!%p190_p2)   ;;  %v4274_v15 = vld [vmem:[%s5115_s1 + $0x74] ss:$8 sps:$4 sm:$0xff] (!%p190_p2)   ;;  %v4281_v16 = vld [vmem:[%s5115_s1 + $0x70] ss:$8 sps:$4 sm:$0xff] (!%p190_p2)  }
   0xb   : > { %vm672_vm0 = vcmask (!%p190_p2), 1043456   ;;  %vm3354_vm1 = vcmask (!%p190_p2), 1040384   ;;  %vm3357_vm2 = vcmask (!%p190_p2), 1041408   ;;  %vm3360_vm3 = vcmask (!%p190_p2), 1042432   ;;  %p224_p4 = scmp.lt.s32.totalorder (!%p190_p2), %s4163_s19, 1 }
   0xc   : > { %441 = vmatpush1.bf16.msra.mxu0 (!%p190_p2), %v4192_v4  ;;  %820 = vmatpush1.bf16.msra.mxu1 (!%p190_p2), %v4192_v4  ;;  %vm3365_vm4 = vcmask (!%p190_p2), 1044480   ;;  %vm3368_vm5 = vcmask (!%p190_p2), 1045504   ;;  %vm3371_vm6 = vcmask (!%p190_p2), 1046528  }
   0xd   : > { %s5121_s22 = smov (!%p218_p3, %s3610_s22), 15  ;;  %442 = vmatprep.subr.bf16.mxu0 %v4199_v5  ;;  %821 = vmatprep.subr.bf16.mxu1 %v4199_v5  ;;  %s5123_s19 = smov (!%p224_p4, %s4163_s19), 1 }
   0xe   : > { %s3949_s6 = smul.u32 100, %s5121_s22  ;;  %s3612_s30 = sshll.u32 %s5123_s19, 3 }
   0xf   : > { %s227_s10 = scalar_lea.vmem %s5119_s5, %s3612_s30 }
  0x10   : > { %s4218_s13 = scalar_lea.vmem %s5114_s0, %s3949_s6  ;;  %443 = vmatpush1.bf16.msra.mxu0 %v4206_v6  ;;  %822 = vmatpush1.bf16.msra.mxu1 %v4206_v6 }
  0x11   : > { %444 = vmatprep.subr.bf16.mxu0 %v4213_v7  ;;  %823 = vmatprep.subr.bf16.mxu1 %v4213_v7  ;;  %v3983_v17 = vld [vmem:[%s4218_s13] sm:$0xff]   ;;  %v3985_v19 = vld [vmem:[%s4218_s13 + $0x8] sm:$0xff]   ;;  %v3987_v21 = vld [vmem:[%s4218_s13 + $0x10] sm:$0xff]  }
  0x12   : > { %v3984_v18 = vld [vmem:[%s4218_s13 + $0x64] sm:$0xff]   ;;  %v3986_v20 = vld [vmem:[%s4218_s13 + $0x6c] sm:$0xff]   ;;  %v3988_v22 = vld [vmem:[%s4218_s13 + $0x74] sm:$0xff]  }
  0x13   : > { %v3989_v23 = vld [vmem:[%s4218_s13 + $0x18] sm:$0xff]   ;;  %v3991_v25 = vld [vmem:[%s4218_s13 + $0x20] sm:$0xff]   ;;  %v3993_v27 = vld [vmem:[%s4218_s13 + $0x28] sm:$0xff]  }
  0x14   : > { %445 = vmatpush1.bf16.msra.mxu0 %v4225_v8  ;;  %824 = vmatpush1.bf16.msra.mxu1 %v4225_v8  ;;  %v3990_v24 = vld [vmem:[%s4218_s13 + $0x7c] sm:$0xff]   ;;  %v3992_v26 = vld [vmem:[%s4218_s13 + $0x84] sm:$0xff]   ;;  %v3994_v28 = vld [vmem:[%s4218_s13 + $0x8c] sm:$0xff]  }
  0x15   : > { %446 = vmatprep.subr.bf16.mxu0 %v4232_v9  ;;  %825 = vmatprep.subr.bf16.mxu1 %v4232_v9  ;;  %v3995_v29 = vld [vmem:[%s4218_s13 + $0x30] sm:$0xff]   ;;  %v3997_v31 = vld [vmem:[%s4218_s13 + $0x38] sm:$0xff]   ;;  %v3999_v33 = vld [vmem:[%s4218_s13 + $0x40] sm:$0xff]  }
  0x16   : > { %v3996_v30 = vld [vmem:[%s4218_s13 + $0x94] sm:$0xff]   ;;  %v3998_v32 = vld [vmem:[%s4218_s13 + $0x9c] sm:$0xff]   ;;  %v4000_v34 = vld [vmem:[%s4218_s13 + $0xa4] sm:$0xff]  }
  0x17   : > { %v4001_v35 = vld [vmem:[%s4218_s13 + $0x48] sm:$0xff]   ;;  %v4003_v37 = vld [vmem:[%s4218_s13 + $0x50] sm:$0xff]   ;;  %v4005_v39 = vld [vmem:[%s4218_s13 + $0x58] sm:$0xff]  }
  0x18   : > { %447 = vmatpush1.bf16.msra.mxu0 %v4239_v10  ;;  %826 = vmatpush1.bf16.msra.mxu1 %v4239_v10  ;;  %v4002_v36 = vld [vmem:[%s4218_s13 + $0xac] sm:$0xff]   ;;  %v4004_v38 = vld [vmem:[%s4218_s13 + $0xb4] sm:$0xff]   ;;  %v4006_v40 = vld [vmem:[%s4218_s13 + $0xbc] sm:$0xff]  }
  0x19   : > { %448 = vmatprep.subr.bf16.mxu0 %v4246_v11  ;;  %827 = vmatprep.subr.bf16.mxu1 %v4246_v11  ;;  %v4007_v41 = vld [vmem:[%s4218_s13 + $0x60] ss:$0 sps:$4 sm:$0x33]   ;;  %v4008_v42 = vld [vmem:[%s4218_s13 + $0xc4] ss:$0 sps:$4 sm:$0x33]  }
  0x1a   : > { %v4009_v43 = vld [vmem:[%s4218_s13 + $0xc8] sm:$0xff]   ;;  %v4011_v45 = vld [vmem:[%s4218_s13 + $0xd0] sm:$0xff]   ;;  %v4013_v47 = vld [vmem:[%s4218_s13 + $0xd8] sm:$0xff]  }
  0x1b   : > { %v4010_v44 = vld [vmem:[%s4218_s13 + $0x12c] sm:$0xff]   ;;  %v4012_v46 = vld [vmem:[%s4218_s13 + $0x134] sm:$0xff]   ;;  %v4014_v48 = vld [vmem:[%s4218_s13 + $0x13c] sm:$0xff]  }
  0x1c   : > { %449 = vmatpush1.bf16.msra.mxu0 %v4253_v12  ;;  %828 = vmatpush1.bf16.msra.mxu1 %v4253_v12  ;;  %v4015_v49 = vld [vmem:[%s4218_s13 + $0xe0] sm:$0xff]   ;;  %v4017_v51 = vld [vmem:[%s4218_s13 + $0xe8] sm:$0xff]   ;;  %v4019_v53 = vld [vmem:[%s4218_s13 + $0xf0] sm:$0xff]  }
  0x1d   : > { %450 = vmatprep.subr.bf16.mxu0 %v4260_v13  ;;  %829 = vmatprep.subr.bf16.mxu1 %v4260_v13  ;;  %v4016_v50 = vld [vmem:[%s4218_s13 + $0x144] sm:$0xff]   ;;  %v4018_v52 = vld [vmem:[%s4218_s13 + $0x14c] sm:$0xff]   ;;  %v4020_v54 = vld [vmem:[%s4218_s13 + $0x154] sm:$0xff]  }
  0x1e   : > { %v4021_v55 = vld [vmem:[%s4218_s13 + $0xf8] sm:$0xff]   ;;  %v4023_v57 = vld [vmem:[%s4218_s13 + $0x100] sm:$0xff]   ;;  %v4025_v59 = vld [vmem:[%s4218_s13 + $0x108] sm:$0xff]  }
  0x1f   : > { %v4022_v56 = vld [vmem:[%s4218_s13 + $0x15c] sm:$0xff]   ;;  %v4024_v58 = vld [vmem:[%s4218_s13 + $0x164] sm:$0xff]   ;;  %v4026_v60 = vld [vmem:[%s4218_s13 + $0x16c] sm:$0xff]  }
  0x20   : > { %451 = vmatpush1.bf16.msra.mxu0 %v4267_v14  ;;  %830 = vmatpush1.bf16.msra.mxu1 %v4267_v14  ;;  %v4027_v61 = vld [vmem:[%s4218_s13 + $0x110] sm:$0xff]   ;;  %v4029_v63 = vld [vmem:[%s4218_s13 + $0x118] sm:$0xff]  }
  0x21   : > { %452 = vmatprep.subr.bf16.mxu0 %v4274_v15  ;;  %831 = vmatprep.subr.bf16.mxu1 %v4274_v15  ;;  %v4028_v62 = vld [vmem:[%s4218_s13 + $0x174] sm:$0xff]  }
  0x24   : > { %453 = vmatpush1.bf16.msra.mxu0 %v4281_v16  ;;  %832 = vmatpush1.bf16.msra.mxu1 %v4281_v16 }
  0x25   : > { %1194 = vmatprep.subr.bf16.mxu0 %v4170_v0  ;;  %1571 = vmatprep.subr.bf16.mxu1 %v4170_v0 }
  0x27   : > { %471 = vmatmul.mubr.bf16.vlgmr.msra.gmra.mrb[0].mxu0 %v3983_v17  ;;  %850 = vmatmul.mubr.bf16.vlgmr.msra.gmra.mrb[0].mxu1 %v3984_v18  ;;  %v4104_v18 = vld [vmem:[%s5115_s1 + $0x14] ss:$8 sps:$4 sm:$0xff]  }
  0x28   : > { %1195 = vmatpush1.bf16.msra.mxu0 %v4176_v1  ;;  %1572 = vmatpush1.bf16.msra.mxu1 %v4176_v1 }
  0x29   : > { %480 = vmatprep.mubr.bf16.mxu0 %v4126_v2  ;;  %859 = vmatprep.mubr.bf16.mxu1 %v4126_v2 }
  0x2a   : > { %1196 = vmatprep.subr.bf16.mxu0 %v4185_v3  ;;  %1573 = vmatprep.subr.bf16.mxu1 %v4185_v3 }
  0x2c   : > { %1197 = vmatpush1.bf16.msra.mxu0 %v4192_v4  ;;  %1574 = vmatpush1.bf16.msra.mxu1 %v4192_v4 }
  0x2d   : > { %1198 = vmatprep.subr.bf16.mxu0 %v4199_v5  ;;  %1575 = vmatprep.subr.bf16.mxu1 %v4199_v5 }
  0x2f   : > { %481 = vmatmul.mubr.bf16.gmra.mrb[4].mxu0 %v3985_v19  ;;  %860 = vmatmul.mubr.bf16.gmra.mrb[4].mxu1 %v3986_v20 }
  0x30   : > { %490 = vmatprep.mubr.bf16.mxu0 %v4126_v2  ;;  %869 = vmatprep.mubr.bf16.mxu1 %v4126_v2 }
  0x31   : > { %1199 = vmatpush1.bf16.msra.mxu0 %v4206_v6  ;;  %1576 = vmatpush1.bf16.msra.mxu1 %v4206_v6 }
  0x32   : > { %1200 = vmatprep.subr.bf16.mxu0 %v4213_v7  ;;  %1577 = vmatprep.subr.bf16.mxu1 %v4213_v7 }
  0x35   : > { %1201 = vmatpush1.bf16.msra.mxu0 %v4225_v8  ;;  %1578 = vmatpush1.bf16.msra.mxu1 %v4225_v8 }
  0x36   : > { %1202 = vmatprep.subr.bf16.mxu0 %v4232_v9  ;;  %1579 = vmatprep.subr.bf16.mxu1 %v4232_v9 }
  0x37   : > { %491 = vmatmul.mubr.bf16.gmra.mrb[8].mxu0 %v3987_v21  ;;  %870 = vmatmul.mubr.bf16.gmra.mrb[8].mxu1 %v3988_v22 }
  0x38   : > { %500 = vmatprep.mubr.bf16.mxu0 %v4126_v2  ;;  %879 = vmatprep.mubr.bf16.mxu1 %v4126_v2 }
  0x39   : > { %1203 = vmatpush1.bf16.msra.mxu0 %v4239_v10  ;;  %1580 = vmatpush1.bf16.msra.mxu1 %v4239_v10 }
  0x3a   : > { %1204 = vmatprep.subr.bf16.mxu0 %v4246_v11  ;;  %1581 = vmatprep.subr.bf16.mxu1 %v4246_v11 }
  0x3d   : > { %1205 = vmatpush1.bf16.msra.mxu0 %v4253_v12  ;;  %1582 = vmatpush1.bf16.msra.mxu1 %v4253_v12 }
  0x3e   : > { %1206 = vmatprep.subr.bf16.mxu0 %v4260_v13  ;;  %1583 = vmatprep.subr.bf16.mxu1 %v4260_v13 }
  0x3f   : > { %501 = vmatmul.mubr.bf16.gmra.mrb[12].mxu0 %v3989_v23  ;;  %880 = vmatmul.mubr.bf16.gmra.mrb[12].mxu1 %v3990_v24  ;;  %v4037_v23 = vld [vmem:[%s4218_s13 + $0x198] sm:$0xff]  }
  0x40   : > { %510 = vmatprep.mubr.bf16.mxu0 %v4126_v2  ;;  %889 = vmatprep.mubr.bf16.mxu1 %v4126_v2  ;;  %v4038_v24 = vld [vmem:[%s4218_s13 + $0x1fc] sm:$0xff]  }
  0x41   : > { %1207 = vmatpush1.bf16.msra.mxu0 %v4267_v14  ;;  %1584 = vmatpush1.bf16.msra.mxu1 %v4267_v14 }
  0x42   : > { %1208 = vmatprep.subr.bf16.mxu0 %v4274_v15  ;;  %1585 = vmatprep.subr.bf16.mxu1 %v4274_v15 }
  0x45   : > { %1209 = vmatpush1.bf16.msra.mxu0 %v4281_v16  ;;  %1586 = vmatpush1.bf16.msra.mxu1 %v4281_v16 }
  0x46   : > { %1948 = vmatprep.subr.bf16.mxu0 %v4170_v0  ;;  %2325 = vmatprep.subr.bf16.mxu1 %v4170_v0 }
  0x47   : > { %511 = vmatmul.mubr.bf16.gmra.mrb[16].mxu0 %v3991_v25  ;;  %890 = vmatmul.mubr.bf16.gmra.mrb[16].mxu1 %v3992_v26 }
  0x48   : > { %520 = vmatprep.mubr.bf16.mxu0 %v4126_v2  ;;  %899 = vmatprep.mubr.bf16.mxu1 %v4126_v2 }
  0x4f   : > { %521 = vmatmul.mubr.bf16.gmra.mrb[20].mxu0 %v3993_v27  ;;  %900 = vmatmul.mubr.bf16.gmra.mrb[20].mxu1 %v3994_v28 }
  0x50   : > { %530 = vmatprep.mubr.bf16.mxu0 %v4126_v2  ;;  %909 = vmatprep.mubr.bf16.mxu1 %v4126_v2 }
  0x57   : > { %531 = vmatmul.mubr.bf16.gmra.mrb[24].mxu0 %v3995_v29  ;;  %910 = vmatmul.mubr.bf16.gmra.mrb[24].mxu1 %v3996_v30  ;;  %v4105_v29 = vld [vmem:[%s5115_s1 + $0x10] ss:$8 sps:$4 sm:$0xff]  }
  0x58   : > { %540 = vmatprep.mubr.bf16.mxu0 %v4126_v2  ;;  %919 = vmatprep.mubr.bf16.mxu1 %v4126_v2 }
  0x5f   : > { %541 = vmatmul.mubr.bf16.gmra.mrb[28].mxu0 %v3997_v31  ;;  %920 = vmatmul.mubr.bf16.gmra.mrb[28].mxu1 %v3998_v32 }
  0x60   : > { %550 = vmatprep.mubr.bf16.mxu0 %v4126_v2  ;;  %929 = vmatprep.mubr.bf16.mxu1 %v4126_v2 }
  0x67   : > { %551 = vmatmul.mubr.bf16.gmra.mrb[32].mxu0 %v3999_v33  ;;  %930 = vmatmul.mubr.bf16.gmra.mrb[32].mxu1 %v4000_v34 }
  0x68   : > { %560 = vmatprep.mubr.bf16.mxu0 %v4126_v2  ;;  %939 = vmatprep.mubr.bf16.mxu1 %v4126_v2 }
  0x6f   : > { %561 = vmatmul.mubr.bf16.gmra.mrb[36].mxu0 %v4001_v35  ;;  %940 = vmatmul.mubr.bf16.gmra.mrb[36].mxu1 %v4002_v36  ;;  %v4106_v35 = vld [vmem:[%s5115_s1 + $0x24] ss:$8 sps:$4 sm:$0xff]  }
  0x70   : > { %570 = vmatprep.mubr.bf16.mxu0 %v4126_v2  ;;  %949 = vmatprep.mubr.bf16.mxu1 %v4126_v2 }
  0x77   : > { %571 = vmatmul.mubr.bf16.gmra.mrb[40].mxu0 %v4003_v37  ;;  %950 = vmatmul.mubr.bf16.gmra.mrb[40].mxu1 %v4004_v38 }
  0x78   : > { %580 = vmatprep.mubr.bf16.mxu0 %v4126_v2  ;;  %959 = vmatprep.mubr.bf16.mxu1 %v4126_v2 }
  0x7f   : > { %581 = vmatmul.mubr.bf16.gmra.mrb[44].mxu0 %v4005_v39  ;;  %960 = vmatmul.mubr.bf16.gmra.mrb[44].mxu1 %v4006_v40 }
  0x80   : > { %590 = vmatprep.mubr.bf16.mxu0 %v4126_v2  ;;  %969 = vmatprep.mubr.bf16.mxu1 %v4126_v2 }
  0x87   : > { %591 = vmatmul.mubr.bf16.gmra.mrb[48].mxu0 %v4007_v41  ;;  %970 = vmatmul.mubr.bf16.gmra.mrb[48].mxu1 %v4008_v42 }
  0x88   : > { %1226 = vmatprep.mubr.bf16.mxu0 %v4126_v2  ;;  %1603 = vmatprep.mubr.bf16.mxu1 %v4126_v2 }
  0x8f   : > { %1227 = vmatmul.mubr.bf16.vlgmr.msra.gmra.mrb[52].mxu0 %v4009_v43  ;;  %1604 = vmatmul.mubr.bf16.vlgmr.msra.gmra.mrb[52].mxu1 %v4010_v44 }
  0x90   : > { %1949 = vmatpush1.bf16.msra.mxu0 %v4176_v1  ;;  %2326 = vmatpush1.bf16.msra.mxu1 %v4176_v1  ;;  %v4031_v1 = vld [vmem:[%s4218_s13 + $0x120] sm:$0xff]  }
  0x91   : > { %1236 = vmatprep.mubr.bf16.mxu0 %v4126_v2  ;;  %1613 = vmatprep.mubr.bf16.mxu1 %v4126_v2 }
  0x92   : > { %1950 = vmatprep.subr.bf16.mxu0 %v4185_v3  ;;  %2327 = vmatprep.subr.bf16.mxu1 %v4185_v3  ;;  %v4032_v3 = vld [vmem:[%s4218_s13 + $0x184] sm:$0xff]  }
  0x94   : > { %1951 = vmatpush1.bf16.msra.mxu0 %v4192_v4  ;;  %2328 = vmatpush1.bf16.msra.mxu1 %v4192_v4  ;;  %v4033_v4 = vld [vmem:[%s4218_s13 + $0x128] ss:$0 sps:$4 sm:$0x33]  }
  0x95   : > { %1952 = vmatprep.subr.bf16.mxu0 %v4199_v5  ;;  %2329 = vmatprep.subr.bf16.mxu1 %v4199_v5  ;;  %v4034_v5 = vld [vmem:[%s4218_s13 + $0x18c] ss:$0 sps:$4 sm:$0x33]  }
  0x97   : > { %1237 = vmatmul.mubr.bf16.gmra.mrb[56].mxu0 %v4011_v45  ;;  %1614 = vmatmul.mubr.bf16.gmra.mrb[56].mxu1 %v4012_v46 }
  0x98   : > { %1246 = vmatprep.mubr.bf16.mxu0 %v4126_v2  ;;  %1623 = vmatprep.mubr.bf16.mxu1 %v4126_v2 }
  0x99   : > { %1953 = vmatpush1.bf16.msra.mxu0 %v4206_v6  ;;  %2330 = vmatpush1.bf16.msra.mxu1 %v4206_v6  ;;  %v272_v6 = vlaneseq }
  0x9a   : > { %1954 = vmatprep.subr.bf16.mxu0 %v4213_v7  ;;  %2331 = vmatprep.subr.bf16.mxu1 %v4213_v7 }
  0x9b   : > { %v273_v7 = vshrl.u32 %v272_v6, 7  ;;  %v4109_v6 = vld [vmem:[%s5115_s1 + $0x30] ss:$8 sps:$4 sm:$0xff]  }
  0x9d   : > { %1955 = vmatpush1.bf16.msra.mxu0 %v4225_v8  ;;  %2332 = vmatpush1.bf16.msra.mxu1 %v4225_v8  ;;  %v4035_v8 = vld [vmem:[%s4218_s13 + $0x190] sm:$0xff]  }
  0x9e   : > { %1956 = vmatprep.subr.bf16.mxu0 %v4232_v9  ;;  %2333 = vmatprep.subr.bf16.mxu1 %v4232_v9  ;;  %v4036_v9 = vld [vmem:[%s4218_s13 + $0x1f4] sm:$0xff]  }
  0x9f   : > { %1247 = vmatmul.mubr.bf16.gmra.mrb[60].mxu0 %v4013_v47  ;;  %1624 = vmatmul.mubr.bf16.gmra.mrb[60].mxu1 %v4014_v48  ;;  %v4107_v47 = vld [vmem:[%s5115_s1 + $0x20] ss:$8 sps:$4 sm:$0xff]  }
  0xa0   : > { %1256 = vmatprep.mubr.bf16.mxu0 %v4126_v2  ;;  %1633 = vmatprep.mubr.bf16.mxu1 %v4126_v2 }
  0xa1   : > { %1957 = vmatpush1.bf16.msra.mxu0 %v4239_v10  ;;  %2334 = vmatpush1.bf16.msra.mxu1 %v4239_v10  ;;  %v274_v10 = vsub.s32 0, %v273_v7 }
  0xa2   : > { %1958 = vmatprep.subr.bf16.mxu0 %v4246_v11  ;;  %2335 = vmatprep.subr.bf16.mxu1 %v4246_v11  ;;  %v270_v11 = vld [vmem:[%s5116_s2] sm:$0x3] }
  0xa5   : > { %1959 = vmatpush1.bf16.msra.mxu0 %v4253_v12  ;;  %2336 = vmatpush1.bf16.msra.mxu1 %v4253_v12  ;;  %v278_v12 = vsub.s32 1, %v273_v7 }
  0xa6   : > { %1960 = vmatprep.subr.bf16.mxu0 %v4260_v13  ;;  %2337 = vmatprep.subr.bf16.mxu1 %v4260_v13  ;;  %v4462_v13 = vrot.slane %v270_v11, %v274_v10 }
  0xa7   : > { %1257 = vmatmul.mubr.bf16.gmra.mrb[64].mxu0 %v4015_v49  ;;  %1634 = vmatmul.mubr.bf16.gmra.mrb[64].mxu1 %v4016_v50 }
  0xa8   : > { %1266 = vmatprep.mubr.bf16.mxu0 %v4126_v2  ;;  %1643 = vmatprep.mubr.bf16.mxu1 %v4126_v2 }
  0xa9   : > { %1961 = vmatpush1.bf16.msra.mxu0 %v4267_v14  ;;  %2338 = vmatpush1.bf16.msra.mxu1 %v4267_v14  ;;  %v4103_v14 = vld [vmem:[%s5115_s1] ss:$8 sps:$4 sm:$0xff]  }
  0xaa   : > { %1962 = vmatprep.subr.bf16.mxu0 %v4274_v15  ;;  %2339 = vmatprep.subr.bf16.mxu1 %v4274_v15  ;;  %v4467_v15 = vrot.slane %v270_v11, %v278_v12  ;;  %v4110_v11 = vld [vmem:[%s5115_s1 + $0x44] ss:$8 sps:$4 sm:$0xff]  }
  0xad   : > { %1963 = vmatpush1.bf16.msra.mxu0 %v4281_v16  ;;  %2340 = vmatpush1.bf16.msra.mxu1 %v4281_v16 }
  0xae   : > { %2702 = vmatprep.subr.bf16.mxu0 %v4170_v0  ;;  %3079 = vmatprep.subr.bf16.mxu1 %v4170_v0  ;;  %v4030_v0 = vld [vmem:[%s4218_s13 + $0x17c] sm:$0xff]  }
  0xaf   : > { %1267 = vmatmul.mubr.bf16.gmra.mrb[68].mxu0 %v4017_v51  ;;  %1644 = vmatmul.mubr.bf16.gmra.mrb[68].mxu1 %v4018_v52  ;;  %v4108_v52 = vld [vmem:[%s5115_s1 + $0x34] ss:$8 sps:$4 sm:$0xff]  }
  0xb0   : > { %1276 = vmatprep.mubr.bf16.mxu0 %v4126_v2  ;;  %1653 = vmatprep.mubr.bf16.mxu1 %v4126_v2 }
  0xb7   : > { %1277 = vmatmul.mubr.bf16.gmra.mrb[72].mxu0 %v4019_v53  ;;  %1654 = vmatmul.mubr.bf16.gmra.mrb[72].mxu1 %v4020_v54 }
  0xb8   : > { %1286 = vmatprep.mubr.bf16.mxu0 %v4126_v2  ;;  %1663 = vmatprep.mubr.bf16.mxu1 %v4126_v2 }
  0xbf   : > { %1287 = vmatmul.mubr.bf16.gmra.mrb[76].mxu0 %v4021_v55  ;;  %1664 = vmatmul.mubr.bf16.gmra.mrb[76].mxu1 %v4022_v56 }
  0xc0   : > { %1296 = vmatprep.mubr.bf16.mxu0 %v4126_v2  ;;  %1673 = vmatprep.mubr.bf16.mxu1 %v4126_v2 }
  0xc7   : > { %1297 = vmatmul.mubr.bf16.gmra.mrb[80].mxu0 %v4023_v57  ;;  %1674 = vmatmul.mubr.bf16.gmra.mrb[80].mxu1 %v4024_v58  ;;  %v4039_v57 = vld [vmem:[%s4218_s13 + $0x1a0] sm:$0xff]  }
  0xc8   : > { %1306 = vmatprep.mubr.bf16.mxu0 %v4126_v2  ;;  %1683 = vmatprep.mubr.bf16.mxu1 %v4126_v2  ;;  %v4040_v58 = vld [vmem:[%s4218_s13 + $0x204] sm:$0xff]  }
  0xcf   : > { %1307 = vmatmul.mubr.bf16.gmra.mrb[84].mxu0 %v4025_v59  ;;  %1684 = vmatmul.mubr.bf16.gmra.mrb[84].mxu1 %v4026_v60 }
  0xd0   : > { %1316 = vmatprep.mubr.bf16.mxu0 %v4126_v2  ;;  %1693 = vmatprep.mubr.bf16.mxu1 %v4126_v2 }
  0xd7   : > { %1317 = vmatmul.mubr.bf16.gmra.mrb[88].mxu0 %v4027_v61  ;;  %1694 = vmatmul.mubr.bf16.gmra.mrb[88].mxu1 %v4028_v62 }
  0xd8   : > { %1326 = vmatprep.mubr.bf16.mxu0 %v4126_v2  ;;  %1703 = vmatprep.mubr.bf16.mxu1 %v4126_v2 }
  0xdf   : > { %1327 = vmatmul.mubr.bf16.gmra.mrb[92].mxu0 %v4029_v63  ;;  %1704 = vmatmul.mubr.bf16.gmra.mrb[92].mxu1 %v4030_v0 }
  0xe0   : > { %1336 = vmatprep.mubr.bf16.mxu0 %v4126_v2  ;;  %1713 = vmatprep.mubr.bf16.mxu1 %v4126_v2 }
  0xe7   : > { %1337 = vmatmul.mubr.bf16.gmra.mrb[96].mxu0 %v4031_v1  ;;  %1714 = vmatmul.mubr.bf16.gmra.mrb[96].mxu1 %v4032_v3 }
  0xe8   : > { %1346 = vmatprep.mubr.bf16.mxu0 %v4126_v2  ;;  %1723 = vmatprep.mubr.bf16.mxu1 %v4126_v2 }
  0xef   : > { %1347 = vmatmul.mubr.bf16.gmra.mrb[100].mxu0 %v4033_v4  ;;  %1724 = vmatmul.mubr.bf16.gmra.mrb[100].mxu1 %v4034_v5 }
  0xf0   : > { %1980 = vmatprep.mubr.bf16.mxu0 %v4126_v2  ;;  %2357 = vmatprep.mubr.bf16.mxu1 %v4126_v2 }
  0xf7   : > { %1981 = vmatmul.mubr.bf16.vlgmr.msra.gmra.mrb[104].mxu0 %v4035_v8  ;;  %2358 = vmatmul.mubr.bf16.vlgmr.msra.gmra.mrb[104].mxu1 %v4036_v9 }
  0xf8   : > { %2703 = vmatpush1.bf16.msra.mxu0 %v4103_v14  ;;  %3080 = vmatpush1.bf16.msra.mxu1 %v4103_v14 }
  0xf9   : > { %1990 = vmatprep.mubr.bf16.mxu0 %v4126_v2  ;;  %2367 = vmatprep.mubr.bf16.mxu1 %v4126_v2 }
  0xfa   : > { %v472_v16 = vpop.f32.mrb[0].mxu0  ;;  %v851_v17 = vpop.f32.mrb[0].mxu1  ;;  %2704 = vmatprep.subr.bf16.mxu0 %v4104_v18  ;;  %3081 = vmatprep.subr.bf16.mxu1 %v4104_v18 }
  0xfb   : > { %v473_v19 = vadd.f32 %v472_v16, %v4462_v13  ;;  %v852_v20 = vadd.f32 %v851_v17, %v4462_v13  ;;  %v474_v21 = vpop.f32.mrb[1].mxu0  ;;  %v853_v22 = vpop.f32.mrb[1].mxu1 }
  0xfc   : > { %v475_v25 = vadd.f32 %v474_v21, %v4467_v15  ;;  %v854_v26 = vadd.f32 %v853_v22, %v4467_v15  ;;  %v476_v27 = vpop.f32.mrb[2].mxu0  ;;  %v855_v28 = vpop.f32.mrb[2].mxu1  ;;  %2705 = vmatpush1.bf16.msra.mxu0 %v4105_v29  ;;  %3082 = vmatpush1.bf16.msra.mxu1 %v4105_v29  ;;  %v4112_v29 = vld [vmem:[%s5115_s1 + $0x54] ss:$8 sps:$4 sm:$0xff]  }
  0xfd   : > { %v978_v30 = vmax.f32 %v852_v20, 0.0  ;;  %v477_v31 = vadd.f32 %v476_v27, %v4462_v13  ;;  %v856_v32 = vadd.f32 %v855_v28, %v4462_v13  ;;  %v478_v33 = vpop.f32.mrb[3].mxu0  ;;  %v857_v34 = vpop.f32.mrb[3].mxu1  ;;  %2706 = vmatprep.subr.bf16.mxu0 %v4106_v35  ;;  %3083 = vmatprep.subr.bf16.mxu1 %v4106_v35  ;;  %v599_v38 = vmax.f32 %v473_v19, 0.0  ;;  %v4042_v35 = vld [vmem:[%s4218_s13 + $0x20c] sm:$0xff]  }
  0xfe   : > { %v479_v36 = vadd.f32 %v478_v33, %v4467_v15  ;;  %v858_v37 = vadd.f32 %v857_v34, %v4467_v15  ;;  %v600_v41 = vmax.f32 %v475_v25, 0.0  ;;  %v979_v42 = vmax.f32 %v854_v26, 0.0  ;;  %v4041_v34 = vld [vmem:[%s4218_s13 + $0x1a8] sm:$0xff]  }
  0xff   : > { %v601_v39 = vmax.f32 %v477_v31, 0.0  ;;  %v980_v40 = vmax.f32 %v856_v32, 0.0  ;;  %1991 = vmatmul.mubr.bf16.gmra.mrb[108].mxu0 %v4037_v23  ;;  %2368 = vmatmul.mubr.bf16.gmra.mrb[108].mxu1 %v4038_v24  ;;  %v4111_v24 = vld [vmem:[%s5115_s1 + $0x40] ss:$8 sps:$4 sm:$0xff]  }
 0x100   : > { %v602_v43 = vmax.f32 %v479_v36, 0.0  ;;  %v981_v44 = vmax.f32 %v858_v37, 0.0  ;;  %2000 = vmatprep.mubr.bf16.mxu0 %v4126_v2  ;;  %2377 = vmatprep.mubr.bf16.mxu1 %v4126_v2 }
 0x101   : > { %v649_v45 = vadd.f32 %v601_v39, %v599_v38  ;;  %v1028_v46 = vadd.f32 %v980_v40, %v978_v30  ;;  %2707 = vmatpush1.bf16.msra.mxu0 %v4107_v47  ;;  %3084 = vmatpush1.bf16.msra.mxu1 %v4107_v47 }
 0x102   : > { %v681_v48 = vadd.f32 %v602_v43, %v600_v41  ;;  %v1059_v49 = vadd.f32 %v981_v44, %v979_v42  ;;  %v482_v50 = vpop.f32.mrb[4].mxu0  ;;  %v861_v51 = vpop.f32.mrb[4].mxu1  ;;  %2708 = vmatprep.subr.bf16.mxu0 %v4108_v52  ;;  %3085 = vmatprep.subr.bf16.mxu1 %v4108_v52 }
 0x103   : > { %v483_v53 = vadd.f32 %v482_v50, %v4462_v13  ;;  %v862_v54 = vadd.f32 %v861_v51, %v4462_v13  ;;  %v484_v55 = vpop.f32.mrb[5].mxu0  ;;  %v863_v56 = vpop.f32.mrb[5].mxu1  ;;  %v4114_v51 = vld [vmem:[%s5115_s1 + $0x64] ss:$8 sps:$4 sm:$0xff]  }
 0x104   : > { %v485_v59 = vadd.f32 %v484_v55, %v4467_v15  ;;  %v864_v60 = vadd.f32 %v863_v56, %v4467_v15  ;;  %v486_v61 = vpop.f32.mrb[6].mxu0  ;;  %v865_v62 = vpop.f32.mrb[6].mxu1 }
 0x105   : > { %v603_v63 = vmax.f32 %v483_v53, 0.0  ;;  %v982_v0 = vmax.f32 %v862_v54, 0.0  ;;  %v487_v1 = vadd.f32 %v486_v61, %v4462_v13  ;;  %v866_v3 = vadd.f32 %v865_v62, %v4462_v13  ;;  %v488_v4 = vpop.f32.mrb[7].mxu0  ;;  %v867_v5 = vpop.f32.mrb[7].mxu1  ;;  %2709 = vmatpush1.bf16.msra.mxu0 %v4109_v6  ;;  %3086 = vmatpush1.bf16.msra.mxu1 %v4109_v6  ;;  %v4115_v62 = vld [vmem:[%s5115_s1 + $0x60] ss:$8 sps:$4 sm:$0xff]  }
 0x106   : > { %v604_v7 = vmax.f32 %v485_v59, 0.0  ;;  %v983_v8 = vmax.f32 %v864_v60, 0.0  ;;  %v489_v9 = vadd.f32 %v488_v4, %v4467_v15  ;;  %v868_v10 = vadd.f32 %v867_v5, %v4467_v15  ;;  %2710 = vmatprep.subr.bf16.mxu0 %v4110_v11  ;;  %3087 = vmatprep.subr.bf16.mxu1 %v4110_v11  ;;  %v4116_v4 = vld [vmem:[%s5115_s1 + $0x74] ss:$8 sps:$4 sm:$0xff]  }
 0x107   : > { %v650_v12 = vadd.f32 %v649_v45, %v603_v63  ;;  %v1029_v14 = vadd.f32 %v1028_v46, %v982_v0  ;;  %v605_v16 = vmax.f32 %v487_v1, 0.0  ;;  %v984_v17 = vmax.f32 %v866_v3, 0.0  ;;  %2001 = vmatmul.mubr.bf16.gmra.mrb[112].mxu0 %v4039_v57  ;;  %2378 = vmatmul.mubr.bf16.gmra.mrb[112].mxu1 %v4040_v58  ;;  %v4113_v46 = vld [vmem:[%s5115_s1 + $0x50] ss:$8 sps:$4 sm:$0xff]  }
 0x108   : > { %v682_v18 = vadd.f32 %v681_v48, %v604_v7  ;;  %v1060_v19 = vadd.f32 %v1059_v49, %v983_v8  ;;  %v606_v20 = vmax.f32 %v489_v9, 0.0  ;;  %v985_v21 = vmax.f32 %v868_v10, 0.0  ;;  %2010 = vmatprep.mubr.bf16.mxu0 %v4126_v2  ;;  %2387 = vmatprep.mubr.bf16.mxu1 %v4126_v2  ;;  %v4043_v9 = vld [vmem:[%s4218_s13 + $0x1b0] sm:$0xff]  }
 0x109   : > { %v651_v22 = vadd.f32 %v650_v12, %v605_v16  ;;  %v1030_v23 = vadd.f32 %v1029_v14, %v984_v17  ;;  %2711 = vmatpush1.bf16.msra.mxu0 %v4111_v24  ;;  %3088 = vmatpush1.bf16.msra.mxu1 %v4111_v24  ;;  %v4044_v10 = vld [vmem:[%s4218_s13 + $0x214] sm:$0xff]  }
 0x10a   : > { %v683_v25 = vadd.f32 %v682_v18, %v606_v20  ;;  %v1061_v26 = vadd.f32 %v1060_v19, %v985_v21  ;;  %v492_v27 = vpop.f32.mrb[8].mxu0  ;;  %v871_v28 = vpop.f32.mrb[8].mxu1  ;;  %2712 = vmatprep.subr.bf16.mxu0 %v4112_v29  ;;  %3089 = vmatprep.subr.bf16.mxu1 %v4112_v29 }
 0x10b   : > { %v493_v30 = vadd.f32 %v492_v27, %v4462_v13  ;;  %v872_v31 = vadd.f32 %v871_v28, %v4462_v13  ;;  %v494_v32 = vpop.f32.mrb[9].mxu0  ;;  %v873_v33 = vpop.f32.mrb[9].mxu1 }
 0x10c   : > { %v495_v36 = vadd.f32 %v494_v32, %v4467_v15  ;;  %v874_v37 = vadd.f32 %v873_v33, %v4467_v15  ;;  %v496_v38 = vpop.f32.mrb[10].mxu0  ;;  %v875_v39 = vpop.f32.mrb[10].mxu1 }
 0x10d   : > { %v607_v40 = vmax.f32 %v493_v30, 0.0  ;;  %v986_v41 = vmax.f32 %v872_v31, 0.0  ;;  %v497_v42 = vadd.f32 %v496_v38, %v4462_v13  ;;  %v876_v43 = vadd.f32 %v875_v39, %v4462_v13  ;;  %v498_v44 = vpop.f32.mrb[11].mxu0  ;;  %v877_v45 = vpop.f32.mrb[11].mxu1  ;;  %2713 = vmatpush1.bf16.msra.mxu0 %v4113_v46  ;;  %3090 = vmatpush1.bf16.msra.mxu1 %v4113_v46  ;;  %v4045_v46 = vld [vmem:[%s4218_s13 + $0x1b8] sm:$0xff]  }
 0x10e   : > { %v608_v47 = vmax.f32 %v495_v36, 0.0  ;;  %v987_v48 = vmax.f32 %v874_v37, 0.0  ;;  %v499_v49 = vadd.f32 %v498_v44, %v4467_v15  ;;  %v878_v50 = vadd.f32 %v877_v45, %v4467_v15  ;;  %2714 = vmatprep.subr.bf16.mxu0 %v4114_v51  ;;  %3091 = vmatprep.subr.bf16.mxu1 %v4114_v51 }
 0x10f   : > { %v652_v52 = vadd.f32 %v651_v22, %v607_v40  ;;  %v1031_v53 = vadd.f32 %v1030_v23, %v986_v41  ;;  %v609_v54 = vmax.f32 %v497_v42, 0.0  ;;  %v988_v55 = vmax.f32 %v876_v43, 0.0  ;;  %2011 = vmatmul.mubr.bf16.gmra.mrb[116].mxu0 %v4041_v34  ;;  %2388 = vmatmul.mubr.bf16.gmra.mrb[116].mxu1 %v4042_v35  ;;  %v4117_v23 = vld [vmem:[%s5115_s1 + $0x70] ss:$8 sps:$4 sm:$0xff]  }
 0x110   : > { %v684_v56 = vadd.f32 %v683_v25, %v608_v47  ;;  %v1062_v57 = vadd.f32 %v1061_v26, %v987_v48  ;;  %v610_v58 = vmax.f32 %v499_v49, 0.0  ;;  %v989_v59 = vmax.f32 %v878_v50, 0.0  ;;  %2020 = vmatprep.mubr.bf16.mxu0 %v4126_v2  ;;  %2397 = vmatprep.mubr.bf16.mxu1 %v4126_v2  ;;  %v4046_v47 = vld [vmem:[%s4218_s13 + $0x21c] sm:$0xff]  }
 0x111   : > { %v653_v60 = vadd.f32 %v652_v52, %v609_v54  ;;  %v1032_v61 = vadd.f32 %v1031_v53, %v988_v55  ;;  %2715 = vmatpush1.bf16.msra.mxu0 %v4115_v62  ;;  %3092 = vmatpush1.bf16.msra.mxu1 %v4115_v62 }
 0x112   : > { %v685_v63 = vadd.f32 %v684_v56, %v610_v58  ;;  %v1063_v0 = vadd.f32 %v1062_v57, %v989_v59  ;;  %v502_v1 = vpop.f32.mrb[12].mxu0  ;;  %v881_v3 = vpop.f32.mrb[12].mxu1  ;;  %2716 = vmatprep.subr.bf16.mxu0 %v4116_v4  ;;  %3093 = vmatprep.subr.bf16.mxu1 %v4116_v4 }
 0x113   : > { %v503_v5 = vadd.f32 %v502_v1, %v4462_v13  ;;  %v882_v6 = vadd.f32 %v881_v3, %v4462_v13  ;;  %v504_v7 = vpop.f32.mrb[13].mxu0  ;;  %v883_v8 = vpop.f32.mrb[13].mxu1 }
 0x114   : > { %v505_v11 = vadd.f32 %v504_v7, %v4467_v15  ;;  %v884_v12 = vadd.f32 %v883_v8, %v4467_v15  ;;  %v506_v14 = vpop.f32.mrb[14].mxu0  ;;  %v885_v16 = vpop.f32.mrb[14].mxu1 }
 0x115   : > { %v611_v17 = vmax.f32 %v503_v5, 0.0  ;;  %v990_v18 = vmax.f32 %v882_v6, 0.0  ;;  %v507_v19 = vadd.f32 %v506_v14, %v4462_v13  ;;  %v886_v20 = vadd.f32 %v885_v16, %v4462_v13  ;;  %v508_v21 = vpop.f32.mrb[15].mxu0  ;;  %v887_v22 = vpop.f32.mrb[15].mxu1  ;;  %2717 = vmatpush1.bf16.msra.mxu0 %v4117_v23  ;;  %3094 = vmatpush1.bf16.msra.mxu1 %v4117_v23 }
 0x116   : > { %v612_v24 = vmax.f32 %v505_v11, 0.0  ;;  %v991_v25 = vmax.f32 %v884_v12, 0.0  ;;  %v509_v26 = vadd.f32 %v508_v21, %v4467_v15  ;;  %v888_v27 = vadd.f32 %v887_v22, %v4467_v15 }
 0x117   : > { %v654_v28 = vadd.f32 %v653_v60, %v611_v17  ;;  %v1033_v29 = vadd.f32 %v1032_v61, %v990_v18  ;;  %v613_v30 = vmax.f32 %v507_v19, 0.0  ;;  %v992_v31 = vmax.f32 %v886_v20, 0.0  ;;  %2021 = vmatmul.mubr.bf16.gmra.mrb[120].mxu0 %v4043_v9  ;;  %2398 = vmatmul.mubr.bf16.gmra.mrb[120].mxu1 %v4044_v10  ;;  %v4047_v19 = vld [vmem:[%s4218_s13 + $0x1c0] sm:$0xff]  }
 0x118   : > { %v686_v32 = vadd.f32 %v685_v63, %v612_v24  ;;  %v1064_v33 = vadd.f32 %v1063_v0, %v991_v25  ;;  %v614_v34 = vmax.f32 %v509_v26, 0.0  ;;  %v993_v35 = vmax.f32 %v888_v27, 0.0  ;;  %2030 = vmatprep.mubr.bf16.mxu0 %v4126_v2  ;;  %2407 = vmatprep.mubr.bf16.mxu1 %v4126_v2  ;;  %v4048_v20 = vld [vmem:[%s4218_s13 + $0x224] sm:$0xff]  }
 0x119   : > { %v655_v36 = vadd.f32 %v654_v28, %v613_v30  ;;  %v1034_v37 = vadd.f32 %v1033_v29, %v992_v31 }
 0x11a   : > { %v687_v38 = vadd.f32 %v686_v32, %v614_v34  ;;  %v1065_v39 = vadd.f32 %v1064_v33, %v993_v35  ;;  %v512_v40 = vpop.f32.mrb[16].mxu0  ;;  %v891_v41 = vpop.f32.mrb[16].mxu1 }
 0x11b   : > { %v513_v42 = vadd.f32 %v512_v40, %v4462_v13  ;;  %v892_v43 = vadd.f32 %v891_v41, %v4462_v13  ;;  %v514_v44 = vpop.f32.mrb[17].mxu0  ;;  %v893_v45 = vpop.f32.mrb[17].mxu1 }
 0x11c   : > { %v515_v48 = vadd.f32 %v514_v44, %v4467_v15  ;;  %v894_v49 = vadd.f32 %v893_v45, %v4467_v15  ;;  %v516_v50 = vpop.f32.mrb[18].mxu0  ;;  %v895_v51 = vpop.f32.mrb[18].mxu1 }
 0x11d   : > { %v615_v52 = vmax.f32 %v513_v42, 0.0  ;;  %v994_v53 = vmax.f32 %v892_v43, 0.0  ;;  %v517_v54 = vadd.f32 %v516_v50, %v4462_v13  ;;  %v896_v55 = vadd.f32 %v895_v51, %v4462_v13  ;;  %v518_v56 = vpop.f32.mrb[19].mxu0  ;;  %v897_v57 = vpop.f32.mrb[19].mxu1 }
 0x11e   : > { %v616_v58 = vmax.f32 %v515_v48, 0.0  ;;  %v995_v59 = vmax.f32 %v894_v49, 0.0  ;;  %v519_v60 = vadd.f32 %v518_v56, %v4467_v15  ;;  %v898_v61 = vadd.f32 %v897_v57, %v4467_v15 }
 0x11f   : > { %v656_v62 = vadd.f32 %v655_v36, %v615_v52  ;;  %v1035_v63 = vadd.f32 %v1034_v37, %v994_v53  ;;  %v617_v0 = vmax.f32 %v517_v54, 0.0  ;;  %v996_v1 = vmax.f32 %v896_v55, 0.0  ;;  %2031 = vmatmul.mubr.bf16.gmra.mrb[124].mxu0 %v4045_v46  ;;  %2408 = vmatmul.mubr.bf16.gmra.mrb[124].mxu1 %v4046_v47  ;;  %v4049_v53 = vld [vmem:[%s4218_s13 + $0x1c8] sm:$0xff]  }
 0x120   : > { %v688_v3 = vadd.f32 %v687_v38, %v616_v58  ;;  %v1066_v4 = vadd.f32 %v1065_v39, %v995_v59  ;;  %v618_v5 = vmax.f32 %v519_v60, 0.0  ;;  %v997_v6 = vmax.f32 %v898_v61, 0.0  ;;  %2040 = vmatprep.mubr.bf16.mxu0 %v4126_v2  ;;  %2417 = vmatprep.mubr.bf16.mxu1 %v4126_v2  ;;  %v4050_v54 = vld [vmem:[%s4218_s13 + $0x22c] sm:$0xff]  }
 0x121   : > { %v657_v7 = vadd.f32 %v656_v62, %v617_v0  ;;  %v1036_v8 = vadd.f32 %v1035_v63, %v996_v1 }
 0x122   : > { %v689_v9 = vadd.f32 %v688_v3, %v618_v5  ;;  %v1067_v10 = vadd.f32 %v1066_v4, %v997_v6  ;;  %v522_v11 = vpop.f32.mrb[20].mxu0  ;;  %v901_v12 = vpop.f32.mrb[20].mxu1 }
 0x123   : > { %v523_v14 = vadd.f32 %v522_v11, %v4462_v13  ;;  %v902_v16 = vadd.f32 %v901_v12, %v4462_v13  ;;  %v524_v17 = vpop.f32.mrb[21].mxu0  ;;  %v903_v18 = vpop.f32.mrb[21].mxu1 }
 0x124   : > { %v525_v21 = vadd.f32 %v524_v17, %v4467_v15  ;;  %v904_v22 = vadd.f32 %v903_v18, %v4467_v15  ;;  %v526_v23 = vpop.f32.mrb[22].mxu0  ;;  %v905_v24 = vpop.f32.mrb[22].mxu1 }
 0x125   : > { %v619_v25 = vmax.f32 %v523_v14, 0.0  ;;  %v998_v26 = vmax.f32 %v902_v16, 0.0  ;;  %v527_v27 = vadd.f32 %v526_v23, %v4462_v13  ;;  %v906_v28 = vadd.f32 %v905_v24, %v4462_v13  ;;  %v528_v29 = vpop.f32.mrb[23].mxu0  ;;  %v907_v30 = vpop.f32.mrb[23].mxu1 }
 0x126   : > { %v620_v31 = vmax.f32 %v525_v21, 0.0  ;;  %v999_v32 = vmax.f32 %v904_v22, 0.0  ;;  %v529_v33 = vadd.f32 %v528_v29, %v4467_v15  ;;  %v908_v34 = vadd.f32 %v907_v30, %v4467_v15 }
 0x127   : > { %v658_v35 = vadd.f32 %v657_v7, %v619_v25  ;;  %v1037_v36 = vadd.f32 %v1036_v8, %v998_v26  ;;  %v621_v37 = vmax.f32 %v527_v27, 0.0  ;;  %v1000_v38 = vmax.f32 %v906_v28, 0.0  ;;  %2041 = vmatmul.mubr.bf16.gmra.mrb[128].mxu0 %v4047_v19  ;;  %2418 = vmatmul.mubr.bf16.gmra.mrb[128].mxu1 %v4048_v20  ;;  %v4051_v26 = vld [vmem:[%s4218_s13 + $0x1d0] sm:$0xff]  }
 0x128   : > { %v690_v39 = vadd.f32 %v689_v9, %v620_v31  ;;  %v1068_v40 = vadd.f32 %v1067_v10, %v999_v32  ;;  %v622_v41 = vmax.f32 %v529_v33, 0.0  ;;  %v1001_v42 = vmax.f32 %v908_v34, 0.0  ;;  %2050 = vmatprep.mubr.bf16.mxu0 %v4126_v2  ;;  %2427 = vmatprep.mubr.bf16.mxu1 %v4126_v2  ;;  %v4052_v27 = vld [vmem:[%s4218_s13 + $0x234] sm:$0xff]  }
 0x129   : > { %v659_v43 = vadd.f32 %v658_v35, %v621_v37  ;;  %v1038_v44 = vadd.f32 %v1037_v36, %v1000_v38 }
 0x12a   : > { %v691_v45 = vadd.f32 %v690_v39, %v622_v41  ;;  %v1069_v46 = vadd.f32 %v1068_v40, %v1001_v42  ;;  %v532_v47 = vpop.f32.mrb[24].mxu0  ;;  %v911_v48 = vpop.f32.mrb[24].mxu1 }
 0x12b   : > { %v533_v49 = vadd.f32 %v532_v47, %v4462_v13  ;;  %v912_v50 = vadd.f32 %v911_v48, %v4462_v13  ;;  %v534_v51 = vpop.f32.mrb[25].mxu0  ;;  %v913_v52 = vpop.f32.mrb[25].mxu1 }
 0x12c   : > { %v535_v55 = vadd.f32 %v534_v51, %v4467_v15  ;;  %v914_v56 = vadd.f32 %v913_v52, %v4467_v15  ;;  %v536_v57 = vpop.f32.mrb[26].mxu0  ;;  %v915_v58 = vpop.f32.mrb[26].mxu1 }
 0x12d   : > { %v623_v59 = vmax.f32 %v533_v49, 0.0  ;;  %v1002_v60 = vmax.f32 %v912_v50, 0.0  ;;  %v537_v61 = vadd.f32 %v536_v57, %v4462_v13  ;;  %v916_v62 = vadd.f32 %v915_v58, %v4462_v13  ;;  %v538_v63 = vpop.f32.mrb[27].mxu0  ;;  %v917_v0 = vpop.f32.mrb[27].mxu1 }
 0x12e   : > { %v624_v1 = vmax.f32 %v535_v55, 0.0  ;;  %v1003_v3 = vmax.f32 %v914_v56, 0.0  ;;  %v539_v4 = vadd.f32 %v538_v63, %v4467_v15  ;;  %v918_v5 = vadd.f32 %v917_v0, %v4467_v15 }
 0x12f   : > { %v660_v6 = vadd.f32 %v659_v43, %v623_v59  ;;  %v1039_v7 = vadd.f32 %v1038_v44, %v1002_v60  ;;  %v625_v8 = vmax.f32 %v537_v61, 0.0  ;;  %v1004_v9 = vmax.f32 %v916_v62, 0.0  ;;  %2051 = vmatmul.mubr.bf16.gmra.mrb[132].mxu0 %v4049_v53  ;;  %2428 = vmatmul.mubr.bf16.gmra.mrb[132].mxu1 %v4050_v54  ;;  %v4053_v60 = vld [vmem:[%s4218_s13 + $0x1d8] sm:$0xff]  }
 0x130   : > { %v692_v10 = vadd.f32 %v691_v45, %v624_v1  ;;  %v1070_v11 = vadd.f32 %v1069_v46, %v1003_v3  ;;  %v626_v12 = vmax.f32 %v539_v4, 0.0  ;;  %v1005_v14 = vmax.f32 %v918_v5, 0.0  ;;  %2060 = vmatprep.mubr.bf16.mxu0 %v4126_v2  ;;  %2437 = vmatprep.mubr.bf16.mxu1 %v4126_v2  ;;  %v4054_v61 = vld [vmem:[%s4218_s13 + $0x23c] sm:$0xff]  }
 0x131   : > { %v661_v16 = vadd.f32 %v660_v6, %v625_v8  ;;  %v1040_v17 = vadd.f32 %v1039_v7, %v1004_v9 }
 0x132   : > { %v693_v18 = vadd.f32 %v692_v10, %v626_v12  ;;  %v1071_v19 = vadd.f32 %v1070_v11, %v1005_v14  ;;  %v542_v20 = vpop.f32.mrb[28].mxu0  ;;  %v921_v21 = vpop.f32.mrb[28].mxu1 }
 0x133   : > { %v543_v22 = vadd.f32 %v542_v20, %v4462_v13  ;;  %v922_v23 = vadd.f32 %v921_v21, %v4462_v13  ;;  %v544_v24 = vpop.f32.mrb[29].mxu0  ;;  %v923_v25 = vpop.f32.mrb[29].mxu1 }
 0x134   : > { %v545_v28 = vadd.f32 %v544_v24, %v4467_v15  ;;  %v924_v29 = vadd.f32 %v923_v25, %v4467_v15  ;;  %v546_v30 = vpop.f32.mrb[30].mxu0  ;;  %v925_v31 = vpop.f32.mrb[30].mxu1 }
 0x135   : > { %v627_v32 = vmax.f32 %v543_v22, 0.0  ;;  %v1006_v33 = vmax.f32 %v922_v23, 0.0  ;;  %v547_v34 = vadd.f32 %v546_v30, %v4462_v13  ;;  %v926_v35 = vadd.f32 %v925_v31, %v4462_v13  ;;  %v548_v36 = vpop.f32.mrb[31].mxu0  ;;  %v927_v37 = vpop.f32.mrb[31].mxu1 }
 0x136   : > { %v628_v38 = vmax.f32 %v545_v28, 0.0  ;;  %v1007_v39 = vmax.f32 %v924_v29, 0.0  ;;  %v549_v40 = vadd.f32 %v548_v36, %v4467_v15  ;;  %v928_v41 = vadd.f32 %v927_v37, %v4467_v15 }
 0x137   : > { %v662_v42 = vadd.f32 %v661_v16, %v627_v32  ;;  %v1041_v43 = vadd.f32 %v1040_v17, %v1006_v33  ;;  %v629_v44 = vmax.f32 %v547_v34, 0.0  ;;  %v1008_v45 = vmax.f32 %v926_v35, 0.0  ;;  %2061 = vmatmul.mubr.bf16.gmra.mrb[136].mxu0 %v4051_v26  ;;  %2438 = vmatmul.mubr.bf16.gmra.mrb[136].mxu1 %v4052_v27  ;;  %v4055_v33 = vld [vmem:[%s4218_s13 + $0x1e0] sm:$0xff]  }
 0x138   : > { %v694_v46 = vadd.f32 %v693_v18, %v628_v38  ;;  %v1072_v47 = vadd.f32 %v1071_v19, %v1007_v39  ;;  %v630_v48 = vmax.f32 %v549_v40, 0.0  ;;  %v1009_v49 = vmax.f32 %v928_v41, 0.0  ;;  %2070 = vmatprep.mubr.bf16.mxu0 %v4126_v2  ;;  %2447 = vmatprep.mubr.bf16.mxu1 %v4126_v2  ;;  %v4056_v34 = vld [vmem:[%s4218_s13 + $0x244] sm:$0xff]  }
 0x139   : > { %v663_v50 = vadd.f32 %v662_v42, %v629_v44  ;;  %v1042_v51 = vadd.f32 %v1041_v43, %v1008_v45 }
 0x13a   : > { %v695_v52 = vadd.f32 %v694_v46, %v630_v48  ;;  %v1073_v53 = vadd.f32 %v1072_v47, %v1009_v49  ;;  %v552_v54 = vpop.f32.mrb[32].mxu0  ;;  %v931_v55 = vpop.f32.mrb[32].mxu1 }
 0x13b   : > { %v553_v56 = vadd.f32 %v552_v54, %v4462_v13  ;;  %v932_v57 = vadd.f32 %v931_v55, %v4462_v13  ;;  %v554_v58 = vpop.f32.mrb[33].mxu0  ;;  %v933_v59 = vpop.f32.mrb[33].mxu1 }
 0x13c   : > { %v555_v62 = vadd.f32 %v554_v58, %v4467_v15  ;;  %v934_v63 = vadd.f32 %v933_v59, %v4467_v15  ;;  %v556_v0 = vpop.f32.mrb[34].mxu0  ;;  %v935_v1 = vpop.f32.mrb[34].mxu1 }
 0x13d   : > { %v631_v3 = vmax.f32 %v553_v56, 0.0  ;;  %v1010_v4 = vmax.f32 %v932_v57, 0.0  ;;  %v557_v5 = vadd.f32 %v556_v0, %v4462_v13  ;;  %v936_v6 = vadd.f32 %v935_v1, %v4462_v13  ;;  %v558_v7 = vpop.f32.mrb[35].mxu0  ;;  %v937_v8 = vpop.f32.mrb[35].mxu1 }
 0x13e   : > { %v632_v9 = vmax.f32 %v555_v62, 0.0  ;;  %v1011_v10 = vmax.f32 %v934_v63, 0.0  ;;  %v559_v11 = vadd.f32 %v558_v7, %v4467_v15  ;;  %v938_v12 = vadd.f32 %v937_v8, %v4467_v15 }
 0x13f   : > { %v664_v14 = vadd.f32 %v663_v50, %v631_v3  ;;  %v1043_v16 = vadd.f32 %v1042_v51, %v1010_v4  ;;  %v633_v17 = vmax.f32 %v557_v5, 0.0  ;;  %v1012_v18 = vmax.f32 %v936_v6, 0.0  ;;  %2071 = vmatmul.mubr.bf16.gmra.mrb[140].mxu0 %v4053_v60  ;;  %2448 = vmatmul.mubr.bf16.gmra.mrb[140].mxu1 %v4054_v61  ;;  %v4057_v4 = vld [vmem:[%s4218_s13 + $0x1e8] sm:$0xff]  }
 0x140   : > { %v696_v19 = vadd.f32 %v695_v52, %v632_v9  ;;  %v1074_v20 = vadd.f32 %v1073_v53, %v1011_v10  ;;  %v634_v21 = vmax.f32 %v559_v11, 0.0  ;;  %v1013_v22 = vmax.f32 %v938_v12, 0.0  ;;  %2080 = vmatprep.mubr.bf16.mxu0 %v4126_v2  ;;  %2457 = vmatprep.mubr.bf16.mxu1 %v4126_v2  ;;  %v4058_v5 = vld [vmem:[%s4218_s13 + $0x24c] sm:$0xff]  }
 0x141   : > { %v665_v23 = vadd.f32 %v664_v14, %v633_v17  ;;  %v1044_v24 = vadd.f32 %v1043_v16, %v1012_v18 }
 0x142   : > { %v697_v25 = vadd.f32 %v696_v19, %v634_v21  ;;  %v1075_v26 = vadd.f32 %v1074_v20, %v1013_v22  ;;  %v562_v27 = vpop.f32.mrb[36].mxu0  ;;  %v941_v28 = vpop.f32.mrb[36].mxu1 }
 0x143   : > { %v563_v29 = vadd.f32 %v562_v27, %v4462_v13  ;;  %v942_v30 = vadd.f32 %v941_v28, %v4462_v13  ;;  %v564_v31 = vpop.f32.mrb[37].mxu0  ;;  %v943_v32 = vpop.f32.mrb[37].mxu1 }
 0x144   : > { %v565_v35 = vadd.f32 %v564_v31, %v4467_v15  ;;  %v944_v36 = vadd.f32 %v943_v32, %v4467_v15  ;;  %v566_v37 = vpop.f32.mrb[38].mxu0  ;;  %v945_v38 = vpop.f32.mrb[38].mxu1 }
 0x145   : > { %v635_v39 = vmax.f32 %v563_v29, 0.0  ;;  %v1014_v40 = vmax.f32 %v942_v30, 0.0  ;;  %v567_v41 = vadd.f32 %v566_v37, %v4462_v13  ;;  %v946_v42 = vadd.f32 %v945_v38, %v4462_v13  ;;  %v568_v43 = vpop.f32.mrb[39].mxu0  ;;  %v947_v44 = vpop.f32.mrb[39].mxu1 }
 0x146   : > { %v636_v45 = vmax.f32 %v565_v35, 0.0  ;;  %v1015_v46 = vmax.f32 %v944_v36, 0.0  ;;  %v569_v47 = vadd.f32 %v568_v43, %v4467_v15  ;;  %v948_v48 = vadd.f32 %v947_v44, %v4467_v15  ;;  %v4059_v36 = vld [vmem:[%s4218_s13 + $0x1f0] ss:$0 sps:$4 sm:$0x33]  }
 0x147   : > { %v666_v49 = vadd.f32 %v665_v23, %v635_v39  ;;  %v1045_v50 = vadd.f32 %v1044_v24, %v1014_v40  ;;  %v637_v51 = vmax.f32 %v567_v41, 0.0  ;;  %v1016_v52 = vmax.f32 %v946_v42, 0.0  ;;  %2081 = vmatmul.mubr.bf16.gmra.mrb[144].mxu0 %v4055_v33  ;;  %2458 = vmatmul.mubr.bf16.gmra.mrb[144].mxu1 %v4056_v34  ;;  %v4060_v41 = vld [vmem:[%s4218_s13 + $0x254] ss:$0 sps:$4 sm:$0x33]  }
 0x148   : > { %v698_v53 = vadd.f32 %v697_v25, %v636_v45  ;;  %v1076_v54 = vadd.f32 %v1075_v26, %v1015_v46  ;;  %v638_v55 = vmax.f32 %v569_v47, 0.0  ;;  %v1017_v56 = vmax.f32 %v948_v48, 0.0  ;;  %2090 = vmatprep.mubr.bf16.mxu0 %v4126_v2  ;;  %2467 = vmatprep.mubr.bf16.mxu1 %v4126_v2 }
 0x149   : > { %v667_v57 = vadd.f32 %v666_v49, %v637_v51  ;;  %v1046_v58 = vadd.f32 %v1045_v50, %v1016_v52 }
 0x14a   : > { %v699_v59 = vadd.f32 %v698_v53, %v638_v55  ;;  %v1077_v60 = vadd.f32 %v1076_v54, %v1017_v56  ;;  %v572_v61 = vpop.f32.mrb[40].mxu0  ;;  %v951_v62 = vpop.f32.mrb[40].mxu1 }
 0x14b   : > { %v573_v63 = vadd.f32 %v572_v61, %v4462_v13  ;;  %v952_v0 = vadd.f32 %v951_v62, %v4462_v13  ;;  %v574_v1 = vpop.f32.mrb[41].mxu0  ;;  %v953_v3 = vpop.f32.mrb[41].mxu1 }
 0x14c   : > { %v575_v6 = vadd.f32 %v574_v1, %v4467_v15  ;;  %v954_v7 = vadd.f32 %v953_v3, %v4467_v15  ;;  %v576_v8 = vpop.f32.mrb[42].mxu0  ;;  %v955_v9 = vpop.f32.mrb[42].mxu1 }
 0x14d   : > { %v639_v10 = vmax.f32 %v573_v63, 0.0  ;;  %v1018_v11 = vmax.f32 %v952_v0, 0.0  ;;  %v577_v12 = vadd.f32 %v576_v8, %v4462_v13  ;;  %v956_v14 = vadd.f32 %v955_v9, %v4462_v13  ;;  %v578_v16 = vpop.f32.mrb[43].mxu0  ;;  %v957_v17 = vpop.f32.mrb[43].mxu1 }
 0x14e   : > { %v640_v18 = vmax.f32 %v575_v6, 0.0  ;;  %v1019_v19 = vmax.f32 %v954_v7, 0.0  ;;  %v579_v20 = vadd.f32 %v578_v16, %v4467_v15  ;;  %v958_v21 = vadd.f32 %v957_v17, %v4467_v15 }
 0x14f   : > { %v668_v22 = vadd.f32 %v667_v57, %v639_v10  ;;  %v1047_v23 = vadd.f32 %v1046_v58, %v1018_v11  ;;  %v641_v24 = vmax.f32 %v577_v12, 0.0  ;;  %v1020_v25 = vmax.f32 %v956_v14, 0.0  ;;  %2091 = vmatmul.mubr.bf16.gmra.mrb[148].mxu0 %v4057_v4  ;;  %2468 = vmatmul.mubr.bf16.gmra.mrb[148].mxu1 %v4058_v5  ;;  %v4061_v11 = vld [vmem:[%s4218_s13 + $0x258] sm:$0xff]  }
 0x150   : > { %v700_v26 = vadd.f32 %v699_v59, %v640_v18  ;;  %v1078_v27 = vadd.f32 %v1077_v60, %v1019_v19  ;;  %v642_v28 = vmax.f32 %v579_v20, 0.0  ;;  %v1021_v29 = vmax.f32 %v958_v21, 0.0  ;;  %2100 = vmatprep.mubr.bf16.mxu0 %v4126_v2  ;;  %2477 = vmatprep.mubr.bf16.mxu1 %v4126_v2  ;;  %v4062_v12 = vld [vmem:[%s4218_s13 + $0x2bc] sm:$0xff]  }
 0x151   : > { %v669_v30 = vadd.f32 %v668_v22, %v641_v24  ;;  %v1048_v31 = vadd.f32 %v1047_v23, %v1020_v25 }
 0x152   : > { %v701_v32 = vadd.f32 %v700_v26, %v642_v28  ;;  %v1079_v33 = vadd.f32 %v1078_v27, %v1021_v29  ;;  %v582_v34 = vpop.f32.mrb[44].mxu0  ;;  %v961_v35 = vpop.f32.mrb[44].mxu1 }
 0x153   : > { %v583_v37 = vadd.f32 %v582_v34, %v4462_v13  ;;  %v962_v38 = vadd.f32 %v961_v35, %v4462_v13  ;;  %v584_v39 = vpop.f32.mrb[45].mxu0  ;;  %v963_v40 = vpop.f32.mrb[45].mxu1 }
 0x154   : > { %v585_v42 = vadd.f32 %v584_v39, %v4467_v15  ;;  %v964_v43 = vadd.f32 %v963_v40, %v4467_v15  ;;  %v586_v44 = vpop.f32.mrb[46].mxu0  ;;  %v965_v45 = vpop.f32.mrb[46].mxu1 }
 0x155   : > { %v643_v46 = vmax.f32 %v583_v37, 0.0  ;;  %v1022_v47 = vmax.f32 %v962_v38, 0.0  ;;  %v587_v48 = vadd.f32 %v586_v44, %v4462_v13  ;;  %v966_v49 = vadd.f32 %v965_v45, %v4462_v13  ;;  %v588_v50 = vpop.f32.mrb[47].mxu0  ;;  %v967_v51 = vpop.f32.mrb[47].mxu1  ;;  %v4064_v44 = vld [vmem:[%s4218_s13 + $0x2c4] sm:$0xff]  }
 0x156   : > { %v644_v52 = vmax.f32 %v585_v42, 0.0  ;;  %v1023_v53 = vmax.f32 %v964_v43, 0.0  ;;  %v589_v54 = vadd.f32 %v588_v50, %v4467_v15  ;;  %v968_v55 = vadd.f32 %v967_v51, %v4467_v15  ;;  %v4063_v43 = vld [vmem:[%s4218_s13 + $0x260] sm:$0xff]  }
 0x157   : > { %v670_v56 = vadd.f32 %v669_v30, %v643_v46  ;;  %v1049_v57 = vadd.f32 %v1048_v31, %v1022_v47  ;;  %v645_v58 = vmax.f32 %v587_v48, 0.0  ;;  %v1024_v59 = vmax.f32 %v966_v49, 0.0  ;;  %2101 = vmatmul.mubr.bf16.gmra.mrb[152].mxu0 %v4059_v36  ;;  %2478 = vmatmul.mubr.bf16.gmra.mrb[152].mxu1 %v4060_v41 }
 0x158   : > { %v702_v60 = vadd.f32 %v701_v32, %v644_v52  ;;  %v1080_v61 = vadd.f32 %v1079_v33, %v1023_v53  ;;  %v646_v62 = vmax.f32 %v589_v54, 0.0  ;;  %v1025_v63 = vmax.f32 %v968_v55, 0.0  ;;  %2734 = vmatprep.mubr.bf16.mxu0 %v4126_v2  ;;  %3111 = vmatprep.mubr.bf16.mxu1 %v4126_v2 }
 0x159   : > { %v671_v0 = vadd.f32 %v670_v56, %v645_v58  ;;  %v1050_v1 = vadd.f32 %v1049_v57, %v1024_v59 }
 0x15a   : > { %v703_v3 = vadd.f32 %v702_v60, %v646_v62  ;;  %v1081_v4 = vadd.f32 %v1080_v61, %v1025_v63  ;;  %v592_v5 = vpop.f32.mrb[48].mxu0  ;;  %v971_v6 = vpop.f32.mrb[48].mxu1 }
 0x15b   : > { %v593_v7 = vadd.f32 %v592_v5, %v4462_v13  ;;  %v972_v8 = vadd.f32 %v971_v6, %v4462_v13  ;;  %v594_v9 = vpop.f32.mrb[49].mxu0  ;;  %v973_v10 = vpop.f32.mrb[49].mxu1 }
 0x15c   : > { %v595_v14 = vadd.f32 %v594_v9, %v4467_v15  ;;  %v974_v16 = vadd.f32 %v973_v10, %v4467_v15  ;;  %v596_v17 = vpop.f32.mrb[50].mxu0  ;;  %v975_v18 = vpop.f32.mrb[50].mxu1 }
 0x15d   : > { %v647_v19 = vmax.f32 %v593_v7, 0.0  ;;  %v1026_v20 = vmax.f32 %v972_v8, 0.0  ;;  %v597_v21 = vpop.f32.mrb[51].mxu0  ;;  %v976_v22 = vpop.f32.mrb[51].mxu1 }
 0x15e   : > { %v648_v23 = vmax.f32 %v595_v14, 0.0  ;;  %v1027_v24 = vmax.f32 %v974_v16, 0.0 }
 0x15f   : > { %v673_v25 = vsel %vm672_vm0, %v647_v19, 0.0  ;;  %v1051_v26 = vsel %vm672_vm0, %v1026_v20, 0.0  ;;  %2735 = vmatmul.mubr.bf16.vlgmr.msra.gmra.mrb[156].mxu0 %v4061_v11  ;;  %3112 = vmatmul.mubr.bf16.vlgmr.msra.gmra.mrb[156].mxu1 %v4062_v12 }
 0x160   : > { %v674_v27 = vadd.f32 %v673_v25, %v671_v0  ;;  %v1052_v28 = vadd.f32 %v1051_v26, %v1050_v1  ;;  %v704_v29 = vsel %vm672_vm0, %v648_v23, 0.0  ;;  %v1082_v30 = vsel %vm672_vm0, %v1027_v24, 0.0  ;;  %2744 = vmatprep.mubr.bf16.mxu0 %v4126_v2  ;;  %3121 = vmatprep.mubr.bf16.mxu1 %v4126_v2  ;;  %v4065_v24 = vld [vmem:[%s4218_s13 + $0x268] sm:$0xff]  }
 0x161   : > { %v705_v31 = vadd.f32 %v704_v29, %v703_v3  ;;  %v1083_v32 = vadd.f32 %v1082_v30, %v1081_v4  ;;  %v4066_v25 = vld [vmem:[%s4218_s13 + $0x2cc] sm:$0xff]  }
 0x162   : > { %v675_v33 = vrot.slane %v674_v27, 4  ;;  %v1053_v34 = vrot.slane %v1052_v28, 4  ;;  %v1228_v35 = vpop.f32.mrb[52].mxu0  ;;  %v1605_v36 = vpop.f32.mrb[52].mxu1 }
 0x163   : > { %v706_v37 = vrot.slane %v705_v31, 4  ;;  %v1084_v38 = vrot.slane %v1083_v32, 4  ;;  %v1229_v39 = vadd.f32 %v1228_v35, %v4462_v13  ;;  %v1606_v40 = vadd.f32 %v1605_v36, %v4462_v13  ;;  %v1230_v41 = vpop.f32.mrb[53].mxu0  ;;  %v1607_v42 = vpop.f32.mrb[53].mxu1 }
 0x164   : > { %v676_v45 = vadd.f32 %v675_v33, %v674_v27  ;;  %v1054_v46 = vadd.f32 %v1053_v34, %v1052_v28  ;;  %v1231_v47 = vadd.f32 %v1230_v41, %v4467_v15  ;;  %v1608_v48 = vadd.f32 %v1607_v42, %v4467_v15  ;;  %v1232_v49 = vpop.f32.mrb[54].mxu0  ;;  %v1609_v50 = vpop.f32.mrb[54].mxu1 }
 0x165   : > { %v707_v51 = vadd.f32 %v706_v37, %v705_v31  ;;  %v1085_v52 = vadd.f32 %v1084_v38, %v1083_v32  ;;  %v1355_v53 = vmax.f32 %v1229_v39, 0.0  ;;  %v1732_v54 = vmax.f32 %v1606_v40, 0.0  ;;  %v1234_v55 = vpop.f32.mrb[55].mxu0  ;;  %v1611_v56 = vpop.f32.mrb[55].mxu1 }
 0x166   : > { %v677_v57 = vrot.slane %v676_v45, 2  ;;  %v1055_v58 = vrot.slane %v1054_v46, 2  ;;  %v1356_v59 = vmax.f32 %v1231_v47, 0.0  ;;  %v1733_v60 = vmax.f32 %v1608_v48, 0.0 }
 0x167   : > { %v708_v61 = vrot.slane %v707_v51, 2  ;;  %v1086_v62 = vrot.slane %v1085_v52, 2  ;;  %v1233_v63 = vadd.f32 %v1232_v49, %v4462_v13  ;;  %v1610_v0 = vadd.f32 %v1609_v50, %v4462_v13  ;;  %2745 = vmatmul.mubr.bf16.gmra.mrb[160].mxu0 %v4063_v43  ;;  %3122 = vmatmul.mubr.bf16.gmra.mrb[160].mxu1 %v4064_v44 }
 0x168   : > { %v678_v1 = vadd.f32 %v677_v57, %v676_v45  ;;  %v1056_v3 = vadd.f32 %v1055_v58, %v1054_v46  ;;  %v1235_v4 = vadd.f32 %v1234_v55, %v4467_v15  ;;  %v1612_v5 = vadd.f32 %v1611_v56, %v4467_v15  ;;  %2754 = vmatprep.mubr.bf16.mxu0 %v4126_v2 }
 0x169   : > { %v709_v6 = vadd.f32 %v708_v61, %v707_v51  ;;  %v1087_v7 = vadd.f32 %v1086_v62, %v1085_v52  ;;  %v1357_v8 = vmax.f32 %v1233_v63, 0.0  ;;  %v1734_v9 = vmax.f32 %v1610_v0, 0.0  ;;  %3131 = vmatprep.mubr.bf16.mxu1 %v4126_v2 }
 0x16a   : > { %v679_v10 = vrot.slane %v678_v1, 1  ;;  %v1057_v11 = vrot.slane %v1056_v3, 1  ;;  %v1358_v12 = vmax.f32 %v1235_v4, 0.0  ;;  %v1735_v14 = vmax.f32 %v1612_v5, 0.0  ;;  %v1238_v16 = vpop.f32.mrb[56].mxu0  ;;  %v1615_v17 = vpop.f32.mrb[56].mxu1 }
 0x16b   : > { %v710_v18 = vrot.slane %v709_v6, 1  ;;  %v1088_v19 = vrot.slane %v1087_v7, 1  ;;  %v1405_v20 = vadd.f32 %v1357_v8, %v1355_v53  ;;  %v1782_v21 = vadd.f32 %v1734_v9, %v1732_v54  ;;  %v1240_v22 = vpop.f32.mrb[57].mxu0  ;;  %v1617_v23 = vpop.f32.mrb[57].mxu1 }
 0x16c   : > { %v680_v26 = vadd.f32 %v679_v10, %v678_v1  ;;  %v1058_v27 = vadd.f32 %v1057_v11, %v1056_v3  ;;  %v1436_v28 = vadd.f32 %v1358_v12, %v1356_v59  ;;  %v1813_v29 = vadd.f32 %v1735_v14, %v1733_v60  ;;  %v1242_v30 = vpop.f32.mrb[58].mxu0  ;;  %v1619_v31 = vpop.f32.mrb[58].mxu1  ;;  %v4067_v3 = vld [vmem:[%s4218_s13 + $0x270] sm:$0xff]  }
 0x16d   : > { %v711_v32 = vadd.f32 %v710_v18, %v709_v6  ;;  %v1089_v33 = vadd.f32 %v1088_v19, %v1087_v7  ;;  %v1239_v34 = vadd.f32 %v1238_v16, %v4462_v13  ;;  %v1616_v35 = vadd.f32 %v1615_v17, %v4462_v13  ;;  %v1244_v36 = vpop.f32.mrb[59].mxu0  ;;  %v1621_v37 = vpop.f32.mrb[59].mxu1  ;;  %v4068_v10 = vld [vmem:[%s4218_s13 + $0x2d4] sm:$0xff]  }
 0x16e   : > { %v713_v38 = vmul.f32 0.0051020407, %v680_v26  ;;  %v1090_v39 = vmul.f32 0.0051020407, %v1058_v27  ;;  %v1241_v40 = vadd.f32 %v1240_v22, %v4467_v15  ;;  %v1618_v41 = vadd.f32 %v1617_v23, %v4467_v15 }
 0x16f   : > { %v714_v42 = vmul.f32 0.0051020407, %v711_v32  ;;  %v1091_v43 = vmul.f32 0.0051020407, %v1089_v33  ;;  %v1359_v44 = vmax.f32 %v1239_v34, 0.0  ;;  %v1736_v45 = vmax.f32 %v1616_v35, 0.0  ;;  %2755 = vmatmul.mubr.bf16.gmra.mrb[164].mxu0 %v4065_v24  ;;  %3132 = vmatmul.mubr.bf16.gmra.mrb[164].mxu1 %v4066_v25 }
 0x170   : > { %v4688_v46 = vsel %vm3354_vm1, %v713_v38, %v1090_v39  ;;  %v1360_v47 = vmax.f32 %v1241_v40, 0.0  ;;  %v1737_v48 = vmax.f32 %v1618_v41, 0.0  ;;  %v1243_v49 = vadd.f32 %v1242_v30, %v4462_v13  ;;  %2764 = vmatprep.mubr.bf16.mxu0 %v4126_v2  ;;  %3141 = vmatprep.mubr.bf16.mxu1 %v4126_v2 }
 0x171   : > { %v4694_v50 = vsel %vm3354_vm1, %v714_v42, %v1091_v43  ;;  %v1406_v51 = vadd.f32 %v1405_v20, %v1359_v44  ;;  %v1783_v52 = vadd.f32 %v1782_v21, %v1736_v45  ;;  %v1620_v53 = vadd.f32 %v1619_v31, %v4462_v13  ;;  %v4069_v43 = vld [vmem:[%s4218_s13 + $0x278] sm:$0xff]  }
 0x172   : > { %v1437_v54 = vadd.f32 %v1436_v28, %v1360_v47  ;;  %v1814_v55 = vadd.f32 %v1813_v29, %v1737_v48  ;;  %v1361_v56 = vmax.f32 %v1243_v49, 0.0  ;;  %v1245_v57 = vadd.f32 %v1244_v36, %v4467_v15  ;;  %v1248_v58 = vpop.f32.mrb[60].mxu0  ;;  %v1625_v59 = vpop.f32.mrb[60].mxu1 }
 0x173   : > { %v1738_v60 = vmax.f32 %v1620_v53, 0.0  ;;  %v1622_v61 = vadd.f32 %v1621_v37, %v4467_v15  ;;  %v1249_v62 = vadd.f32 %v1248_v58, %v4462_v13  ;;  %v1626_v63 = vadd.f32 %v1625_v59, %v4462_v13  ;;  %v1250_v0 = vpop.f32.mrb[61].mxu0  ;;  %v1627_v1 = vpop.f32.mrb[61].mxu1 }
 0x174   : > { %v1407_v4 = vadd.f32 %v1406_v51, %v1361_v56  ;;  %v1362_v5 = vmax.f32 %v1245_v57, 0.0  ;;  %v1251_v6 = vadd.f32 %v1250_v0, %v4467_v15  ;;  %v1628_v7 = vadd.f32 %v1627_v1, %v4467_v15  ;;  %v1252_v8 = vpop.f32.mrb[62].mxu0  ;;  %v1629_v9 = vpop.f32.mrb[62].mxu1 }
 0x175   : > { %v1784_v11 = vadd.f32 %v1783_v52, %v1738_v60  ;;  %v1739_v12 = vmax.f32 %v1622_v61, 0.0  ;;  %v1363_v14 = vmax.f32 %v1249_v62, 0.0  ;;  %v1740_v16 = vmax.f32 %v1626_v63, 0.0  ;;  %v1254_v17 = vpop.f32.mrb[63].mxu0  ;;  %v1631_v18 = vpop.f32.mrb[63].mxu1  ;;  %v4070_v52 = vld [vmem:[%s4218_s13 + $0x2dc] sm:$0xff]  }
 0x176   : > { %v1438_v19 = vadd.f32 %v1437_v54, %v1362_v5  ;;  %v1364_v20 = vmax.f32 %v1251_v6, 0.0  ;;  %v1741_v21 = vmax.f32 %v1628_v7, 0.0  ;;  %v1253_v22 = vadd.f32 %v1252_v8, %v4462_v13 }
 0x177   : > { %v1815_v23 = vadd.f32 %v1814_v55, %v1739_v12  ;;  %v1408_v24 = vadd.f32 %v1407_v4, %v1363_v14  ;;  %v1785_v25 = vadd.f32 %v1784_v11, %v1740_v16  ;;  %v1630_v26 = vadd.f32 %v1629_v9, %v4462_v13  ;;  %2765 = vmatmul.mubr.bf16.gmra.mrb[168].mxu0 %v4067_v3 }
 0x178   : > { %v1439_v27 = vadd.f32 %v1438_v19, %v1364_v20  ;;  %v1365_v28 = vmax.f32 %v1253_v22, 0.0  ;;  %v1255_v29 = vadd.f32 %v1254_v17, %v4467_v15  ;;  %v1632_v30 = vadd.f32 %v1631_v18, %v4467_v15  ;;  %3142 = vmatmul.mubr.bf16.gmra.mrb[168].mxu1 %v4068_v10  ;;  %2774 = vmatprep.mubr.bf16.mxu0 %v4126_v2  ;;  %v4071_v20 = vld [vmem:[%s4218_s13 + $0x280] sm:$0xff]  }
 0x179   : > { %v1816_v31 = vadd.f32 %v1815_v23, %v1741_v21  ;;  %v1742_v32 = vmax.f32 %v1630_v26, 0.0  ;;  %3151 = vmatprep.mubr.bf16.mxu1 %v4126_v2 }
 0x17a   : > { %v1409_v33 = vadd.f32 %v1408_v24, %v1365_v28  ;;  %v1366_v34 = vmax.f32 %v1255_v29, 0.0  ;;  %v1743_v35 = vmax.f32 %v1632_v30, 0.0  ;;  %v1258_v36 = vpop.f32.mrb[64].mxu0  ;;  %v1635_v37 = vpop.f32.mrb[64].mxu1 }
 0x17b   : > { %v1786_v38 = vadd.f32 %v1785_v25, %v1742_v32  ;;  %v1259_v39 = vadd.f32 %v1258_v36, %v4462_v13  ;;  %v1636_v40 = vadd.f32 %v1635_v37, %v4462_v13  ;;  %v1260_v41 = vpop.f32.mrb[65].mxu0  ;;  %v1637_v42 = vpop.f32.mrb[65].mxu1  ;;  %v4072_v25 = vld [vmem:[%s4218_s13 + $0x2e4] sm:$0xff]  }
 0x17c   : > { %v1440_v44 = vadd.f32 %v1439_v27, %v1366_v34  ;;  %v1817_v45 = vadd.f32 %v1816_v31, %v1743_v35  ;;  %v1261_v47 = vadd.f32 %v1260_v41, %v4467_v15  ;;  %v1638_v48 = vadd.f32 %v1637_v42, %v4467_v15  ;;  %v1262_v49 = vpop.f32.mrb[66].mxu0  ;;  %v1639_v51 = vpop.f32.mrb[66].mxu1 }
 0x17d   : > { %v1367_v53 = vmax.f32 %v1259_v39, 0.0  ;;  %v1744_v54 = vmax.f32 %v1636_v40, 0.0  ;;  %v1263_v55 = vadd.f32 %v1262_v49, %v4462_v13  ;;  %v1640_v56 = vadd.f32 %v1639_v51, %v4462_v13  ;;  %v1264_v57 = vpop.f32.mrb[67].mxu0  ;;  %v1641_v58 = vpop.f32.mrb[67].mxu1 }
 0x17e   : > { %v1368_v59 = vmax.f32 %v1261_v47, 0.0  ;;  %v1745_v60 = vmax.f32 %v1638_v48, 0.0  ;;  %v1265_v61 = vadd.f32 %v1264_v57, %v4467_v15  ;;  %v1642_v62 = vadd.f32 %v1641_v58, %v4467_v15 }
 0x17f   : > { %v1410_v63 = vadd.f32 %v1409_v33, %v1367_v53  ;;  %v1787_v0 = vadd.f32 %v1786_v38, %v1744_v54  ;;  %v1369_v1 = vmax.f32 %v1263_v55, 0.0  ;;  %v1746_v3 = vmax.f32 %v1640_v56, 0.0  ;;  %2775 = vmatmul.mubr.bf16.gmra.mrb[172].mxu0 %v4069_v43  ;;  %v4073_v56 = vld [vmem:[%s4218_s13 + $0x288] sm:$0xff]  }
 0x180   : > { %v1441_v4 = vadd.f32 %v1440_v44, %v1368_v59  ;;  %v1818_v5 = vadd.f32 %v1817_v45, %v1745_v60  ;;  %v1370_v6 = vmax.f32 %v1265_v61, 0.0  ;;  %v1747_v7 = vmax.f32 %v1642_v62, 0.0  ;;  %3152 = vmatmul.mubr.bf16.gmra.mrb[172].mxu1 %v4070_v52  ;;  %2784 = vmatprep.mubr.bf16.mxu0 %v4126_v2  ;;  %v4074_v61 = vld [vmem:[%s4218_s13 + $0x2ec] sm:$0xff]  }
 0x181   : > { %v1411_v8 = vadd.f32 %v1410_v63, %v1369_v1  ;;  %v1788_v9 = vadd.f32 %v1787_v0, %v1746_v3  ;;  %3161 = vmatprep.mubr.bf16.mxu1 %v4126_v2 }
 0x182   : > { %v1442_v10 = vadd.f32 %v1441_v4, %v1370_v6  ;;  %v1819_v11 = vadd.f32 %v1818_v5, %v1747_v7  ;;  %v1268_v12 = vpop.f32.mrb[68].mxu0  ;;  %v1645_v14 = vpop.f32.mrb[68].mxu1 }
 0x183   : > { %v1269_v16 = vadd.f32 %v1268_v12, %v4462_v13  ;;  %v1646_v17 = vadd.f32 %v1645_v14, %v4462_v13  ;;  %v1270_v18 = vpop.f32.mrb[69].mxu0  ;;  %v1647_v19 = vpop.f32.mrb[69].mxu1 }
 0x184   : > { %v1271_v21 = vadd.f32 %v1270_v18, %v4467_v15  ;;  %v1648_v22 = vadd.f32 %v1647_v19, %v4467_v15  ;;  %v1272_v23 = vpop.f32.mrb[70].mxu0  ;;  %v1649_v24 = vpop.f32.mrb[70].mxu1 }
 0x185   : > { %v1371_v26 = vmax.f32 %v1269_v16, 0.0  ;;  %v1748_v27 = vmax.f32 %v1646_v17, 0.0  ;;  %v1273_v28 = vadd.f32 %v1272_v23, %v4462_v13  ;;  %v1650_v29 = vadd.f32 %v1649_v24, %v4462_v13  ;;  %v1274_v30 = vpop.f32.mrb[71].mxu0  ;;  %v1651_v31 = vpop.f32.mrb[71].mxu1 }
 0x186   : > { %v1372_v32 = vmax.f32 %v1271_v21, 0.0  ;;  %v1749_v33 = vmax.f32 %v1648_v22, 0.0  ;;  %v1275_v34 = vadd.f32 %v1274_v30, %v4467_v15  ;;  %v1652_v35 = vadd.f32 %v1651_v31, %v4467_v15 }
 0x187   : > { %v1412_v36 = vadd.f32 %v1411_v8, %v1371_v26  ;;  %v1789_v37 = vadd.f32 %v1788_v9, %v1748_v27  ;;  %v1373_v38 = vmax.f32 %v1273_v28, 0.0  ;;  %v1750_v39 = vmax.f32 %v1650_v29, 0.0  ;;  %2785 = vmatmul.mubr.bf16.gmra.mrb[176].mxu0 %v4071_v20  ;;  %v4075_v29 = vld [vmem:[%s4218_s13 + $0x290] sm:$0xff]  }
 0x188   : > { %v1443_v40 = vadd.f32 %v1442_v10, %v1372_v32  ;;  %v1820_v41 = vadd.f32 %v1819_v11, %v1749_v33  ;;  %v1374_v42 = vmax.f32 %v1275_v34, 0.0  ;;  %v1751_v43 = vmax.f32 %v1652_v35, 0.0  ;;  %3162 = vmatmul.mubr.bf16.gmra.mrb[176].mxu1 %v4072_v25  ;;  %2794 = vmatprep.mubr.bf16.mxu0 %v4126_v2  ;;  %v4076_v34 = vld [vmem:[%s4218_s13 + $0x2f4] sm:$0xff]  }
 0x189   : > { %v1413_v44 = vadd.f32 %v1412_v36, %v1373_v38  ;;  %v1790_v45 = vadd.f32 %v1789_v37, %v1750_v39  ;;  %3171 = vmatprep.mubr.bf16.mxu1 %v4126_v2 }
 0x18a   : > { %v1444_v47 = vadd.f32 %v1443_v40, %v1374_v42  ;;  %v1821_v48 = vadd.f32 %v1820_v41, %v1751_v43  ;;  %v1278_v49 = vpop.f32.mrb[72].mxu0  ;;  %v1655_v51 = vpop.f32.mrb[72].mxu1 }
 0x18b   : > { %v1279_v52 = vadd.f32 %v1278_v49, %v4462_v13  ;;  %v1656_v53 = vadd.f32 %v1655_v51, %v4462_v13  ;;  %v1280_v54 = vpop.f32.mrb[73].mxu0  ;;  %v1657_v55 = vpop.f32.mrb[73].mxu1 }
 0x18c   : > { %v1281_v57 = vadd.f32 %v1280_v54, %v4467_v15  ;;  %v1658_v58 = vadd.f32 %v1657_v55, %v4467_v15  ;;  %v1282_v59 = vpop.f32.mrb[74].mxu0  ;;  %v1659_v60 = vpop.f32.mrb[74].mxu1 }
 0x18d   : > { %v1375_v62 = vmax.f32 %v1279_v52, 0.0  ;;  %v1752_v63 = vmax.f32 %v1656_v53, 0.0  ;;  %v1283_v0 = vadd.f32 %v1282_v59, %v4462_v13  ;;  %v1660_v1 = vadd.f32 %v1659_v60, %v4462_v13  ;;  %v1284_v3 = vpop.f32.mrb[75].mxu0  ;;  %v1661_v4 = vpop.f32.mrb[75].mxu1 }
 0x18e   : > { %v1376_v5 = vmax.f32 %v1281_v57, 0.0  ;;  %v1753_v6 = vmax.f32 %v1658_v58, 0.0  ;;  %v1285_v7 = vadd.f32 %v1284_v3, %v4467_v15  ;;  %v1662_v8 = vadd.f32 %v1661_v4, %v4467_v15 }
 0x18f   : > { %v1414_v9 = vadd.f32 %v1413_v44, %v1375_v62  ;;  %v1791_v10 = vadd.f32 %v1790_v45, %v1752_v63  ;;  %v1377_v11 = vmax.f32 %v1283_v0, 0.0  ;;  %v1754_v12 = vmax.f32 %v1660_v1, 0.0  ;;  %2795 = vmatmul.mubr.bf16.gmra.mrb[180].mxu0 %v4073_v56  ;;  %v4077_v1 = vld [vmem:[%s4218_s13 + $0x298] sm:$0xff]  }
 0x190   : > { %v1445_v14 = vadd.f32 %v1444_v47, %v1376_v5  ;;  %v1822_v16 = vadd.f32 %v1821_v48, %v1753_v6  ;;  %v1378_v17 = vmax.f32 %v1285_v7, 0.0  ;;  %v1755_v18 = vmax.f32 %v1662_v8, 0.0  ;;  %3172 = vmatmul.mubr.bf16.gmra.mrb[180].mxu1 %v4074_v61  ;;  %2804 = vmatprep.mubr.bf16.mxu0 %v4126_v2  ;;  %v4078_v7 = vld [vmem:[%s4218_s13 + $0x2fc] sm:$0xff]  }
 0x191   : > { %v1415_v19 = vadd.f32 %v1414_v9, %v1377_v11  ;;  %v1792_v20 = vadd.f32 %v1791_v10, %v1754_v12  ;;  %3181 = vmatprep.mubr.bf16.mxu1 %v4126_v2 }
 0x192   : > { %v1446_v21 = vadd.f32 %v1445_v14, %v1378_v17  ;;  %v1823_v22 = vadd.f32 %v1822_v16, %v1755_v18  ;;  %v1288_v23 = vpop.f32.mrb[76].mxu0  ;;  %v1665_v24 = vpop.f32.mrb[76].mxu1 }
 0x193   : > { %v1289_v25 = vadd.f32 %v1288_v23, %v4462_v13  ;;  %v1666_v26 = vadd.f32 %v1665_v24, %v4462_v13  ;;  %v1290_v27 = vpop.f32.mrb[77].mxu0  ;;  %v1667_v28 = vpop.f32.mrb[77].mxu1 }
 0x194   : > { %v1291_v30 = vadd.f32 %v1290_v27, %v4467_v15  ;;  %v1668_v31 = vadd.f32 %v1667_v28, %v4467_v15  ;;  %v1292_v32 = vpop.f32.mrb[78].mxu0  ;;  %v1669_v33 = vpop.f32.mrb[78].mxu1 }
 0x195   : > { %v1379_v35 = vmax.f32 %v1289_v25, 0.0  ;;  %v1756_v36 = vmax.f32 %v1666_v26, 0.0  ;;  %v1293_v37 = vadd.f32 %v1292_v32, %v4462_v13  ;;  %v1670_v38 = vadd.f32 %v1669_v33, %v4462_v13  ;;  %v1294_v39 = vpop.f32.mrb[79].mxu0  ;;  %v1671_v40 = vpop.f32.mrb[79].mxu1 }
 0x196   : > { %v1380_v41 = vmax.f32 %v1291_v30, 0.0  ;;  %v1757_v42 = vmax.f32 %v1668_v31, 0.0  ;;  %v1295_v43 = vadd.f32 %v1294_v39, %v4467_v15  ;;  %v1672_v44 = vadd.f32 %v1671_v40, %v4467_v15 }
 0x197   : > { %v1416_v45 = vadd.f32 %v1415_v19, %v1379_v35  ;;  %v1793_v47 = vadd.f32 %v1792_v20, %v1756_v36  ;;  %v1381_v48 = vmax.f32 %v1293_v37, 0.0  ;;  %v1758_v49 = vmax.f32 %v1670_v38, 0.0  ;;  %2805 = vmatmul.mubr.bf16.gmra.mrb[184].mxu0 %v4075_v29  ;;  %v4079_v38 = vld [vmem:[%s4218_s13 + $0x2a0] sm:$0xff]  }
 0x198   : > { %v1447_v51 = vadd.f32 %v1446_v21, %v1380_v41  ;;  %v1824_v52 = vadd.f32 %v1823_v22, %v1757_v42  ;;  %v1382_v53 = vmax.f32 %v1295_v43, 0.0  ;;  %v1759_v54 = vmax.f32 %v1672_v44, 0.0  ;;  %3182 = vmatmul.mubr.bf16.gmra.mrb[184].mxu1 %v4076_v34  ;;  %2814 = vmatprep.mubr.bf16.mxu0 %v4126_v2  ;;  %v4080_v43 = vld [vmem:[%s4218_s13 + $0x304] sm:$0xff]  }
 0x199   : > { %v1417_v55 = vadd.f32 %v1416_v45, %v1381_v48  ;;  %v1794_v56 = vadd.f32 %v1793_v47, %v1758_v49  ;;  %3191 = vmatprep.mubr.bf16.mxu1 %v4126_v2 }
 0x19a   : > { %v1448_v57 = vadd.f32 %v1447_v51, %v1382_v53  ;;  %v1825_v58 = vadd.f32 %v1824_v52, %v1759_v54  ;;  %v1298_v59 = vpop.f32.mrb[80].mxu0  ;;  %v1675_v60 = vpop.f32.mrb[80].mxu1 }
 0x19b   : > { %v1299_v61 = vadd.f32 %v1298_v59, %v4462_v13  ;;  %v1676_v62 = vadd.f32 %v1675_v60, %v4462_v13  ;;  %v1300_v63 = vpop.f32.mrb[81].mxu0  ;;  %v1677_v0 = vpop.f32.mrb[81].mxu1 }
 0x19c   : > { %v1301_v3 = vadd.f32 %v1300_v63, %v4467_v15  ;;  %v1678_v4 = vadd.f32 %v1677_v0, %v4467_v15  ;;  %v1302_v5 = vpop.f32.mrb[82].mxu0  ;;  %v1679_v6 = vpop.f32.mrb[82].mxu1 }
 0x19d   : > { %v1383_v8 = vmax.f32 %v1299_v61, 0.0  ;;  %v1760_v9 = vmax.f32 %v1676_v62, 0.0  ;;  %v1303_v10 = vadd.f32 %v1302_v5, %v4462_v13  ;;  %v1680_v11 = vadd.f32 %v1679_v6, %v4462_v13  ;;  %v1304_v12 = vpop.f32.mrb[83].mxu0  ;;  %v1681_v14 = vpop.f32.mrb[83].mxu1 }
 0x19e   : > { %v1384_v16 = vmax.f32 %v1301_v3, 0.0  ;;  %v1761_v17 = vmax.f32 %v1678_v4, 0.0  ;;  %v1305_v18 = vadd.f32 %v1304_v12, %v4467_v15  ;;  %v1682_v19 = vadd.f32 %v1681_v14, %v4467_v15 }
 0x19f   : > { %v1418_v20 = vadd.f32 %v1417_v55, %v1383_v8  ;;  %v1795_v21 = vadd.f32 %v1794_v56, %v1760_v9  ;;  %v1385_v22 = vmax.f32 %v1303_v10, 0.0  ;;  %v1762_v23 = vmax.f32 %v1680_v11, 0.0  ;;  %2815 = vmatmul.mubr.bf16.gmra.mrb[188].mxu0 %v4077_v1  ;;  %v4081_v11 = vld [vmem:[%s4218_s13 + $0x2a8] sm:$0xff]  }
 0x1a0   : > { %v1449_v24 = vadd.f32 %v1448_v57, %v1384_v16  ;;  %v1826_v25 = vadd.f32 %v1825_v58, %v1761_v17  ;;  %v1386_v26 = vmax.f32 %v1305_v18, 0.0  ;;  %v1763_v27 = vmax.f32 %v1682_v19, 0.0  ;;  %3192 = vmatmul.mubr.bf16.gmra.mrb[188].mxu1 %v4078_v7  ;;  %2824 = vmatprep.mubr.bf16.mxu0 %v4126_v2  ;;  %v4082_v18 = vld [vmem:[%s4218_s13 + $0x30c] sm:$0xff]  }
 0x1a1   : > { %v1419_v28 = vadd.f32 %v1418_v20, %v1385_v22  ;;  %v1796_v29 = vadd.f32 %v1795_v21, %v1762_v23  ;;  %3201 = vmatprep.mubr.bf16.mxu1 %v4126_v2 }
 0x1a2   : > { %v1450_v30 = vadd.f32 %v1449_v24, %v1386_v26  ;;  %v1827_v31 = vadd.f32 %v1826_v25, %v1763_v27  ;;  %v1308_v32 = vpop.f32.mrb[84].mxu0  ;;  %v1685_v33 = vpop.f32.mrb[84].mxu1 }
 0x1a3   : > { %v1309_v34 = vadd.f32 %v1308_v32, %v4462_v13  ;;  %v1686_v35 = vadd.f32 %v1685_v33, %v4462_v13  ;;  %v1310_v36 = vpop.f32.mrb[85].mxu0  ;;  %v1687_v37 = vpop.f32.mrb[85].mxu1 }
 0x1a4   : > { %v1311_v39 = vadd.f32 %v1310_v36, %v4467_v15  ;;  %v1688_v40 = vadd.f32 %v1687_v37, %v4467_v15  ;;  %v1312_v41 = vpop.f32.mrb[86].mxu0  ;;  %v1689_v42 = vpop.f32.mrb[86].mxu1 }
 0x1a5   : > { %v1387_v44 = vmax.f32 %v1309_v34, 0.0  ;;  %v1764_v45 = vmax.f32 %v1686_v35, 0.0  ;;  %v1313_v47 = vadd.f32 %v1312_v41, %v4462_v13  ;;  %v1690_v48 = vadd.f32 %v1689_v42, %v4462_v13  ;;  %v1314_v49 = vpop.f32.mrb[87].mxu0  ;;  %v1691_v51 = vpop.f32.mrb[87].mxu1 }
 0x1a6   : > { %v1388_v52 = vmax.f32 %v1311_v39, 0.0  ;;  %v1765_v53 = vmax.f32 %v1688_v40, 0.0  ;;  %v1315_v54 = vadd.f32 %v1314_v49, %v4467_v15  ;;  %v1692_v55 = vadd.f32 %v1691_v51, %v4467_v15 }
 0x1a7   : > { %v1420_v56 = vadd.f32 %v1419_v28, %v1387_v44  ;;  %v1797_v57 = vadd.f32 %v1796_v29, %v1764_v45  ;;  %v1389_v58 = vmax.f32 %v1313_v47, 0.0  ;;  %v1766_v59 = vmax.f32 %v1690_v48, 0.0  ;;  %2825 = vmatmul.mubr.bf16.gmra.mrb[192].mxu0 %v4079_v38  ;;  %v4083_v48 = vld [vmem:[%s4218_s13 + $0x2b0] sm:$0xff]  }
 0x1a8   : > { %v1451_v60 = vadd.f32 %v1450_v30, %v1388_v52  ;;  %v1828_v61 = vadd.f32 %v1827_v31, %v1765_v53  ;;  %v1390_v62 = vmax.f32 %v1315_v54, 0.0  ;;  %v1767_v63 = vmax.f32 %v1692_v55, 0.0  ;;  %3202 = vmatmul.mubr.bf16.gmra.mrb[192].mxu1 %v4080_v43  ;;  %2834 = vmatprep.mubr.bf16.mxu0 %v4126_v2  ;;  %v4084_v54 = vld [vmem:[%s4218_s13 + $0x314] sm:$0xff]  }
 0x1a9   : > { %v1421_v0 = vadd.f32 %v1420_v56, %v1389_v58  ;;  %v1798_v1 = vadd.f32 %v1797_v57, %v1766_v59  ;;  %3211 = vmatprep.mubr.bf16.mxu1 %v4126_v2 }
 0x1aa   : > { %v1452_v3 = vadd.f32 %v1451_v60, %v1390_v62  ;;  %v1829_v4 = vadd.f32 %v1828_v61, %v1767_v63  ;;  %v1318_v5 = vpop.f32.mrb[88].mxu0  ;;  %v1695_v6 = vpop.f32.mrb[88].mxu1 }
 0x1ab   : > { %v1319_v7 = vadd.f32 %v1318_v5, %v4462_v13  ;;  %v1696_v8 = vadd.f32 %v1695_v6, %v4462_v13  ;;  %v1320_v9 = vpop.f32.mrb[89].mxu0  ;;  %v1697_v10 = vpop.f32.mrb[89].mxu1 }
 0x1ac   : > { %v1321_v12 = vadd.f32 %v1320_v9, %v4467_v15  ;;  %v1698_v14 = vadd.f32 %v1697_v10, %v4467_v15  ;;  %v1322_v16 = vpop.f32.mrb[90].mxu0  ;;  %v1699_v17 = vpop.f32.mrb[90].mxu1 }
 0x1ad   : > { %v1391_v19 = vmax.f32 %v1319_v7, 0.0  ;;  %v1768_v20 = vmax.f32 %v1696_v8, 0.0  ;;  %v1323_v21 = vadd.f32 %v1322_v16, %v4462_v13  ;;  %v1700_v22 = vadd.f32 %v1699_v17, %v4462_v13  ;;  %v1324_v23 = vpop.f32.mrb[91].mxu0  ;;  %v1701_v24 = vpop.f32.mrb[91].mxu1 }
 0x1ae   : > { %v1392_v25 = vmax.f32 %v1321_v12, 0.0  ;;  %v1769_v26 = vmax.f32 %v1698_v14, 0.0  ;;  %v1325_v27 = vadd.f32 %v1324_v23, %v4467_v15  ;;  %v1702_v28 = vadd.f32 %v1701_v24, %v4467_v15 }
 0x1af   : > { %v1422_v29 = vadd.f32 %v1421_v0, %v1391_v19  ;;  %v1799_v30 = vadd.f32 %v1798_v1, %v1768_v20  ;;  %v1393_v31 = vmax.f32 %v1323_v21, 0.0  ;;  %v1770_v32 = vmax.f32 %v1700_v22, 0.0  ;;  %2835 = vmatmul.mubr.bf16.gmra.mrb[196].mxu0 %v4081_v11  ;;  %v4085_v22 = vld [vmem:[%s4218_s13 + $0x2b8] ss:$0 sps:$4 sm:$0x33]  }
 0x1b0   : > { %v1453_v33 = vadd.f32 %v1452_v3, %v1392_v25  ;;  %v1830_v34 = vadd.f32 %v1829_v4, %v1769_v26  ;;  %v1394_v35 = vmax.f32 %v1325_v27, 0.0  ;;  %v1771_v36 = vmax.f32 %v1702_v28, 0.0  ;;  %3212 = vmatmul.mubr.bf16.gmra.mrb[196].mxu1 %v4082_v18  ;;  %2844 = vmatprep.mubr.bf16.mxu0 %v4126_v2  ;;  %v4086_v27 = vld [vmem:[%s4218_s13 + $0x31c] ss:$0 sps:$4 sm:$0x33]  }
 0x1b1   : > { %v1423_v37 = vadd.f32 %v1422_v29, %v1393_v31  ;;  %v1800_v38 = vadd.f32 %v1799_v30, %v1770_v32  ;;  %3221 = vmatprep.mubr.bf16.mxu1 %v4126_v2 }
 0x1b2   : > { %v1454_v39 = vadd.f32 %v1453_v33, %v1394_v35  ;;  %v1831_v40 = vadd.f32 %v1830_v34, %v1771_v36  ;;  %v1328_v41 = vpop.f32.mrb[92].mxu0  ;;  %v1705_v42 = vpop.f32.mrb[92].mxu1 }
 0x1b3   : > { %v1329_v43 = vadd.f32 %v1328_v41, %v4462_v13  ;;  %v1706_v44 = vadd.f32 %v1705_v42, %v4462_v13  ;;  %v1330_v45 = vpop.f32.mrb[93].mxu0  ;;  %v1707_v47 = vpop.f32.mrb[93].mxu1 }
 0x1b4   : > { %v1331_v49 = vadd.f32 %v1330_v45, %v4467_v15  ;;  %v1708_v51 = vadd.f32 %v1707_v47, %v4467_v15  ;;  %v1332_v52 = vpop.f32.mrb[94].mxu0  ;;  %v1709_v53 = vpop.f32.mrb[94].mxu1 }
 0x1b5   : > { %v1395_v55 = vmax.f32 %v1329_v43, 0.0  ;;  %v1772_v56 = vmax.f32 %v1706_v44, 0.0  ;;  %v1333_v57 = vadd.f32 %v1332_v52, %v4462_v13  ;;  %v1710_v58 = vadd.f32 %v1709_v53, %v4462_v13  ;;  %v1334_v59 = vpop.f32.mrb[95].mxu0  ;;  %v1711_v60 = vpop.f32.mrb[95].mxu1 }
 0x1b6   : > { %v1396_v61 = vmax.f32 %v1331_v49, 0.0  ;;  %v1773_v62 = vmax.f32 %v1708_v51, 0.0  ;;  %v1335_v63 = vadd.f32 %v1334_v59, %v4467_v15  ;;  %v1712_v0 = vadd.f32 %v1711_v60, %v4467_v15 }
 0x1b7   : > { %v1424_v1 = vadd.f32 %v1423_v37, %v1395_v55  ;;  %v1801_v3 = vadd.f32 %v1800_v38, %v1772_v56  ;;  %v1397_v4 = vmax.f32 %v1333_v57, 0.0  ;;  %v1774_v5 = vmax.f32 %v1710_v58, 0.0  ;;  %2845 = vmatmul.mubr.bf16.gmra.mrb[200].mxu0 %v4083_v48 }
 0x1b8   : > { %v1455_v6 = vadd.f32 %v1454_v39, %v1396_v61  ;;  %v1832_v7 = vadd.f32 %v1831_v40, %v1773_v62  ;;  %v1398_v8 = vmax.f32 %v1335_v63, 0.0  ;;  %v1775_v9 = vmax.f32 %v1712_v0, 0.0  ;;  %3222 = vmatmul.mubr.bf16.gmra.mrb[200].mxu1 %v4084_v54  ;;  %2854 = vmatprep.mubr.bf16.mxu0 %v4126_v2 }
 0x1b9   : > { %v1425_v10 = vadd.f32 %v1424_v1, %v1397_v4  ;;  %v1802_v11 = vadd.f32 %v1801_v3, %v1774_v5  ;;  %3231 = vmatprep.mubr.bf16.mxu1 %v4126_v2 }
 0x1ba   : > { %v1456_v12 = vadd.f32 %v1455_v6, %v1398_v8  ;;  %v1833_v14 = vadd.f32 %v1832_v7, %v1775_v9  ;;  %v1338_v16 = vpop.f32.mrb[96].mxu0  ;;  %v1715_v17 = vpop.f32.mrb[96].mxu1 }
 0x1bb   : > { %v1339_v18 = vadd.f32 %v1338_v16, %v4462_v13  ;;  %v1716_v19 = vadd.f32 %v1715_v17, %v4462_v13  ;;  %v1340_v20 = vpop.f32.mrb[97].mxu0  ;;  %v1717_v21 = vpop.f32.mrb[97].mxu1 }
 0x1bc   : > { %v1341_v23 = vadd.f32 %v1340_v20, %v4467_v15  ;;  %v1718_v24 = vadd.f32 %v1717_v21, %v4467_v15  ;;  %v1342_v25 = vpop.f32.mrb[98].mxu0  ;;  %v1719_v26 = vpop.f32.mrb[98].mxu1 }
 0x1bd   : > { %v1399_v28 = vmax.f32 %v1339_v18, 0.0  ;;  %v1776_v2 = vmax.f32 %v1716_v19, 0.0  ;;  %v1343_v29 = vadd.f32 %v1342_v25, %v4462_v13  ;;  %v1720_v30 = vadd.f32 %v1719_v26, %v4462_v13  ;;  %v1344_v31 = vpop.f32.mrb[99].mxu0  ;;  %v1721_v32 = vpop.f32.mrb[99].mxu1 }
 0x1be   : > { %v1400_v33 = vmax.f32 %v1341_v23, 0.0  ;;  %v1777_v34 = vmax.f32 %v1718_v24, 0.0  ;;  %v1345_v35 = vadd.f32 %v1344_v31, %v4467_v15  ;;  %v1722_v36 = vadd.f32 %v1721_v32, %v4467_v15 }
 0x1bf   : > { %v1426_v37 = vadd.f32 %v1425_v10, %v1399_v28  ;;  %v1803_v38 = vadd.f32 %v1802_v11, %v1776_v2  ;;  %v1401_v39 = vmax.f32 %v1343_v29, 0.0  ;;  %v1778_v40 = vmax.f32 %v1720_v30, 0.0  ;;  %2855 = vmatmul.mubr.bf16.gmra.mrb[204].mxu0 %v4085_v22  ;;  %v4087_v29 = vld [vmem:[%s5117_s3 + $0x40] sm:$0xff]  }
 0x1c0   : > { %v1457_v41 = vadd.f32 %v1456_v12, %v1400_v33  ;;  %v1834_v42 = vadd.f32 %v1833_v14, %v1777_v34  ;;  %v1402_v43 = vmax.f32 %v1345_v35, 0.0  ;;  %v1779_v44 = vmax.f32 %v1722_v36, 0.0  ;;  %3232 = vmatmul.mubr.bf16.gmra.mrb[204].mxu1 %v4086_v27  ;;  %v4088_v30 = vld [vmem:[%s5117_s3] sm:$0xff]   ;;  %3927 = vmatprep.subr.bf16.mxu0 %v4087_v29 }
 0x1c1   : > { %v1427_v45 = vadd.f32 %v1426_v37, %v1401_v39  ;;  %v1804_v47 = vadd.f32 %v1803_v38, %v1778_v40  ;;  %3928 = vmatpush3.bf16.msra.mxu0 %v4088_v30 }
 0x1c2   : > { %v1458_v48 = vadd.f32 %v1457_v41, %v1402_v43  ;;  %v1835_v49 = vadd.f32 %v1834_v42, %v1779_v44  ;;  %v1348_v51 = vpop.f32.mrb[100].mxu0  ;;  %v1725_v52 = vpop.f32.mrb[100].mxu1 }
 0x1c3   : > { %v1349_v53 = vadd.f32 %v1348_v51, %v4462_v13  ;;  %v1726_v54 = vadd.f32 %v1725_v52, %v4462_v13  ;;  %v1350_v55 = vpop.f32.mrb[101].mxu0  ;;  %v1727_v56 = vpop.f32.mrb[101].mxu1 }
 0x1c4   : > { %v1351_v57 = vadd.f32 %v1350_v55, %v4467_v15  ;;  %v1728_v58 = vadd.f32 %v1727_v56, %v4467_v15  ;;  %v1352_v59 = vpop.f32.mrb[102].mxu0  ;;  %v1729_v60 = vpop.f32.mrb[102].mxu1 }
 0x1c5   : > { %v1403_v61 = vmax.f32 %v1349_v53, 0.0  ;;  %v1780_v62 = vmax.f32 %v1726_v54, 0.0  ;;  %v1353_v63 = vpop.f32.mrb[103].mxu0  ;;  %v1730_v0 = vpop.f32.mrb[103].mxu1 }
 0x1c6   : > { %v1404_v1 = vmax.f32 %v1351_v57, 0.0  ;;  %v1781_v3 = vmax.f32 %v1728_v58, 0.0 }
 0x1c7   : > { %v1428_v4 = vsel %vm672_vm0, %v1403_v61, 0.0  ;;  %v1805_v5 = vsel %vm672_vm0, %v1780_v62, 0.0 }
 0x1c8   : > { %v1429_v6 = vadd.f32 %v1428_v4, %v1427_v45  ;;  %v1806_v7 = vadd.f32 %v1805_v5, %v1804_v47  ;;  %v1459_v8 = vsel %vm672_vm0, %v1404_v1, 0.0  ;;  %v1836_v9 = vsel %vm672_vm0, %v1781_v3, 0.0 }
 0x1c9   : > { %v1460_v10 = vadd.f32 %v1459_v8, %v1458_v48  ;;  %v1837_v11 = vadd.f32 %v1836_v9, %v1835_v49 }
 0x1ca   : > { %v1430_v12 = vrot.slane %v1429_v6, 4  ;;  %v1807_v14 = vrot.slane %v1806_v7, 4  ;;  %v1982_v16 = vpop.f32.mrb[104].mxu0  ;;  %v2359_v17 = vpop.f32.mrb[104].mxu1 }
 0x1cb   : > { %v1461_v18 = vrot.slane %v1460_v10, 4  ;;  %v1838_v19 = vrot.slane %v1837_v11, 4  ;;  %v1983_v20 = vadd.f32 %v1982_v16, %v4462_v13  ;;  %v2360_v21 = vadd.f32 %v2359_v17, %v4462_v13  ;;  %v1984_v22 = vpop.f32.mrb[105].mxu0  ;;  %v2361_v23 = vpop.f32.mrb[105].mxu1 }
 0x1cc   : > { %v1431_v24 = vadd.f32 %v1430_v12, %v1429_v6  ;;  %v1808_v25 = vadd.f32 %v1807_v14, %v1806_v7  ;;  %v1985_v26 = vadd.f32 %v1984_v22, %v4467_v15  ;;  %v2362_v27 = vadd.f32 %v2361_v23, %v4467_v15  ;;  %v1986_v28 = vpop.f32.mrb[106].mxu0  ;;  %v2363_v2 = vpop.f32.mrb[106].mxu1 }
 0x1cd   : > { %v1462_v31 = vadd.f32 %v1461_v18, %v1460_v10  ;;  %v1839_v32 = vadd.f32 %v1838_v19, %v1837_v11  ;;  %v2109_v33 = vmax.f32 %v1983_v20, 0.0  ;;  %v2486_v34 = vmax.f32 %v2360_v21, 0.0  ;;  %v1988_v35 = vpop.f32.mrb[107].mxu0  ;;  %v2365_v36 = vpop.f32.mrb[107].mxu1 }
 0x1ce   : > { %v1432_v37 = vrot.slane %v1431_v24, 2  ;;  %v1809_v38 = vrot.slane %v1808_v25, 2  ;;  %v2110_v39 = vmax.f32 %v1985_v26, 0.0  ;;  %v2487_v40 = vmax.f32 %v2362_v27, 0.0 }
 0x1cf   : > { %v1463_v41 = vrot.slane %v1462_v31, 2  ;;  %v1840_v42 = vrot.slane %v1839_v32, 2  ;;  %v1987_v43 = vadd.f32 %v1986_v28, %v4462_v13  ;;  %v2364_v44 = vadd.f32 %v2363_v2, %v4462_v13 }
 0x1d0   : > { %v1433_v45 = vadd.f32 %v1432_v37, %v1431_v24  ;;  %v1810_v47 = vadd.f32 %v1809_v38, %v1808_v25  ;;  %v1989_v48 = vadd.f32 %v1988_v35, %v4467_v15  ;;  %v2366_v49 = vadd.f32 %v2365_v36, %v4467_v15 }
 0x1d1   : > { %v1464_v51 = vadd.f32 %v1463_v41, %v1462_v31  ;;  %v1841_v52 = vadd.f32 %v1840_v42, %v1839_v32  ;;  %v2111_v53 = vmax.f32 %v1987_v43, 0.0  ;;  %v2488_v54 = vmax.f32 %v2364_v44, 0.0 }
 0x1d2   : > { %v1434_v55 = vrot.slane %v1433_v45, 1  ;;  %v1811_v56 = vrot.slane %v1810_v47, 1  ;;  %v2112_v57 = vmax.f32 %v1989_v48, 0.0  ;;  %v2489_v58 = vmax.f32 %v2366_v49, 0.0  ;;  %v1992_v59 = vpop.f32.mrb[108].mxu0  ;;  %v2369_v60 = vpop.f32.mrb[108].mxu1 }
 0x1d3   : > { %v1465_v61 = vrot.slane %v1464_v51, 1  ;;  %v1842_v62 = vrot.slane %v1841_v52, 1  ;;  %v2159_v63 = vadd.f32 %v2111_v53, %v2109_v33  ;;  %v2536_v0 = vadd.f32 %v2488_v54, %v2486_v34  ;;  %v1994_v1 = vpop.f32.mrb[109].mxu0  ;;  %v2371_v3 = vpop.f32.mrb[109].mxu1  ;;  %v4089_v33 = vld [vmem:[%s5117_s3 + $0x48] sm:$0xff]  }
 0x1d4   : > { %v1435_v4 = vadd.f32 %v1434_v55, %v1433_v45  ;;  %v1812_v5 = vadd.f32 %v1811_v56, %v1810_v47  ;;  %v2190_v6 = vadd.f32 %v2112_v57, %v2110_v39  ;;  %v2567_v7 = vadd.f32 %v2489_v58, %v2487_v40  ;;  %v1996_v8 = vpop.f32.mrb[110].mxu0  ;;  %v2373_v9 = vpop.f32.mrb[110].mxu1  ;;  %v4090_v39 = vld [vmem:[%s5117_s3 + $0x8] sm:$0xff]   ;;  %3929 = vmatprep.subr.bf16.mxu0 %v4089_v33 }
 0x1d5   : > { %v1466_v10 = vadd.f32 %v1465_v61, %v1464_v51  ;;  %v1843_v11 = vadd.f32 %v1842_v62, %v1841_v52  ;;  %v1993_v12 = vadd.f32 %v1992_v59, %v4462_v13  ;;  %v2370_v14 = vadd.f32 %v2369_v60, %v4462_v13  ;;  %v1998_v16 = vpop.f32.mrb[111].mxu0  ;;  %v2375_v17 = vpop.f32.mrb[111].mxu1  ;;  %3930 = vmatpush3.bf16.msra.mxu0 %v4090_v39 }
 0x1d6   : > { %v1467_v18 = vmul.f32 0.0051020407, %v1435_v4  ;;  %v1844_v19 = vmul.f32 0.0051020407, %v1812_v5  ;;  %v1995_v20 = vadd.f32 %v1994_v1, %v4467_v15  ;;  %v2372_v21 = vadd.f32 %v2371_v3, %v4467_v15 }
 0x1d7   : > { %v1468_v22 = vmul.f32 0.0051020407, %v1466_v10  ;;  %v1845_v23 = vmul.f32 0.0051020407, %v1843_v11  ;;  %v2113_v24 = vmax.f32 %v1993_v12, 0.0  ;;  %v2490_v25 = vmax.f32 %v2370_v14, 0.0 }
 0x1d8   : > { %v3358_v26 = vsel %vm3357_vm2, %v4688_v46, %v1467_v18  ;;  %v2114_v27 = vmax.f32 %v1995_v20, 0.0  ;;  %v2491_v28 = vmax.f32 %v2372_v21, 0.0  ;;  %v1997_v2 = vadd.f32 %v1996_v8, %v4462_v13 }
 0x1d9   : > { %v4847_v29 = vsel %vm3360_vm3, %v3358_v26, %v1844_v19  ;;  %v3359_v30 = vsel %vm3357_vm2, %v4694_v50, %v1468_v22  ;;  %v2160_v31 = vadd.f32 %v2159_v63, %v2113_v24  ;;  %v2537_v32 = vadd.f32 %v2536_v0, %v2490_v25  ;;  %v4091_v25 = vld [vmem:[%s5117_s3 + $0x50] sm:$0xff]  }
 0x1da   : > { %v2191_v34 = vadd.f32 %v2190_v6, %v2114_v27  ;;  %v2568_v35 = vadd.f32 %v2567_v7, %v2491_v28  ;;  %v2115_v36 = vmax.f32 %v1997_v2, 0.0  ;;  %v2374_v46 = vadd.f32 %v2373_v9, %v4462_v13  ;;  %v2002_v37 = vpop.f32.mrb[112].mxu0  ;;  %v2379_v38 = vpop.f32.mrb[112].mxu1  ;;  %3931 = vmatprep.subr.bf16.mxu0 %v4091_v25 }
 0x1db   : > { %v1999_v40 = vadd.f32 %v1998_v16, %v4467_v15  ;;  %v2376_v50 = vadd.f32 %v2375_v17, %v4467_v15  ;;  %v2003_v41 = vadd.f32 %v2002_v37, %v4462_v13  ;;  %v2380_v42 = vadd.f32 %v2379_v38, %v4462_v13  ;;  %v2004_v43 = vpop.f32.mrb[113].mxu0  ;;  %v2381_v44 = vpop.f32.mrb[113].mxu1 }
 0x1dc   : > { %v2161_v45 = vadd.f32 %v2160_v31, %v2115_v36  ;;  %v2492_v47 = vmax.f32 %v2374_v46, 0.0  ;;  %v2005_v48 = vadd.f32 %v2004_v43, %v4467_v15  ;;  %v2382_v49 = vadd.f32 %v2381_v44, %v4467_v15  ;;  %v2006_v51 = vpop.f32.mrb[114].mxu0  ;;  %v2383_v52 = vpop.f32.mrb[114].mxu1 }
 0x1dd   : > { %v2116_v53 = vmax.f32 %v1999_v40, 0.0  ;;  %v2493_v54 = vmax.f32 %v2376_v50, 0.0  ;;  %v2117_v55 = vmax.f32 %v2003_v41, 0.0  ;;  %v2494_v56 = vmax.f32 %v2380_v42, 0.0  ;;  %v2008_v57 = vpop.f32.mrb[115].mxu0  ;;  %v2385_v58 = vpop.f32.mrb[115].mxu1 }
 0x1de   : > { %v2538_v59 = vadd.f32 %v2537_v32, %v2492_v47  ;;  %v2118_v60 = vmax.f32 %v2005_v48, 0.0  ;;  %v2495_v61 = vmax.f32 %v2382_v49, 0.0  ;;  %v2007_v62 = vadd.f32 %v2006_v51, %v4462_v13 }
 0x1df   : > { %v2192_v63 = vadd.f32 %v2191_v34, %v2116_v53  ;;  %v2569_v0 = vadd.f32 %v2568_v35, %v2493_v54  ;;  %v2162_v1 = vadd.f32 %v2161_v45, %v2117_v55  ;;  %v2384_v3 = vadd.f32 %v2383_v52, %v4462_v13 }
 0x1e0   : > { %v2539_v4 = vadd.f32 %v2538_v59, %v2494_v56  ;;  %v2119_v5 = vmax.f32 %v2007_v62, 0.0  ;;  %v2009_v6 = vadd.f32 %v2008_v57, %v4467_v15  ;;  %v2386_v7 = vadd.f32 %v2385_v58, %v4467_v15 }
 0x1e1   : > { %v2193_v8 = vadd.f32 %v2192_v63, %v2118_v60  ;;  %v2570_v9 = vadd.f32 %v2569_v0, %v2495_v61  ;;  %v2496_v10 = vmax.f32 %v2384_v3, 0.0  ;;  %v4869_v11 = vsel %vm3360_vm3, %v3359_v30, %v1845_v23  ;;  %v4092_v23 = vld [vmem:[%s5117_s3 + $0x10] sm:$0xff]  }
 0x1e2   : > { %v2163_v12 = vadd.f32 %v2162_v1, %v2119_v5  ;;  %v2120_v14 = vmax.f32 %v2009_v6, 0.0  ;;  %v2497_v16 = vmax.f32 %v2386_v7, 0.0  ;;  %v2012_v17 = vpop.f32.mrb[116].mxu0  ;;  %v2389_v18 = vpop.f32.mrb[116].mxu1  ;;  %3932 = vmatpush3.bf16.msra.mxu0 %v4092_v23 }
 0x1e3   : > { %v2540_v19 = vadd.f32 %v2539_v4, %v2496_v10  ;;  %v2013_v20 = vadd.f32 %v2012_v17, %v4462_v13  ;;  %v2390_v21 = vadd.f32 %v2389_v18, %v4462_v13  ;;  %v2014_v22 = vpop.f32.mrb[117].mxu0  ;;  %v2391_v24 = vpop.f32.mrb[117].mxu1 }
 0x1e4   : > { %v2194_v26 = vadd.f32 %v2193_v8, %v2120_v14  ;;  %v2571_v27 = vadd.f32 %v2570_v9, %v2497_v16  ;;  %v2015_v28 = vadd.f32 %v2014_v22, %v4467_v15  ;;  %v2392_v2 = vadd.f32 %v2391_v24, %v4467_v15  ;;  %v2016_v30 = vpop.f32.mrb[118].mxu0  ;;  %v2393_v31 = vpop.f32.mrb[118].mxu1 }
 0x1e5   : > { %v2121_v32 = vmax.f32 %v2013_v20, 0.0  ;;  %v2498_v33 = vmax.f32 %v2390_v21, 0.0  ;;  %v2017_v34 = vadd.f32 %v2016_v30, %v4462_v13  ;;  %v2394_v35 = vadd.f32 %v2393_v31, %v4462_v13  ;;  %v2018_v36 = vpop.f32.mrb[119].mxu0  ;;  %v2395_v46 = vpop.f32.mrb[119].mxu1 }
 0x1e6   : > { %v2122_v37 = vmax.f32 %v2015_v28, 0.0  ;;  %v2499_v38 = vmax.f32 %v2392_v2, 0.0  ;;  %v2019_v39 = vadd.f32 %v2018_v36, %v4467_v15  ;;  %v2396_v40 = vadd.f32 %v2395_v46, %v4467_v15 }
 0x1e7   : > { %v2164_v50 = vadd.f32 %v2163_v12, %v2121_v32  ;;  %v2541_v41 = vadd.f32 %v2540_v19, %v2498_v33  ;;  %v2123_v42 = vmax.f32 %v2017_v34, 0.0  ;;  %v2500_v43 = vmax.f32 %v2394_v35, 0.0  ;;  %v4093_v32 = vld [vmem:[%s5117_s3 + $0x58] sm:$0xff]  }
 0x1e8   : > { %v2195_v44 = vadd.f32 %v2194_v26, %v2122_v37  ;;  %v2572_v45 = vadd.f32 %v2571_v27, %v2499_v38  ;;  %v2124_v47 = vmax.f32 %v2019_v39, 0.0  ;;  %v2501_v48 = vmax.f32 %v2396_v40, 0.0  ;;  %v4094_v33 = vld [vmem:[%s5117_s3 + $0x18] sm:$0xff]   ;;  %3933 = vmatprep.subr.bf16.mxu0 %v4093_v32 }
 0x1e9   : > { %v2165_v49 = vadd.f32 %v2164_v50, %v2123_v42  ;;  %v2542_v51 = vadd.f32 %v2541_v41, %v2500_v43  ;;  %3934 = vmatpush3.bf16.msra.mxu0 %v4094_v33 }
 0x1ea   : > { %v2196_v52 = vadd.f32 %v2195_v44, %v2124_v47  ;;  %v2573_v53 = vadd.f32 %v2572_v45, %v2501_v48  ;;  %v2022_v54 = vpop.f32.mrb[120].mxu0  ;;  %v2399_v55 = vpop.f32.mrb[120].mxu1 }
 0x1eb   : > { %v2023_v56 = vadd.f32 %v2022_v54, %v4462_v13  ;;  %v2400_v57 = vadd.f32 %v2399_v55, %v4462_v13  ;;  %v2024_v58 = vpop.f32.mrb[121].mxu0  ;;  %v2401_v59 = vpop.f32.mrb[121].mxu1 }
 0x1ec   : > { %v2025_v60 = vadd.f32 %v2024_v58, %v4467_v15  ;;  %v2402_v61 = vadd.f32 %v2401_v59, %v4467_v15  ;;  %v2026_v62 = vpop.f32.mrb[122].mxu0  ;;  %v2403_v63 = vpop.f32.mrb[122].mxu1 }
 0x1ed   : > { %v2125_v0 = vmax.f32 %v2023_v56, 0.0  ;;  %v2502_v1 = vmax.f32 %v2400_v57, 0.0  ;;  %v2027_v3 = vadd.f32 %v2026_v62, %v4462_v13  ;;  %v2404_v4 = vadd.f32 %v2403_v63, %v4462_v13  ;;  %v2028_v5 = vpop.f32.mrb[123].mxu0  ;;  %v2405_v6 = vpop.f32.mrb[123].mxu1 }
 0x1ee   : > { %v2126_v7 = vmax.f32 %v2025_v60, 0.0  ;;  %v2503_v8 = vmax.f32 %v2402_v61, 0.0  ;;  %v2029_v9 = vadd.f32 %v2028_v5, %v4467_v15  ;;  %v2406_v10 = vadd.f32 %v2405_v6, %v4467_v15 }
 0x1ef   : > { %v2166_v12 = vadd.f32 %v2165_v49, %v2125_v0  ;;  %v2543_v14 = vadd.f32 %v2542_v51, %v2502_v1  ;;  %v2127_v16 = vmax.f32 %v2027_v3, 0.0  ;;  %v2504_v17 = vmax.f32 %v2404_v4, 0.0 }
 0x1f0   : > { %v2197_v18 = vadd.f32 %v2196_v52, %v2126_v7  ;;  %v2574_v19 = vadd.f32 %v2573_v53, %v2503_v8  ;;  %v2128_v20 = vmax.f32 %v2029_v9, 0.0  ;;  %v2505_v21 = vmax.f32 %v2406_v10, 0.0 }
 0x1f1   : > { %v2167_v22 = vadd.f32 %v2166_v12, %v2127_v16  ;;  %v2544_v24 = vadd.f32 %v2543_v14, %v2504_v17 }
 0x1f2   : > { %v2198_v25 = vadd.f32 %v2197_v18, %v2128_v20  ;;  %v2575_v23 = vadd.f32 %v2574_v19, %v2505_v21  ;;  %v2032_v26 = vpop.f32.mrb[124].mxu0  ;;  %v2409_v27 = vpop.f32.mrb[124].mxu1 }
 0x1f3   : > { %v2033_v28 = vadd.f32 %v2032_v26, %v4462_v13  ;;  %v2410_v2 = vadd.f32 %v2409_v27, %v4462_v13  ;;  %v2034_v30 = vpop.f32.mrb[125].mxu0  ;;  %v2411_v31 = vpop.f32.mrb[125].mxu1 }
 0x1f4   : > { %v2035_v34 = vadd.f32 %v2034_v30, %v4467_v15  ;;  %v2412_v35 = vadd.f32 %v2411_v31, %v4467_v15  ;;  %v2036_v36 = vpop.f32.mrb[126].mxu0  ;;  %v2413_v46 = vpop.f32.mrb[126].mxu1  ;;  %v4096_v31 = vld [vmem:[%s5117_s3 + $0x20] sm:$0xff]  }
 0x1f5   : > { %v2129_v37 = vmax.f32 %v2033_v28, 0.0  ;;  %v2506_v38 = vmax.f32 %v2410_v2, 0.0  ;;  %v2037_v39 = vadd.f32 %v2036_v36, %v4462_v13  ;;  %v2414_v40 = vadd.f32 %v2413_v46, %v4462_v13  ;;  %v2038_v50 = vpop.f32.mrb[127].mxu0  ;;  %v2415_v41 = vpop.f32.mrb[127].mxu1  ;;  %v4095_v28 = vld [vmem:[%s5117_s3 + $0x60] sm:$0xff]  }
 0x1f6   : > { %v2130_v42 = vmax.f32 %v2035_v34, 0.0  ;;  %v2507_v43 = vmax.f32 %v2412_v35, 0.0  ;;  %v2039_v44 = vadd.f32 %v2038_v50, %v4467_v15  ;;  %v2416_v45 = vadd.f32 %v2415_v41, %v4467_v15  ;;  %3935 = vmatprep.subr.bf16.mxu0 %v4095_v28 }
 0x1f7   : > { %v2168_v47 = vadd.f32 %v2167_v22, %v2129_v37  ;;  %v2545_v48 = vadd.f32 %v2544_v24, %v2506_v38  ;;  %v2131_v49 = vmax.f32 %v2037_v39, 0.0  ;;  %v2508_v51 = vmax.f32 %v2414_v40, 0.0  ;;  %3936 = vmatpush3.bf16.msra.mxu0 %v4096_v31 }
 0x1f8   : > { %v2199_v52 = vadd.f32 %v2198_v25, %v2130_v42  ;;  %v2576_v53 = vadd.f32 %v2575_v23, %v2507_v43  ;;  %v2132_v54 = vmax.f32 %v2039_v44, 0.0  ;;  %v2509_v55 = vmax.f32 %v2416_v45, 0.0 }
 0x1f9   : > { %v2169_v56 = vadd.f32 %v2168_v47, %v2131_v49  ;;  %v2546_v57 = vadd.f32 %v2545_v48, %v2508_v51 }
 0x1fa   : > { %v2200_v58 = vadd.f32 %v2199_v52, %v2132_v54  ;;  %v2577_v59 = vadd.f32 %v2576_v53, %v2509_v55  ;;  %v2042_v60 = vpop.f32.mrb[128].mxu0  ;;  %v2419_v61 = vpop.f32.mrb[128].mxu1 }
 0x1fb   : > { %v2043_v62 = vadd.f32 %v2042_v60, %v4462_v13  ;;  %v2420_v63 = vadd.f32 %v2419_v61, %v4462_v13  ;;  %v2044_v0 = vpop.f32.mrb[129].mxu0  ;;  %v2421_v1 = vpop.f32.mrb[129].mxu1 }
 0x1fc   : > { %v2045_v3 = vadd.f32 %v2044_v0, %v4467_v15  ;;  %v2422_v4 = vadd.f32 %v2421_v1, %v4467_v15  ;;  %v2046_v5 = vpop.f32.mrb[130].mxu0  ;;  %v2423_v6 = vpop.f32.mrb[130].mxu1 }
 0x1fd   : > { %v2133_v7 = vmax.f32 %v2043_v62, 0.0  ;;  %v2510_v8 = vmax.f32 %v2420_v63, 0.0  ;;  %v2047_v9 = vadd.f32 %v2046_v5, %v4462_v13  ;;  %v2424_v10 = vadd.f32 %v2423_v6, %v4462_v13  ;;  %v2048_v12 = vpop.f32.mrb[131].mxu0  ;;  %v2425_v14 = vpop.f32.mrb[131].mxu1 }
 0x1fe   : > { %v2134_v16 = vmax.f32 %v2045_v3, 0.0  ;;  %v2511_v17 = vmax.f32 %v2422_v4, 0.0  ;;  %v2049_v18 = vadd.f32 %v2048_v12, %v4467_v15  ;;  %v2426_v19 = vadd.f32 %v2425_v14, %v4467_v15 }
 0x1ff   : > { %v2170_v20 = vadd.f32 %v2169_v56, %v2133_v7  ;;  %v2547_v21 = vadd.f32 %v2546_v57, %v2510_v8  ;;  %v2135_v22 = vmax.f32 %v2047_v9, 0.0  ;;  %v2512_v24 = vmax.f32 %v2424_v10, 0.0  ;;  %v4097_v9 = vld [vmem:[%s5117_s3 + $0x68] sm:$0xff]  }
 0x200   : > { %v2201_v25 = vadd.f32 %v2200_v58, %v2134_v16  ;;  %v2578_v23 = vadd.f32 %v2577_v59, %v2511_v17  ;;  %v2136_v26 = vmax.f32 %v2049_v18, 0.0  ;;  %v2513_v27 = vmax.f32 %v2426_v19, 0.0  ;;  %v4098_v10 = vld [vmem:[%s5117_s3 + $0x28] sm:$0xff]   ;;  %3937 = vmatprep.subr.bf16.mxu0 %v4097_v9 }
 0x201   : > { %v2171_v2 = vadd.f32 %v2170_v20, %v2135_v22  ;;  %v2548_v30 = vadd.f32 %v2547_v21, %v2512_v24  ;;  %3938 = vmatpush3.bf16.msra.mxu0 %v4098_v10 }
 0x202   : > { %v2202_v32 = vadd.f32 %v2201_v25, %v2136_v26  ;;  %v2579_v33 = vadd.f32 %v2578_v23, %v2513_v27  ;;  %v2052_v34 = vpop.f32.mrb[132].mxu0  ;;  %v2429_v35 = vpop.f32.mrb[132].mxu1 }
 0x203   : > { %v2053_v36 = vadd.f32 %v2052_v34, %v4462_v13  ;;  %v2430_v46 = vadd.f32 %v2429_v35, %v4462_v13  ;;  %v2054_v37 = vpop.f32.mrb[133].mxu0  ;;  %v2431_v38 = vpop.f32.mrb[133].mxu1 }
 0x204   : > { %v2055_v39 = vadd.f32 %v2054_v37, %v4467_v15  ;;  %v2432_v40 = vadd.f32 %v2431_v38, %v4467_v15  ;;  %v2056_v50 = vpop.f32.mrb[134].mxu0  ;;  %v2433_v41 = vpop.f32.mrb[134].mxu1 }
 0x205   : > { %v2137_v42 = vmax.f32 %v2053_v36, 0.0  ;;  %v2514_v43 = vmax.f32 %v2430_v46, 0.0  ;;  %v2057_v44 = vadd.f32 %v2056_v50, %v4462_v13  ;;  %v2434_v45 = vadd.f32 %v2433_v41, %v4462_v13  ;;  %v2058_v47 = vpop.f32.mrb[135].mxu0  ;;  %v2435_v48 = vpop.f32.mrb[135].mxu1 }
 0x206   : > { %v2138_v49 = vmax.f32 %v2055_v39, 0.0  ;;  %v2515_v51 = vmax.f32 %v2432_v40, 0.0  ;;  %v2059_v52 = vadd.f32 %v2058_v47, %v4467_v15  ;;  %v2436_v53 = vadd.f32 %v2435_v48, %v4467_v15 }
 0x207   : > { %v2172_v54 = vadd.f32 %v2171_v2, %v2137_v42  ;;  %v2549_v55 = vadd.f32 %v2548_v30, %v2514_v43  ;;  %v2139_v56 = vmax.f32 %v2057_v44, 0.0  ;;  %v2516_v57 = vmax.f32 %v2434_v45, 0.0 }
 0x208   : > { %v2203_v58 = vadd.f32 %v2202_v32, %v2138_v49  ;;  %v2580_v59 = vadd.f32 %v2579_v33, %v2515_v51  ;;  %v2140_v60 = vmax.f32 %v2059_v52, 0.0  ;;  %v2517_v61 = vmax.f32 %v2436_v53, 0.0 }
 0x209   : > { %v2173_v62 = vadd.f32 %v2172_v54, %v2139_v56  ;;  %v2550_v63 = vadd.f32 %v2549_v55, %v2516_v57 }
 0x20a   : > { %v2204_v0 = vadd.f32 %v2203_v58, %v2140_v60  ;;  %v2581_v1 = vadd.f32 %v2580_v59, %v2517_v61  ;;  %v2062_v3 = vpop.f32.mrb[136].mxu0  ;;  %v2439_v4 = vpop.f32.mrb[136].mxu1 }
 0x20b   : > { %v2063_v5 = vadd.f32 %v2062_v3, %v4462_v13  ;;  %v2440_v6 = vadd.f32 %v2439_v4, %v4462_v13  ;;  %v2064_v7 = vpop.f32.mrb[137].mxu0  ;;  %v2441_v8 = vpop.f32.mrb[137].mxu1 }
 0x20c   : > { %v2065_v12 = vadd.f32 %v2064_v7, %v4467_v15  ;;  %v2442_v14 = vadd.f32 %v2441_v8, %v4467_v15  ;;  %v2066_v16 = vpop.f32.mrb[138].mxu0  ;;  %v2443_v17 = vpop.f32.mrb[138].mxu1 }
 0x20d   : > { %v2141_v18 = vmax.f32 %v2063_v5, 0.0  ;;  %v2518_v19 = vmax.f32 %v2440_v6, 0.0  ;;  %v2067_v20 = vadd.f32 %v2066_v16, %v4462_v13  ;;  %v2444_v21 = vadd.f32 %v2443_v17, %v4462_v13  ;;  %v2068_v22 = vpop.f32.mrb[139].mxu0  ;;  %v2445_v24 = vpop.f32.mrb[139].mxu1 }
 0x20e   : > { %v2142_v25 = vmax.f32 %v2065_v12, 0.0  ;;  %v2519_v23 = vmax.f32 %v2442_v14, 0.0  ;;  %v2069_v26 = vadd.f32 %v2068_v22, %v4467_v15  ;;  %v2446_v27 = vadd.f32 %v2445_v24, %v4467_v15 }
 0x20f   : > { %v2174_v28 = vadd.f32 %v2173_v62, %v2141_v18  ;;  %v2551_v2 = vadd.f32 %v2550_v63, %v2518_v19  ;;  %v2143_v30 = vmax.f32 %v2067_v20, 0.0  ;;  %v2520_v31 = vmax.f32 %v2444_v21, 0.0 }
 0x210   : > { %v2205_v32 = vadd.f32 %v2204_v0, %v2142_v25  ;;  %v2582_v33 = vadd.f32 %v2581_v1, %v2519_v23  ;;  %v2144_v34 = vmax.f32 %v2069_v26, 0.0  ;;  %v2521_v35 = vmax.f32 %v2446_v27, 0.0 }
 0x211   : > { %v2175_v36 = vadd.f32 %v2174_v28, %v2143_v30  ;;  %v2552_v46 = vadd.f32 %v2551_v2, %v2520_v31 }
 0x212   : > { %v2206_v37 = vadd.f32 %v2205_v32, %v2144_v34  ;;  %v2583_v38 = vadd.f32 %v2582_v33, %v2521_v35  ;;  %v2072_v39 = vpop.f32.mrb[140].mxu0  ;;  %v2449_v40 = vpop.f32.mrb[140].mxu1 }
 0x213   : > { %v2073_v50 = vadd.f32 %v2072_v39, %v4462_v13  ;;  %v2450_v41 = vadd.f32 %v2449_v40, %v4462_v13  ;;  %v2074_v42 = vpop.f32.mrb[141].mxu0  ;;  %v2451_v43 = vpop.f32.mrb[141].mxu1 }
 0x214   : > { %v2075_v44 = vadd.f32 %v2074_v42, %v4467_v15  ;;  %v2452_v45 = vadd.f32 %v2451_v43, %v4467_v15  ;;  %v2076_v47 = vpop.f32.mrb[142].mxu0  ;;  %v2453_v48 = vpop.f32.mrb[142].mxu1 }
 0x215   : > { %v2145_v49 = vmax.f32 %v2073_v50, 0.0  ;;  %v2522_v51 = vmax.f32 %v2450_v41, 0.0  ;;  %v2077_v52 = vadd.f32 %v2076_v47, %v4462_v13  ;;  %v2454_v53 = vadd.f32 %v2453_v48, %v4462_v13  ;;  %v2078_v54 = vpop.f32.mrb[143].mxu0  ;;  %v2455_v55 = vpop.f32.mrb[143].mxu1 }
 0x216   : > { %v2146_v56 = vmax.f32 %v2075_v44, 0.0  ;;  %v2523_v57 = vmax.f32 %v2452_v45, 0.0  ;;  %v2079_v58 = vadd.f32 %v2078_v54, %v4467_v15  ;;  %v2456_v59 = vadd.f32 %v2455_v55, %v4467_v15 }
 0x217   : > { %v2176_v60 = vadd.f32 %v2175_v36, %v2145_v49  ;;  %v2553_v61 = vadd.f32 %v2552_v46, %v2522_v51  ;;  %v2147_v62 = vmax.f32 %v2077_v52, 0.0  ;;  %v2524_v63 = vmax.f32 %v2454_v53, 0.0 }
 0x218   : > { %v2207_v0 = vadd.f32 %v2206_v37, %v2146_v56  ;;  %v2584_v1 = vadd.f32 %v2583_v38, %v2523_v57  ;;  %v2148_v3 = vmax.f32 %v2079_v58, 0.0  ;;  %v2525_v4 = vmax.f32 %v2456_v59, 0.0 }
 0x219   : > { %v2177_v5 = vadd.f32 %v2176_v60, %v2147_v62  ;;  %v2554_v6 = vadd.f32 %v2553_v61, %v2524_v63 }
 0x21a   : > { %v2208_v7 = vadd.f32 %v2207_v0, %v2148_v3  ;;  %v2585_v8 = vadd.f32 %v2584_v1, %v2525_v4  ;;  %v2082_v9 = vpop.f32.mrb[144].mxu0  ;;  %v2459_v10 = vpop.f32.mrb[144].mxu1 }
 0x21b   : > { %v2083_v12 = vadd.f32 %v2082_v9, %v4462_v13  ;;  %v2460_v14 = vadd.f32 %v2459_v10, %v4462_v13  ;;  %v2084_v16 = vpop.f32.mrb[145].mxu0  ;;  %v2461_v17 = vpop.f32.mrb[145].mxu1 }
 0x21c   : > { %v2085_v18 = vadd.f32 %v2084_v16, %v4467_v15  ;;  %v2462_v19 = vadd.f32 %v2461_v17, %v4467_v15  ;;  %v2086_v20 = vpop.f32.mrb[146].mxu0  ;;  %v2463_v21 = vpop.f32.mrb[146].mxu1 }
 0x21d   : > { %v2149_v22 = vmax.f32 %v2083_v12, 0.0  ;;  %v2526_v24 = vmax.f32 %v2460_v14, 0.0  ;;  %v2087_v25 = vadd.f32 %v2086_v20, %v4462_v13  ;;  %v2464_v23 = vadd.f32 %v2463_v21, %v4462_v13  ;;  %v2088_v26 = vpop.f32.mrb[147].mxu0  ;;  %v2465_v27 = vpop.f32.mrb[147].mxu1  ;;  %v4102_v21 = vld [vmem:[%s5117_s3 + $0x38] sm:$0xff]  }
 0x21e   : > { %v2150_v28 = vmax.f32 %v2085_v18, 0.0  ;;  %v2527_v2 = vmax.f32 %v2462_v19, 0.0  ;;  %v2089_v30 = vadd.f32 %v2088_v26, %v4467_v15  ;;  %v2466_v31 = vadd.f32 %v2465_v27, %v4467_v15 }
 0x21f   : > { %v2178_v32 = vadd.f32 %v2177_v5, %v2149_v22  ;;  %v2555_v33 = vadd.f32 %v2554_v6, %v2526_v24  ;;  %v2151_v34 = vmax.f32 %v2087_v25, 0.0  ;;  %v2528_v35 = vmax.f32 %v2464_v23, 0.0  ;;  %v4099_v5 = vld [vmem:[%s5117_s3 + $0x70] sm:$0xff]  }
 0x220   : > { %v2209_v36 = vadd.f32 %v2208_v7, %v2150_v28  ;;  %v2586_v46 = vadd.f32 %v2585_v8, %v2527_v2  ;;  %v2152_v37 = vmax.f32 %v2089_v30, 0.0  ;;  %v2529_v38 = vmax.f32 %v2466_v31, 0.0  ;;  %v4100_v6 = vld [vmem:[%s5117_s3 + $0x30] sm:$0xff]   ;;  %v4101_v7 = vld [vmem:[%s5117_s3 + $0x78] sm:$0xff]   ;;  %3939 = vmatprep.subr.bf16.mxu0 %v4099_v5 }
 0x221   : > { %v2179_v39 = vadd.f32 %v2178_v32, %v2151_v34  ;;  %v2556_v40 = vadd.f32 %v2555_v33, %v2528_v35  ;;  %3940 = vmatpush3.bf16.msra.mxu0 %v4100_v6 }
 0x222   : > { %v2210_v50 = vadd.f32 %v2209_v36, %v2152_v37  ;;  %v2587_v41 = vadd.f32 %v2586_v46, %v2529_v38  ;;  %v2092_v42 = vpop.f32.mrb[148].mxu0  ;;  %v2469_v43 = vpop.f32.mrb[148].mxu1  ;;  %3941 = vmatprep.subr.bf16.mxu0 %v4101_v7 }
 0x223   : > { %v2093_v44 = vadd.f32 %v2092_v42, %v4462_v13  ;;  %v2470_v45 = vadd.f32 %v2469_v43, %v4462_v13  ;;  %v2094_v47 = vpop.f32.mrb[149].mxu0  ;;  %v2471_v48 = vpop.f32.mrb[149].mxu1 }
 0x224   : > { %v2095_v49 = vadd.f32 %v2094_v47, %v4467_v15  ;;  %v2472_v51 = vadd.f32 %v2471_v48, %v4467_v15  ;;  %v2096_v52 = vpop.f32.mrb[150].mxu0  ;;  %v2473_v53 = vpop.f32.mrb[150].mxu1 }
 0x225   : > { %v2153_v54 = vmax.f32 %v2093_v44, 0.0  ;;  %v2530_v55 = vmax.f32 %v2470_v45, 0.0  ;;  %v2097_v56 = vadd.f32 %v2096_v52, %v4462_v13  ;;  %v2474_v57 = vadd.f32 %v2473_v53, %v4462_v13  ;;  %v2098_v58 = vpop.f32.mrb[151].mxu0  ;;  %v2475_v59 = vpop.f32.mrb[151].mxu1  ;;  %3942 = vmatpush3.bf16.msra.mxu0 %v4102_v21 }
 0x226   : > { %v2154_v60 = vmax.f32 %v2095_v49, 0.0  ;;  %v2531_v61 = vmax.f32 %v2472_v51, 0.0  ;;  %v2099_v62 = vadd.f32 %v2098_v58, %v4467_v15  ;;  %v2476_v63 = vadd.f32 %v2475_v59, %v4467_v15 }
 0x227   : > { %v2180_v0 = vadd.f32 %v2179_v39, %v2153_v54  ;;  %v2557_v1 = vadd.f32 %v2556_v40, %v2530_v55  ;;  %v2155_v3 = vmax.f32 %v2097_v56, 0.0  ;;  %v2532_v4 = vmax.f32 %v2474_v57, 0.0 }
 0x228   : > { %v2211_v8 = vadd.f32 %v2210_v50, %v2154_v60  ;;  %v2588_v9 = vadd.f32 %v2587_v41, %v2531_v61  ;;  %v2156_v10 = vmax.f32 %v2099_v62, 0.0  ;;  %v2533_v12 = vmax.f32 %v2476_v63, 0.0 }
 0x229   : > { %v2181_v14 = vadd.f32 %v2180_v0, %v2155_v3  ;;  %v2558_v16 = vadd.f32 %v2557_v1, %v2532_v4 }
 0x22a   : > { %v2212_v17 = vadd.f32 %v2211_v8, %v2156_v10  ;;  %v2589_v18 = vadd.f32 %v2588_v9, %v2533_v12  ;;  %v2102_v19 = vpop.f32.mrb[152].mxu0  ;;  %v2479_v20 = vpop.f32.mrb[152].mxu1 }
 0x22b   : > { %v2103_v22 = vadd.f32 %v2102_v19, %v4462_v13  ;;  %v2480_v24 = vadd.f32 %v2479_v20, %v4462_v13  ;;  %v2104_v25 = vpop.f32.mrb[153].mxu0  ;;  %v2481_v23 = vpop.f32.mrb[153].mxu1 }
 0x22c   : > { %v2105_v26 = vadd.f32 %v2104_v25, %v4467_v15  ;;  %v2482_v27 = vadd.f32 %v2481_v23, %v4467_v15  ;;  %v2106_v28 = vpop.f32.mrb[154].mxu0  ;;  %v2483_v2 = vpop.f32.mrb[154].mxu1 }
 0x22d   : > { %v2157_v30 = vmax.f32 %v2103_v22, 0.0  ;;  %v2534_v31 = vmax.f32 %v2480_v24, 0.0  ;;  %v2107_v32 = vpop.f32.mrb[155].mxu0  ;;  %v2484_v33 = vpop.f32.mrb[155].mxu1 }
 0x22e   : > { %v2158_v34 = vmax.f32 %v2105_v26, 0.0  ;;  %v2535_v35 = vmax.f32 %v2482_v27, 0.0 }
 0x22f   : > { %v2182_v36 = vsel %vm672_vm0, %v2157_v30, 0.0  ;;  %v2559_v46 = vsel %vm672_vm0, %v2534_v31, 0.0 }
 0x230   : > { %v2183_v37 = vadd.f32 %v2182_v36, %v2181_v14  ;;  %v2560_v38 = vadd.f32 %v2559_v46, %v2558_v16  ;;  %v2213_v39 = vsel %vm672_vm0, %v2158_v34, 0.0  ;;  %v2590_v40 = vsel %vm672_vm0, %v2535_v35, 0.0 }
 0x231   : > { %v2214_v50 = vadd.f32 %v2213_v39, %v2212_v17  ;;  %v2591_v41 = vadd.f32 %v2590_v40, %v2589_v18 }
 0x232   : > { %v2184_v42 = vrot.slane %v2183_v37, 4  ;;  %v2561_v43 = vrot.slane %v2560_v38, 4  ;;  %v2736_v44 = vpop.f32.mrb[156].mxu0  ;;  %v3113_v45 = vpop.f32.mrb[156].mxu1 }
 0x233   : > { %v2215_v47 = vrot.slane %v2214_v50, 4  ;;  %v2592_v48 = vrot.slane %v2591_v41, 4  ;;  %v2737_v49 = vadd.f32 %v2736_v44, %v4462_v13  ;;  %v3114_v51 = vadd.f32 %v3113_v45, %v4462_v13  ;;  %v2738_v52 = vpop.f32.mrb[157].mxu0  ;;  %v3115_v53 = vpop.f32.mrb[157].mxu1 }
 0x234   : > { %v2185_v54 = vadd.f32 %v2184_v42, %v2183_v37  ;;  %v2562_v55 = vadd.f32 %v2561_v43, %v2560_v38  ;;  %v2739_v56 = vadd.f32 %v2738_v52, %v4467_v15  ;;  %v3116_v57 = vadd.f32 %v3115_v53, %v4467_v15  ;;  %v2740_v58 = vpop.f32.mrb[158].mxu0  ;;  %v3117_v59 = vpop.f32.mrb[158].mxu1 }
 0x235   : > { %v2216_v60 = vadd.f32 %v2215_v47, %v2214_v50  ;;  %v2593_v61 = vadd.f32 %v2592_v48, %v2591_v41  ;;  %v2863_v62 = vmax.f32 %v2737_v49, 0.0  ;;  %v3240_v63 = vmax.f32 %v3114_v51, 0.0  ;;  %v2742_v0 = vpop.f32.mrb[159].mxu0  ;;  %v3119_v1 = vpop.f32.mrb[159].mxu1 }
 0x236   : > { %v2186_v3 = vrot.slane %v2185_v54, 2  ;;  %v2563_v4 = vrot.slane %v2562_v55, 2  ;;  %v2864_v5 = vmax.f32 %v2739_v56, 0.0  ;;  %v3241_v6 = vmax.f32 %v3116_v57, 0.0 }
 0x237   : > { %v2217_v7 = vrot.slane %v2216_v60, 2  ;;  %v2594_v8 = vrot.slane %v2593_v61, 2  ;;  %v2741_v9 = vadd.f32 %v2740_v58, %v4462_v13  ;;  %v3118_v10 = vadd.f32 %v3117_v59, %v4462_v13 }
 0x238   : > { %v2187_v12 = vadd.f32 %v2186_v3, %v2185_v54  ;;  %v2564_v14 = vadd.f32 %v2563_v4, %v2562_v55  ;;  %v2743_v16 = vadd.f32 %v2742_v0, %v4467_v15  ;;  %v3120_v17 = vadd.f32 %v3119_v1, %v4467_v15 }
 0x239   : > { %v2218_v18 = vadd.f32 %v2217_v7, %v2216_v60  ;;  %v2595_v19 = vadd.f32 %v2594_v8, %v2593_v61  ;;  %v2865_v20 = vmax.f32 %v2741_v9, 0.0  ;;  %v3242_v21 = vmax.f32 %v3118_v10, 0.0 }
 0x23a   : > { %v2188_v22 = vrot.slane %v2187_v12, 1  ;;  %v2565_v24 = vrot.slane %v2564_v14, 1  ;;  %v2866_v25 = vmax.f32 %v2743_v16, 0.0  ;;  %v3243_v23 = vmax.f32 %v3120_v17, 0.0  ;;  %v2746_v26 = vpop.f32.mrb[160].mxu0  ;;  %v3123_v27 = vpop.f32.mrb[160].mxu1 }
 0x23b   : > { %v2219_v28 = vrot.slane %v2218_v18, 1  ;;  %v2596_v2 = vrot.slane %v2595_v19, 1  ;;  %v2913_v30 = vadd.f32 %v2865_v20, %v2863_v62  ;;  %v3290_v31 = vadd.f32 %v3242_v21, %v3240_v63  ;;  %v2748_v32 = vpop.f32.mrb[161].mxu0  ;;  %v3125_v33 = vpop.f32.mrb[161].mxu1 }
 0x23c   : > { %v2189_v34 = vadd.f32 %v2188_v22, %v2187_v12  ;;  %v2566_v35 = vadd.f32 %v2565_v24, %v2564_v14  ;;  %v2944_v36 = vadd.f32 %v2866_v25, %v2864_v5  ;;  %v3321_v46 = vadd.f32 %v3243_v23, %v3241_v6  ;;  %v2750_v37 = vpop.f32.mrb[162].mxu0  ;;  %v3127_v38 = vpop.f32.mrb[162].mxu1 }
 0x23d   : > { %v2220_v39 = vadd.f32 %v2219_v28, %v2218_v18  ;;  %v2597_v40 = vadd.f32 %v2596_v2, %v2595_v19  ;;  %v2747_v50 = vadd.f32 %v2746_v26, %v4462_v13  ;;  %v3124_v41 = vadd.f32 %v3123_v27, %v4462_v13  ;;  %v2752_v42 = vpop.f32.mrb[163].mxu0  ;;  %v3129_v43 = vpop.f32.mrb[163].mxu1 }
 0x23e   : > { %v2221_v44 = vmul.f32 0.0051020407, %v2189_v34  ;;  %v2598_v45 = vmul.f32 0.0051020407, %v2566_v35  ;;  %v2749_v47 = vadd.f32 %v2748_v32, %v4467_v15  ;;  %v3126_v48 = vadd.f32 %v3125_v33, %v4467_v15 }
 0x23f   : > { %v2222_v49 = vmul.f32 0.0051020407, %v2220_v39  ;;  %v2599_v51 = vmul.f32 0.0051020407, %v2597_v40  ;;  %v2867_v52 = vmax.f32 %v2747_v50, 0.0  ;;  %v3244_v53 = vmax.f32 %v3124_v41, 0.0 }
 0x240   : > { %v3363_v54 = vsel %vm672_vm0, %v4847_v29, %v2221_v44  ;;  %v2868_v55 = vmax.f32 %v2749_v47, 0.0  ;;  %v3245_v56 = vmax.f32 %v3126_v48, 0.0  ;;  %v2751_v57 = vadd.f32 %v2750_v37, %v4462_v13 }
 0x241   : > { %v2914_v58 = vadd.f32 %v2913_v30, %v2867_v52  ;;  %v3291_v59 = vadd.f32 %v3290_v31, %v3244_v53  ;;  %v3128_v60 = vadd.f32 %v3127_v38, %v4462_v13  ;;  %v2753_v61 = vadd.f32 %v2752_v42, %v4467_v15 }
 0x242   : > { %v2945_v62 = vadd.f32 %v2944_v36, %v2868_v55  ;;  %v3322_v63 = vadd.f32 %v3321_v46, %v3245_v56  ;;  %v2869_v0 = vmax.f32 %v2751_v57, 0.0  ;;  %v3130_v1 = vadd.f32 %v3129_v43, %v4467_v15  ;;  %v2756_v3 = vpop.f32.mrb[164].mxu0  ;;  %v3133_v4 = vpop.f32.mrb[164].mxu1 }
 0x243   : > { %v3246_v5 = vmax.f32 %v3128_v60, 0.0  ;;  %v2870_v6 = vmax.f32 %v2753_v61, 0.0  ;;  %v2757_v29 = vadd.f32 %v2756_v3, %v4462_v13  ;;  %v3134_v7 = vadd.f32 %v3133_v4, %v4462_v13  ;;  %v2758_v8 = vpop.f32.mrb[165].mxu0  ;;  %v3135_v9 = vpop.f32.mrb[165].mxu1 }
 0x244   : > { %v2915_v10 = vadd.f32 %v2914_v58, %v2869_v0  ;;  %v3247_v12 = vmax.f32 %v3130_v1, 0.0  ;;  %v2759_v14 = vadd.f32 %v2758_v8, %v4467_v15  ;;  %v3136_v16 = vadd.f32 %v3135_v9, %v4467_v15  ;;  %v2760_v17 = vpop.f32.mrb[166].mxu0  ;;  %v3137_v18 = vpop.f32.mrb[166].mxu1 }
 0x245   : > { %v3292_v19 = vadd.f32 %v3291_v59, %v3246_v5  ;;  %v2946_v20 = vadd.f32 %v2945_v62, %v2870_v6  ;;  %v2871_v21 = vmax.f32 %v2757_v29, 0.0  ;;  %v3248_v22 = vmax.f32 %v3134_v7, 0.0  ;;  %v2762_v24 = vpop.f32.mrb[167].mxu0  ;;  %v3139_v25 = vpop.f32.mrb[167].mxu1 }
 0x246   : > { %v3323_v23 = vadd.f32 %v3322_v63, %v3247_v12  ;;  %v2872_v26 = vmax.f32 %v2759_v14, 0.0  ;;  %v3249_v27 = vmax.f32 %v3136_v16, 0.0  ;;  %v2761_v28 = vadd.f32 %v2760_v17, %v4462_v13 }
 0x247   : > { %v2916_v2 = vadd.f32 %v2915_v10, %v2871_v21  ;;  %v3293_v30 = vadd.f32 %v3292_v19, %v3248_v22  ;;  %v3138_v31 = vadd.f32 %v3137_v18, %v4462_v13  ;;  %v2763_v32 = vadd.f32 %v2762_v24, %v4467_v15 }
 0x248   : > { %v2947_v33 = vadd.f32 %v2946_v20, %v2872_v26  ;;  %v3324_v34 = vadd.f32 %v3323_v23, %v3249_v27  ;;  %v2873_v35 = vmax.f32 %v2761_v28, 0.0  ;;  %v3140_v36 = vadd.f32 %v3139_v25, %v4467_v15 }
 0x249   : > { %v3250_v46 = vmax.f32 %v3138_v31, 0.0  ;;  %v2874_v37 = vmax.f32 %v2763_v32, 0.0  ;;  %v3364_v38 = vsel %vm672_vm0, %v4869_v11, %v2222_v49  ;;  %v5016_v39 = vsel %vm3365_vm4, %v3363_v54, %v2598_v45 }
 0x24a   : > { %v2917_v40 = vadd.f32 %v2916_v2, %v2873_v35  ;;  %v3251_v50 = vmax.f32 %v3140_v36, 0.0  ;;  %v2766_v41 = vpop.f32.mrb[168].mxu0  ;;  %v5019_v42 = vsel %vm3365_vm4, %v3364_v38, %v2599_v51 }
 0x24b   : > { %v3294_v43 = vadd.f32 %v3293_v30, %v3250_v46  ;;  %v2948_v44 = vadd.f32 %v2947_v33, %v2874_v37  ;;  %v2767_v47 = vadd.f32 %v2766_v41, %v4462_v13  ;;  %v3143_v48 = vpop.f32.mrb[168].mxu1  ;;  %v2768_v52 = vpop.f32.mrb[169].mxu0 }
 0x24c   : > { %v3325_v53 = vadd.f32 %v3324_v34, %v3251_v50  ;;  %v3144_v55 = vadd.f32 %v3143_v48, %v4462_v13  ;;  %v2769_v11 = vadd.f32 %v2768_v52, %v4467_v15  ;;  %v3145_v49 = vpop.f32.mrb[169].mxu1  ;;  %v2770_v45 = vpop.f32.mrb[170].mxu0 }
 0x24d   : > { %v2875_v54 = vmax.f32 %v2767_v47, 0.0  ;;  %v3146_v56 = vadd.f32 %v3145_v49, %v4467_v15  ;;  %v2771_v57 = vadd.f32 %v2770_v45, %v4462_v13  ;;  %v3147_v51 = vpop.f32.mrb[170].mxu1  ;;  %v2772_v58 = vpop.f32.mrb[171].mxu0 }
 0x24e   : > { %v3252_v59 = vmax.f32 %v3144_v55, 0.0  ;;  %v2876_v60 = vmax.f32 %v2769_v11, 0.0  ;;  %v3148_v61 = vadd.f32 %v3147_v51, %v4462_v13  ;;  %v2773_v62 = vadd.f32 %v2772_v58, %v4467_v15  ;;  %v3149_v63 = vpop.f32.mrb[171].mxu1 }
 0x24f   : > { %v2918_v0 = vadd.f32 %v2917_v40, %v2875_v54  ;;  %v3253_v1 = vmax.f32 %v3146_v56, 0.0  ;;  %v2877_v3 = vmax.f32 %v2771_v57, 0.0  ;;  %v3150_v4 = vadd.f32 %v3149_v63, %v4467_v15 }
 0x250   : > { %v3295_v5 = vadd.f32 %v3294_v43, %v3252_v59  ;;  %v2949_v6 = vadd.f32 %v2948_v44, %v2876_v60  ;;  %v3254_v29 = vmax.f32 %v3148_v61, 0.0  ;;  %v2878_v7 = vmax.f32 %v2773_v62, 0.0 }
 0x251   : > { %v3326_v8 = vadd.f32 %v3325_v53, %v3253_v1  ;;  %v2919_v9 = vadd.f32 %v2918_v0, %v2877_v3  ;;  %v3255_v10 = vmax.f32 %v3150_v4, 0.0 }
 0x252   : > { %v3296_v12 = vadd.f32 %v3295_v5, %v3254_v29  ;;  %v2950_v14 = vadd.f32 %v2949_v6, %v2878_v7  ;;  %v2776_v16 = vpop.f32.mrb[172].mxu0 }
 0x253   : > { %v3327_v17 = vadd.f32 %v3326_v8, %v3255_v10  ;;  %v2777_v18 = vadd.f32 %v2776_v16, %v4462_v13  ;;  %v3153_v19 = vpop.f32.mrb[172].mxu1  ;;  %v2778_v20 = vpop.f32.mrb[173].mxu0 }
 0x254   : > { %v3154_v21 = vadd.f32 %v3153_v19, %v4462_v13  ;;  %v2779_v22 = vadd.f32 %v2778_v20, %v4467_v15  ;;  %v3155_v24 = vpop.f32.mrb[173].mxu1  ;;  %v2780_v25 = vpop.f32.mrb[174].mxu0 }
 0x255   : > { %v2879_v23 = vmax.f32 %v2777_v18, 0.0  ;;  %v3156_v26 = vadd.f32 %v3155_v24, %v4467_v15  ;;  %v2781_v27 = vadd.f32 %v2780_v25, %v4462_v13  ;;  %v3157_v28 = vpop.f32.mrb[174].mxu1  ;;  %v2782_v2 = vpop.f32.mrb[175].mxu0 }
 0x256   : > { %v3256_v30 = vmax.f32 %v3154_v21, 0.0  ;;  %v2880_v31 = vmax.f32 %v2779_v22, 0.0  ;;  %v3158_v32 = vadd.f32 %v3157_v28, %v4462_v13  ;;  %v2783_v33 = vadd.f32 %v2782_v2, %v4467_v15  ;;  %v3159_v34 = vpop.f32.mrb[175].mxu1 }
 0x257   : > { %v2920_v35 = vadd.f32 %v2919_v9, %v2879_v23  ;;  %v3257_v36 = vmax.f32 %v3156_v26, 0.0  ;;  %v2881_v46 = vmax.f32 %v2781_v27, 0.0  ;;  %v3160_v37 = vadd.f32 %v3159_v34, %v4467_v15 }
 0x258   : > { %v3297_v38 = vadd.f32 %v3296_v12, %v3256_v30  ;;  %v2951_v40 = vadd.f32 %v2950_v14, %v2880_v31  ;;  %v3258_v50 = vmax.f32 %v3158_v32, 0.0  ;;  %v2882_v41 = vmax.f32 %v2783_v33, 0.0 }
 0x259   : > { %v3328_v43 = vadd.f32 %v3327_v17, %v3257_v36  ;;  %v2921_v44 = vadd.f32 %v2920_v35, %v2881_v46  ;;  %v3259_v47 = vmax.f32 %v3160_v37, 0.0 }
 0x25a   : > { %v3298_v48 = vadd.f32 %v3297_v38, %v3258_v50  ;;  %v2952_v52 = vadd.f32 %v2951_v40, %v2882_v41  ;;  %v2786_v53 = vpop.f32.mrb[176].mxu0 }
 0x25b   : > { %v3329_v55 = vadd.f32 %v3328_v43, %v3259_v47  ;;  %v2787_v11 = vadd.f32 %v2786_v53, %v4462_v13  ;;  %v3163_v49 = vpop.f32.mrb[176].mxu1  ;;  %v2788_v45 = vpop.f32.mrb[177].mxu0 }
 0x25c   : > { %v3164_v54 = vadd.f32 %v3163_v49, %v4462_v13  ;;  %v2789_v56 = vadd.f32 %v2788_v45, %v4467_v15  ;;  %v3165_v57 = vpop.f32.mrb[177].mxu1  ;;  %v2790_v51 = vpop.f32.mrb[178].mxu0 }
 0x25d   : > { %v2883_v58 = vmax.f32 %v2787_v11, 0.0  ;;  %v3166_v59 = vadd.f32 %v3165_v57, %v4467_v15  ;;  %v2791_v60 = vadd.f32 %v2790_v51, %v4462_v13  ;;  %v3167_v61 = vpop.f32.mrb[178].mxu1  ;;  %v2792_v62 = vpop.f32.mrb[179].mxu0 }
 0x25e   : > { %v3260_v63 = vmax.f32 %v3164_v54, 0.0  ;;  %v2884_v0 = vmax.f32 %v2789_v56, 0.0  ;;  %v3168_v1 = vadd.f32 %v3167_v61, %v4462_v13  ;;  %v2793_v3 = vadd.f32 %v2792_v62, %v4467_v15  ;;  %v3169_v4 = vpop.f32.mrb[179].mxu1 }
 0x25f   : > { %v2922_v5 = vadd.f32 %v2921_v44, %v2883_v58  ;;  %v3261_v6 = vmax.f32 %v3166_v59, 0.0  ;;  %v2885_v29 = vmax.f32 %v2791_v60, 0.0  ;;  %v3170_v7 = vadd.f32 %v3169_v4, %v4467_v15 }
 0x260   : > { %v3299_v8 = vadd.f32 %v3298_v48, %v3260_v63  ;;  %v2953_v9 = vadd.f32 %v2952_v52, %v2884_v0  ;;  %v3262_v10 = vmax.f32 %v3168_v1, 0.0  ;;  %v2886_v12 = vmax.f32 %v2793_v3, 0.0 }
 0x261   : > { %v3330_v14 = vadd.f32 %v3329_v55, %v3261_v6  ;;  %v2923_v16 = vadd.f32 %v2922_v5, %v2885_v29  ;;  %v3263_v17 = vmax.f32 %v3170_v7, 0.0 }
 0x262   : > { %v3300_v18 = vadd.f32 %v3299_v8, %v3262_v10  ;;  %v2954_v19 = vadd.f32 %v2953_v9, %v2886_v12  ;;  %v2796_v20 = vpop.f32.mrb[180].mxu0 }
 0x263   : > { %v3331_v21 = vadd.f32 %v3330_v14, %v3263_v17  ;;  %v2797_v22 = vadd.f32 %v2796_v20, %v4462_v13  ;;  %v3173_v24 = vpop.f32.mrb[180].mxu1  ;;  %v2798_v25 = vpop.f32.mrb[181].mxu0 }
 0x264   : > { %v3174_v23 = vadd.f32 %v3173_v24, %v4462_v13  ;;  %v2799_v26 = vadd.f32 %v2798_v25, %v4467_v15  ;;  %v3175_v27 = vpop.f32.mrb[181].mxu1  ;;  %v2800_v28 = vpop.f32.mrb[182].mxu0 }
 0x265   : > { %v2887_v2 = vmax.f32 %v2797_v22, 0.0  ;;  %v3176_v30 = vadd.f32 %v3175_v27, %v4467_v15  ;;  %v2801_v31 = vadd.f32 %v2800_v28, %v4462_v13  ;;  %v3177_v32 = vpop.f32.mrb[182].mxu1  ;;  %v2802_v33 = vpop.f32.mrb[183].mxu0 }
 0x266   : > { %v3264_v34 = vmax.f32 %v3174_v23, 0.0  ;;  %v2888_v35 = vmax.f32 %v2799_v26, 0.0  ;;  %v3178_v36 = vadd.f32 %v3177_v32, %v4462_v13  ;;  %v2803_v46 = vadd.f32 %v2802_v33, %v4467_v15  ;;  %v3179_v37 = vpop.f32.mrb[183].mxu1 }
 0x267   : > { %v2924_v38 = vadd.f32 %v2923_v16, %v2887_v2  ;;  %v3265_v40 = vmax.f32 %v3176_v30, 0.0  ;;  %v2889_v50 = vmax.f32 %v2801_v31, 0.0  ;;  %v3180_v41 = vadd.f32 %v3179_v37, %v4467_v15 }
 0x268   : > { %v3301_v43 = vadd.f32 %v3300_v18, %v3264_v34  ;;  %v2955_v44 = vadd.f32 %v2954_v19, %v2888_v35  ;;  %v3266_v47 = vmax.f32 %v3178_v36, 0.0  ;;  %v2890_v48 = vmax.f32 %v2803_v46, 0.0 }
 0x269   : > { %v3332_v52 = vadd.f32 %v3331_v21, %v3265_v40  ;;  %v2925_v53 = vadd.f32 %v2924_v38, %v2889_v50  ;;  %v3267_v55 = vmax.f32 %v3180_v41, 0.0 }
 0x26a   : > { %v3302_v11 = vadd.f32 %v3301_v43, %v3266_v47  ;;  %v2956_v49 = vadd.f32 %v2955_v44, %v2890_v48  ;;  %v2806_v45 = vpop.f32.mrb[184].mxu0 }
 0x26b   : > { %v3333_v54 = vadd.f32 %v3332_v52, %v3267_v55  ;;  %v2807_v56 = vadd.f32 %v2806_v45, %v4462_v13  ;;  %v3183_v57 = vpop.f32.mrb[184].mxu1  ;;  %v2808_v51 = vpop.f32.mrb[185].mxu0 }
 0x26c   : > { %v3184_v58 = vadd.f32 %v3183_v57, %v4462_v13  ;;  %v2809_v59 = vadd.f32 %v2808_v51, %v4467_v15  ;;  %v3185_v60 = vpop.f32.mrb[185].mxu1  ;;  %v2810_v61 = vpop.f32.mrb[186].mxu0 }
 0x26d   : > { %v2891_v62 = vmax.f32 %v2807_v56, 0.0  ;;  %v3186_v63 = vadd.f32 %v3185_v60, %v4467_v15  ;;  %v2811_v0 = vadd.f32 %v2810_v61, %v4462_v13  ;;  %v3187_v1 = vpop.f32.mrb[186].mxu1  ;;  %v2812_v3 = vpop.f32.mrb[187].mxu0 }
 0x26e   : > { %v3268_v4 = vmax.f32 %v3184_v58, 0.0  ;;  %v2892_v5 = vmax.f32 %v2809_v59, 0.0  ;;  %v3188_v6 = vadd.f32 %v3187_v1, %v4462_v13  ;;  %v2813_v29 = vadd.f32 %v2812_v3, %v4467_v15  ;;  %v3189_v7 = vpop.f32.mrb[187].mxu1 }
 0x26f   : > { %v2926_v8 = vadd.f32 %v2925_v53, %v2891_v62  ;;  %v3269_v9 = vmax.f32 %v3186_v63, 0.0  ;;  %v2893_v10 = vmax.f32 %v2811_v0, 0.0  ;;  %v3190_v12 = vadd.f32 %v3189_v7, %v4467_v15 }
 0x270   : > { %v3303_v14 = vadd.f32 %v3302_v11, %v3268_v4  ;;  %v2957_v16 = vadd.f32 %v2956_v49, %v2892_v5  ;;  %v3270_v17 = vmax.f32 %v3188_v6, 0.0  ;;  %v2894_v18 = vmax.f32 %v2813_v29, 0.0 }
 0x271   : > { %v3334_v19 = vadd.f32 %v3333_v54, %v3269_v9  ;;  %v2927_v20 = vadd.f32 %v2926_v8, %v2893_v10  ;;  %v3271_v21 = vmax.f32 %v3190_v12, 0.0 }
 0x272   : > { %v3304_v22 = vadd.f32 %v3303_v14, %v3270_v17  ;;  %v2958_v24 = vadd.f32 %v2957_v16, %v2894_v18  ;;  %v2816_v25 = vpop.f32.mrb[188].mxu0 }
 0x273   : > { %v3335_v23 = vadd.f32 %v3334_v19, %v3271_v21  ;;  %v2817_v26 = vadd.f32 %v2816_v25, %v4462_v13  ;;  %v3193_v27 = vpop.f32.mrb[188].mxu1  ;;  %v2818_v28 = vpop.f32.mrb[189].mxu0 }
 0x274   : > { %v3194_v2 = vadd.f32 %v3193_v27, %v4462_v13  ;;  %v2819_v30 = vadd.f32 %v2818_v28, %v4467_v15  ;;  %v3195_v31 = vpop.f32.mrb[189].mxu1  ;;  %v2820_v32 = vpop.f32.mrb[190].mxu0 }
 0x275   : > { %v2895_v33 = vmax.f32 %v2817_v26, 0.0  ;;  %v3196_v34 = vadd.f32 %v3195_v31, %v4467_v15  ;;  %v2821_v35 = vadd.f32 %v2820_v32, %v4462_v13  ;;  %v3197_v36 = vpop.f32.mrb[190].mxu1  ;;  %v2822_v46 = vpop.f32.mrb[191].mxu0 }
 0x276   : > { %v3272_v37 = vmax.f32 %v3194_v2, 0.0  ;;  %v2896_v38 = vmax.f32 %v2819_v30, 0.0  ;;  %v3198_v40 = vadd.f32 %v3197_v36, %v4462_v13  ;;  %v2823_v50 = vadd.f32 %v2822_v46, %v4467_v15  ;;  %v3199_v41 = vpop.f32.mrb[191].mxu1 }
 0x277   : > { %v2928_v43 = vadd.f32 %v2927_v20, %v2895_v33  ;;  %v3273_v44 = vmax.f32 %v3196_v34, 0.0  ;;  %v2897_v47 = vmax.f32 %v2821_v35, 0.0  ;;  %v3200_v48 = vadd.f32 %v3199_v41, %v4467_v15 }
 0x278   : > { %v3305_v52 = vadd.f32 %v3304_v22, %v3272_v37  ;;  %v2959_v53 = vadd.f32 %v2958_v24, %v2896_v38  ;;  %v3274_v55 = vmax.f32 %v3198_v40, 0.0  ;;  %v2898_v11 = vmax.f32 %v2823_v50, 0.0 }
 0x279   : > { %v3336_v49 = vadd.f32 %v3335_v23, %v3273_v44  ;;  %v2929_v45 = vadd.f32 %v2928_v43, %v2897_v47  ;;  %v3275_v54 = vmax.f32 %v3200_v48, 0.0 }
 0x27a   : > { %v3306_v56 = vadd.f32 %v3305_v52, %v3274_v55  ;;  %v2960_v57 = vadd.f32 %v2959_v53, %v2898_v11  ;;  %v2826_v51 = vpop.f32.mrb[192].mxu0 }
 0x27b   : > { %v3337_v58 = vadd.f32 %v3336_v49, %v3275_v54  ;;  %v2827_v59 = vadd.f32 %v2826_v51, %v4462_v13  ;;  %v3203_v60 = vpop.f32.mrb[192].mxu1  ;;  %v2828_v61 = vpop.f32.mrb[193].mxu0 }
 0x27c   : > { %v3204_v62 = vadd.f32 %v3203_v60, %v4462_v13  ;;  %v2829_v63 = vadd.f32 %v2828_v61, %v4467_v15  ;;  %v3205_v0 = vpop.f32.mrb[193].mxu1  ;;  %v2830_v1 = vpop.f32.mrb[194].mxu0 }
 0x27d   : > { %v2899_v3 = vmax.f32 %v2827_v59, 0.0  ;;  %v3206_v4 = vadd.f32 %v3205_v0, %v4467_v15  ;;  %v2831_v5 = vadd.f32 %v2830_v1, %v4462_v13  ;;  %v3207_v6 = vpop.f32.mrb[194].mxu1  ;;  %v2832_v29 = vpop.f32.mrb[195].mxu0 }
 0x27e   : > { %v3276_v7 = vmax.f32 %v3204_v62, 0.0  ;;  %v2900_v8 = vmax.f32 %v2829_v63, 0.0  ;;  %v3208_v9 = vadd.f32 %v3207_v6, %v4462_v13  ;;  %v2833_v10 = vadd.f32 %v2832_v29, %v4467_v15  ;;  %v3209_v12 = vpop.f32.mrb[195].mxu1 }
 0x27f   : > { %v2930_v14 = vadd.f32 %v2929_v45, %v2899_v3  ;;  %v3277_v16 = vmax.f32 %v3206_v4, 0.0  ;;  %v2901_v17 = vmax.f32 %v2831_v5, 0.0  ;;  %v3210_v18 = vadd.f32 %v3209_v12, %v4467_v15 }
 0x280   : > { %v3307_v19 = vadd.f32 %v3306_v56, %v3276_v7  ;;  %v2961_v20 = vadd.f32 %v2960_v57, %v2900_v8  ;;  %v3278_v21 = vmax.f32 %v3208_v9, 0.0  ;;  %v2902_v22 = vmax.f32 %v2833_v10, 0.0 }
 0x281   : > { %v3338_v24 = vadd.f32 %v3337_v58, %v3277_v16  ;;  %v2931_v25 = vadd.f32 %v2930_v14, %v2901_v17  ;;  %v3279_v23 = vmax.f32 %v3210_v18, 0.0 }
 0x282   : > { %v3308_v26 = vadd.f32 %v3307_v19, %v3278_v21  ;;  %v2962_v27 = vadd.f32 %v2961_v20, %v2902_v22  ;;  %v2836_v28 = vpop.f32.mrb[196].mxu0 }
 0x283   : > { %v3339_v2 = vadd.f32 %v3338_v24, %v3279_v23  ;;  %v2837_v30 = vadd.f32 %v2836_v28, %v4462_v13  ;;  %v3213_v31 = vpop.f32.mrb[196].mxu1  ;;  %v2838_v32 = vpop.f32.mrb[197].mxu0 }
 0x284   : > { %v3214_v33 = vadd.f32 %v3213_v31, %v4462_v13  ;;  %v2839_v34 = vadd.f32 %v2838_v32, %v4467_v15  ;;  %v3215_v35 = vpop.f32.mrb[197].mxu1  ;;  %v2840_v36 = vpop.f32.mrb[198].mxu0 }
 0x285   : > { %v2903_v46 = vmax.f32 %v2837_v30, 0.0  ;;  %v3216_v37 = vadd.f32 %v3215_v35, %v4467_v15  ;;  %v2841_v38 = vadd.f32 %v2840_v36, %v4462_v13  ;;  %v3217_v40 = vpop.f32.mrb[198].mxu1  ;;  %v2842_v50 = vpop.f32.mrb[199].mxu0 }
 0x286   : > { %v3280_v41 = vmax.f32 %v3214_v33, 0.0  ;;  %v2904_v43 = vmax.f32 %v2839_v34, 0.0  ;;  %v3218_v44 = vadd.f32 %v3217_v40, %v4462_v13  ;;  %v2843_v47 = vadd.f32 %v2842_v50, %v4467_v15  ;;  %v3219_v48 = vpop.f32.mrb[199].mxu1 }
 0x287   : > { %v2932_v52 = vadd.f32 %v2931_v25, %v2903_v46  ;;  %v3281_v53 = vmax.f32 %v3216_v37, 0.0  ;;  %v2905_v55 = vmax.f32 %v2841_v38, 0.0  ;;  %v3220_v11 = vadd.f32 %v3219_v48, %v4467_v15 }
 0x288   : > { %v3309_v49 = vadd.f32 %v3308_v26, %v3280_v41  ;;  %v2963_v45 = vadd.f32 %v2962_v27, %v2904_v43  ;;  %v3282_v54 = vmax.f32 %v3218_v44, 0.0  ;;  %v2906_v56 = vmax.f32 %v2843_v47, 0.0 }
 0x289   : > { %v3340_v57 = vadd.f32 %v3339_v2, %v3281_v53  ;;  %v2933_v51 = vadd.f32 %v2932_v52, %v2905_v55  ;;  %v3283_v58 = vmax.f32 %v3220_v11, 0.0 }
 0x28a   : > { %v3310_v59 = vadd.f32 %v3309_v49, %v3282_v54  ;;  %v2964_v60 = vadd.f32 %v2963_v45, %v2906_v56  ;;  %v2846_v61 = vpop.f32.mrb[200].mxu0 }
 0x28b   : > { %v3341_v62 = vadd.f32 %v3340_v57, %v3283_v58  ;;  %v2847_v63 = vadd.f32 %v2846_v61, %v4462_v13  ;;  %v3223_v0 = vpop.f32.mrb[200].mxu1  ;;  %v2848_v1 = vpop.f32.mrb[201].mxu0 }
 0x28c   : > { %v3224_v3 = vadd.f32 %v3223_v0, %v4462_v13  ;;  %v2849_v4 = vadd.f32 %v2848_v1, %v4467_v15  ;;  %v3225_v5 = vpop.f32.mrb[201].mxu1  ;;  %v2850_v6 = vpop.f32.mrb[202].mxu0 }
 0x28d   : > { %v2907_v29 = vmax.f32 %v2847_v63, 0.0  ;;  %v3226_v7 = vadd.f32 %v3225_v5, %v4467_v15  ;;  %v2851_v8 = vadd.f32 %v2850_v6, %v4462_v13  ;;  %v3227_v9 = vpop.f32.mrb[202].mxu1  ;;  %v2852_v10 = vpop.f32.mrb[203].mxu0 }
 0x28e   : > { %v3284_v12 = vmax.f32 %v3224_v3, 0.0  ;;  %v2908_v14 = vmax.f32 %v2849_v4, 0.0  ;;  %v3228_v16 = vadd.f32 %v3227_v9, %v4462_v13  ;;  %v2853_v17 = vadd.f32 %v2852_v10, %v4467_v15  ;;  %v3229_v18 = vpop.f32.mrb[203].mxu1 }
 0x28f   : > { %v2934_v19 = vadd.f32 %v2933_v51, %v2907_v29  ;;  %v3285_v20 = vmax.f32 %v3226_v7, 0.0  ;;  %v2909_v21 = vmax.f32 %v2851_v8, 0.0  ;;  %v3230_v22 = vadd.f32 %v3229_v18, %v4467_v15 }
 0x290   : > { %v3311_v24 = vadd.f32 %v3310_v59, %v3284_v12  ;;  %v2965_v25 = vadd.f32 %v2964_v60, %v2908_v14  ;;  %v3286_v23 = vmax.f32 %v3228_v16, 0.0  ;;  %v2910_v26 = vmax.f32 %v2853_v17, 0.0 }
 0x291   : > { %v3342_v27 = vadd.f32 %v3341_v62, %v3285_v20  ;;  %v2935_v28 = vadd.f32 %v2934_v19, %v2909_v21  ;;  %v3287_v2 = vmax.f32 %v3230_v22, 0.0 }
 0x292   : > { %v3312_v30 = vadd.f32 %v3311_v24, %v3286_v23  ;;  %v2966_v31 = vadd.f32 %v2965_v25, %v2910_v26  ;;  %v2856_v32 = vpop.f32.mrb[204].mxu0 }
 0x293   : > { %v3343_v33 = vadd.f32 %v3342_v27, %v3287_v2  ;;  %v2857_v34 = vadd.f32 %v2856_v32, %v4462_v13  ;;  %v3233_v35 = vpop.f32.mrb[204].mxu1  ;;  %v2858_v36 = vpop.f32.mrb[205].mxu0 }
 0x294   : > { %v3234_v46 = vadd.f32 %v3233_v35, %v4462_v13  ;;  %v2859_v37 = vadd.f32 %v2858_v36, %v4467_v15  ;;  %v3235_v38 = vpop.f32.mrb[205].mxu1  ;;  %v2860_v40 = vpop.f32.mrb[206].mxu0 }
 0x295   : > { %v2911_v50 = vmax.f32 %v2857_v34, 0.0  ;;  %v3236_v41 = vadd.f32 %v3235_v38, %v4467_v15  ;;  %v3237_v43 = vpop.f32.mrb[206].mxu1  ;;  %v2861_v44 = vpop.f32.mrb[207].mxu0 }
 0x296   : > { %v3288_v47 = vmax.f32 %v3234_v46, 0.0  ;;  %v2912_v48 = vmax.f32 %v2859_v37, 0.0  ;;  %v3238_v52 = vpop.f32.mrb[207].mxu1 }
 0x297   : > { %v2936_v53 = vsel %vm672_vm0, %v2911_v50, 0.0  ;;  %v3289_v55 = vmax.f32 %v3236_v41, 0.0 }
 0x298   : > { %v2937_v11 = vadd.f32 %v2936_v53, %v2935_v28  ;;  %v3313_v49 = vsel %vm672_vm0, %v3288_v47, 0.0  ;;  %v2967_v13 = vsel %vm672_vm0, %v2912_v48, 0.0 }
 0x299   : > { %v3314_v45 = vadd.f32 %v3313_v49, %v3312_v30  ;;  %v2968_v54 = vadd.f32 %v2967_v13, %v2966_v31  ;;  %v3344_v56 = vsel %vm672_vm0, %v3289_v55, 0.0  ;;  %v3908_v30 = vld [vmem:[%s5118_s4] ss:$0 sm:$0xff] }
 0x29a   : > { %v2938_v57 = vrot.slane %v2937_v11, 4  ;;  %v3345_v51 = vadd.f32 %v3344_v56, %v3343_v33 }
 0x29b   : > { %v3315_v15 = vrot.slane %v3314_v45, 4  ;;  %v2969_v58 = vrot.slane %v2968_v54, 4 }
 0x29c   : > { %v2939_v59 = vadd.f32 %v2938_v57, %v2937_v11  ;;  %v3346_v60 = vrot.slane %v3345_v51, 4 }
 0x29d   : > { %v3316_v61 = vadd.f32 %v3315_v15, %v3314_v45  ;;  %v2970_v62 = vadd.f32 %v2969_v58, %v2968_v54 }
 0x29e   : > { %v2940_v63 = vrot.slane %v2939_v59, 2  ;;  %v3347_v0 = vadd.f32 %v3346_v60, %v3345_v51 }
 0x29f   : > { %v3317_v1 = vrot.slane %v3316_v61, 2  ;;  %v2971_v3 = vrot.slane %v2970_v62, 2 }
 0x2a0   : > { %v2941_v4 = vadd.f32 %v2940_v63, %v2939_v59  ;;  %v3348_v5 = vrot.slane %v3347_v0, 2 }
 0x2a1   : > { %v3318_v6 = vadd.f32 %v3317_v1, %v3316_v61  ;;  %v2972_v29 = vadd.f32 %v2971_v3, %v2970_v62 }
 0x2a2   : > { %v2942_v7 = vrot.slane %v2941_v4, 1  ;;  %v3349_v8 = vadd.f32 %v3348_v5, %v3347_v0 }
 0x2a3   : > { %v3319_v9 = vrot.slane %v3318_v6, 1  ;;  %v2973_v10 = vrot.slane %v2972_v29, 1 }
 0x2a4   : > { %v2943_v12 = vadd.f32 %v2942_v7, %v2941_v4  ;;  %v3350_v14 = vrot.slane %v3349_v8, 1 }
 0x2a5   : > { %v3320_v16 = vadd.f32 %v3319_v9, %v3318_v6  ;;  %v2974_v17 = vadd.f32 %v2973_v10, %v2972_v29 }
 0x2a6   : > { %v2975_v18 = vmul.f32 0.0051020407, %v2943_v12  ;;  %v3351_v19 = vadd.f32 %v3350_v14, %v3349_v8 }
 0x2a7   : > { %v3352_v20 = vmul.f32 0.0051020407, %v3320_v16  ;;  %v2976_v21 = vmul.f32 0.0051020407, %v2974_v17 }
 0x2a8   : > { %v3353_v22 = vmul.f32 0.0051020407, %v3351_v19  ;;  %v3369_v24 = vsel %vm3368_vm5, %v5016_v39, %v2975_v18 }
 0x2a9   : > { %v3370_v25 = vsel %vm3368_vm5, %v5019_v42, %v2976_v21  ;;  %v3372_v23 = vsel %vm3371_vm6, %v3369_v24, %v3352_v20 }
 0x2aa   : > { %v3373_v26 = vsel %vm3371_vm6, %v3370_v25, %v3353_v22  ;;  %v3374_v28 = vpack.c.bf16 %v3372_v23, %v3372_v23 }
 0x2ab   : > { %v3375_v27 = vpack.c.bf16 %v3373_v26, %v3373_v26 }
 0x2ad   : > { %3543 = vmatprep.mubr.bf16.mxu0 %v3375_v27 }
 0x2ae   : > { %3544 = vmatmul.mubr.bf16.vlgmr.msra.gmra.mrb[208].mxu0 %v3374_v28 }
 0x381   : > { %v3943_v2 = vpop.f32.mrb[208].mxu0 }
 0x382   : > { %v3944_v31 = vpop.f32.mrb[209].mxu0 }
 0x383   : > { %v3945_v32 = vadd.f32 %v3944_v31, %v3943_v2  ;;  %v3946_v33 = vpop.f32.mrb[210].mxu0 }
 0x384   : > { %v3947_v39 = vpop.f32.mrb[211].mxu0 }
 0x385   : > { %v3546_v42 = vadd.f32 %v3945_v32, %v3908_v30 }
 0x387   : > { %3551 = vst [vmem:[%s227_s10] sm:$0xff] %v3546_v42 }
 0x388 PF: > { %s15_s18 = sadd.s32 1, %s4124_s18  }
 0x389   : > { %p12_p5 = scmp.ge.s32.totalorder %s15_s18, 4  }
 0x38b   :  { %14 = sbr.rel (!%p12_p5) target bundleno = 1 (0x1), region = 77 }

</bundles_post_ra>
